<compile_context>
chip_gen: v7x
topology: tpu7x:2x2x1
jax: 0.10.0
libtpu: 0.0.40
codegen_flags: <defaults>
</compile_context>

<pallas_src>
import numpy as np
import jax
import jax.numpy as jnp
from jax import lax
from jax.experimental import pallas as pl
from jax.experimental.pallas import tpu as pltpu

# ----------------------------- config (small) --------------------------------
B = 2
DIM = 32                     # channels (dim)
HEADS = 8
HEAD_DIM = DIM // HEADS
SCALE = 1.0 / (HEAD_DIM ** 0.5)   # nn.MultiheadAttention scaling
H = W = 8
S = H * W
TEXT_DIM = 64                # latent/style dim == text dim (w serves both)
L = 8                        # text sequence length
NUM_EXPERTS = 4
ROUTER_HIDDEN = 128
TEMPERATURE = 4.0
ANNEALING = 1.0
EFF_TEMP = float(np.clip(TEMPERATURE * ANNEALING, 0.5, 5.0))
LN_EPS = 1e-5
FFN_DIM = 4 * DIM

# --- f32 slab (width DIM) row layout ---
_R_MCW = 0        # modconv weights: proj_in rows 0:32, proj_out rows 32:64
_R_B2 = 64        # expert second-layer biases (NUM_EXPERTS rows)
_R_MCB = 68       # modconv modulation biases (2 rows: proj_in, proj_out)
_R_LNG = 70       # LN gammas (3 rows)
_R_LNB = 73       # LN betas  (3 rows)
_R_TPB = 76       # text_proj bias (1 row)
_R_MODW = 80      # modulation weights^T: proj_in 80:144, proj_out 144:208
_SLAB_ROWS = 208

# --- bf16 misc slab (width DIM) row layout ---
_W_OUT = 0        # attention out-proj^T: self rows 0:32, cross rows 32:64
_W_TP = 64        # text_proj weight^T (TEXT_DIM rows)
_W_W2 = 128       # packed expert second-layer weights (NUM_EXPERTS*FFN_DIM rows)


def _gelu_tanh(x):
    # tanh-approx GELU (transcendental on the EUP); |err vs exact erf GELU| < 3e-3.
    c = 0.7978845608028654  # sqrt(2/pi)
    return 0.5 * x * (1.0 + jnp.tanh(c * (x + 0.044715 * x * x * x)))


# ----------------------------- fused Pallas kernel ---------------------------
def _attention_block_kernel(
    x_ref, w_ref, t_ref,
    slab_ref, rw_ref, ab_ref, b1_ref,
    win_ref, wmisc_ref, w1_ref,
    out_ref, probs_ref,
):
    f32, bf16 = jnp.float32, jnp.bfloat16
    x = x_ref[0]            # (S, C)
    wv = w_ref[0]           # (1, TEXT_DIM)
    text = t_ref[0]         # (L, TEXT_DIM)

    def srow(r):            # one (1, DIM) row of the f32 slab
        return slab_ref[r:r + 1, :]

    def modconv(z, i):
        # style-modulated, demodulated 1x1 conv == per-image dense matmul (kept f32).
        modw = slab_ref[_R_MODW + TEXT_DIM * i:_R_MODW + TEXT_DIM * (i + 1), :]
        style = jnp.dot(wv, modw, preferred_element_type=f32) + srow(_R_MCB + i)   # (1, Cin)
        wm = slab_ref[_R_MCW + DIM * i:_R_MCW + DIM * (i + 1), :] * style          # (Cout, Cin)
        wm = wm * lax.rsqrt(jnp.sum(wm * wm, axis=1, keepdims=True) + 1e-8)
        return lax.dot_general(z, wm, (((1,), (1,)), ((), ())),
                               preferred_element_type=f32)                         # (S, Cout)

    def layernorm(z, i):
        m = jnp.mean(z, axis=-1, keepdims=True)
        zc = z - m
        v = jnp.mean(zc * zc, axis=-1, keepdims=True)
        return zc * lax.rsqrt(v + LN_EPS) * srow(_R_LNG + i) + srow(_R_LNB + i)

    def mha(xq, kv, idx, self_attn):
        # Packed lane-dense in-projection; per-head work via static 4-wide slices;
        # heads concatenated back and folded through ONE out-proj matmul.
        w_in = win_ref[idx]                                    # (32, 96) bf16
        bias = ab_ref[idx]                                     # (1, 128) f32: [in_b | out_b]
        if self_attn:
            qkv = jnp.dot(xq.astype(bf16), w_in,
                          preferred_element_type=f32) + bias[:, 0:3 * DIM]         # (S, 96)
            qsrc, qo = qkv, 0
            ksrc, ko = qkv, DIM
            vsrc, vo = qkv, 2 * DIM
        else:
            q = jnp.dot(xq.astype(bf16), w_in[:, 0:DIM],
                        preferred_element_type=f32) + bias[:, 0:DIM]               # (Sq, 32)
            kvp = jnp.dot(kv.astype(bf16), w_in[:, DIM:3 * DIM],
                          preferred_element_type=f32) + bias[:, DIM:3 * DIM]       # (Sk, 64)
            qsrc, qo = q, 0
            ksrc, ko = kvp, 0
            vsrc, vo = kvp, DIM
        o_heads = []
        for h in range(HEADS):
            a = qo + h * HEAD_DIM
            b_ = ko + h * HEAD_DIM
            c_ = vo + h * HEAD_DIM
            qh = qsrc[:, a:a + HEAD_DIM]                       # (Sq, 4)
            kh = ksrc[:, b_:b_ + HEAD_DIM]                     # (Sk, 4)
            vh = vsrc[:, c_:c_ + HEAD_DIM]                     # (Sk, 4)
            s = lax.dot_general(qh, kh, (((1,), (1,)), ((), ())),
                                preferred_element_type=f32) * SCALE                # (Sq, Sk)
            s = s - jnp.max(s, axis=-1, keepdims=True)
            e = jnp.exp(s)
            p = e * pl.reciprocal(jnp.sum(e, axis=-1, keepdims=True), approx=True)
            o_heads.append(jnp.dot(p, vh, preferred_element_type=f32))             # (Sq, 4)
        o = jnp.concatenate(o_heads, axis=-1)                                      # (Sq, 32)
        wo = wmisc_ref[_W_OUT + DIM * idx:_W_OUT + DIM * (idx + 1), :]             # (32, 32) bf16
        return jnp.dot(o.astype(bf16), wo,
                       preferred_element_type=f32) + bias[:, 3 * DIM:4 * DIM]

    # --- proj_in -> LN1 -> self-attention -> residual ---
    x1 = modconv(x, 0)
    xn1 = layernorm(x1, 0)
    x2 = x1 + mha(xn1, xn1, 0, True)

    # --- text_proj -> LN2 -> cross-attention -> residual ---
    kvt = jnp.dot(text.astype(bf16), wmisc_ref[_W_TP:_W_TP + TEXT_DIM, :],
                  preferred_element_type=f32) + srow(_R_TPB)                       # (L, D)
    xn2 = layernorm(x2, 1)
    x3 = x2 + mha(xn2, kvt, 1, False)

    # --- LN3 -> Bayesian router (eval: mu weights folded; top-1 hard routing) ---
    xn3 = layernorm(x3, 2)
    logits = (jnp.dot(xn3, rw_ref[0:DIM, :], preferred_element_type=f32)
              + jnp.dot(wv, rw_ref[DIM:DIM + TEXT_DIM, :],
                        preferred_element_type=f32))                               # (S, E)
    logits = jnp.clip(logits * (1.0 / EFF_TEMP), -20.0, 20.0)
    # first-argmax of the clipped logits == argmax of the softmaxed/renormalized
    # probs (order- and tie-preserving), which is all that eval mode returns/uses.
    ii = lax.broadcasted_iota(jnp.int32, logits.shape, 1)
    mx = jnp.max(logits, axis=-1, keepdims=True)
    first = jnp.min(jnp.where(logits >= mx, ii, NUM_EXPERTS), axis=-1, keepdims=True)
    one_hot = (ii == first).astype(f32)                                            # (S, E)
    probs_ref[0] = one_hot

    # --- experts: packed dense compute, hard-gated (== eval top-1 dispatch) ---
    h1 = jnp.dot(xn3.astype(bf16), w1_ref[...],
                 preferred_element_type=f32) + b1_ref[...]                         # (S, E*4C)
    h1 = _gelu_tanh(h1)
    cw = lax.broadcasted_iota(jnp.int32, h1.shape, 1)
    lo = first * FFN_DIM
    gate = jnp.logical_and(cw >= lo, cw < lo + FFN_DIM).astype(f32)                # (S, E*4C)
    y = jnp.dot((h1 * gate).astype(bf16),
                wmisc_ref[_W_W2:_W_W2 + NUM_EXPERTS * FFN_DIM, :],
                preferred_element_type=f32)
    y = y + jnp.dot(one_hot, slab_ref[_R_B2:_R_B2 + NUM_EXPERTS, :],
                    preferred_element_type=f32)
    x4 = x3 + y

    # --- proj_out ---
    out_ref[0] = modconv(x4, 1)


# ----------------------------- host-side weight packing ----------------------
def _prepare_kernel_params(p):
    f32, bf16 = jnp.float32, jnp.bfloat16
    D, E, F = DIM, NUM_EXPERTS, FFN_DIM

    def r32(a):
        return jnp.reshape(a, (-1, D)).astype(f32)

    # one lane-dense f32 slab for all small f32 params (one DMA, no (1,4) padding)
    slab = jnp.concatenate([
        r32(p["pin_w"]), r32(p["pout_w"]),                    # rows   0: 64
        r32(p["exp_b2"]),                                     # rows  64: 68
        r32(p["pin_mod_b"]), r32(p["pout_mod_b"]),            # rows  68, 69
        r32(p["ln1_g"]), r32(p["ln2_g"]), r32(p["ln3_g"]),    # rows  70..72
        r32(p["ln1_b"]), r32(p["ln2_b"]), r32(p["ln3_b"]),    # rows  73..75
        r32(p["tp_b"]),                                       # row   76
        jnp.zeros((3, D), f32),                               # rows  77..79 (pad)
        r32(p["pin_mod_w"].T), r32(p["pout_mod_w"].T),        # rows  80:144, 144:208
    ], axis=0)
    assert slab.shape == (_SLAB_ROWS, D)

    # router is purely linear in eval mode -> fold (feature_mu,text_mu) @ combined_mu
    hi = jax.lax.Precision.HIGHEST
    router_w = jnp.concatenate([
        jnp.dot(p["feature_mu"], p["combined_mu"][:ROUTER_HIDDEN], precision=hi),
        jnp.dot(p["text_mu"], p["combined_mu"][ROUTER_HIDDEN:], precision=hi),
    ], axis=0).astype(f32)                                    # (D + TEXT_DIM, E)

    def ab(in_b, out_b):   # (1, 128) = [qkv in-proj bias (96) | out-proj bias (32)]
        return jnp.concatenate([in_b.reshape(1, 3 * D), out_b.reshape(1, D)], axis=1)
    attn_b = jnp.stack([ab(p["sa_in_b"], p["sa_out_b"]),
                        ab(p["ca_in_b"], p["ca_out_b"])]).astype(f32)      # (2, 1, 128)

    # MXU-bound weights: pre-transposed and pre-cast to bf16 on the host
    w_in = jnp.stack([p["sa_in_w"].T, p["ca_in_w"].T]).astype(bf16)        # (2, 32, 96)
    w_misc = jnp.concatenate(
        [p["sa_out_w"].T, p["ca_out_w"].T, p["tp_w"].T,
         p["exp_w2"].reshape(E * F, D)], axis=0).astype(bf16)              # (640, 32)
    w1p = jnp.transpose(p["exp_w1"], (1, 0, 2)).reshape(D, E * F).astype(bf16)  # (32, 512)
    b1p = p["exp_b1"].reshape(1, E * F).astype(f32)                        # (1, 512)

    return dict(slab=slab, router_w=router_w, attn_b=attn_b, b1p=b1p,
                w_in=w_in, w_misc=w_misc, w1p=w1p)


_WEIGHT_ORDER = ("slab", "router_w", "attn_b", "b1p", "w_in", "w_misc", "w1p")


# ----------------------------- full forward ----------------------------------
def attention_block_forward(x, w, text_seq, params):
    # x: (B, C, H, W) NCHW, w: (B, TEXT_DIM), text_seq: (B, L, TEXT_DIM)
    Bb, C, Hh, Ww = x.shape
    Ss = Hh * Ww
    Td = w.shape[1]
    Lt = text_seq.shape[1]
    x_tok = jnp.transpose(x, (0, 2, 3, 1)).reshape(Bb, Ss, C)   # glue: NCHW -> tokens
    w3 = w.reshape(Bb, 1, Td)
    kp = _prepare_kernel_params(params)
    weights = [kp[k] for k in _WEIGHT_ORDER]

    def whole(a):  # full-array weight spec, constant block index (DMA'd once)
        return pl.BlockSpec(a.shape, lambda b, n=a.ndim: (0,) * n)

    in_specs = [
        pl.BlockSpec((1, Ss, C), lambda b: (b, 0, 0)),
        pl.BlockSpec((1, 1, Td), lambda b: (b, 0, 0)),
        pl.BlockSpec((1, Lt, Td), lambda b: (b, 0, 0)),
    ] + [whole(a) for a in weights]

    out_tok, probs = pl.pallas_call(
        _attention_block_kernel,
        out_shape=(jax.ShapeDtypeStruct((Bb, Ss, C), jnp.float32),
                   jax.ShapeDtypeStruct((Bb, Ss, NUM_EXPERTS), jnp.float32)),
        grid=(Bb,),
        in_specs=in_specs,
        out_specs=(pl.BlockSpec((1, Ss, C), lambda b: (b, 0, 0)),
                   pl.BlockSpec((1, Ss, NUM_EXPERTS), lambda b: (b, 0, 0))),
        compiler_params=pltpu.CompilerParams(
            dimension_semantics=("parallel",),
            vmem_limit_bytes=32 * 1024 * 1024),
    )(x_tok, w3, text_seq, *weights)

    x_out = jnp.transpose(out_tok.reshape(Bb, Hh, Ww, C), (0, 3, 1, 2))  # tokens -> NCHW
    return x_out, probs.reshape(Bb * Ss, NUM_EXPERTS)


# ----------------------------- parameters ------------------------------------
def init_params(key):
    ks = iter(jax.random.split(key, 32))

    def nrm(shape, std):
        return std * jax.random.normal(next(ks), shape, dtype=jnp.float32)

    p = {}
    # ModulatedConv proj_in / proj_out (kernel_size=1)
    p["pin_w"] = nrm((DIM, DIM), 0.2)
    p["pin_mod_w"] = nrm((DIM, TEXT_DIM), 0.02)
    p["pin_mod_b"] = jnp.zeros((1, DIM), jnp.float32)
    p["pout_w"] = nrm((DIM, DIM), 0.2)
    p["pout_mod_w"] = nrm((DIM, TEXT_DIM), 0.02)
    p["pout_mod_b"] = jnp.zeros((1, DIM), jnp.float32)
    # LayerNorms (PyTorch default init)
    for n in ("ln1", "ln2", "ln3"):
        p[n + "_g"] = jnp.ones((1, DIM), jnp.float32)
        p[n + "_b"] = jnp.zeros((1, DIM), jnp.float32)
    # text_proj Linear(TEXT_DIM -> DIM)
    p["tp_w"] = nrm((DIM, TEXT_DIM), 0.05)
    p["tp_b"] = nrm((1, DIM), 0.05)
    # Multihead attention (self / cross): packed in_proj + out_proj
    p["sa_in_w"] = nrm((3 * DIM, DIM), 0.05)
    p["sa_in_b"] = nrm((1, 3 * DIM), 0.05)
    p["sa_out_w"] = nrm((DIM, DIM), 0.05)
    p["sa_out_b"] = nrm((1, DIM), 0.05)
    p["ca_in_w"] = nrm((3 * DIM, DIM), 0.05)
    p["ca_in_b"] = nrm((1, 3 * DIM), 0.05)
    p["ca_out_w"] = nrm((DIM, DIM), 0.05)
    p["ca_out_b"] = nrm((1, DIM), 0.05)
    # Bayesian router (eval path uses mu only), temperature is the constant EFF_TEMP
    p["feature_mu"] = nrm((DIM, ROUTER_HIDDEN), 0.1)
    p["text_mu"] = nrm((TEXT_DIM, ROUTER_HIDDEN), 0.1)
    p["combined_mu"] = nrm((2 * ROUTER_HIDDEN, NUM_EXPERTS), 0.1)
    # Experts: Linear(D,4D) -> GELU -> Linear(4D,D); stored (in, out) pre-transposed
    p["exp_w1"] = nrm((NUM_EXPERTS, DIM, 4 * DIM), 0.05)
    p["exp_b1"] = nrm((NUM_EXPERTS, 1, 4 * DIM), 0.05)
    p["exp_w2"] = nrm((NUM_EXPERTS, 4 * DIM, DIM), 0.05)
    p["exp_b2"] = nrm((NUM_EXPERTS, 1, DIM), 0.05)
    return p


# ----------------------------- pure-JAX reference ----------------------------
def reference_forward(x, w, text_seq, p):
    Bb, C, Hh, Ww = x.shape
    Ss = Hh * Ww
    xt = jnp.transpose(x, (0, 2, 3, 1)).reshape(Bb, Ss, C)

    def modconv(z, weight, mw, mb):
        style = w @ mw.T + mb
        wm = weight[None, :, :] * style[:, None, :]
        d = lax.rsqrt(jnp.sum(wm * wm, axis=2, keepdims=True) + 1e-8)
        wm = wm * d
        return jnp.einsum('bsc,boc->bso', z, wm)

    def ln(z, g, b):
        m = jnp.mean(z, -1, keepdims=True)
        v = jnp.mean((z - m) ** 2, -1, keepdims=True)
        return (z - m) * lax.rsqrt(v + LN_EPS) * g + b

    def mha(q_in, kv_in, inw, inb, ow, ob):
        D = DIM
        q = q_in @ inw[:D].T + inb[0, :D]
        k = kv_in @ inw[D:2 * D].T + inb[0, D:2 * D]
        v = kv_in @ inw[2 * D:].T + inb[0, 2 * D:]
        Bq, Sq, _ = q.shape
        Sk = k.shape[1]
        qh = q.reshape(Bq, Sq, HEADS, HEAD_DIM).transpose(0, 2, 1, 3)
        kh = k.reshape(Bq, Sk, HEADS, HEAD_DIM).transpose(0, 2, 1, 3)
        vh = v.reshape(Bq, Sk, HEADS, HEAD_DIM).transpose(0, 2, 1, 3)
        sc = jnp.einsum('bhqd,bhkd->bhqk', qh, kh) * SCALE
        a = jax.nn.softmax(sc, axis=-1)
        o = jnp.einsum('bhqk,bhkd->bhqd', a, vh).transpose(0, 2, 1, 3).reshape(Bq, Sq, D)
        return o @ ow.T + ob[0]

    x_flat = modconv(xt, p["pin_w"], p["pin_mod_w"], p["pin_mod_b"])
    xn = ln(x_flat, p["ln1_g"][0], p["ln1_b"][0])
    x_flat = x_flat + mha(xn, xn, p["sa_in_w"], p["sa_in_b"], p["sa_out_w"], p["sa_out_b"])
    tproj = text_seq @ p["tp_w"].T + p["tp_b"][0]
    xn2 = ln(x_flat, p["ln2_g"][0], p["ln2_b"][0])
    x_flat = x_flat + mha(xn2, tproj, p["ca_in_w"], p["ca_in_b"], p["ca_out_w"], p["ca_out_b"])
    xn3 = ln(x_flat, p["ln3_g"][0], p["ln3_b"][0]).reshape(Bb * Ss, C)
    wt = jnp.repeat(w, Ss, axis=0)
    logits = jnp.concatenate([xn3 @ p["feature_mu"], wt @ p["text_mu"]], axis=1) @ p["combined_mu"]
    logits = jnp.clip(logits / EFF_TEMP, -20.0, 20.0)
    probs = jax.nn.softmax(logits, axis=1)
    probs = jnp.clip(probs, 1e-6, 1.0)
    probs = probs / jnp.sum(probs, axis=1, keepdims=True)
    one_hot = jax.nn.one_hot(jnp.argmax(probs, axis=1), NUM_EXPERTS, dtype=jnp.float32)
    acc = jnp.zeros_like(xn3)
    for e in range(NUM_EXPERTS):
        h1 = jax.nn.gelu(xn3 @ p["exp_w1"][e] + p["exp_b1"][e], approximate=False)
        acc = acc + one_hot[:, e:e + 1] * (h1 @ p["exp_w2"][e] + p["exp_b2"][e])
    x_flat = x_flat + acc.reshape(Bb, Ss, C)
    x_out = modconv(x_flat, p["pout_w"], p["pout_mod_w"], p["pout_mod_b"])
    return jnp.transpose(x_out.reshape(Bb, Hh, Ww, C), (0, 3, 1, 2)), one_hot


# ----------------------------- main -------------------------------------------
if __name__ == "__main__":
    key = jax.random.PRNGKey(0)
    kx, kw, kt, kp = jax.random.split(key, 4)
    x = jax.random.normal(kx, (B, DIM, H, W), dtype=jnp.float32)        # NCHW like PyTorch
    w = jax.random.normal(kw, (B, TEXT_DIM), dtype=jnp.float32)
    text_seq = jax.random.normal(kt, (B, L, TEXT_DIM), dtype=jnp.float32)
    params = init_params(kp)

    fwd = jax.jit(attention_block_forward)
    x_out, routing_probs = fwd(x, w, text_seq, params)
    x_out = jax.block_until_ready(x_out)
    routing_probs = jax.block_until_ready(routing_probs)

    assert x_out.shape == (B, DIM, H, W)
    assert routing_probs.shape == (B * H * W, NUM_EXPERTS)
    assert bool(jnp.all(jnp.isfinite(x_out)))

    # Correctness vs a full-precision pure-JAX reference. The kernel uses bf16
    # MXU weights + tanh-GELU + approx reciprocals, so near-tie tokens may flip
    # their hard routing; those tokens are excluded from the dense comparison.
    with jax.default_matmul_precision("highest"):
        x_ref, probs_ref = jax.jit(reference_forward)(x, w, text_seq, params)
        x_ref = jax.block_until_ready(x_ref)

    rp = np.asarray(routing_probs)
    rr = np.asarray(probs_ref)
    tok_match = rp.argmax(axis=1) == rr.argmax(axis=1)
    assert tok_match.mean() >= 0.95, "routing disagreement too large"
    xo = np.asarray(x_out).transpose(0, 2, 3, 1).reshape(-1, DIM)
    xr = np.asarray(x_ref).transpose(0, 2, 3, 1).reshape(-1, DIM)
    np.testing.assert_allclose(xo[tok_match], xr[tok_match], rtol=4e-2, atol=4e-2)

    print("KERNEL_OK")
</pallas_src>

<mosaic_0001>
module attributes {stable_mosaic.version = 11 : i64} {
  func.func @_attention_block_kernel(%arg0: i32, %arg1: memref<1x64x32xf32, #tpu.memory_space<vmem>>, %arg2: memref<1x1x64xf32, #tpu.memory_space<vmem>>, %arg3: memref<1x8x64xf32, #tpu.memory_space<vmem>>, %arg4: memref<208x32xf32, #tpu.memory_space<vmem>>, %arg5: memref<96x4xf32, #tpu.memory_space<vmem>>, %arg6: memref<2x1x128xf32, #tpu.memory_space<vmem>>, %arg7: memref<1x512xf32, #tpu.memory_space<vmem>>, %arg8: memref<2x32x96xbf16, #tpu.memory_space<vmem>>, %arg9: memref<640x32xbf16, #tpu.memory_space<vmem>>, %arg10: memref<32x512xbf16, #tpu.memory_space<vmem>>, %arg11: memref<1x64x32xf32, #tpu.memory_space<vmem>>, %arg12: memref<1x64x4xf32, #tpu.memory_space<vmem>>) attributes {dimension_semantics = [#tpu.dimension_semantics<parallel>], iteration_bounds = array<i64: 2>, scalar_prefetch = 0 : i64, scratch_operands = 0 : i64, tpu.core_type = #tpu.core_type<tc>, window_params = [{transform_indices = @transform_0, window_bounds = array<i64: 1, 64, 32>}, {transform_indices = @transform_1, window_bounds = array<i64: 1, 1, 64>}, {transform_indices = @transform_2, window_bounds = array<i64: 1, 8, 64>}, {pipeline_mode = #tpu.pipeline_mode<synchronous>, transform_indices = @transform_3, window_bounds = array<i64: 208, 32>}, {pipeline_mode = #tpu.pipeline_mode<synchronous>, transform_indices = @transform_4, window_bounds = array<i64: 96, 4>}, {pipeline_mode = #tpu.pipeline_mode<synchronous>, transform_indices = @transform_5, window_bounds = array<i64: 2, 1, 128>}, {pipeline_mode = #tpu.pipeline_mode<synchronous>, transform_indices = @transform_6, window_bounds = array<i64: 1, 512>}, {pipeline_mode = #tpu.pipeline_mode<synchronous>, transform_indices = @transform_7, window_bounds = array<i64: 2, 32, 96>}, {pipeline_mode = #tpu.pipeline_mode<synchronous>, transform_indices = @transform_8, window_bounds = array<i64: 640, 32>}, {pipeline_mode = #tpu.pipeline_mode<synchronous>, transform_indices = @transform_9, window_bounds = array<i64: 32, 512>}, {transform_indices = @transform_10, window_bounds = array<i64: 1, 64, 32>}, {transform_indices = @transform_11, window_bounds = array<i64: 1, 64, 4>}]} {
    %c0 = arith.constant 0 : index
    %c0_0 = arith.constant 0 : index
    %c0_1 = arith.constant 0 : index
    %0 = vector.load %arg1[%c0, %c0_0, %c0_1] : memref<1x64x32xf32, #tpu.memory_space<vmem>>, vector<1x64x32xf32>
    %1 = vector.shape_cast %0 : vector<1x64x32xf32> to vector<64x32xf32>
    %c0_2 = arith.constant 0 : index
    %c0_3 = arith.constant 0 : index
    %c0_4 = arith.constant 0 : index
    %2 = vector.load %arg2[%c0_2, %c0_3, %c0_4] : memref<1x1x64xf32, #tpu.memory_space<vmem>>, vector<1x1x64xf32>
    %3 = vector.shape_cast %2 : vector<1x1x64xf32> to vector<1x64xf32>
    %c0_5 = arith.constant 0 : index
    %c0_6 = arith.constant 0 : index
    %c0_7 = arith.constant 0 : index
    %4 = vector.load %arg3[%c0_5, %c0_6, %c0_7] : memref<1x8x64xf32, #tpu.memory_space<vmem>>, vector<1x8x64xf32>
    %5 = vector.shape_cast %4 : vector<1x8x64xf32> to vector<8x64xf32>
    %c80 = arith.constant 80 : index
    %c0_8 = arith.constant 0 : index
    %6 = vector.load %arg4[%c80, %c0_8] : memref<208x32xf32, #tpu.memory_space<vmem>>, vector<64x32xf32>
    %cst = arith.constant dense<0.000000e+00> : vector<1x32xf32>
    %7 = tpu.matmul %3, %6, %cst {dimension_numbers = #tpu.dot_dimension_numbers<[1], [0], [0], [1], [0, 0, 1, 1], [], []>} : vector<1x64xf32>, vector<64x32xf32>, vector<1x32xf32> -> vector<1x32xf32>
    %c68 = arith.constant 68 : index
    %c0_9 = arith.constant 0 : index
    %8 = vector.load %arg4[%c68, %c0_9] : memref<208x32xf32, #tpu.memory_space<vmem>>, vector<1x32xf32>
    %9 = arith.addf %7, %8 : vector<1x32xf32>
    %c0_10 = arith.constant 0 : index
    %c0_11 = arith.constant 0 : index
    %10 = vector.load %arg4[%c0_10, %c0_11] : memref<208x32xf32, #tpu.memory_space<vmem>>, vector<32x32xf32>
    %11 = vector.broadcast %9 : vector<1x32xf32> to vector<32x32xf32>
    %12 = arith.mulf %10, %11 : vector<32x32xf32>
    %13 = arith.mulf %12, %12 : vector<32x32xf32>
    %cst_12 = arith.constant dense<0.000000e+00> : vector<32xf32>
    %14 = vector.multi_reduction <add>, %13, %cst_12 [1] : vector<32x32xf32> to vector<32xf32>
    %15 = vector.shape_cast %14 : vector<32xf32> to vector<32x1xf32>
    %cst_13 = arith.constant 9.99999993E-9 : f32
    %16 = vector.broadcast %cst_13 : f32 to vector<32x1xf32>
    %17 = arith.addf %15, %16 : vector<32x1xf32>
    %18 = math.rsqrt %17 : vector<32x1xf32>
    %19 = vector.broadcast %18 : vector<32x1xf32> to vector<32x32xf32>
    %20 = arith.mulf %12, %19 : vector<32x32xf32>
    %cst_14 = arith.constant dense<0.000000e+00> : vector<64x32xf32>
    %21 = tpu.matmul %1, %20, %cst_14 {dimension_numbers = #tpu.dot_dimension_numbers<[1], [1], [0], [0], [0, 0, 1, 0], [], []>} : vector<64x32xf32>, vector<32x32xf32>, vector<64x32xf32> -> vector<64x32xf32>
    %cst_15 = arith.constant dense<0.000000e+00> : vector<64xf32>
    %22 = vector.multi_reduction <add>, %21, %cst_15 [1] : vector<64x32xf32> to vector<64xf32>
    %23 = vector.shape_cast %22 : vector<64xf32> to vector<64x1xf32>
    %cst_16 = arith.constant 3.200000e+01 : f32
    %24 = vector.broadcast %cst_16 : f32 to vector<64x1xf32>
    %25 = arith.divf %23, %24 : vector<64x1xf32>
    %26 = vector.broadcast %25 : vector<64x1xf32> to vector<64x32xf32>
    %27 = arith.subf %21, %26 : vector<64x32xf32>
    %28 = arith.mulf %27, %27 : vector<64x32xf32>
    %cst_17 = arith.constant dense<0.000000e+00> : vector<64xf32>
    %29 = vector.multi_reduction <add>, %28, %cst_17 [1] : vector<64x32xf32> to vector<64xf32>
    %30 = vector.shape_cast %29 : vector<64xf32> to vector<64x1xf32>
    %cst_18 = arith.constant 3.200000e+01 : f32
    %31 = vector.broadcast %cst_18 : f32 to vector<64x1xf32>
    %32 = arith.divf %30, %31 : vector<64x1xf32>
    %cst_19 = arith.constant 9.99999974E-6 : f32
    %33 = vector.broadcast %cst_19 : f32 to vector<64x1xf32>
    %34 = arith.addf %32, %33 : vector<64x1xf32>
    %35 = math.rsqrt %34 : vector<64x1xf32>
    %36 = vector.broadcast %35 : vector<64x1xf32> to vector<64x32xf32>
    %37 = arith.mulf %27, %36 : vector<64x32xf32>
    %c70 = arith.constant 70 : index
    %c0_20 = arith.constant 0 : index
    %38 = vector.load %arg4[%c70, %c0_20] : memref<208x32xf32, #tpu.memory_space<vmem>>, vector<1x32xf32>
    %39 = vector.broadcast %38 : vector<1x32xf32> to vector<64x32xf32>
    %40 = arith.mulf %37, %39 : vector<64x32xf32>
    %c73 = arith.constant 73 : index
    %c0_21 = arith.constant 0 : index
    %41 = vector.load %arg4[%c73, %c0_21] : memref<208x32xf32, #tpu.memory_space<vmem>>, vector<1x32xf32>
    %42 = vector.broadcast %41 : vector<1x32xf32> to vector<64x32xf32>
    %43 = arith.addf %40, %42 : vector<64x32xf32>
    %c0_22 = arith.constant 0 : index
    %c0_23 = arith.constant 0 : index
    %c0_24 = arith.constant 0 : index
    %44 = vector.load %arg8[%c0_22, %c0_23, %c0_24] : memref<2x32x96xbf16, #tpu.memory_space<vmem>>, vector<1x32x96xbf16>
    %45 = vector.shape_cast %44 : vector<1x32x96xbf16> to vector<32x96xbf16>
    %c0_25 = arith.constant 0 : index
    %c0_26 = arith.constant 0 : index
    %c0_27 = arith.constant 0 : index
    %46 = vector.load %arg6[%c0_25, %c0_26, %c0_27] : memref<2x1x128xf32, #tpu.memory_space<vmem>>, vector<1x1x128xf32>
    %47 = vector.shape_cast %46 : vector<1x1x128xf32> to vector<1x128xf32>
    %48 = arith.truncf %43 : vector<64x32xf32> to vector<64x32xbf16>
    %cst_28 = arith.constant dense<0.000000e+00> : vector<64x96xf32>
    %49 = tpu.matmul %48, %45, %cst_28 {dimension_numbers = #tpu.dot_dimension_numbers<[1], [0], [0], [1], [0, 0, 1, 1], [], []>} : vector<64x32xbf16>, vector<32x96xbf16>, vector<64x96xf32> -> vector<64x96xf32>
    %50 = vector.extract_strided_slice %47 {offsets = [0, 0], sizes = [1, 96], strides = [1, 1]} : vector<1x128xf32> to vector<1x96xf32>
    %51 = vector.broadcast %50 : vector<1x96xf32> to vector<64x96xf32>
    %52 = arith.addf %49, %51 : vector<64x96xf32>
    %53 = vector.extract_strided_slice %52 {offsets = [0, 0], sizes = [64, 4], strides = [1, 1]} : vector<64x96xf32> to vector<64x4xf32>
    %54 = vector.extract_strided_slice %52 {offsets = [0, 32], sizes = [64, 4], strides = [1, 1]} : vector<64x96xf32> to vector<64x4xf32>
    %55 = vector.extract_strided_slice %52 {offsets = [0, 64], sizes = [64, 4], strides = [1, 1]} : vector<64x96xf32> to vector<64x4xf32>
    %cst_29 = arith.constant dense<0.000000e+00> : vector<64x64xf32>
    %56 = tpu.matmul %53, %54, %cst_29 {dimension_numbers = #tpu.dot_dimension_numbers<[1], [1], [0], [0], [0, 0, 1, 0], [], []>} : vector<64x4xf32>, vector<64x4xf32>, vector<64x64xf32> -> vector<64x64xf32>
    %cst_30 = arith.constant 5.000000e-01 : f32
    %57 = vector.broadcast %cst_30 : f32 to vector<64x64xf32>
    %58 = arith.mulf %56, %57 : vector<64x64xf32>
    %cst_31 = arith.constant dense<0xFF800000> : vector<64xf32>
    %59 = vector.multi_reduction <maximumf>, %58, %cst_31 [1] : vector<64x64xf32> to vector<64xf32>
    %60 = vector.shape_cast %59 : vector<64xf32> to vector<64x1xf32>
    %61 = vector.broadcast %60 : vector<64x1xf32> to vector<64x64xf32>
    %62 = arith.subf %58, %61 : vector<64x64xf32>
    %63 = math.exp %62 : vector<64x64xf32>
    %cst_32 = arith.constant dense<0.000000e+00> : vector<64xf32>
    %64 = vector.multi_reduction <add>, %63, %cst_32 [1] : vector<64x64xf32> to vector<64xf32>
    %65 = vector.shape_cast %64 : vector<64xf32> to vector<64x1xf32>
    %66 = tpu.reciprocal %65 {approx = true} : vector<64x1xf32> -> vector<64x1xf32>
    %67 = vector.broadcast %66 : vector<64x1xf32> to vector<64x64xf32>
    %68 = arith.mulf %63, %67 : vector<64x64xf32>
    %cst_33 = arith.constant dense<0.000000e+00> : vector<64x4xf32>
    %69 = tpu.matmul %68, %55, %cst_33 {dimension_numbers = #tpu.dot_dimension_numbers<[1], [0], [0], [1], [0, 0, 1, 1], [], []>} : vector<64x64xf32>, vector<64x4xf32>, vector<64x4xf32> -> vector<64x4xf32>
    %70 = vector.extract_strided_slice %52 {offsets = [0, 4], sizes = [64, 4], strides = [1, 1]} : vector<64x96xf32> to vector<64x4xf32>
    %71 = vector.extract_strided_slice %52 {offsets = [0, 36], sizes = [64, 4], strides = [1, 1]} : vector<64x96xf32> to vector<64x4xf32>
    %72 = vector.extract_strided_slice %52 {offsets = [0, 68], sizes = [64, 4], strides = [1, 1]} : vector<64x96xf32> to vector<64x4xf32>
    %cst_34 = arith.constant dense<0.000000e+00> : vector<64x64xf32>
    %73 = tpu.matmul %70, %71, %cst_34 {dimension_numbers = #tpu.dot_dimension_numbers<[1], [1], [0], [0], [0, 0, 1, 0], [], []>} : vector<64x4xf32>, vector<64x4xf32>, vector<64x64xf32> -> vector<64x64xf32>
    %cst_35 = arith.constant 5.000000e-01 : f32
    %74 = vector.broadcast %cst_35 : f32 to vector<64x64xf32>
    %75 = arith.mulf %73, %74 : vector<64x64xf32>
    %cst_36 = arith.constant dense<0xFF800000> : vector<64xf32>
    %76 = vector.multi_reduction <maximumf>, %75, %cst_36 [1] : vector<64x64xf32> to vector<64xf32>
    %77 = vector.shape_cast %76 : vector<64xf32> to vector<64x1xf32>
    %78 = vector.broadcast %77 : vector<64x1xf32> to vector<64x64xf32>
    %79 = arith.subf %75, %78 : vector<64x64xf32>
    %80 = math.exp %79 : vector<64x64xf32>
    %cst_37 = arith.constant dense<0.000000e+00> : vector<64xf32>
    %81 = vector.multi_reduction <add>, %80, %cst_37 [1] : vector<64x64xf32> to vector<64xf32>
    %82 = vector.shape_cast %81 : vector<64xf32> to vector<64x1xf32>
    %83 = tpu.reciprocal %82 {approx = true} : vector<64x1xf32> -> vector<64x1xf32>
    %84 = vector.broadcast %83 : vector<64x1xf32> to vector<64x64xf32>
    %85 = arith.mulf %80, %84 : vector<64x64xf32>
    %cst_38 = arith.constant dense<0.000000e+00> : vector<64x4xf32>
    %86 = tpu.matmul %85, %72, %cst_38 {dimension_numbers = #tpu.dot_dimension_numbers<[1], [0], [0], [1], [0, 0, 1, 1], [], []>} : vector<64x64xf32>, vector<64x4xf32>, vector<64x4xf32> -> vector<64x4xf32>
    %87 = vector.extract_strided_slice %52 {offsets = [0, 8], sizes = [64, 4], strides = [1, 1]} : vector<64x96xf32> to vector<64x4xf32>
    %88 = vector.extract_strided_slice %52 {offsets = [0, 40], sizes = [64, 4], strides = [1, 1]} : vector<64x96xf32> to vector<64x4xf32>
    %89 = vector.extract_strided_slice %52 {offsets = [0, 72], sizes = [64, 4], strides = [1, 1]} : vector<64x96xf32> to vector<64x4xf32>
    %cst_39 = arith.constant dense<0.000000e+00> : vector<64x64xf32>
    %90 = tpu.matmul %87, %88, %cst_39 {dimension_numbers = #tpu.dot_dimension_numbers<[1], [1], [0], [0], [0, 0, 1, 0], [], []>} : vector<64x4xf32>, vector<64x4xf32>, vector<64x64xf32> -> vector<64x64xf32>
    %cst_40 = arith.constant 5.000000e-01 : f32
    %91 = vector.broadcast %cst_40 : f32 to vector<64x64xf32>
    %92 = arith.mulf %90, %91 : vector<64x64xf32>
    %cst_41 = arith.constant dense<0xFF800000> : vector<64xf32>
    %93 = vector.multi_reduction <maximumf>, %92, %cst_41 [1] : vector<64x64xf32> to vector<64xf32>
    %94 = vector.shape_cast %93 : vector<64xf32> to vector<64x1xf32>
    %95 = vector.broadcast %94 : vector<64x1xf32> to vector<64x64xf32>
    %96 = arith.subf %92, %95 : vector<64x64xf32>
    %97 = math.exp %96 : vector<64x64xf32>
    %cst_42 = arith.constant dense<0.000000e+00> : vector<64xf32>
    %98 = vector.multi_reduction <add>, %97, %cst_42 [1] : vector<64x64xf32> to vector<64xf32>
    %99 = vector.shape_cast %98 : vector<64xf32> to vector<64x1xf32>
    %100 = tpu.reciprocal %99 {approx = true} : vector<64x1xf32> -> vector<64x1xf32>
    %101 = vector.broadcast %100 : vector<64x1xf32> to vector<64x64xf32>
    %102 = arith.mulf %97, %101 : vector<64x64xf32>
    %cst_43 = arith.constant dense<0.000000e+00> : vector<64x4xf32>
    %103 = tpu.matmul %102, %89, %cst_43 {dimension_numbers = #tpu.dot_dimension_numbers<[1], [0], [0], [1], [0, 0, 1, 1], [], []>} : vector<64x64xf32>, vector<64x4xf32>, vector<64x4xf32> -> vector<64x4xf32>
    %104 = vector.extract_strided_slice %52 {offsets = [0, 12], sizes = [64, 4], strides = [1, 1]} : vector<64x96xf32> to vector<64x4xf32>
    %105 = vector.extract_strided_slice %52 {offsets = [0, 44], sizes = [64, 4], strides = [1, 1]} : vector<64x96xf32> to vector<64x4xf32>
    %106 = vector.extract_strided_slice %52 {offsets = [0, 76], sizes = [64, 4], strides = [1, 1]} : vector<64x96xf32> to vector<64x4xf32>
    %cst_44 = arith.constant dense<0.000000e+00> : vector<64x64xf32>
    %107 = tpu.matmul %104, %105, %cst_44 {dimension_numbers = #tpu.dot_dimension_numbers<[1], [1], [0], [0], [0, 0, 1, 0], [], []>} : vector<64x4xf32>, vector<64x4xf32>, vector<64x64xf32> -> vector<64x64xf32>
    %cst_45 = arith.constant 5.000000e-01 : f32
    %108 = vector.broadcast %cst_45 : f32 to vector<64x64xf32>
    %109 = arith.mulf %107, %108 : vector<64x64xf32>
    %cst_46 = arith.constant dense<0xFF800000> : vector<64xf32>
    %110 = vector.multi_reduction <maximumf>, %109, %cst_46 [1] : vector<64x64xf32> to vector<64xf32>
    %111 = vector.shape_cast %110 : vector<64xf32> to vector<64x1xf32>
    %112 = vector.broadcast %111 : vector<64x1xf32> to vector<64x64xf32>
    %113 = arith.subf %109, %112 : vector<64x64xf32>
    %114 = math.exp %113 : vector<64x64xf32>
    %cst_47 = arith.constant dense<0.000000e+00> : vector<64xf32>
    %115 = vector.multi_reduction <add>, %114, %cst_47 [1] : vector<64x64xf32> to vector<64xf32>
    %116 = vector.shape_cast %115 : vector<64xf32> to vector<64x1xf32>
    %117 = tpu.reciprocal %116 {approx = true} : vector<64x1xf32> -> vector<64x1xf32>
    %118 = vector.broadcast %117 : vector<64x1xf32> to vector<64x64xf32>
    %119 = arith.mulf %114, %118 : vector<64x64xf32>
    %cst_48 = arith.constant dense<0.000000e+00> : vector<64x4xf32>
    %120 = tpu.matmul %119, %106, %cst_48 {dimension_numbers = #tpu.dot_dimension_numbers<[1], [0], [0], [1], [0, 0, 1, 1], [], []>} : vector<64x64xf32>, vector<64x4xf32>, vector<64x4xf32> -> vector<64x4xf32>
    %121 = vector.extract_strided_slice %52 {offsets = [0, 16], sizes = [64, 4], strides = [1, 1]} : vector<64x96xf32> to vector<64x4xf32>
    %122 = vector.extract_strided_slice %52 {offsets = [0, 48], sizes = [64, 4], strides = [1, 1]} : vector<64x96xf32> to vector<64x4xf32>
    %123 = vector.extract_strided_slice %52 {offsets = [0, 80], sizes = [64, 4], strides = [1, 1]} : vector<64x96xf32> to vector<64x4xf32>
    %cst_49 = arith.constant dense<0.000000e+00> : vector<64x64xf32>
    %124 = tpu.matmul %121, %122, %cst_49 {dimension_numbers = #tpu.dot_dimension_numbers<[1], [1], [0], [0], [0, 0, 1, 0], [], []>} : vector<64x4xf32>, vector<64x4xf32>, vector<64x64xf32> -> vector<64x64xf32>
    %cst_50 = arith.constant 5.000000e-01 : f32
    %125 = vector.broadcast %cst_50 : f32 to vector<64x64xf32>
    %126 = arith.mulf %124, %125 : vector<64x64xf32>
    %cst_51 = arith.constant dense<0xFF800000> : vector<64xf32>
    %127 = vector.multi_reduction <maximumf>, %126, %cst_51 [1] : vector<64x64xf32> to vector<64xf32>
    %128 = vector.shape_cast %127 : vector<64xf32> to vector<64x1xf32>
    %129 = vector.broadcast %128 : vector<64x1xf32> to vector<64x64xf32>
    %130 = arith.subf %126, %129 : vector<64x64xf32>
    %131 = math.exp %130 : vector<64x64xf32>
    %cst_52 = arith.constant dense<0.000000e+00> : vector<64xf32>
    %132 = vector.multi_reduction <add>, %131, %cst_52 [1] : vector<64x64xf32> to vector<64xf32>
    %133 = vector.shape_cast %132 : vector<64xf32> to vector<64x1xf32>
    %134 = tpu.reciprocal %133 {approx = true} : vector<64x1xf32> -> vector<64x1xf32>
    %135 = vector.broadcast %134 : vector<64x1xf32> to vector<64x64xf32>
    %136 = arith.mulf %131, %135 : vector<64x64xf32>
    %cst_53 = arith.constant dense<0.000000e+00> : vector<64x4xf32>
    %137 = tpu.matmul %136, %123, %cst_53 {dimension_numbers = #tpu.dot_dimension_numbers<[1], [0], [0], [1], [0, 0, 1, 1], [], []>} : vector<64x64xf32>, vector<64x4xf32>, vector<64x4xf32> -> vector<64x4xf32>
    %138 = vector.extract_strided_slice %52 {offsets = [0, 20], sizes = [64, 4], strides = [1, 1]} : vector<64x96xf32> to vector<64x4xf32>
    %139 = vector.extract_strided_slice %52 {offsets = [0, 52], sizes = [64, 4], strides = [1, 1]} : vector<64x96xf32> to vector<64x4xf32>
    %140 = vector.extract_strided_slice %52 {offsets = [0, 84], sizes = [64, 4], strides = [1, 1]} : vector<64x96xf32> to vector<64x4xf32>
    %cst_54 = arith.constant dense<0.000000e+00> : vector<64x64xf32>
    %141 = tpu.matmul %138, %139, %cst_54 {dimension_numbers = #tpu.dot_dimension_numbers<[1], [1], [0], [0], [0, 0, 1, 0], [], []>} : vector<64x4xf32>, vector<64x4xf32>, vector<64x64xf32> -> vector<64x64xf32>
    %cst_55 = arith.constant 5.000000e-01 : f32
    %142 = vector.broadcast %cst_55 : f32 to vector<64x64xf32>
    %143 = arith.mulf %141, %142 : vector<64x64xf32>
    %cst_56 = arith.constant dense<0xFF800000> : vector<64xf32>
    %144 = vector.multi_reduction <maximumf>, %143, %cst_56 [1] : vector<64x64xf32> to vector<64xf32>
    %145 = vector.shape_cast %144 : vector<64xf32> to vector<64x1xf32>
    %146 = vector.broadcast %145 : vector<64x1xf32> to vector<64x64xf32>
    %147 = arith.subf %143, %146 : vector<64x64xf32>
    %148 = math.exp %147 : vector<64x64xf32>
    %cst_57 = arith.constant dense<0.000000e+00> : vector<64xf32>
    %149 = vector.multi_reduction <add>, %148, %cst_57 [1] : vector<64x64xf32> to vector<64xf32>
    %150 = vector.shape_cast %149 : vector<64xf32> to vector<64x1xf32>
    %151 = tpu.reciprocal %150 {approx = true} : vector<64x1xf32> -> vector<64x1xf32>
    %152 = vector.broadcast %151 : vector<64x1xf32> to vector<64x64xf32>
    %153 = arith.mulf %148, %152 : vector<64x64xf32>
    %cst_58 = arith.constant dense<0.000000e+00> : vector<64x4xf32>
    %154 = tpu.matmul %153, %140, %cst_58 {dimension_numbers = #tpu.dot_dimension_numbers<[1], [0], [0], [1], [0, 0, 1, 1], [], []>} : vector<64x64xf32>, vector<64x4xf32>, vector<64x4xf32> -> vector<64x4xf32>
    %155 = vector.extract_strided_slice %52 {offsets = [0, 24], sizes = [64, 4], strides = [1, 1]} : vector<64x96xf32> to vector<64x4xf32>
    %156 = vector.extract_strided_slice %52 {offsets = [0, 56], sizes = [64, 4], strides = [1, 1]} : vector<64x96xf32> to vector<64x4xf32>
    %157 = vector.extract_strided_slice %52 {offsets = [0, 88], sizes = [64, 4], strides = [1, 1]} : vector<64x96xf32> to vector<64x4xf32>
    %cst_59 = arith.constant dense<0.000000e+00> : vector<64x64xf32>
    %158 = tpu.matmul %155, %156, %cst_59 {dimension_numbers = #tpu.dot_dimension_numbers<[1], [1], [0], [0], [0, 0, 1, 0], [], []>} : vector<64x4xf32>, vector<64x4xf32>, vector<64x64xf32> -> vector<64x64xf32>
    %cst_60 = arith.constant 5.000000e-01 : f32
    %159 = vector.broadcast %cst_60 : f32 to vector<64x64xf32>
    %160 = arith.mulf %158, %159 : vector<64x64xf32>
    %cst_61 = arith.constant dense<0xFF800000> : vector<64xf32>
    %161 = vector.multi_reduction <maximumf>, %160, %cst_61 [1] : vector<64x64xf32> to vector<64xf32>
    %162 = vector.shape_cast %161 : vector<64xf32> to vector<64x1xf32>
    %163 = vector.broadcast %162 : vector<64x1xf32> to vector<64x64xf32>
    %164 = arith.subf %160, %163 : vector<64x64xf32>
    %165 = math.exp %164 : vector<64x64xf32>
    %cst_62 = arith.constant dense<0.000000e+00> : vector<64xf32>
    %166 = vector.multi_reduction <add>, %165, %cst_62 [1] : vector<64x64xf32> to vector<64xf32>
    %167 = vector.shape_cast %166 : vector<64xf32> to vector<64x1xf32>
    %168 = tpu.reciprocal %167 {approx = true} : vector<64x1xf32> -> vector<64x1xf32>
    %169 = vector.broadcast %168 : vector<64x1xf32> to vector<64x64xf32>
    %170 = arith.mulf %165, %169 : vector<64x64xf32>
    %cst_63 = arith.constant dense<0.000000e+00> : vector<64x4xf32>
    %171 = tpu.matmul %170, %157, %cst_63 {dimension_numbers = #tpu.dot_dimension_numbers<[1], [0], [0], [1], [0, 0, 1, 1], [], []>} : vector<64x64xf32>, vector<64x4xf32>, vector<64x4xf32> -> vector<64x4xf32>
    %172 = vector.extract_strided_slice %52 {offsets = [0, 28], sizes = [64, 4], strides = [1, 1]} : vector<64x96xf32> to vector<64x4xf32>
    %173 = vector.extract_strided_slice %52 {offsets = [0, 60], sizes = [64, 4], strides = [1, 1]} : vector<64x96xf32> to vector<64x4xf32>
    %174 = vector.extract_strided_slice %52 {offsets = [0, 92], sizes = [64, 4], strides = [1, 1]} : vector<64x96xf32> to vector<64x4xf32>
    %cst_64 = arith.constant dense<0.000000e+00> : vector<64x64xf32>
    %175 = tpu.matmul %172, %173, %cst_64 {dimension_numbers = #tpu.dot_dimension_numbers<[1], [1], [0], [0], [0, 0, 1, 0], [], []>} : vector<64x4xf32>, vector<64x4xf32>, vector<64x64xf32> -> vector<64x64xf32>
    %cst_65 = arith.constant 5.000000e-01 : f32
    %176 = vector.broadcast %cst_65 : f32 to vector<64x64xf32>
    %177 = arith.mulf %175, %176 : vector<64x64xf32>
    %cst_66 = arith.constant dense<0xFF800000> : vector<64xf32>
    %178 = vector.multi_reduction <maximumf>, %177, %cst_66 [1] : vector<64x64xf32> to vector<64xf32>
    %179 = vector.shape_cast %178 : vector<64xf32> to vector<64x1xf32>
    %180 = vector.broadcast %179 : vector<64x1xf32> to vector<64x64xf32>
    %181 = arith.subf %177, %180 : vector<64x64xf32>
    %182 = math.exp %181 : vector<64x64xf32>
    %cst_67 = arith.constant dense<0.000000e+00> : vector<64xf32>
    %183 = vector.multi_reduction <add>, %182, %cst_67 [1] : vector<64x64xf32> to vector<64xf32>
    %184 = vector.shape_cast %183 : vector<64xf32> to vector<64x1xf32>
    %185 = tpu.reciprocal %184 {approx = true} : vector<64x1xf32> -> vector<64x1xf32>
    %186 = vector.broadcast %185 : vector<64x1xf32> to vector<64x64xf32>
    %187 = arith.mulf %182, %186 : vector<64x64xf32>
    %cst_68 = arith.constant dense<0.000000e+00> : vector<64x4xf32>
    %188 = tpu.matmul %187, %174, %cst_68 {dimension_numbers = #tpu.dot_dimension_numbers<[1], [0], [0], [1], [0, 0, 1, 1], [], []>} : vector<64x64xf32>, vector<64x4xf32>, vector<64x4xf32> -> vector<64x4xf32>
    %189 = tpu.concatenate %69, %86, %103, %120, %137, %154, %171, %188 in 1 : vector<64x4xf32>, vector<64x4xf32>, vector<64x4xf32>, vector<64x4xf32>, vector<64x4xf32>, vector<64x4xf32>, vector<64x4xf32>, vector<64x4xf32> -> vector<64x32xf32>
    %c0_69 = arith.constant 0 : index
    %c0_70 = arith.constant 0 : index
    %190 = vector.load %arg9[%c0_69, %c0_70] : memref<640x32xbf16, #tpu.memory_space<vmem>>, vector<32x32xbf16>
    %191 = arith.truncf %189 : vector<64x32xf32> to vector<64x32xbf16>
    %cst_71 = arith.constant dense<0.000000e+00> : vector<64x32xf32>
    %192 = tpu.matmul %191, %190, %cst_71 {dimension_numbers = #tpu.dot_dimension_numbers<[1], [0], [0], [1], [0, 0, 1, 1], [], []>} : vector<64x32xbf16>, vector<32x32xbf16>, vector<64x32xf32> -> vector<64x32xf32>
    %193 = vector.extract_strided_slice %47 {offsets = [0, 96], sizes = [1, 32], strides = [1, 1]} : vector<1x128xf32> to vector<1x32xf32>
    %194 = vector.broadcast %193 : vector<1x32xf32> to vector<64x32xf32>
    %195 = arith.addf %192, %194 : vector<64x32xf32>
    %196 = arith.addf %21, %195 : vector<64x32xf32>
    %197 = arith.truncf %5 : vector<8x64xf32> to vector<8x64xbf16>
    %c64 = arith.constant 64 : index
    %c0_72 = arith.constant 0 : index
    %198 = vector.load %arg9[%c64, %c0_72] : memref<640x32xbf16, #tpu.memory_space<vmem>>, vector<64x32xbf16>
    %cst_73 = arith.constant dense<0.000000e+00> : vector<8x32xf32>
    %199 = tpu.matmul %197, %198, %cst_73 {dimension_numbers = #tpu.dot_dimension_numbers<[1], [0], [0], [1], [0, 0, 1, 1], [], []>} : vector<8x64xbf16>, vector<64x32xbf16>, vector<8x32xf32> -> vector<8x32xf32>
    %c76 = arith.constant 76 : index
    %c0_74 = arith.constant 0 : index
    %200 = vector.load %arg4[%c76, %c0_74] : memref<208x32xf32, #tpu.memory_space<vmem>>, vector<1x32xf32>
    %201 = vector.broadcast %200 : vector<1x32xf32> to vector<8x32xf32>
    %202 = arith.addf %199, %201 : vector<8x32xf32>
    %cst_75 = arith.constant dense<0.000000e+00> : vector<64xf32>
    %203 = vector.multi_reduction <add>, %196, %cst_75 [1] : vector<64x32xf32> to vector<64xf32>
    %204 = vector.shape_cast %203 : vector<64xf32> to vector<64x1xf32>
    %cst_76 = arith.constant 3.200000e+01 : f32
    %205 = vector.broadcast %cst_76 : f32 to vector<64x1xf32>
    %206 = arith.divf %204, %205 : vector<64x1xf32>
    %207 = vector.broadcast %206 : vector<64x1xf32> to vector<64x32xf32>
    %208 = arith.subf %196, %207 : vector<64x32xf32>
    %209 = arith.mulf %208, %208 : vector<64x32xf32>
    %cst_77 = arith.constant dense<0.000000e+00> : vector<64xf32>
    %210 = vector.multi_reduction <add>, %209, %cst_77 [1] : vector<64x32xf32> to vector<64xf32>
    %211 = vector.shape_cast %210 : vector<64xf32> to vector<64x1xf32>
    %cst_78 = arith.constant 3.200000e+01 : f32
    %212 = vector.broadcast %cst_78 : f32 to vector<64x1xf32>
    %213 = arith.divf %211, %212 : vector<64x1xf32>
    %cst_79 = arith.constant 9.99999974E-6 : f32
    %214 = vector.broadcast %cst_79 : f32 to vector<64x1xf32>
    %215 = arith.addf %213, %214 : vector<64x1xf32>
    %216 = math.rsqrt %215 : vector<64x1xf32>
    %217 = vector.broadcast %216 : vector<64x1xf32> to vector<64x32xf32>
    %218 = arith.mulf %208, %217 : vector<64x32xf32>
    %c71 = arith.constant 71 : index
    %c0_80 = arith.constant 0 : index
    %219 = vector.load %arg4[%c71, %c0_80] : memref<208x32xf32, #tpu.memory_space<vmem>>, vector<1x32xf32>
    %220 = vector.broadcast %219 : vector<1x32xf32> to vector<64x32xf32>
    %221 = arith.mulf %218, %220 : vector<64x32xf32>
    %c74 = arith.constant 74 : index
    %c0_81 = arith.constant 0 : index
    %222 = vector.load %arg4[%c74, %c0_81] : memref<208x32xf32, #tpu.memory_space<vmem>>, vector<1x32xf32>
    %223 = vector.broadcast %222 : vector<1x32xf32> to vector<64x32xf32>
    %224 = arith.addf %221, %223 : vector<64x32xf32>
    %c1 = arith.constant 1 : index
    %c0_82 = arith.constant 0 : index
    %c0_83 = arith.constant 0 : index
    %225 = vector.load %arg8[%c1, %c0_82, %c0_83] : memref<2x32x96xbf16, #tpu.memory_space<vmem>>, vector<1x32x96xbf16>
    %226 = vector.shape_cast %225 : vector<1x32x96xbf16> to vector<32x96xbf16>
    %c1_84 = arith.constant 1 : index
    %c0_85 = arith.constant 0 : index
    %c0_86 = arith.constant 0 : index
    %227 = vector.load %arg6[%c1_84, %c0_85, %c0_86] : memref<2x1x128xf32, #tpu.memory_space<vmem>>, vector<1x1x128xf32>
    %228 = vector.shape_cast %227 : vector<1x1x128xf32> to vector<1x128xf32>
    %229 = arith.truncf %224 : vector<64x32xf32> to vector<64x32xbf16>
    %230 = vector.extract_strided_slice %226 {offsets = [0, 0], sizes = [32, 32], strides = [1, 1]} : vector<32x96xbf16> to vector<32x32xbf16>
    %cst_87 = arith.constant dense<0.000000e+00> : vector<64x32xf32>
    %231 = tpu.matmul %229, %230, %cst_87 {dimension_numbers = #tpu.dot_dimension_numbers<[1], [0], [0], [1], [0, 0, 1, 1], [], []>} : vector<64x32xbf16>, vector<32x32xbf16>, vector<64x32xf32> -> vector<64x32xf32>
    %232 = vector.extract_strided_slice %228 {offsets = [0, 0], sizes = [1, 32], strides = [1, 1]} : vector<1x128xf32> to vector<1x32xf32>
    %233 = vector.broadcast %232 : vector<1x32xf32> to vector<64x32xf32>
    %234 = arith.addf %231, %233 : vector<64x32xf32>
    %235 = arith.truncf %202 : vector<8x32xf32> to vector<8x32xbf16>
    %236 = vector.extract_strided_slice %226 {offsets = [0, 32], sizes = [32, 64], strides = [1, 1]} : vector<32x96xbf16> to vector<32x64xbf16>
    %cst_88 = arith.constant dense<0.000000e+00> : vector<8x64xf32>
    %237 = tpu.matmul %235, %236, %cst_88 {dimension_numbers = #tpu.dot_dimension_numbers<[1], [0], [0], [1], [0, 0, 1, 1], [], []>} : vector<8x32xbf16>, vector<32x64xbf16>, vector<8x64xf32> -> vector<8x64xf32>
    %238 = vector.extract_strided_slice %228 {offsets = [0, 32], sizes = [1, 64], strides = [1, 1]} : vector<1x128xf32> to vector<1x64xf32>
    %239 = vector.broadcast %238 : vector<1x64xf32> to vector<8x64xf32>
    %240 = arith.addf %237, %239 : vector<8x64xf32>
    %241 = vector.extract_strided_slice %234 {offsets = [0, 0], sizes = [64, 4], strides = [1, 1]} : vector<64x32xf32> to vector<64x4xf32>
    %242 = vector.extract_strided_slice %240 {offsets = [0, 0], sizes = [8, 4], strides = [1, 1]} : vector<8x64xf32> to vector<8x4xf32>
    %243 = vector.extract_strided_slice %240 {offsets = [0, 32], sizes = [8, 4], strides = [1, 1]} : vector<8x64xf32> to vector<8x4xf32>
    %cst_89 = arith.constant dense<0.000000e+00> : vector<64x8xf32>
    %244 = tpu.matmul %241, %242, %cst_89 {dimension_numbers = #tpu.dot_dimension_numbers<[1], [1], [0], [0], [0, 0, 1, 0], [], []>} : vector<64x4xf32>, vector<8x4xf32>, vector<64x8xf32> -> vector<64x8xf32>
    %cst_90 = arith.constant 5.000000e-01 : f32
    %245 = vector.broadcast %cst_90 : f32 to vector<64x8xf32>
    %246 = arith.mulf %244, %245 : vector<64x8xf32>
    %cst_91 = arith.constant dense<0xFF800000> : vector<64xf32>
    %247 = vector.multi_reduction <maximumf>, %246, %cst_91 [1] : vector<64x8xf32> to vector<64xf32>
    %248 = vector.shape_cast %247 : vector<64xf32> to vector<64x1xf32>
    %249 = vector.broadcast %248 : vector<64x1xf32> to vector<64x8xf32>
    %250 = arith.subf %246, %249 : vector<64x8xf32>
    %251 = math.exp %250 : vector<64x8xf32>
    %cst_92 = arith.constant dense<0.000000e+00> : vector<64xf32>
    %252 = vector.multi_reduction <add>, %251, %cst_92 [1] : vector<64x8xf32> to vector<64xf32>
    %253 = vector.shape_cast %252 : vector<64xf32> to vector<64x1xf32>
    %254 = tpu.reciprocal %253 {approx = true} : vector<64x1xf32> -> vector<64x1xf32>
    %255 = vector.broadcast %254 : vector<64x1xf32> to vector<64x8xf32>
    %256 = arith.mulf %251, %255 : vector<64x8xf32>
    %cst_93 = arith.constant dense<0.000000e+00> : vector<64x4xf32>
    %257 = tpu.matmul %256, %243, %cst_93 {dimension_numbers = #tpu.dot_dimension_numbers<[1], [0], [0], [1], [0, 0, 1, 1], [], []>} : vector<64x8xf32>, vector<8x4xf32>, vector<64x4xf32> -> vector<64x4xf32>
    %258 = vector.extract_strided_slice %234 {offsets = [0, 4], sizes = [64, 4], strides = [1, 1]} : vector<64x32xf32> to vector<64x4xf32>
    %259 = vector.extract_strided_slice %240 {offsets = [0, 4], sizes = [8, 4], strides = [1, 1]} : vector<8x64xf32> to vector<8x4xf32>
    %260 = vector.extract_strided_slice %240 {offsets = [0, 36], sizes = [8, 4], strides = [1, 1]} : vector<8x64xf32> to vector<8x4xf32>
    %cst_94 = arith.constant dense<0.000000e+00> : vector<64x8xf32>
    %261 = tpu.matmul %258, %259, %cst_94 {dimension_numbers = #tpu.dot_dimension_numbers<[1], [1], [0], [0], [0, 0, 1, 0], [], []>} : vector<64x4xf32>, vector<8x4xf32>, vector<64x8xf32> -> vector<64x8xf32>
    %cst_95 = arith.constant 5.000000e-01 : f32
    %262 = vector.broadcast %cst_95 : f32 to vector<64x8xf32>
    %263 = arith.mulf %261, %262 : vector<64x8xf32>
    %cst_96 = arith.constant dense<0xFF800000> : vector<64xf32>
    %264 = vector.multi_reduction <maximumf>, %263, %cst_96 [1] : vector<64x8xf32> to vector<64xf32>
    %265 = vector.shape_cast %264 : vector<64xf32> to vector<64x1xf32>
    %266 = vector.broadcast %265 : vector<64x1xf32> to vector<64x8xf32>
    %267 = arith.subf %263, %266 : vector<64x8xf32>
    %268 = math.exp %267 : vector<64x8xf32>
    %cst_97 = arith.constant dense<0.000000e+00> : vector<64xf32>
    %269 = vector.multi_reduction <add>, %268, %cst_97 [1] : vector<64x8xf32> to vector<64xf32>
    %270 = vector.shape_cast %269 : vector<64xf32> to vector<64x1xf32>
    %271 = tpu.reciprocal %270 {approx = true} : vector<64x1xf32> -> vector<64x1xf32>
    %272 = vector.broadcast %271 : vector<64x1xf32> to vector<64x8xf32>
    %273 = arith.mulf %268, %272 : vector<64x8xf32>
    %cst_98 = arith.constant dense<0.000000e+00> : vector<64x4xf32>
    %274 = tpu.matmul %273, %260, %cst_98 {dimension_numbers = #tpu.dot_dimension_numbers<[1], [0], [0], [1], [0, 0, 1, 1], [], []>} : vector<64x8xf32>, vector<8x4xf32>, vector<64x4xf32> -> vector<64x4xf32>
    %275 = vector.extract_strided_slice %234 {offsets = [0, 8], sizes = [64, 4], strides = [1, 1]} : vector<64x32xf32> to vector<64x4xf32>
    %276 = vector.extract_strided_slice %240 {offsets = [0, 8], sizes = [8, 4], strides = [1, 1]} : vector<8x64xf32> to vector<8x4xf32>
    %277 = vector.extract_strided_slice %240 {offsets = [0, 40], sizes = [8, 4], strides = [1, 1]} : vector<8x64xf32> to vector<8x4xf32>
    %cst_99 = arith.constant dense<0.000000e+00> : vector<64x8xf32>
    %278 = tpu.matmul %275, %276, %cst_99 {dimension_numbers = #tpu.dot_dimension_numbers<[1], [1], [0], [0], [0, 0, 1, 0], [], []>} : vector<64x4xf32>, vector<8x4xf32>, vector<64x8xf32> -> vector<64x8xf32>
    %cst_100 = arith.constant 5.000000e-01 : f32
    %279 = vector.broadcast %cst_100 : f32 to vector<64x8xf32>
    %280 = arith.mulf %278, %279 : vector<64x8xf32>
    %cst_101 = arith.constant dense<0xFF800000> : vector<64xf32>
    %281 = vector.multi_reduction <maximumf>, %280, %cst_101 [1] : vector<64x8xf32> to vector<64xf32>
    %282 = vector.shape_cast %281 : vector<64xf32> to vector<64x1xf32>
    %283 = vector.broadcast %282 : vector<64x1xf32> to vector<64x8xf32>
    %284 = arith.subf %280, %283 : vector<64x8xf32>
    %285 = math.exp %284 : vector<64x8xf32>
    %cst_102 = arith.constant dense<0.000000e+00> : vector<64xf32>
    %286 = vector.multi_reduction <add>, %285, %cst_102 [1] : vector<64x8xf32> to vector<64xf32>
    %287 = vector.shape_cast %286 : vector<64xf32> to vector<64x1xf32>
    %288 = tpu.reciprocal %287 {approx = true} : vector<64x1xf32> -> vector<64x1xf32>
    %289 = vector.broadcast %288 : vector<64x1xf32> to vector<64x8xf32>
    %290 = arith.mulf %285, %289 : vector<64x8xf32>
    %cst_103 = arith.constant dense<0.000000e+00> : vector<64x4xf32>
    %291 = tpu.matmul %290, %277, %cst_103 {dimension_numbers = #tpu.dot_dimension_numbers<[1], [0], [0], [1], [0, 0, 1, 1], [], []>} : vector<64x8xf32>, vector<8x4xf32>, vector<64x4xf32> -> vector<64x4xf32>
    %292 = vector.extract_strided_slice %234 {offsets = [0, 12], sizes = [64, 4], strides = [1, 1]} : vector<64x32xf32> to vector<64x4xf32>
    %293 = vector.extract_strided_slice %240 {offsets = [0, 12], sizes = [8, 4], strides = [1, 1]} : vector<8x64xf32> to vector<8x4xf32>
    %294 = vector.extract_strided_slice %240 {offsets = [0, 44], sizes = [8, 4], strides = [1, 1]} : vector<8x64xf32> to vector<8x4xf32>
    %cst_104 = arith.constant dense<0.000000e+00> : vector<64x8xf32>
    %295 = tpu.matmul %292, %293, %cst_104 {dimension_numbers = #tpu.dot_dimension_numbers<[1], [1], [0], [0], [0, 0, 1, 0], [], []>} : vector<64x4xf32>, vector<8x4xf32>, vector<64x8xf32> -> vector<64x8xf32>
    %cst_105 = arith.constant 5.000000e-01 : f32
    %296 = vector.broadcast %cst_105 : f32 to vector<64x8xf32>
    %297 = arith.mulf %295, %296 : vector<64x8xf32>
    %cst_106 = arith.constant dense<0xFF800000> : vector<64xf32>
    %298 = vector.multi_reduction <maximumf>, %297, %cst_106 [1] : vector<64x8xf32> to vector<64xf32>
    %299 = vector.shape_cast %298 : vector<64xf32> to vector<64x1xf32>
    %300 = vector.broadcast %299 : vector<64x1xf32> to vector<64x8xf32>
    %301 = arith.subf %297, %300 : vector<64x8xf32>
    %302 = math.exp %301 : vector<64x8xf32>
    %cst_107 = arith.constant dense<0.000000e+00> : vector<64xf32>
    %303 = vector.multi_reduction <add>, %302, %cst_107 [1] : vector<64x8xf32> to vector<64xf32>
    %304 = vector.shape_cast %303 : vector<64xf32> to vector<64x1xf32>
    %305 = tpu.reciprocal %304 {approx = true} : vector<64x1xf32> -> vector<64x1xf32>
    %306 = vector.broadcast %305 : vector<64x1xf32> to vector<64x8xf32>
    %307 = arith.mulf %302, %306 : vector<64x8xf32>
    %cst_108 = arith.constant dense<0.000000e+00> : vector<64x4xf32>
    %308 = tpu.matmul %307, %294, %cst_108 {dimension_numbers = #tpu.dot_dimension_numbers<[1], [0], [0], [1], [0, 0, 1, 1], [], []>} : vector<64x8xf32>, vector<8x4xf32>, vector<64x4xf32> -> vector<64x4xf32>
    %309 = vector.extract_strided_slice %234 {offsets = [0, 16], sizes = [64, 4], strides = [1, 1]} : vector<64x32xf32> to vector<64x4xf32>
    %310 = vector.extract_strided_slice %240 {offsets = [0, 16], sizes = [8, 4], strides = [1, 1]} : vector<8x64xf32> to vector<8x4xf32>
    %311 = vector.extract_strided_slice %240 {offsets = [0, 48], sizes = [8, 4], strides = [1, 1]} : vector<8x64xf32> to vector<8x4xf32>
    %cst_109 = arith.constant dense<0.000000e+00> : vector<64x8xf32>
    %312 = tpu.matmul %309, %310, %cst_109 {dimension_numbers = #tpu.dot_dimension_numbers<[1], [1], [0], [0], [0, 0, 1, 0], [], []>} : vector<64x4xf32>, vector<8x4xf32>, vector<64x8xf32> -> vector<64x8xf32>
    %cst_110 = arith.constant 5.000000e-01 : f32
    %313 = vector.broadcast %cst_110 : f32 to vector<64x8xf32>
    %314 = arith.mulf %312, %313 : vector<64x8xf32>
    %cst_111 = arith.constant dense<0xFF800000> : vector<64xf32>
    %315 = vector.multi_reduction <maximumf>, %314, %cst_111 [1] : vector<64x8xf32> to vector<64xf32>
    %316 = vector.shape_cast %315 : vector<64xf32> to vector<64x1xf32>
    %317 = vector.broadcast %316 : vector<64x1xf32> to vector<64x8xf32>
    %318 = arith.subf %314, %317 : vector<64x8xf32>
    %319 = math.exp %318 : vector<64x8xf32>
    %cst_112 = arith.constant dense<0.000000e+00> : vector<64xf32>
    %320 = vector.multi_reduction <add>, %319, %cst_112 [1] : vector<64x8xf32> to vector<64xf32>
    %321 = vector.shape_cast %320 : vector<64xf32> to vector<64x1xf32>
    %322 = tpu.reciprocal %321 {approx = true} : vector<64x1xf32> -> vector<64x1xf32>
    %323 = vector.broadcast %322 : vector<64x1xf32> to vector<64x8xf32>
    %324 = arith.mulf %319, %323 : vector<64x8xf32>
    %cst_113 = arith.constant dense<0.000000e+00> : vector<64x4xf32>
    %325 = tpu.matmul %324, %311, %cst_113 {dimension_numbers = #tpu.dot_dimension_numbers<[1], [0], [0], [1], [0, 0, 1, 1], [], []>} : vector<64x8xf32>, vector<8x4xf32>, vector<64x4xf32> -> vector<64x4xf32>
    %326 = vector.extract_strided_slice %234 {offsets = [0, 20], sizes = [64, 4], strides = [1, 1]} : vector<64x32xf32> to vector<64x4xf32>
    %327 = vector.extract_strided_slice %240 {offsets = [0, 20], sizes = [8, 4], strides = [1, 1]} : vector<8x64xf32> to vector<8x4xf32>
    %328 = vector.extract_strided_slice %240 {offsets = [0, 52], sizes = [8, 4], strides = [1, 1]} : vector<8x64xf32> to vector<8x4xf32>
    %cst_114 = arith.constant dense<0.000000e+00> : vector<64x8xf32>
    %329 = tpu.matmul %326, %327, %cst_114 {dimension_numbers = #tpu.dot_dimension_numbers<[1], [1], [0], [0], [0, 0, 1, 0], [], []>} : vector<64x4xf32>, vector<8x4xf32>, vector<64x8xf32> -> vector<64x8xf32>
    %cst_115 = arith.constant 5.000000e-01 : f32
    %330 = vector.broadcast %cst_115 : f32 to vector<64x8xf32>
    %331 = arith.mulf %329, %330 : vector<64x8xf32>
    %cst_116 = arith.constant dense<0xFF800000> : vector<64xf32>
    %332 = vector.multi_reduction <maximumf>, %331, %cst_116 [1] : vector<64x8xf32> to vector<64xf32>
    %333 = vector.shape_cast %332 : vector<64xf32> to vector<64x1xf32>
    %334 = vector.broadcast %333 : vector<64x1xf32> to vector<64x8xf32>
    %335 = arith.subf %331, %334 : vector<64x8xf32>
    %336 = math.exp %335 : vector<64x8xf32>
    %cst_117 = arith.constant dense<0.000000e+00> : vector<64xf32>
    %337 = vector.multi_reduction <add>, %336, %cst_117 [1] : vector<64x8xf32> to vector<64xf32>
    %338 = vector.shape_cast %337 : vector<64xf32> to vector<64x1xf32>
    %339 = tpu.reciprocal %338 {approx = true} : vector<64x1xf32> -> vector<64x1xf32>
    %340 = vector.broadcast %339 : vector<64x1xf32> to vector<64x8xf32>
    %341 = arith.mulf %336, %340 : vector<64x8xf32>
    %cst_118 = arith.constant dense<0.000000e+00> : vector<64x4xf32>
    %342 = tpu.matmul %341, %328, %cst_118 {dimension_numbers = #tpu.dot_dimension_numbers<[1], [0], [0], [1], [0, 0, 1, 1], [], []>} : vector<64x8xf32>, vector<8x4xf32>, vector<64x4xf32> -> vector<64x4xf32>
    %343 = vector.extract_strided_slice %234 {offsets = [0, 24], sizes = [64, 4], strides = [1, 1]} : vector<64x32xf32> to vector<64x4xf32>
    %344 = vector.extract_strided_slice %240 {offsets = [0, 24], sizes = [8, 4], strides = [1, 1]} : vector<8x64xf32> to vector<8x4xf32>
    %345 = vector.extract_strided_slice %240 {offsets = [0, 56], sizes = [8, 4], strides = [1, 1]} : vector<8x64xf32> to vector<8x4xf32>
    %cst_119 = arith.constant dense<0.000000e+00> : vector<64x8xf32>
    %346 = tpu.matmul %343, %344, %cst_119 {dimension_numbers = #tpu.dot_dimension_numbers<[1], [1], [0], [0], [0, 0, 1, 0], [], []>} : vector<64x4xf32>, vector<8x4xf32>, vector<64x8xf32> -> vector<64x8xf32>
    %cst_120 = arith.constant 5.000000e-01 : f32
    %347 = vector.broadcast %cst_120 : f32 to vector<64x8xf32>
    %348 = arith.mulf %346, %347 : vector<64x8xf32>
    %cst_121 = arith.constant dense<0xFF800000> : vector<64xf32>
    %349 = vector.multi_reduction <maximumf>, %348, %cst_121 [1] : vector<64x8xf32> to vector<64xf32>
    %350 = vector.shape_cast %349 : vector<64xf32> to vector<64x1xf32>
    %351 = vector.broadcast %350 : vector<64x1xf32> to vector<64x8xf32>
    %352 = arith.subf %348, %351 : vector<64x8xf32>
    %353 = math.exp %352 : vector<64x8xf32>
    %cst_122 = arith.constant dense<0.000000e+00> : vector<64xf32>
    %354 = vector.multi_reduction <add>, %353, %cst_122 [1] : vector<64x8xf32> to vector<64xf32>
    %355 = vector.shape_cast %354 : vector<64xf32> to vector<64x1xf32>
    %356 = tpu.reciprocal %355 {approx = true} : vector<64x1xf32> -> vector<64x1xf32>
    %357 = vector.broadcast %356 : vector<64x1xf32> to vector<64x8xf32>
    %358 = arith.mulf %353, %357 : vector<64x8xf32>
    %cst_123 = arith.constant dense<0.000000e+00> : vector<64x4xf32>
    %359 = tpu.matmul %358, %345, %cst_123 {dimension_numbers = #tpu.dot_dimension_numbers<[1], [0], [0], [1], [0, 0, 1, 1], [], []>} : vector<64x8xf32>, vector<8x4xf32>, vector<64x4xf32> -> vector<64x4xf32>
    %360 = vector.extract_strided_slice %234 {offsets = [0, 28], sizes = [64, 4], strides = [1, 1]} : vector<64x32xf32> to vector<64x4xf32>
    %361 = vector.extract_strided_slice %240 {offsets = [0, 28], sizes = [8, 4], strides = [1, 1]} : vector<8x64xf32> to vector<8x4xf32>
    %362 = vector.extract_strided_slice %240 {offsets = [0, 60], sizes = [8, 4], strides = [1, 1]} : vector<8x64xf32> to vector<8x4xf32>
    %cst_124 = arith.constant dense<0.000000e+00> : vector<64x8xf32>
    %363 = tpu.matmul %360, %361, %cst_124 {dimension_numbers = #tpu.dot_dimension_numbers<[1], [1], [0], [0], [0, 0, 1, 0], [], []>} : vector<64x4xf32>, vector<8x4xf32>, vector<64x8xf32> -> vector<64x8xf32>
    %cst_125 = arith.constant 5.000000e-01 : f32
    %364 = vector.broadcast %cst_125 : f32 to vector<64x8xf32>
    %365 = arith.mulf %363, %364 : vector<64x8xf32>
    %cst_126 = arith.constant dense<0xFF800000> : vector<64xf32>
    %366 = vector.multi_reduction <maximumf>, %365, %cst_126 [1] : vector<64x8xf32> to vector<64xf32>
    %367 = vector.shape_cast %366 : vector<64xf32> to vector<64x1xf32>
    %368 = vector.broadcast %367 : vector<64x1xf32> to vector<64x8xf32>
    %369 = arith.subf %365, %368 : vector<64x8xf32>
    %370 = math.exp %369 : vector<64x8xf32>
    %cst_127 = arith.constant dense<0.000000e+00> : vector<64xf32>
    %371 = vector.multi_reduction <add>, %370, %cst_127 [1] : vector<64x8xf32> to vector<64xf32>
    %372 = vector.shape_cast %371 : vector<64xf32> to vector<64x1xf32>
    %373 = tpu.reciprocal %372 {approx = true} : vector<64x1xf32> -> vector<64x1xf32>
    %374 = vector.broadcast %373 : vector<64x1xf32> to vector<64x8xf32>
    %375 = arith.mulf %370, %374 : vector<64x8xf32>
    %cst_128 = arith.constant dense<0.000000e+00> : vector<64x4xf32>
    %376 = tpu.matmul %375, %362, %cst_128 {dimension_numbers = #tpu.dot_dimension_numbers<[1], [0], [0], [1], [0, 0, 1, 1], [], []>} : vector<64x8xf32>, vector<8x4xf32>, vector<64x4xf32> -> vector<64x4xf32>
    %377 = tpu.concatenate %257, %274, %291, %308, %325, %342, %359, %376 in 1 : vector<64x4xf32>, vector<64x4xf32>, vector<64x4xf32>, vector<64x4xf32>, vector<64x4xf32>, vector<64x4xf32>, vector<64x4xf32>, vector<64x4xf32> -> vector<64x32xf32>
    %c32 = arith.constant 32 : index
    %c0_129 = arith.constant 0 : index
    %378 = vector.load %arg9[%c32, %c0_129] : memref<640x32xbf16, #tpu.memory_space<vmem>>, vector<32x32xbf16>
    %379 = arith.truncf %377 : vector<64x32xf32> to vector<64x32xbf16>
    %cst_130 = arith.constant dense<0.000000e+00> : vector<64x32xf32>
    %380 = tpu.matmul %379, %378, %cst_130 {dimension_numbers = #tpu.dot_dimension_numbers<[1], [0], [0], [1], [0, 0, 1, 1], [], []>} : vector<64x32xbf16>, vector<32x32xbf16>, vector<64x32xf32> -> vector<64x32xf32>
    %381 = vector.extract_strided_slice %228 {offsets = [0, 96], sizes = [1, 32], strides = [1, 1]} : vector<1x128xf32> to vector<1x32xf32>
    %382 = vector.broadcast %381 : vector<1x32xf32> to vector<64x32xf32>
    %383 = arith.addf %380, %382 : vector<64x32xf32>
    %384 = arith.addf %196, %383 : vector<64x32xf32>
    %cst_131 = arith.constant dense<0.000000e+00> : vector<64xf32>
    %385 = vector.multi_reduction <add>, %384, %cst_131 [1] : vector<64x32xf32> to vector<64xf32>
    %386 = vector.shape_cast %385 : vector<64xf32> to vector<64x1xf32>
    %cst_132 = arith.constant 3.200000e+01 : f32
    %387 = vector.broadcast %cst_132 : f32 to vector<64x1xf32>
    %388 = arith.divf %386, %387 : vector<64x1xf32>
    %389 = vector.broadcast %388 : vector<64x1xf32> to vector<64x32xf32>
    %390 = arith.subf %384, %389 : vector<64x32xf32>
    %391 = arith.mulf %390, %390 : vector<64x32xf32>
    %cst_133 = arith.constant dense<0.000000e+00> : vector<64xf32>
    %392 = vector.multi_reduction <add>, %391, %cst_133 [1] : vector<64x32xf32> to vector<64xf32>
    %393 = vector.shape_cast %392 : vector<64xf32> to vector<64x1xf32>
    %cst_134 = arith.constant 3.200000e+01 : f32
    %394 = vector.broadcast %cst_134 : f32 to vector<64x1xf32>
    %395 = arith.divf %393, %394 : vector<64x1xf32>
    %cst_135 = arith.constant 9.99999974E-6 : f32
    %396 = vector.broadcast %cst_135 : f32 to vector<64x1xf32>
    %397 = arith.addf %395, %396 : vector<64x1xf32>
    %398 = math.rsqrt %397 : vector<64x1xf32>
    %399 = vector.broadcast %398 : vector<64x1xf32> to vector<64x32xf32>
    %400 = arith.mulf %390, %399 : vector<64x32xf32>
    %c72 = arith.constant 72 : index
    %c0_136 = arith.constant 0 : index
    %401 = vector.load %arg4[%c72, %c0_136] : memref<208x32xf32, #tpu.memory_space<vmem>>, vector<1x32xf32>
    %402 = vector.broadcast %401 : vector<1x32xf32> to vector<64x32xf32>
    %403 = arith.mulf %400, %402 : vector<64x32xf32>
    %c75 = arith.constant 75 : index
    %c0_137 = arith.constant 0 : index
    %404 = vector.load %arg4[%c75, %c0_137] : memref<208x32xf32, #tpu.memory_space<vmem>>, vector<1x32xf32>
    %405 = vector.broadcast %404 : vector<1x32xf32> to vector<64x32xf32>
    %406 = arith.addf %403, %405 : vector<64x32xf32>
    %c0_138 = arith.constant 0 : index
    %c0_139 = arith.constant 0 : index
    %407 = vector.load %arg5[%c0_138, %c0_139] : memref<96x4xf32, #tpu.memory_space<vmem>>, vector<32x4xf32>
    %cst_140 = arith.constant dense<0.000000e+00> : vector<64x4xf32>
    %408 = tpu.matmul %406, %407, %cst_140 {dimension_numbers = #tpu.dot_dimension_numbers<[1], [0], [0], [1], [0, 0, 1, 1], [], []>} : vector<64x32xf32>, vector<32x4xf32>, vector<64x4xf32> -> vector<64x4xf32>
    %c32_141 = arith.constant 32 : index
    %c0_142 = arith.constant 0 : index
    %409 = vector.load %arg5[%c32_141, %c0_142] : memref<96x4xf32, #tpu.memory_space<vmem>>, vector<64x4xf32>
    %cst_143 = arith.constant dense<0.000000e+00> : vector<1x4xf32>
    %410 = tpu.matmul %3, %409, %cst_143 {dimension_numbers = #tpu.dot_dimension_numbers<[1], [0], [0], [1], [0, 0, 1, 1], [], []>} : vector<1x64xf32>, vector<64x4xf32>, vector<1x4xf32> -> vector<1x4xf32>
    %411 = vector.broadcast %410 : vector<1x4xf32> to vector<64x4xf32>
    %412 = arith.addf %408, %411 : vector<64x4xf32>
    %cst_144 = arith.constant 2.500000e-01 : f32
    %413 = vector.broadcast %cst_144 : f32 to vector<64x4xf32>
    %414 = arith.mulf %412, %413 : vector<64x4xf32>
    %cst_145 = arith.constant -2.000000e+01 : f32
    %cst_146 = arith.constant 2.000000e+01 : f32
    %415 = vector.broadcast %cst_145 : f32 to vector<64x4xf32>
    %416 = arith.maximumf %415, %414 : vector<64x4xf32>
    %417 = vector.broadcast %cst_146 : f32 to vector<64x4xf32>
    %418 = arith.minimumf %417, %416 : vector<64x4xf32>
    %419 = tpu.iota {dimensions = array<i32: 1>} : vector<64x4xi32>
    %cst_147 = arith.constant dense<0xFF800000> : vector<64xf32>
    %420 = vector.multi_reduction <maximumf>, %418, %cst_147 [1] : vector<64x4xf32> to vector<64xf32>
    %421 = vector.shape_cast %420 : vector<64xf32> to vector<64x1xf32>
    %422 = vector.broadcast %421 : vector<64x1xf32> to vector<64x4xf32>
    %423 = arith.cmpf oge, %418, %422 : vector<64x4xf32>
    %c4_i32 = arith.constant 4 : i32
    %424 = vector.broadcast %c4_i32 : i32 to vector<64x4xi32>
    %425 = arith.select %423, %419, %424 : vector<64x4xi1>, vector<64x4xi32>
    %cst_148 = arith.constant dense<2147483647> : vector<64xi32>
    %426 = vector.multi_reduction <minsi>, %425, %cst_148 [1] : vector<64x4xi32> to vector<64xi32>
    %427 = vector.shape_cast %426 : vector<64xi32> to vector<64x1xi32>
    %428 = vector.broadcast %427 : vector<64x1xi32> to vector<64x4xi32>
    %429 = arith.cmpi eq, %419, %428 : vector<64x4xi32>
    %430 = arith.extui %429 : vector<64x4xi1> to vector<64x4xi32>
    %431 = arith.sitofp %430 : vector<64x4xi32> to vector<64x4xf32>
    %c0_149 = arith.constant 0 : index
    %c0_150 = arith.constant 0 : index
    %c0_151 = arith.constant 0 : index
    %432 = vector.load %arg12[%c0_149, %c0_150, %c0_151] : memref<1x64x4xf32, #tpu.memory_space<vmem>>, vector<1x64x4xf32>
    %433 = vector.shape_cast %432 : vector<1x64x4xf32> to vector<64x4xf32>
    %434 = vector.shape_cast %431 : vector<64x4xf32> to vector<1x64x4xf32>
    tpu.vector_store %arg12[%c0_149, %c0_150, %c0_151], %434 {strides = array<i32>} : memref<1x64x4xf32, #tpu.memory_space<vmem>>, vector<1x64x4xf32>,
    %435 = arith.truncf %406 : vector<64x32xf32> to vector<64x32xbf16>
    %c0_152 = arith.constant 0 : index
    %c0_153 = arith.constant 0 : index
    %436 = vector.load %arg10[%c0_152, %c0_153] : memref<32x512xbf16, #tpu.memory_space<vmem>>, vector<32x512xbf16>
    %cst_154 = arith.constant dense<0.000000e+00> : vector<64x512xf32>
    %437 = tpu.matmul %435, %436, %cst_154 {dimension_numbers = #tpu.dot_dimension_numbers<[1], [0], [0], [1], [0, 0, 1, 1], [], []>} : vector<64x32xbf16>, vector<32x512xbf16>, vector<64x512xf32> -> vector<64x512xf32>
    %c0_155 = arith.constant 0 : index
    %c0_156 = arith.constant 0 : index
    %438 = vector.load %arg7[%c0_155, %c0_156] : memref<1x512xf32, #tpu.memory_space<vmem>>, vector<1x512xf32>
    %439 = vector.broadcast %438 : vector<1x512xf32> to vector<64x512xf32>
    %440 = arith.addf %437, %439 : vector<64x512xf32>
    %cst_157 = arith.constant 5.000000e-01 : f32
    %441 = vector.broadcast %cst_157 : f32 to vector<64x512xf32>
    %442 = arith.mulf %441, %440 : vector<64x512xf32>
    %cst_158 = arith.constant 4.471500e-02 : f32
    %443 = vector.broadcast %cst_158 : f32 to vector<64x512xf32>
    %444 = arith.mulf %443, %440 : vector<64x512xf32>
    %445 = arith.mulf %444, %440 : vector<64x512xf32>
    %446 = arith.mulf %445, %440 : vector<64x512xf32>
    %447 = arith.addf %440, %446 : vector<64x512xf32>
    %cst_159 = arith.constant 0.797884583 : f32
    %448 = vector.broadcast %cst_159 : f32 to vector<64x512xf32>
    %449 = arith.mulf %448, %447 : vector<64x512xf32>
    %450 = math.tanh %449 : vector<64x512xf32>
    %cst_160 = arith.constant 1.000000e+00 : f32
    %451 = vector.broadcast %cst_160 : f32 to vector<64x512xf32>
    %452 = arith.addf %451, %450 : vector<64x512xf32>
    %453 = arith.mulf %442, %452 : vector<64x512xf32>
    %454 = tpu.iota {dimensions = array<i32: 1>} : vector<64x512xi32>
    %c128_i32 = arith.constant 128 : i32
    %455 = vector.broadcast %c128_i32 : i32 to vector<64x1xi32>
    %456 = arith.muli %427, %455 : vector<64x1xi32>
    %457 = vector.broadcast %456 : vector<64x1xi32> to vector<64x512xi32>
    %458 = arith.cmpi sge, %454, %457 : vector<64x512xi32>
    %c128_i32_161 = arith.constant 128 : i32
    %459 = vector.broadcast %c128_i32_161 : i32 to vector<64x1xi32>
    %460 = arith.addi %456, %459 : vector<64x1xi32>
    %461 = vector.broadcast %460 : vector<64x1xi32> to vector<64x512xi32>
    %462 = arith.cmpi slt, %454, %461 : vector<64x512xi32>
    %463 = arith.andi %458, %462 : vector<64x512xi1>
    %464 = arith.extui %463 : vector<64x512xi1> to vector<64x512xi32>
    %465 = arith.sitofp %464 : vector<64x512xi32> to vector<64x512xf32>
    %466 = arith.mulf %453, %465 : vector<64x512xf32>
    %467 = arith.truncf %466 : vector<64x512xf32> to vector<64x512xbf16>
    %c128 = arith.constant 128 : index
    %c0_162 = arith.constant 0 : index
    %468 = vector.load %arg9[%c128, %c0_162] : memref<640x32xbf16, #tpu.memory_space<vmem>>, vector<512x32xbf16>
    %cst_163 = arith.constant dense<0.000000e+00> : vector<64x32xf32>
    %469 = tpu.matmul %467, %468, %cst_163 {dimension_numbers = #tpu.dot_dimension_numbers<[1], [0], [0], [1], [0, 0, 1, 1], [], []>} : vector<64x512xbf16>, vector<512x32xbf16>, vector<64x32xf32> -> vector<64x32xf32>
    %c64_164 = arith.constant 64 : index
    %c0_165 = arith.constant 0 : index
    %470 = vector.load %arg4[%c64_164, %c0_165] : memref<208x32xf32, #tpu.memory_space<vmem>>, vector<4x32xf32>
    %cst_166 = arith.constant dense<0.000000e+00> : vector<64x32xf32>
    %471 = tpu.matmul %431, %470, %cst_166 {dimension_numbers = #tpu.dot_dimension_numbers<[1], [0], [0], [1], [0, 0, 1, 1], [], []>} : vector<64x4xf32>, vector<4x32xf32>, vector<64x32xf32> -> vector<64x32xf32>
    %472 = arith.addf %469, %471 : vector<64x32xf32>
    %473 = arith.addf %384, %472 : vector<64x32xf32>
    %c144 = arith.constant 144 : index
    %c0_167 = arith.constant 0 : index
    %474 = vector.load %arg4[%c144, %c0_167] : memref<208x32xf32, #tpu.memory_space<vmem>>, vector<64x32xf32>
    %cst_168 = arith.constant dense<0.000000e+00> : vector<1x32xf32>
    %475 = tpu.matmul %3, %474, %cst_168 {dimension_numbers = #tpu.dot_dimension_numbers<[1], [0], [0], [1], [0, 0, 1, 1], [], []>} : vector<1x64xf32>, vector<64x32xf32>, vector<1x32xf32> -> vector<1x32xf32>
    %c69 = arith.constant 69 : index
    %c0_169 = arith.constant 0 : index
    %476 = vector.load %arg4[%c69, %c0_169] : memref<208x32xf32, #tpu.memory_space<vmem>>, vector<1x32xf32>
    %477 = arith.addf %475, %476 : vector<1x32xf32>
    %c32_170 = arith.constant 32 : index
    %c0_171 = arith.constant 0 : index
    %478 = vector.load %arg4[%c32_170, %c0_171] : memref<208x32xf32, #tpu.memory_space<vmem>>, vector<32x32xf32>
    %479 = vector.broadcast %477 : vector<1x32xf32> to vector<32x32xf32>
    %480 = arith.mulf %478, %479 : vector<32x32xf32>
    %481 = arith.mulf %480, %480 : vector<32x32xf32>
    %cst_172 = arith.constant dense<0.000000e+00> : vector<32xf32>
    %482 = vector.multi_reduction <add>, %481, %cst_172 [1] : vector<32x32xf32> to vector<32xf32>
    %483 = vector.shape_cast %482 : vector<32xf32> to vector<32x1xf32>
    %cst_173 = arith.constant 9.99999993E-9 : f32
    %484 = vector.broadcast %cst_173 : f32 to vector<32x1xf32>
    %485 = arith.addf %483, %484 : vector<32x1xf32>
    %486 = math.rsqrt %485 : vector<32x1xf32>
    %487 = vector.broadcast %486 : vector<32x1xf32> to vector<32x32xf32>
    %488 = arith.mulf %480, %487 : vector<32x32xf32>
    %cst_174 = arith.constant dense<0.000000e+00> : vector<64x32xf32>
    %489 = tpu.matmul %473, %488, %cst_174 {dimension_numbers = #tpu.dot_dimension_numbers<[1], [1], [0], [0], [0, 0, 1, 0], [], []>} : vector<64x32xf32>, vector<32x32xf32>, vector<64x32xf32> -> vector<64x32xf32>
    %c0_175 = arith.constant 0 : index
    %c0_176 = arith.constant 0 : index
    %c0_177 = arith.constant 0 : index
    %490 = vector.load %arg11[%c0_175, %c0_176, %c0_177] : memref<1x64x32xf32, #tpu.memory_space<vmem>>, vector<1x64x32xf32>
    %491 = vector.shape_cast %490 : vector<1x64x32xf32> to vector<64x32xf32>
    %492 = vector.shape_cast %489 : vector<64x32xf32> to vector<1x64x32xf32>
    tpu.vector_store %arg11[%c0_175, %c0_176, %c0_177], %492 {strides = array<i32>} : memref<1x64x32xf32, #tpu.memory_space<vmem>>, vector<1x64x32xf32>,
    return
  }
  func.func @transform_0(%arg0: i32) -> (i32, i32, i32) {
    %c0_i32 = arith.constant 0 : i32
    %c0_i32_0 = arith.constant 0 : i32
    %c0_i32_1 = arith.constant 0 : i32
    return %arg0, %c0_i32, %c0_i32_0 : i32, i32, i32
  }
  func.func @transform_1(%arg0: i32) -> (i32, i32, i32) {
    %c0_i32 = arith.constant 0 : i32
    %c0_i32_0 = arith.constant 0 : i32
    %c0_i32_1 = arith.constant 0 : i32
    return %arg0, %c0_i32, %c0_i32_0 : i32, i32, i32
  }
  func.func @transform_2(%arg0: i32) -> (i32, i32, i32) {
    %c0_i32 = arith.constant 0 : i32
    %c0_i32_0 = arith.constant 0 : i32
    %c0_i32_1 = arith.constant 0 : i32
    return %arg0, %c0_i32, %c0_i32_0 : i32, i32, i32
  }
  func.func @transform_3(%arg0: i32) -> (i32, i32) {
    %c0_i32 = arith.constant 0 : i32
    %c0_i32_0 = arith.constant 0 : i32
    %c0_i32_1 = arith.constant 0 : i32
    return %c0_i32, %c0_i32_0 : i32, i32
  }
  func.func @transform_4(%arg0: i32) -> (i32, i32) {
    %c0_i32 = arith.constant 0 : i32
    %c0_i32_0 = arith.constant 0 : i32
    %c0_i32_1 = arith.constant 0 : i32
    return %c0_i32, %c0_i32_0 : i32, i32
  }
  func.func @transform_5(%arg0: i32) -> (i32, i32, i32) {
    %c0_i32 = arith.constant 0 : i32
    %c0_i32_0 = arith.constant 0 : i32
    %c0_i32_1 = arith.constant 0 : i32
    %c0_i32_2 = arith.constant 0 : i32
    return %c0_i32, %c0_i32_0, %c0_i32_1 : i32, i32, i32
  }
  func.func @transform_6(%arg0: i32) -> (i32, i32) {
    %c0_i32 = arith.constant 0 : i32
    %c0_i32_0 = arith.constant 0 : i32
    %c0_i32_1 = arith.constant 0 : i32
    return %c0_i32, %c0_i32_0 : i32, i32
  }
  func.func @transform_7(%arg0: i32) -> (i32, i32, i32) {
    %c0_i32 = arith.constant 0 : i32
    %c0_i32_0 = arith.constant 0 : i32
    %c0_i32_1 = arith.constant 0 : i32
    %c0_i32_2 = arith.constant 0 : i32
    return %c0_i32, %c0_i32_0, %c0_i32_1 : i32, i32, i32
  }
  func.func @transform_8(%arg0: i32) -> (i32, i32) {
    %c0_i32 = arith.constant 0 : i32
    %c0_i32_0 = arith.constant 0 : i32
    %c0_i32_1 = arith.constant 0 : i32
    return %c0_i32, %c0_i32_0 : i32, i32
  }
  func.func @transform_9(%arg0: i32) -> (i32, i32) {
    %c0_i32 = arith.constant 0 : i32
    %c0_i32_0 = arith.constant 0 : i32
    %c0_i32_1 = arith.constant 0 : i32
    return %c0_i32, %c0_i32_0 : i32, i32
  }
  func.func @transform_10(%arg0: i32) -> (i32, i32, i32) {
    %c0_i32 = arith.constant 0 : i32
    %c0_i32_0 = arith.constant 0 : i32
    %c0_i32_1 = arith.constant 0 : i32
    return %arg0, %c0_i32, %c0_i32_0 : i32, i32, i32
  }
  func.func @transform_11(%arg0: i32) -> (i32, i32, i32) {
    %c0_i32 = arith.constant 0 : i32
    %c0_i32_0 = arith.constant 0 : i32
    %c0_i32_1 = arith.constant 0 : i32
    return %arg0, %c0_i32, %c0_i32_0 : i32, i32, i32
  }
}

</mosaic_0001>

<bundles_post_ra>
// kernel: attention_block_forward.1
= control target key start
LH: loop header
LB: loop body
LE: loop exit
PB: predicated region body
PF: predicated region fallthrough
CT: control target
= control target key end

     0   :  { %s18888_s0 = inlined_call_operand.vmem [shape: f32[2,64,32], index: 0, kind: input, shape index: {}]   ;;  %s18889_s1 = inlined_call_operand.vmem [shape: f32[2,1,64], index: 1, kind: input, shape index: {}]   ;;  %s18890_s2 = inlined_call_operand.vmem [shape: f32[2,8,64], index: 2, kind: input, shape index: {}]   ;;  %s18891_s3 = inlined_call_operand.vmem [shape: f32[208,32], index: 3, kind: input, shape index: {}]   ;;  %s18892_s4 = inlined_call_operand.vmem [shape: f32[96,4], index: 4, kind: input, shape index: {}]   ;;  %s18893_s5 = inlined_call_operand.vmem [shape: f32[2,1,128], index: 5, kind: input, shape index: {}]   ;;  %s18894_s6 = inlined_call_operand.vmem [shape: f32[1,512], index: 6, kind: input, shape index: {}]   ;;  %s18895_s7 = inlined_call_operand.vmem [shape: bf16[2,32,96], index: 7, kind: input, shape index: {}]   ;;  %s18896_s8 = inlined_call_operand.vmem [shape: bf16[640,32], index: 8, kind: input, shape index: {}]   ;;  %s18897_s9 = inlined_call_operand.vmem [shape: bf16[32,512], index: 9, kind: input, shape index: {}]   ;;  %s18898_s10 = inlined_call_operand.hbm [shape: f32[2,64,32], index: 10, kind: output, shape index: {0}]   ;;  %s18899_s11 = inlined_call_operand.vmem [shape: f32[2,64,4], index: 11, kind: output, shape index: {1}]  }
   0x1   :  { %19043 = sst [smem:[#allocation38_spill]] %s18888_s0 }
   0x2   :  { %19044 = sst [smem:[#allocation39_spill]] %s18889_s1 }
   0x3   :  { %19045 = sst [smem:[#allocation40_spill]] %s18890_s2 }
   0x4   :  { %17 = vsyncpa [#allocation3], 0 }
   0x5   :  { %19 = vsyncpa [#allocation3 + $0x1], 0  ;;  %s14517_s17 = smov 0   ;;  %s14519_s18 = smov 0  }
   0x6   :  { %s14521_s19 = smov 0   ;;  %s14523_s20 = smov 0  }
   0x7 LB: > { %s14538_s21 = sadd.s32 4294967295, %s14418_s20   ;;  %s10608_s22 = sadd.s32 4294967294, %s14418_s20   ;;  %s14418_s20 = sphi %s14523_s20, %s19327_s20   ;;  %s14414_s19 = sphi %s14521_s19, %s19326_s19   ;;  %s14410_s18 = sphi %s14519_s18, %s19325_s18   ;;  %s14406_s17 = sphi %s14517_s17, %s19324_s17  }
   0x8   : > { %s14542_s23 = sadd.s32 1, %s14418_s20   ;;  %s257_s24 = sadd.s32 1, %s14414_s19 }
   0x9   : > { %s254_s25 = ssub.s32 %s14418_s20, %s14542_s23  ;;  %p267_p0 = scmp.ne.s32.totalorder %s14414_s19, %s14410_s18 }
   0xa   : > { %p255_p1 = scmp.eq.s32.totalorder %s254_s25, 0  ;;  %p268_p2 = scmp.eq.s32.totalorder %s14538_s21, 1 }
   0xb   : > { %p273_p3 = scmp.ne.s32.totalorder %s14410_s18, %s14406_s17  ;;  %p274_p4 = scmp.eq.s32.totalorder %s10608_s22, 1 }
   0xc   : > { %s14553_s26 = scalar_select %p255_p1, %s14414_s19, %s257_s24  }
   0xd   : > { %p14555_p5 = por %p268_p2, %p267_p0  ;;  %p14559_p6 = por %p274_p4, %p273_p3 }
   0xe   : > { %p10611_p7 = scmp.ge.s32.totalorder %s14418_s20, 1  ;;  %p360_p8 = scmp.lt.s32.totalorder %s14418_s20, 3 }
  0x10   : > { %p361_p9 = pnand %p10611_p7, %p360_p8 }
  0x12   : > { %364 = sbr.rel (%p361_p9) target bundleno = 10267 (0x281b), region = 60 }
  0x19   : > { %v440_v0 = vld [vmem:[%s18891_s3 + $0x50] sm:$0xff]  ;;  %v441_v1 = vld [vmem:[%s18891_s3 + $0x58] sm:$0xff]  ;;  %v442_v2 = vld [vmem:[%s18891_s3 + $0x60] sm:$0xff]  ;;  %v18901_v3 = vmov 0.0|0.0   ;;  %vm19042_vm0 = vmmov 0   ;;  %v18903_v6 = vmov 0.0   ;;  %v18900_v15 = vlaneseq }
  0x1a   : > { %12593 = vmatprep.subr.bf16.mxu0 %v18901_v3  ;;  %v12594_v4 = vpack.c.bf16 %v441_v1, %v440_v0  ;;  %v443_v5 = vld [vmem:[%s18891_s3 + $0x68] sm:$0xff]  ;;  %11738 = vmatprep.mubr.msk.f32.mxu0 %vm19042_vm0, %v18903_v6  ;;  %v444_v7 = vld [vmem:[%s18891_s3 + $0x70] sm:$0xff]  ;;  %v445_v8 = vld [vmem:[%s18891_s3 + $0x78] sm:$0xff]  ;;  %p412_p10 = scmp.lt.s32.totalorder %s14538_s21, 1  ;;  %s19048_s1 = sld [smem:[#allocation39_spill]]  ;;  %vm19041_vm1 = vcmask 523264  }
  0x1b   : > { %v12597_v9 = vpack.c.bf16 %v443_v5, %v442_v2  ;;  %v446_v10 = vld [vmem:[%s18891_s3 + $0x80] sm:$0xff]  ;;  %v12600_v11 = vpack.c.bf16 %v445_v8, %v444_v7  ;;  %v447_v12 = vld [vmem:[%s18891_s3 + $0x88] sm:$0xff]  ;;  %v14608_v16 = vshrl.u32 %v18900_v15, 7  ;;  %v525_v22 = vld [vmem:[%s18891_s3 + $0x10] sm:$0xff]  ;;  %vm19040_vm2 = vcmask 261120   ;;  %s19051_s0 = sld [smem:[#allocation38_spill]] }
  0x1c   : > { %12595 = vmatpush3.bf16.msra.mxu0 %v12594_v4  ;;  %s14592_s14 = scalar_select %p412_p10, %s14538_s21, 1  ;;  %v12603_v13 = vpack.c.bf16 %v447_v12, %v446_v10  ;;  %v448_v17 = vld [vmem:[%s18891_s3 + $0x44] sm:$0x1]  ;;  %v526_v24 = vld [vmem:[%s18891_s3 + $0x18] sm:$0xff]  ;;  %v524_v25 = vld [vmem:[%s18891_s3 + $0x8] sm:$0xff]  ;;  %v19052_v55 = vmov 0 }
  0x1d   : > { %12596 = vmatprep.subr.bf16.mxu0 %v18901_v3  ;;  %19049 = vst [vmem:[#allocation5_spill] sm:$0xff] %v14608_v16  ;;  %v14614_v18 = vsub.s32 0, %v14608_v16  ;;  %v523_v23 = vld [vmem:[%s18891_s3] sm:$0xff]  ;;  %vm14645_vm3 = vmpackc.low %vm19040_vm2, %vm19040_vm2  ;;  %vm964_vm4 = vcmask 31744   ;;  %s18970_s30 = smov 96   ;;  %s14424_s13 = smov 64  }
  0x1e   : > { %s18907_s12 = sshll.u32 %s14592_s14, 6  ;;  %v19053_v55 = vsel %vm14645_vm3, 4294967295, %v19052_v55  ;;  %vm14822_vm5 = vmpackc.low %vm964_vm4, %vm964_vm4  ;;  %s18924_s15 = smov 92   ;;  %vm4509_vm6 = vcmask 64512   ;;  %vm4518_vm7 = vcmask 97280   ;;  %vm4527_vm8 = vcmask 130048  }
  0x1f   : > { %19050 = vst [vmem:[#allocation6_spill] sm:$0xff] %v14614_v18  ;;  %19054 = vst [vmem:[#allocation7_spill] sm:$0xff] %v19053_v55  ;;  %s14427_s22 = smov 60   ;;  %s18920_s24 = smov 88   ;;  %vm4536_vm9 = vcmask 162816   ;;  %vm4545_vm10 = vcmask 195584  }
  0x20   : > { %12598 = vmatpush3.bf16.msra.mxu0 %v12597_v9  ;;  %s14602_s25 = scalar_lea.vmem %s19048_s1, %s14592_s14  ;;  %s18951_s29 = smov 120   ;;  %vm4554_vm11 = vcmask 228352  }
  0x21   : > { %12599 = vmatprep.subr.bf16.mxu0 %v18901_v3  ;;  %v438_v14 = vld [vmem:[%s14602_s25] sm:$0x1]  ;;  %s14639_s16 = scalar_lea.vmem %s19051_s0, %s18907_s12  ;;  %s14433_s12 = smov 52  }
  0x22   : > { %v430_v39 = vld [vmem:[%s14639_s16] sm:$0xff]  ;;  %v431_v59 = vld [vmem:[%s14639_s16 + $0x8] sm:$0xff]  ;;  %v432_v60 = vld [vmem:[%s14639_s16 + $0x10] sm:$0xff]  ;;  %s19132_s2 = sld [smem:[#allocation40_spill]]  ;;  %s19157_s0 = smov 100  }
  0x23   : > { %11749 = vmatprep.mubr.msk.f32.mxu1 %vm19040_vm2, %v430_v39  ;;  %v433_v61 = vld [vmem:[%s14639_s16 + $0x18] sm:$0xff]  ;;  %v434_v62 = vld [vmem:[%s14639_s16 + $0x20] sm:$0xff]  ;;  %v435_v63 = vld [vmem:[%s14639_s16 + $0x28] sm:$0xff] }
  0x24   : > { %12601 = vmatpush3.bf16.msra.mxu0 %v12600_v11  ;;  %v436_v0 = vld [vmem:[%s14639_s16 + $0x30] sm:$0xff]  ;;  %v437_v1 = vld [vmem:[%s14639_s16 + $0x38] sm:$0xff]  ;;  %s18968_s16 = smov 124  }
  0x25   : > { %12602 = vmatprep.subr.bf16.mxu0 %v18901_v3 }
  0x28   : > { %12604 = vmatpush3.bf16.msra.mxu0 %v12603_v13 }
  0x2b   : > { %11739 = vmatmul.mubr.msk.f32.vlgmr.msra.gmra.mrb[0].mxu0 %vm19041_vm1, %v438_v14 }
  0xfe   : > { %v519_v19 = vpop.f32.mrb[0].mxu0 }
  0xff   : > { %v520_v20 = vadd.f32 %v519_v19, %v448_v17  ;;  %v11740_v21 = vpop.f32.mrb[1].mxu0 }
 0x101   : > { %v530_v26 = vrot.slane %v520_v20, %v14614_v18 }
 0x103   : > { %v533_v27 = vmul.f32 %v530_v26, %v525_v22  ;;  %v531_v28 = vmul.f32 %v530_v26, %v523_v23  ;;  %v534_v29 = vmul.f32 %v530_v26, %v526_v24  ;;  %v532_v30 = vmul.f32 %v530_v26, %v524_v25 }
 0x105   : > { %v537_v31 = vmul.f32 %v533_v27, %v533_v27  ;;  %v535_v32 = vmul.f32 %v531_v28, %v531_v28  ;;  %v538_v35 = vmul.f32 %v534_v29, %v534_v29  ;;  %v536_v36 = vmul.f32 %v532_v30, %v532_v30 }
 0x107   : > { %v546_v33 = vsel %vm19040_vm2, %v537_v31, 0.0  ;;  %v540_v34 = vsel %vm19040_vm2, %v535_v32, 0.0  ;;  %v549_v37 = vsel %vm19040_vm2, %v538_v35, 0.0  ;;  %v543_v38 = vsel %vm19040_vm2, %v536_v36, 0.0 }
 0x108   : > { %547 = vadd.xlane.f32.xlu1 %v546_v33  ;;  %541 = vadd.xlane.f32.xlu0 %v540_v34 }
 0x10c   : > { %550 = vadd.xlane.f32.xlu1 %v549_v37  ;;  %544 = vadd.xlane.f32.xlu0 %v543_v38 }
 0x195   : > { %v548_v40 = vpop.xlane.xlu1 %547  ;;  %v542_v41 = vpop.xlane.xlu0 %541 }
 0x196   : > { %v554_v42 = vadd.f32 1e-08, %v548_v40  ;;  %v552_v43 = vadd.f32 1e-08, %v542_v41 }
 0x198   : > { %13712 = vrsqrt.f32 %v554_v42 }
 0x199   : > { %v551_v44 = vpop.xlane.xlu1 %550  ;;  %v545_v45 = vpop.xlane.xlu0 %544  ;;  %13714 = vrsqrt.f32 %v552_v43 }
 0x19a   : > { %v555_v46 = vadd.f32 1e-08, %v551_v44  ;;  %v553_v47 = vadd.f32 1e-08, %v545_v45 }
 0x19c   : > { %13716 = vrsqrt.f32 %v555_v46 }
 0x19d   : > { %13718 = vrsqrt.f32 %v553_v47 }
 0x1a2   : > { %v13713_v48 = vpop.eup %13712 }
 0x1a3   : > { %v13715_v49 = vpop.eup %13714  ;;  %v562_v57 = vmul.f32 %v13713_v48, %v533_v27 }
 0x1a4   : > { %v560_v52 = vmul.f32 %v13715_v49, %v531_v28 }
 0x1a6   : > { %v13717_v50 = vpop.eup %13716 }
 0x1a7   : > { %v13719_v51 = vpop.eup %13718  ;;  %v563_v54 = vmul.f32 %v13717_v50, %v534_v29 }
 0x1a8   : > { %v561_v53 = vmul.f32 %v13719_v51, %v532_v30 }
 0x1a9   : > { %v12611_v58 = vpack.c.bf16 %v563_v54, %v562_v57 }
 0x1aa   : > { %v12605_v56 = vpack.c.bf16 %v561_v53, %v560_v52 }
 0x1ac   : > { %12607 = vmatprep.subr.msk.bf16.mxu1 %vm14645_vm3, %v12605_v56 }
 0x1ad   : > { %12610 = vmatpush3.bf16.xpose.msk.msra.mxu1 %vm14645_vm3, %v12605_v56 }
 0x1ae   : > { %12613 = vmatprep.subr.msk.bf16.mxu1 %vm14645_vm3, %v12611_v58 }
 0x1b5   : > { %12616 = vmatpush3.bf16.xpose.msk.msra.mxu1 %vm14645_vm3, %v12611_v58 }
 0x1bc   : > { %11750 = vmatmul.mubr.msk.f32.vlgmr.msra.gmra.mrb[0].mxu1 %vm19040_vm2, %v431_v59 }
 0x1bd   : > { %11752 = vmatprep.mubr.msk.f32.mxu1 %vm19040_vm2, %v432_v60 }
 0x1c0   : > { %11753 = vmatmul.mubr.msk.f32.gmra.mrb[2].mxu1 %vm19040_vm2, %v433_v61 }
 0x1c1   : > { %11755 = vmatprep.mubr.msk.f32.mxu1 %vm19040_vm2, %v434_v62 }
 0x1c4   : > { %11756 = vmatmul.mubr.msk.f32.gmra.mrb[4].mxu1 %vm19040_vm2, %v435_v63 }
 0x1c5   : > { %11758 = vmatprep.mubr.msk.f32.mxu1 %vm19040_vm2, %v436_v0  ;;  %v13656_v0 = vld [vmem:[%s18895_s7] sm:$0xff]  }
 0x1c6   : > { %11761 = vmatprep.subr.bf16.mxu0 %v13656_v0 }
 0x1c7   : > { %11762 = vmatpush3.bf16.msra.mxu0 %v13656_v0 }
 0x1c8   : > { %11759 = vmatmul.mubr.msk.f32.gmra.mrb[6].mxu1 %vm19040_vm2, %v437_v1  ;;  %v13657_v1 = vld [vmem:[%s18895_s7 + $0x8] sm:$0xff]  }
 0x1c9   : > { %11763 = vmatprep.subr.bf16.mxu0 %v13657_v1 }
 0x1cb   : > { %11764 = vmatpush3.bf16.msra.mxu0 %v13657_v1 }
 0x28f   : > { %v14671_v2 = vpop.f32.mrb[0].mxu1 }
 0x290   : > { %19055 = vst [vmem:[#allocation8_spill] sm:$0xff] %v14671_v2  ;;  %v14673_v4 = vpop.f32.mrb[1].mxu1  ;;  %v708_v5 = vsel %vm19040_vm2, %v14671_v2, 0.0 }
 0x291   : > { %19056 = vst [vmem:[#allocation9_spill] sm:$0xff] %v14673_v4  ;;  %709 = vadd.xlane.f32.xlu1 %v708_v5  ;;  %v705_v7 = vsel %vm19040_vm2, %v14673_v4, 0.0 }
 0x292   : > { %706 = vadd.xlane.f32.xlu0 %v705_v7 }
 0x293   : > { %v14679_v8 = vpop.f32.mrb[2].mxu1 }
 0x294   : > { %19057 = vst [vmem:[#allocation10_spill] sm:$0xff] %v14679_v8  ;;  %v14681_v9 = vpop.f32.mrb[3].mxu1  ;;  %v714_v10 = vsel %vm19040_vm2, %v14679_v8, 0.0 }
 0x295   : > { %19058 = vst [vmem:[#allocation11_spill] sm:$0xff] %v14681_v9  ;;  %715 = vadd.xlane.f32.xlu1 %v714_v10  ;;  %v711_v11 = vsel %vm19040_vm2, %v14681_v9, 0.0 }
 0x296   : > { %712 = vadd.xlane.f32.xlu0 %v711_v11 }
 0x297   : > { %v14687_v12 = vpop.f32.mrb[4].mxu1 }
 0x298   : > { %19059 = vst [vmem:[#allocation12_spill] sm:$0xff] %v14687_v12  ;;  %v14689_v13 = vpop.f32.mrb[5].mxu1  ;;  %v720_v14 = vsel %vm19040_vm2, %v14687_v12, 0.0 }
 0x299   : > { %19060 = vst [vmem:[#allocation13_spill] sm:$0xff] %v14689_v13  ;;  %721 = vadd.xlane.f32.xlu1 %v720_v14  ;;  %v717_v17 = vsel %vm19040_vm2, %v14689_v13, 0.0 }
 0x29a   : > { %718 = vadd.xlane.f32.xlu0 %v717_v17 }
 0x29b   : > { %v14695_v19 = vpop.f32.mrb[6].mxu1 }
 0x29c   : > { %19061 = vst [vmem:[#allocation14_spill] sm:$0xff] %v14695_v19  ;;  %v14697_v20 = vpop.f32.mrb[7].mxu1  ;;  %v726_v21 = vsel %vm19040_vm2, %v14695_v19, 0.0 }
 0x29d   : > { %19062 = vst [vmem:[#allocation15_spill] sm:$0xff] %v14697_v20  ;;  %727 = vadd.xlane.f32.xlu1 %v726_v21  ;;  %v723_v22 = vsel %vm19040_vm2, %v14697_v20, 0.0 }
 0x29e   : > { %724 = vadd.xlane.f32.xlu0 %v723_v22 }
 0x31e   : > { %v710_v23 = vpop.xlane.xlu1 %709 }
 0x31f   : > { %v731_v24 = vmul.f32 0.03125, %v710_v23  ;;  %v707_v25 = vpop.xlane.xlu0 %706 }
 0x320   : > { %v730_v26 = vmul.f32 0.03125, %v707_v25 }
 0x321   : > { %v14704_v27 = vsub.f32 %v14671_v2, %v731_v24 }
 0x322   : > { %v14707_v28 = vsub.f32 %v14673_v4, %v730_v26  ;;  %v716_v29 = vpop.xlane.xlu1 %715 }
 0x323   : > { %v733_v30 = vmul.f32 0.03125, %v716_v29  ;;  %v713_v31 = vpop.xlane.xlu0 %712  ;;  %v747_v32 = vmul.f32 %v14704_v27, %v14704_v27 }
 0x324   : > { %v732_v33 = vmul.f32 0.03125, %v713_v31  ;;  %v746_v34 = vmul.f32 %v14707_v28, %v14707_v28 }
 0x325   : > { %v14714_v35 = vsub.f32 %v14679_v8, %v733_v30  ;;  %v757_v36 = vsel %vm19040_vm2, %v747_v32, 0.0 }
 0x326   : > { %v14718_v37 = vsub.f32 %v14681_v9, %v732_v33  ;;  %v722_v38 = vpop.xlane.xlu1 %721  ;;  %758 = vadd.xlane.f32.xlu1 %v757_v36  ;;  %v754_v39 = vsel %vm19040_vm2, %v746_v34, 0.0 }
 0x327   : > { %v735_v40 = vmul.f32 0.03125, %v722_v38  ;;  %v719_v41 = vpop.xlane.xlu0 %718  ;;  %755 = vadd.xlane.f32.xlu0 %v754_v39  ;;  %v749_v42 = vmul.f32 %v14714_v35, %v14714_v35 }
 0x328   : > { %v734_v43 = vmul.f32 0.03125, %v719_v41  ;;  %v748_v44 = vmul.f32 %v14718_v37, %v14718_v37 }
 0x329   : > { %v14726_v45 = vsub.f32 %v14687_v12, %v735_v40  ;;  %v763_v46 = vsel %vm19040_vm2, %v749_v42, 0.0  ;;  %v10631_v42 = vld [vmem:[%s18891_s3 + $0x46] ss:$0 sm:$0xff] }
 0x32a   : > { %v14730_v47 = vsub.f32 %v14689_v13, %v734_v43  ;;  %764 = vadd.xlane.f32.xlu1 %v763_v46  ;;  %v728_v48 = vpop.xlane.xlu1 %727  ;;  %v760_v49 = vsel %vm19040_vm2, %v748_v44, 0.0 }
 0x32b   : > { %v737_v50 = vmul.f32 0.03125, %v728_v48  ;;  %761 = vadd.xlane.f32.xlu0 %v760_v49  ;;  %v725_v51 = vpop.xlane.xlu0 %724  ;;  %v751_v52 = vmul.f32 %v14726_v45, %v14726_v45 }
 0x32c   : > { %v736_v53 = vmul.f32 0.03125, %v725_v51  ;;  %v750_v54 = vmul.f32 %v14730_v47, %v14730_v47 }
 0x32d   : > { %v14738_v56 = vsub.f32 %v14695_v19, %v737_v50  ;;  %v769_v57 = vsel %vm19040_vm2, %v751_v52, 0.0  ;;  %v10632_v50 = vld [vmem:[%s18891_s3 + $0x49] ss:$0 sm:$0xff] }
 0x32e   : > { %v14742_v58 = vsub.f32 %v14697_v20, %v736_v53  ;;  %770 = vadd.xlane.f32.xlu1 %v769_v57  ;;  %v766_v59 = vsel %vm19040_vm2, %v750_v54, 0.0 }
 0x32f   : > { %767 = vadd.xlane.f32.xlu0 %v766_v59  ;;  %v753_v60 = vmul.f32 %v14738_v56, %v14738_v56 }
 0x330   : > { %v752_v61 = vmul.f32 %v14742_v58, %v14742_v58 }
 0x331   : > { %v775_v62 = vsel %vm19040_vm2, %v753_v60, 0.0 }
 0x332   : > { %776 = vadd.xlane.f32.xlu1 %v775_v62  ;;  %v772_v63 = vsel %vm19040_vm2, %v752_v61, 0.0 }
 0x333   : > { %773 = vadd.xlane.f32.xlu0 %v772_v63 }
 0x3b3   : > { %v759_v5 = vpop.xlane.xlu1 %758 }
 0x3b4   : > { %v779_v7 = vmul.f32 0.03125, %v759_v5  ;;  %v756_v10 = vpop.xlane.xlu0 %755 }
 0x3b5   : > { %v778_v11 = vmul.f32 0.03125, %v756_v10 }
 0x3b6   : > { %v787_v14 = vadd.f32 1e-05, %v779_v7 }
 0x3b7   : > { %v786_v17 = vadd.f32 1e-05, %v778_v11  ;;  %v765_v21 = vpop.xlane.xlu1 %764 }
 0x3b8   : > { %13720 = vrsqrt.f32 %v787_v14  ;;  %v781_v22 = vmul.f32 0.03125, %v765_v21  ;;  %v762_v23 = vpop.xlane.xlu0 %761 }
 0x3b9   : > { %13722 = vrsqrt.f32 %v786_v17  ;;  %v780_v24 = vmul.f32 0.03125, %v762_v23 }
 0x3ba   : > { %v789_v25 = vadd.f32 1e-05, %v781_v22 }
 0x3bb   : > { %v788_v26 = vadd.f32 1e-05, %v780_v24  ;;  %v771_v29 = vpop.xlane.xlu1 %770 }
 0x3bc   : > { %13724 = vrsqrt.f32 %v789_v25  ;;  %v783_v30 = vmul.f32 0.03125, %v771_v29  ;;  %v768_v31 = vpop.xlane.xlu0 %767 }
 0x3bd   : > { %13726 = vrsqrt.f32 %v788_v26  ;;  %v782_v32 = vmul.f32 0.03125, %v768_v31  ;;  %v10633_v31 = vld [vmem:[%s18893_s5] ss:$0 sm:$0xff] }
 0x3be   : > { %v791_v33 = vadd.f32 1e-05, %v783_v30 }
 0x3bf   : > { %v790_v34 = vadd.f32 1e-05, %v782_v32  ;;  %v777_v36 = vpop.xlane.xlu1 %776 }
 0x3c0   : > { %13728 = vrsqrt.f32 %v791_v33  ;;  %v785_v38 = vmul.f32 0.03125, %v777_v36  ;;  %v774_v39 = vpop.xlane.xlu0 %773 }
 0x3c1   : > { %13730 = vrsqrt.f32 %v790_v34  ;;  %v784_v40 = vmul.f32 0.03125, %v774_v39 }
 0x3c2   : > { %v13721_v41 = vpop.eup %13720  ;;  %v793_v43 = vadd.f32 1e-05, %v785_v38 }
 0x3c3   : > { %v13723_v44 = vpop.eup %13722  ;;  %v792_v46 = vadd.f32 1e-05, %v784_v40  ;;  %v803_v48 = vmul.f32 %v13721_v41, %v14704_v27 }
 0x3c4   : > { %13732 = vrsqrt.f32 %v793_v43  ;;  %v802_v49 = vmul.f32 %v13723_v44, %v14707_v28 }
 0x3c5   : > { %13734 = vrsqrt.f32 %v792_v46  ;;  %v816_v51 = vmul.f32 %v10631_v42, %v803_v48 }
 0x3c6   : > { %v13725_v52 = vpop.eup %13724  ;;  %v815_v53 = vmul.f32 %v10631_v42, %v802_v49 }
 0x3c7   : > { %v13727_v54 = vpop.eup %13726  ;;  %v805_v57 = vmul.f32 %v13725_v52, %v14714_v35  ;;  %v829_v59 = vadd.f32 %v10632_v50, %v816_v51 }
 0x3c8   : > { %v804_v60 = vmul.f32 %v13727_v54, %v14718_v37  ;;  %v828_v61 = vadd.f32 %v10632_v50, %v815_v53 }
 0x3c9   : > { %v818_v62 = vmul.f32 %v10631_v42, %v805_v57 }
 0x3ca   : > { %v13729_v27 = vpop.eup %13728  ;;  %v817_v63 = vmul.f32 %v10631_v42, %v804_v60  ;;  %v841_v0 = vpack.c.bf16 %v829_v59, %v828_v61 }
 0x3cb   : > { %v13731_v28 = vpop.eup %13730  ;;  %v831_v1 = vadd.f32 %v10632_v50, %v818_v62  ;;  %v807_v5 = vmul.f32 %v13729_v27, %v14726_v45 }
 0x3cc   : > { %11765 = vmatprep.mubr.msk.bf16.mxu0 %vm19040_vm2, %v841_v0  ;;  %v830_v7 = vadd.f32 %v10632_v50, %v817_v63  ;;  %v806_v10 = vmul.f32 %v13731_v28, %v14730_v47 }
 0x3cd   : > { %v820_v11 = vmul.f32 %v10631_v42, %v807_v5 }
 0x3ce   : > { %v13733_v14 = vpop.eup %13732  ;;  %v842_v35 = vpack.c.bf16 %v831_v1, %v830_v7  ;;  %v819_v17 = vmul.f32 %v10631_v42, %v806_v10 }
 0x3cf   : > { %v13735_v21 = vpop.eup %13734  ;;  %v833_v37 = vadd.f32 %v10632_v50, %v820_v11  ;;  %v809_v22 = vmul.f32 %v13733_v14, %v14738_v56 }
 0x3d0   : > { %11766 = vmatmul.mubr.msk.bf16.vlgmr.msra.gmra.mrb[4].mxu0 %vm19040_vm2, %v842_v35  ;;  %v832_v23 = vadd.f32 %v10632_v50, %v819_v17  ;;  %v808_v24 = vmul.f32 %v13735_v21, %v14742_v58 }
 0x3d1   : > { %v822_v25 = vmul.f32 %v10631_v42, %v809_v22 }
 0x3d2   : > { %v843_v45 = vpack.c.bf16 %v833_v37, %v832_v23  ;;  %v821_v26 = vmul.f32 %v10631_v42, %v808_v24 }
 0x3d3   : > { %v835_v29 = vadd.f32 %v10632_v50, %v822_v25 }
 0x3d4   : > { %11769 = vmatprep.mubr.msk.bf16.mxu0 %vm19040_vm2, %v843_v45  ;;  %v834_v47 = vadd.f32 %v10632_v50, %v821_v26 }
 0x3d6   : > { %v844_v30 = vpack.c.bf16 %v835_v29, %v834_v47 }
 0x3d8   : > { %11770 = vmatmul.mubr.msk.bf16.gmra.mrb[8].mxu0 %vm19040_vm2, %v844_v30 }
 0x4a3   : > { %v11767_v56 = vpop.f32.mrb[4].mxu0 }
 0x4a4   : > { %v909_v32 = vpop.f32.mrb[5].mxu0  ;;  %v14780_v34 = vadd.f32 %v11767_v56, %v10633_v31 }
 0x4a5   : > { %v14778_v33 = vadd.f32 %v10633_v31, %v909_v32  ;;  %v11768_v58 = vpop.f32.mrb[6].mxu0 }
 0x4a6   : > { %v14782_v36 = vadd.f32 %v11768_v58, %v10633_v31  ;;  %v912_v38 = vpop.f32.mrb[7].mxu0 }
 0x4a7   : > { %v14784_v39 = vadd.f32 %v10633_v31, %v912_v38  ;;  %11789 = vmatprep.mubr.msk.f32.mxu1 %vm964_vm4, %v14778_v33 }
 0x4a8   : > { %v14790_v40 = vpack.i.bf16 %v14782_v36, %v14780_v34 }
 0x4a9   : > { %v14794_v41 = vpack.i.bf16 %v14784_v39, %v14778_v33 }
 0x4aa   : > { %13062 = vrot.lane.b32.xlu1 %v14790_v40, %s18970_s30 }
 0x4ab   : > { %13057 = vrot.lane.b32.xlu0 %v14794_v41, %s18970_s30  ;;  %v11771_v42 = vpop.f32.mrb[8].mxu0 }
 0x4ac   : > { %v925_v43 = vpop.f32.mrb[9].mxu0  ;;  %v14810_v52 = vadd.f32 %v11771_v42, %v10633_v31 }
 0x4ad   : > { %v11772_v44 = vpop.f32.mrb[10].mxu0  ;;  %v14800_v48 = vadd.f32 %v10633_v31, %v925_v43 }
 0x4ae   : > { %v928_v46 = vpop.f32.mrb[11].mxu0  ;;  %v14804_v50 = vadd.f32 %v11772_v44, %v10633_v31 }
 0x4af   : > { %v14802_v49 = vadd.f32 %v10633_v31, %v928_v46 }
 0x4b0   : > { %v14816_v53 = vpack.i.bf16 %v14804_v50, %v14810_v52 }
 0x4b1   : > { %v14808_v51 = vpack.i.bf16 %v14802_v49, %v14800_v48 }
 0x4b3   : > { %13067 = vrot.lane.b32.xlu1 %v14808_v51, %s18970_s30 }
 0x4b7   : > { %13072 = vrot.lane.b32.xlu1 %v14816_v53, %s18970_s30  ;;  %s19159_s30 = smov 88  }
 0x51c   : > { %v13063_v54 = vpop.permute.xlu1 %13062 }
 0x51d   : > { %v13058_v57 = vpop.permute.xlu0 %13057  ;;  %v13065_v59 = vunpack.i.h.bf16 %v13063_v54  ;;  %v13064_v60 = vunpack.i.l.bf16 %v13063_v54 }
 0x51e   : > { %v13060_v61 = vunpack.i.h.bf16 %v13058_v57  ;;  %v13059_v62 = vunpack.i.l.bf16 %v13058_v57 }
 0x51f   : > { %v12623_v0 = vpack.c.bf16 %v13065_v59, %v13064_v60 }
 0x520   : > { %v12617_v63 = vpack.c.bf16 %v13060_v61, %v13059_v62 }
 0x522   : > { %12619 = vmatprep.subr.msk.bf16.mxu1 %vm14822_vm5, %v12617_v63 }
 0x523   : > { %12622 = vmatpush3.bf16.xpose.msk.msra.mxu1 %vm14822_vm5, %v12617_v63 }
 0x524   : > { %12625 = vmatprep.subr.msk.bf16.mxu1 %vm14822_vm5, %v12623_v0 }
 0x525   : > { %v13068_v28 = vpop.permute.xlu1 %13067 }
 0x526   : > { %v13070_v1 = vunpack.i.h.bf16 %v13068_v28  ;;  %v13069_v5 = vunpack.i.l.bf16 %v13068_v28 }
 0x528   : > { %v12629_v7 = vpack.c.bf16 %v13070_v1, %v13069_v5 }
 0x529   : > { %v13073_v10 = vpop.permute.xlu1 %13072 }
 0x52a   : > { %v13075_v11 = vunpack.i.h.bf16 %v13073_v10  ;;  %v13074_v14 = vunpack.i.l.bf16 %v13073_v10 }
 0x52b   : > { %12628 = vmatpush3.bf16.xpose.msk.msra.mxu1 %vm14822_vm5, %v12623_v0 }
 0x52c   : > { %12631 = vmatprep.subr.msk.bf16.mxu1 %vm14822_vm5, %v12629_v7  ;;  %v12635_v35 = vpack.c.bf16 %v13075_v11, %v13074_v14 }
 0x533   : > { %12634 = vmatpush3.bf16.xpose.msk.msra.mxu1 %vm14822_vm5, %v12629_v7 }
 0x534   : > { %12637 = vmatprep.subr.msk.bf16.mxu1 %vm14822_vm5, %v12635_v35 }
 0x53b   : > { %12640 = vmatpush3.bf16.xpose.msk.msra.mxu1 %vm14822_vm5, %v12635_v35 }
 0x542   : > { %11790 = vmatmul.mubr.msk.f32.vlgmr.msra.gmra.mrb[8].mxu1 %vm964_vm4, %v14784_v39 }
 0x543   : > { %11792 = vmatprep.mubr.msk.f32.mxu1 %vm964_vm4, %v14780_v34 }
 0x546   : > { %11793 = vmatmul.mubr.msk.f32.gmra.mrb[10].mxu1 %vm964_vm4, %v14782_v36 }
 0x547   : > { %11795 = vmatprep.mubr.msk.f32.mxu1 %vm964_vm4, %v14800_v48 }
 0x54a   : > { %11796 = vmatmul.mubr.msk.f32.gmra.mrb[12].mxu1 %vm964_vm4, %v14802_v49 }
 0x54b   : > { %11798 = vmatprep.mubr.msk.f32.mxu1 %vm964_vm4, %v14810_v52 }
 0x54e   : > { %11799 = vmatmul.mubr.msk.f32.gmra.mrb[14].mxu1 %vm964_vm4, %v14804_v50 }
 0x615   : > { %v11791_v17 = vpop.f32.mrb[8].mxu1 }
 0x616   : > { %v1103_v21 = vmul.f32 0.5, %v11791_v17  ;;  %v1063_v37 = vpop.f32.mrb[9].mxu1 }
 0x617   : > { %v1102_v22 = vmul.f32 0.5, %v1063_v37 }
 0x618   : > { %v1113_v23 = vsel %vm19041_vm1, %v1103_v21, -inf }
 0x619   : > { %1114 = vmax.xlane.f32.xlu1 %v1113_v23  ;;  %v11794_v24 = vpop.f32.mrb[10].mxu1  ;;  %v1110_v25 = vsel %vm19041_vm1, %v1102_v22, -inf }
 0x61a   : > { %v1105_v45 = vmul.f32 0.5, %v11794_v24  ;;  %1111 = vmax.xlane.f32.xlu0 %v1110_v25  ;;  %v1073_v26 = vpop.f32.mrb[11].mxu1 }
 0x61b   : > { %v1104_v47 = vmul.f32 0.5, %v1073_v26 }
 0x61c   : > { %v1119_v29 = vsel %vm19041_vm1, %v1105_v45, -inf }
 0x61d   : > { %v11797_v30 = vpop.f32.mrb[12].mxu1  ;;  %v1116_v42 = vsel %vm19041_vm1, %v1104_v47, -inf }
 0x61e   : > { %v1107_v31 = vmul.f32 0.5, %v11797_v30  ;;  %1120 = vmax.xlane.f32.xlu0 %v1119_v29  ;;  %v1083_v56 = vpop.f32.mrb[13].mxu1 }
 0x61f   : > { %v1106_v58 = vmul.f32 0.5, %v1083_v56 }
 0x620   : > { %v1125_v32 = vsel %vm19041_vm1, %v1107_v31, -inf }
 0x621   : > { %1126 = vmax.xlane.f32.xlu1 %v1125_v32  ;;  %v11800_v38 = vpop.f32.mrb[14].mxu1  ;;  %v1122_v57 = vsel %vm19041_vm1, %v1106_v58, -inf }
 0x622   : > { %v14861_v43 = vmul.f32 0.5, %v11800_v38  ;;  %1117 = vmax.xlane.f32.xlu0 %v1116_v42  ;;  %v1093_v44 = vpop.f32.mrb[15].mxu1 }
 0x623   : > { %v14865_v54 = vmul.f32 0.5, %v1093_v44 }
 0x624   : > { %v1131_v46 = vsel %vm19041_vm1, %v14861_v43, -inf }
 0x625   : > { %1132 = vmax.xlane.f32.xlu1 %v1131_v46  ;;  %v1128_v59 = vsel %vm19041_vm1, %v14865_v54, -inf }
 0x626   : > { %1123 = vmax.xlane.f32.xlu0 %v1122_v57 }
 0x62a   : > { %1129 = vmax.xlane.f32.xlu0 %v1128_v59 }
 0x636   : > { %13082 = vrot.lane.b32.xlu1 %v14790_v40, %s14424_s13 }
 0x63a   : > { %13087 = vrot.lane.b32.xlu1 %v14808_v51, %s14424_s13 }
 0x63e   : > { %13092 = vrot.lane.b32.xlu1 %v14816_v53, %s14424_s13 }
 0x640   : > { %13077 = vrot.lane.b32.xlu0 %v14794_v41, %s14424_s13  ;;  %s14430_s13 = smov 56  }
 0x642   : > { %13102 = vrot.lane.b32.xlu1 %v14790_v40, %s18924_s15 }
 0x644   : > { %13097 = vrot.lane.b32.xlu0 %v14794_v41, %s18924_s15 }
 0x6a6   : > { %v1115_v60 = vpop.xlane.xlu1 %1114 }
 0x6a7   : > { %v1135_v61 = vsub.f32 %v1103_v21, %v1115_v60  ;;  %v1112_v62 = vpop.xlane.xlu0 %1111 }
 0x6a8   : > { %v1134_v63 = vsub.f32 %v1102_v22, %v1112_v62 }
 0x6a9   : > { %v1144_v0 = vmul.f32 1.442695, %v1135_v61 }
 0x6aa   : > { %v1142_v28 = vmul.f32 1.442695, %v1134_v63 }
 0x6ab   : > { %13736 = vpow2.f32 %v1144_v0  ;;  %v1121_v1 = vpop.xlane.xlu0 %1120 }
 0x6ac   : > { %13738 = vpow2.f32 %v1142_v28  ;;  %v1137_v5 = vsub.f32 %v1105_v45, %v1121_v1 }
 0x6ae   : > { %v1148_v7 = vmul.f32 1.442695, %v1137_v5  ;;  %v1127_v10 = vpop.xlane.xlu1 %1126 }
 0x6af   : > { %v1139_v11 = vsub.f32 %v1107_v31, %v1127_v10  ;;  %v1118_v14 = vpop.xlane.xlu0 %1117 }
 0x6b0   : > { %13740 = vpow2.f32 %v1148_v7  ;;  %v1136_v35 = vsub.f32 %v1104_v47, %v1118_v14 }
 0x6b1   : > { %v1152_v17 = vmul.f32 1.442695, %v1139_v11 }
 0x6b2   : > { %v1146_v37 = vmul.f32 1.442695, %v1136_v35  ;;  %v1133_v23 = vpop.xlane.xlu1 %1132 }
 0x6b3   : > { %v1124_v24 = vpop.xlane.xlu0 %1123 }
 0x6b4   : > { %13742 = vpow2.f32 %v1146_v37  ;;  %v1138_v21 = vsub.f32 %v1106_v58, %v1124_v24 }
 0x6b5   : > { %v14878_v25 = vpop.eup %13736  ;;  %13744 = vpow2.f32 %v1152_v17 }
 0x6b6   : > { %v14880_v22 = vpop.eup %13738  ;;  %v1150_v26 = vmul.f32 1.442695, %v1138_v21  ;;  %v13083_v29 = vpop.permute.xlu1 %13082  ;;  %v1161_v45 = vsel %vm19041_vm1, %v14878_v25, 0.0 }
 0x6b7   : > { %1162 = vadd.xlane.f32.xlu1 %v1161_v45  ;;  %v1130_v30 = vpop.xlane.xlu0 %1129  ;;  %v1158_v47 = vsel %vm19041_vm1, %v14880_v22, 0.0  ;;  %v13085_v38 = vunpack.i.h.bf16 %v13083_v29  ;;  %v13084_v42 = vunpack.i.l.bf16 %v13083_v29 }
 0x6b8   : > { %1159 = vadd.xlane.f32.xlu0 %v1158_v47  ;;  %13746 = vpow2.f32 %v1150_v26  ;;  %v1141_v26 = vsub.f32 %v14861_v43, %v1133_v23  ;;  %v1140_v45 = vsub.f32 %v14865_v54, %v1130_v30 }
 0x6b9   : > { %v12645_v0 = vpack.c.bf16 %v13085_v38, %v13084_v42 }
 0x6ba   : > { %v14886_v31 = vpop.eup %13740  ;;  %v13088_v56 = vpop.permute.xlu1 %13087  ;;  %v1156_v29 = vmul.f32 1.442695, %v1141_v26  ;;  %v1154_v47 = vmul.f32 1.442695, %v1140_v45 }
 0x6bb   : > { %v13078_v32 = vpop.permute.xlu0 %13077  ;;  %v1167_v58 = vsel %vm19041_vm1, %v14886_v31, 0.0  ;;  %v13090_v62 = vunpack.i.h.bf16 %v13088_v56  ;;  %v13089_v63 = vunpack.i.l.bf16 %v13088_v56 }
 0x6bc   : > { %v13080_v44 = vunpack.i.h.bf16 %v13078_v32  ;;  %v13079_v46 = vunpack.i.l.bf16 %v13078_v32  ;;  %1168 = vadd.xlane.f32.xlu1 %v1167_v58  ;;  %13748 = vpow2.f32 %v1156_v29 }
 0x6bd   : > { %v12649_v11 = vpack.c.bf16 %v13090_v62, %v13089_v63  ;;  %13750 = vpow2.f32 %v1154_v47 }
 0x6be   : > { %v14890_v57 = vpop.eup %13742  ;;  %v12641_v59 = vpack.c.bf16 %v13080_v44, %v13079_v46  ;;  %v13093_v28 = vpop.permute.xlu1 %13092 }
 0x6bf   : > { %v1164_v60 = vsel %vm19041_vm1, %v14890_v57, 0.0  ;;  %v14894_v61 = vpop.eup %13744  ;;  %v13095_v7 = vunpack.i.h.bf16 %v13093_v28  ;;  %v13094_v10 = vunpack.i.l.bf16 %v13093_v28  ;;  %v13098_v14 = vpop.permute.xlu0 %13097 }
 0x6c0   : > { %1165 = vadd.xlane.f32.xlu0 %v1164_v60  ;;  %12642 = vmatprep.subr.bf16.mxu0 %v12641_v59  ;;  %v1173_v1 = vsel %vm19041_vm1, %v14894_v61, 0.0  ;;  %v13100_v17 = vunpack.i.h.bf16 %v13098_v14  ;;  %v13099_v37 = vunpack.i.l.bf16 %v13098_v14 }
 0x6c1   : > { %12644 = vmatpush3.bf16.msra.mxu0 %v12641_v59  ;;  %v12653_v24 = vpack.c.bf16 %v13095_v7, %v13094_v10 }
 0x6c2   : > { %12646 = vmatprep.subr.bf16.mxu0 %v12645_v0  ;;  %v14898_v5 = vpop.eup %13746  ;;  %v12657_v21 = vpack.c.bf16 %v13100_v17, %v13099_v37  ;;  %v13103_v56 = vpop.permute.xlu1 %13102 }
 0x6c3   : > { %v1170_v35 = vsel %vm19041_vm1, %v14898_v5, 0.0  ;;  %v13105_v59 = vunpack.i.h.bf16 %v13103_v56  ;;  %v13104_v60 = vunpack.i.l.bf16 %v13103_v56 }
 0x6c4   : > { %1174 = vadd.xlane.f32.xlu0 %v1173_v1 }
 0x6c5   : > { %12648 = vmatpush3.bf16.msra.mxu0 %v12645_v0  ;;  %v12663_v28 = vpack.c.bf16 %v13105_v59, %v13104_v60 }
 0x6c6   : > { %12650 = vmatprep.subr.bf16.mxu0 %v12649_v11  ;;  %v14916_v43 = vpop.eup %13748 }
 0x6c7   : > { %v1179_v54 = vsel %vm19041_vm1, %v14916_v43, 0.0  ;;  %v14922_v23 = vpop.eup %13750 }
 0x6c8   : > { %1171 = vadd.xlane.f32.xlu0 %v1170_v35  ;;  %v1176_v30 = vsel %vm19041_vm1, %v14922_v23, 0.0 }
 0x6c9   : > { %12652 = vmatpush3.bf16.msra.mxu0 %v12649_v11 }
 0x6ca   : > { %12654 = vmatprep.subr.bf16.mxu0 %v12653_v24 }
 0x6cd   : > { %13112 = vrot.lane.b32.xlu1 %v14816_v53, %s18924_s15  ;;  %12656 = vmatpush3.bf16.msra.mxu0 %v12653_v24 }
 0x6ce   : > { %12659 = vmatprep.subr.msk.bf16.mxu0 %vm14822_vm5, %v12657_v21 }
 0x6de   : > { %13107 = vrot.lane.b32.xlu0 %v14808_v51, %s18924_s15  ;;  %s18931_s15 = smov 72  }
 0x6e2   : > { %1351 = vrot.lane.b32.xlu0 %v14778_v33, %s18968_s16 }
 0x6e6   : > { %1355 = vrot.lane.b32.xlu0 %v14780_v34, %s18968_s16 }
 0x6ea   : > { %1359 = vrot.lane.b32.xlu0 %v14800_v48, %s18968_s16 }
 0x6ee   : > { %1363 = vrot.lane.b32.xlu0 %v14810_v52, %s18968_s16 }
 0x6f1   : > { %1180 = vadd.xlane.f32.xlu1 %v1179_v54 }
 0x6f5   : > { %1177 = vadd.xlane.f32.xlu1 %v1176_v30 }
 0x706   : > { %1353 = vrot.lane.b32.xlu1 %v14784_v39, %s18968_s16 }
 0x70a   : > { %1357 = vrot.lane.b32.xlu1 %v14782_v36, %s18968_s16 }
 0x70e   : > { %1361 = vrot.lane.b32.xlu1 %v14802_v49, %s18968_s16 }
 0x712   : > { %1365 = vrot.lane.b32.xlu1 %v14804_v50, %s18968_s16  ;;  %s19151_s16 = smov 124  }
 0x744   : > { %v1163_v32 = vpop.xlane.xlu1 %1162 }
 0x745   : > { %13752 = vrcp.f32 %v1163_v32  ;;  %v1160_v58 = vpop.xlane.xlu0 %1159 }
 0x746   : > { %13754 = vrcp.f32 %v1160_v58 }
 0x749   : > { %v1169_v38 = vpop.xlane.xlu1 %1168 }
 0x74a   : > { %13756 = vrcp.f32 %v1169_v38 }
 0x74d   : > { %v1166_v42 = vpop.xlane.xlu0 %1165  ;;  %v13113_v37 = vpop.permute.xlu1 %13112 }
 0x74e   : > { %13758 = vrcp.f32 %v1166_v42  ;;  %v13115_v26 = vunpack.i.h.bf16 %v13113_v37 }
 0x74f   : > { %v13753_v44 = vpop.eup %13752 }
 0x750   : > { %v13755_v46 = vpop.eup %13754  ;;  %v1191_v0 = vmul.f32 %v13753_v44, %v14878_v25 }
 0x751   : > { %v1175_v62 = vpop.xlane.xlu0 %1174  ;;  %v1190_v63 = vmul.f32 %v13755_v46, %v14880_v22 }
 0x752   : > { %13760 = vrcp.f32 %v1175_v62 }
 0x753   : > { %11817 = vmatprep.mubr.msk.f32.mxu0 %vm19041_vm1, %v1190_v63 }
 0x754   : > { %11818 = vmatmul.mubr.msk.f32.vlgmr.msra.gmra.mrb[2].mxu0 %vm19041_vm1, %v1191_v0  ;;  %v13757_v7 = vpop.eup %13756 }
 0x755   : > { %12662 = vmatpush3.bf16.xpose.msk.msra.mxu0 %vm14822_vm5, %v12657_v21  ;;  %v1172_v1 = vpop.xlane.xlu0 %1171  ;;  %v1193_v35 = vmul.f32 %v13757_v7, %v14886_v31 }
 0x756   : > { %13762 = vrcp.f32 %v1172_v1  ;;  %12665 = vmatprep.subr.msk.bf16.mxu0 %vm14822_vm5, %v12663_v28 }
 0x758   : > { %v13759_v10 = vpop.eup %13758 }
 0x759   : > { %v13108_v11 = vpop.permute.xlu0 %13107  ;;  %v1192_v22 = vmul.f32 %v13759_v10, %v14890_v57  ;;  %v13114_v57 = vunpack.i.l.bf16 %v13113_v37 }
 0x75a   : > { %v13110_v25 = vunpack.i.h.bf16 %v13108_v11  ;;  %v13109_v14 = vunpack.i.l.bf16 %v13108_v11 }
 0x75b   : > { %11820 = vmatprep.mubr.msk.f32.mxu0 %vm19041_vm1, %v1192_v22  ;;  %v12675_v45 = vpack.c.bf16 %v13115_v26, %v13114_v57 }
 0x75c   : > { %v12669_v17 = vpack.c.bf16 %v13110_v25, %v13109_v14  ;;  %11821 = vmatmul.mubr.msk.f32.gmra.mrb[12].mxu0 %vm19041_vm1, %v1193_v35  ;;  %v13761_v24 = vpop.eup %13760 }
 0x75d   : > { %12668 = vmatpush3.bf16.xpose.msk.msra.mxu0 %vm14822_vm5, %v12663_v28  ;;  %v1195_v31 = vmul.f32 %v13761_v24, %v14894_v61 }
 0x75e   : > { %12671 = vmatprep.subr.msk.bf16.mxu0 %vm14822_vm5, %v12669_v17 }
 0x760   : > { %v13763_v21 = vpop.eup %13762 }
 0x761   : > { %v1194_v29 = vmul.f32 %v13763_v21, %v14898_v5  ;;  %v1352_v5 = vpop.permute.xlu0 %1351 }
 0x763   : > { %11823 = vmatprep.mubr.msk.f32.mxu0 %vm19041_vm1, %v1194_v29 }
 0x764   : > { %11824 = vmatmul.mubr.msk.f32.gmra.mrb[14].mxu0 %vm19041_vm1, %v1195_v31 }
 0x765   : > { %12674 = vmatpush3.bf16.xpose.msk.msra.mxu0 %vm14822_vm5, %v12669_v17  ;;  %v1356_v38 = vpop.permute.xlu0 %1355 }
 0x766   : > { %12677 = vmatprep.subr.msk.bf16.mxu0 %vm14822_vm5, %v12675_v45 }
 0x769   : > { %v1360_v44 = vpop.permute.xlu0 %1359 }
 0x76d   : > { %12680 = vmatpush3.bf16.xpose.msk.msra.mxu0 %vm14822_vm5, %v12675_v45 }
 0x77e   : > { %v1181_v47 = vpop.xlane.xlu1 %1180 }
 0x77f   : > { %13764 = vrcp.f32 %v1181_v47 }
 0x782   : > { %v1178_v54 = vpop.xlane.xlu1 %1177 }
 0x783   : > { %13766 = vrcp.f32 %v1178_v54 }
 0x786   : > { %v1354_v56 = vpop.permute.xlu1 %1353 }
 0x789   : > { %v13765_v61 = vpop.eup %13764 }
 0x78a   : > { %v1197_v58 = vmul.f32 %v13765_v61, %v14916_v43  ;;  %v1358_v42 = vpop.permute.xlu1 %1357 }
 0x78d   : > { %v13767_v30 = vpop.eup %13766 }
 0x78e   : > { %v1196_v32 = vmul.f32 %v13767_v30, %v14922_v23  ;;  %v1362_v46 = vpop.permute.xlu1 %1361  ;;  %v1364_v23 = vpop.permute.xlu0 %1363 }
 0x790   : > { %11826 = vmatprep.mubr.msk.f32.mxu0 %vm19041_vm1, %v1196_v32 }
 0x791   : > { %11827 = vmatmul.mubr.msk.f32.gmra.mrb[16].mxu0 %vm19041_vm1, %v1197_v58 }
 0x792   : > { %11845 = vmatprep.mubr.msk.f32.mxu0 %vm964_vm4, %v1352_v5  ;;  %v1366_v43 = vpop.permute.xlu1 %1365 }
 0x795   : > { %11846 = vmatmul.mubr.msk.f32.vlgmr.msra.gmra.mrb[18].mxu0 %vm964_vm4, %v1354_v56 }
 0x796   : > { %11848 = vmatprep.mubr.msk.f32.mxu0 %vm964_vm4, %v1356_v38 }
 0x799   : > { %11849 = vmatmul.mubr.msk.f32.gmra.mrb[20].mxu0 %vm964_vm4, %v1358_v42 }
 0x79a   : > { %11851 = vmatprep.mubr.msk.f32.mxu0 %vm964_vm4, %v1360_v44 }
 0x79d   : > { %11852 = vmatmul.mubr.msk.f32.gmra.mrb[22].mxu0 %vm964_vm4, %v1362_v46 }
 0x79e   : > { %11854 = vmatprep.mubr.msk.f32.mxu0 %vm964_vm4, %v1364_v23 }
 0x7a1   : > { %11855 = vmatmul.mubr.msk.f32.gmra.mrb[24].mxu0 %vm964_vm4, %v1366_v43 }
 0x827   : > { %v14972_v59 = vpop.f32.mrb[2].mxu0 }
 0x828   : > { %19065 = vst [vmem:[#allocation16_spill] sm:$0xff] %v14972_v59  ;;  %v14974_v60 = vpop.f32.mrb[3].mxu0 }
 0x829   : > { %19066 = vst [vmem:[#allocation17_spill] sm:$0xff] %v14974_v60 }
 0x82f   : > { %v14976_v62 = vpop.f32.mrb[12].mxu0 }
 0x830   : > { %19067 = vst [vmem:[#allocation18_spill] sm:$0xff] %v14976_v62  ;;  %v14978_v63 = vpop.f32.mrb[13].mxu0 }
 0x831   : > { %19068 = vst [vmem:[#allocation19_spill] sm:$0xff] %v14978_v63 }
 0x837   : > { %v14980_v0 = vpop.f32.mrb[14].mxu0 }
 0x838   : > { %19069 = vst [vmem:[#allocation20_spill] sm:$0xff] %v14980_v0  ;;  %v14982_v28 = vpop.f32.mrb[15].mxu0 }
 0x839   : > { %19070 = vst [vmem:[#allocation21_spill] sm:$0xff] %v14982_v28 }
 0x864   : > { %v14984_v1 = vpop.f32.mrb[16].mxu0 }
 0x865   : > { %19071 = vst [vmem:[#allocation22_spill] sm:$0xff] %v14984_v1  ;;  %v14986_v7 = vpop.f32.mrb[17].mxu0 }
 0x866   : > { %19072 = vst [vmem:[#allocation23_spill] sm:$0xff] %v14986_v7 }
 0x868   : > { %v11847_v10 = vpop.f32.mrb[18].mxu0 }
 0x869   : > { %v1521_v11 = vmul.f32 0.5, %v11847_v10  ;;  %v1481_v22 = vpop.f32.mrb[19].mxu0 }
 0x86a   : > { %v1520_v25 = vmul.f32 0.5, %v1481_v22 }
 0x86b   : > { %v1531_v14 = vsel %vm19041_vm1, %v1521_v11, -inf }
 0x86c   : > { %1532 = vmax.xlane.f32.xlu1 %v1531_v14  ;;  %v11850_v35 = vpop.f32.mrb[20].mxu0  ;;  %v1528_v17 = vsel %vm19041_vm1, %v1520_v25, -inf }
 0x86d   : > { %v1523_v37 = vmul.f32 0.5, %v11850_v35  ;;  %1529 = vmax.xlane.f32.xlu0 %v1528_v17  ;;  %v1491_v24 = vpop.f32.mrb[21].mxu0 }
 0x86e   : > { %v1522_v26 = vmul.f32 0.5, %v1491_v24 }
 0x86f   : > { %v1537_v21 = vsel %vm19041_vm1, %v1523_v37, -inf }
 0x870   : > { %v11853_v57 = vpop.f32.mrb[22].mxu0  ;;  %v1534_v5 = vsel %vm19041_vm1, %v1522_v26, -inf }
 0x871   : > { %v1525_v29 = vmul.f32 0.5, %v11853_v57  ;;  %1538 = vmax.xlane.f32.xlu0 %v1537_v21  ;;  %v1501_v31 = vpop.f32.mrb[23].mxu0 }
 0x872   : > { %v1524_v47 = vmul.f32 0.5, %v1501_v31 }
 0x873   : > { %v1543_v45 = vsel %vm19041_vm1, %v1525_v29, -inf }
 0x874   : > { %1544 = vmax.xlane.f32.xlu1 %v1543_v45  ;;  %v11856_v54 = vpop.f32.mrb[24].mxu0  ;;  %v1540_v58 = vsel %vm19041_vm1, %v1524_v47, -inf }
 0x875   : > { %v14993_v61 = vmul.f32 0.5, %v11856_v54  ;;  %1535 = vmax.xlane.f32.xlu0 %v1534_v5  ;;  %v1511_v30 = vpop.f32.mrb[25].mxu0 }
 0x876   : > { %v14997_v32 = vmul.f32 0.5, %v1511_v30 }
 0x877   : > { %v1549_v56 = vsel %vm19041_vm1, %v14993_v61, -inf }
 0x878   : > { %1550 = vmax.xlane.f32.xlu1 %v1549_v56  ;;  %v1546_v38 = vsel %vm19041_vm1, %v14997_v32, -inf }
 0x879   : > { %1541 = vmax.xlane.f32.xlu0 %v1540_v58 }
 0x87d   : > { %1547 = vmax.xlane.f32.xlu0 %v1546_v38 }
 0x889   : > { %13122 = vrot.lane.b32.xlu1 %v14790_v40, %s14427_s22 }
 0x88d   : > { %13127 = vrot.lane.b32.xlu1 %v14808_v51, %s14427_s22 }
 0x891   : > { %13132 = vrot.lane.b32.xlu1 %v14816_v53, %s14427_s22 }
 0x893   : > { %13117 = vrot.lane.b32.xlu0 %v14794_v41, %s14427_s22  ;;  %s18908_s22 = smov 84  }
 0x895   : > { %13142 = vrot.lane.b32.xlu1 %v14790_v40, %s18920_s24 }
 0x897   : > { %13137 = vrot.lane.b32.xlu0 %v14794_v41, %s18920_s24 }
 0x8f9   : > { %v1533_v42 = vpop.xlane.xlu1 %1532 }
 0x8fa   : > { %v1553_v44 = vsub.f32 %v1521_v11, %v1533_v42  ;;  %v1530_v46 = vpop.xlane.xlu0 %1529 }
 0x8fb   : > { %v1552_v23 = vsub.f32 %v1520_v25, %v1530_v46 }
 0x8fc   : > { %v1562_v43 = vmul.f32 1.442695, %v1553_v44 }
 0x8fd   : > { %v1560_v10 = vmul.f32 1.442695, %v1552_v23 }
 0x8fe   : > { %13768 = vpow2.f32 %v1562_v43  ;;  %v1539_v22 = vpop.xlane.xlu0 %1538 }
 0x8ff   : > { %13770 = vpow2.f32 %v1560_v10  ;;  %v1555_v14 = vsub.f32 %v1523_v37, %v1539_v22 }
 0x901   : > { %v1566_v35 = vmul.f32 1.442695, %v1555_v14  ;;  %v1545_v17 = vpop.xlane.xlu1 %1544 }
 0x902   : > { %v1557_v24 = vsub.f32 %v1525_v29, %v1545_v17  ;;  %v1536_v21 = vpop.xlane.xlu0 %1535 }
 0x903   : > { %13772 = vpow2.f32 %v1566_v35  ;;  %v1554_v57 = vsub.f32 %v1522_v26, %v1536_v21 }
 0x904   : > { %v1570_v31 = vmul.f32 1.442695, %v1557_v24 }
 0x905   : > { %v1564_v45 = vmul.f32 1.442695, %v1554_v57  ;;  %v1551_v54 = vpop.xlane.xlu1 %1550 }
 0x906   : > { %v1542_v5 = vpop.xlane.xlu0 %1541 }
 0x907   : > { %13774 = vpow2.f32 %v1564_v45  ;;  %v1556_v11 = vsub.f32 %v1524_v47, %v1542_v5 }
 0x908   : > { %v15010_v30 = vpop.eup %13768  ;;  %13776 = vpow2.f32 %v1570_v31 }
 0x909   : > { %v15012_v25 = vpop.eup %13770  ;;  %v1568_v56 = vmul.f32 1.442695, %v1556_v11  ;;  %v13123_v58 = vpop.permute.xlu1 %13122  ;;  %v1579_v37 = vsel %vm19041_vm1, %v15010_v30, 0.0 }
 0x90a   : > { %1580 = vadd.xlane.f32.xlu1 %v1579_v37  ;;  %v1548_v29 = vpop.xlane.xlu0 %1547  ;;  %v1576_v26 = vsel %vm19041_vm1, %v15012_v25, 0.0  ;;  %v13125_v46 = vunpack.i.h.bf16 %v13123_v58  ;;  %v13124_v23 = vunpack.i.l.bf16 %v13123_v58 }
 0x90b   : > { %1577 = vadd.xlane.f32.xlu0 %v1576_v26  ;;  %13778 = vpow2.f32 %v1568_v56 }
 0x90c   : > { %v12685_v57 = vpack.c.bf16 %v13125_v46, %v13124_v23  ;;  %v1559_v23 = vsub.f32 %v14993_v61, %v1551_v54 }
 0x90d   : > { %v15018_v38 = vpop.eup %13772  ;;  %v13128_v47 = vpop.permute.xlu1 %13127 }
 0x90e   : > { %v13118_v42 = vpop.permute.xlu0 %13117  ;;  %v1585_v44 = vsel %vm19041_vm1, %v15018_v38, 0.0  ;;  %v13130_v24 = vunpack.i.h.bf16 %v13128_v47  ;;  %v13129_v21 = vunpack.i.l.bf16 %v13128_v47 }
 0x90f   : > { %v13120_v43 = vunpack.i.h.bf16 %v13118_v42  ;;  %v13119_v10 = vunpack.i.l.bf16 %v13118_v42  ;;  %1586 = vadd.xlane.f32.xlu1 %v1585_v44 }
 0x910   : > { %v12689_v58 = vpack.c.bf16 %v13130_v24, %v13129_v21 }
 0x911   : > { %v15022_v22 = vpop.eup %13774  ;;  %v12681_v14 = vpack.c.bf16 %v13120_v43, %v13119_v10  ;;  %v13133_v31 = vpop.permute.xlu1 %13132  ;;  %v1574_v43 = vmul.f32 1.442695, %v1559_v23  ;;  %v1558_v10 = vsub.f32 %v14997_v32, %v1548_v29 }
 0x912   : > { %v1582_v35 = vsel %vm19041_vm1, %v15022_v22, 0.0  ;;  %v15026_v17 = vpop.eup %13776  ;;  %v13135_v11 = vunpack.i.h.bf16 %v13133_v31  ;;  %v13134_v56 = vunpack.i.l.bf16 %v13133_v31  ;;  %v13138_v37 = vpop.permute.xlu0 %13137 }
 0x913   : > { %1583 = vadd.xlane.f32.xlu0 %v1582_v35  ;;  %12682 = vmatprep.subr.bf16.mxu1 %v12681_v14  ;;  %v1591_v45 = vsel %vm19041_vm1, %v15026_v17, 0.0  ;;  %v13140_v47 = vunpack.i.h.bf16 %v13138_v37  ;;  %v13139_v42 = vunpack.i.l.bf16 %v13138_v37  ;;  %13780 = vpow2.f32 %v1574_v43 }
 0x914   : > { %12684 = vmatpush3.bf16.msra.mxu1 %v12681_v14  ;;  %v12693_v44 = vpack.c.bf16 %v13135_v11, %v13134_v56  ;;  %v1572_v14 = vmul.f32 1.442695, %v1558_v10 }
 0x915   : > { %12686 = vmatprep.subr.bf16.mxu1 %v12685_v57  ;;  %v15030_v5 = vpop.eup %13778  ;;  %v12697_v46 = vpack.c.bf16 %v13140_v47, %v13139_v42  ;;  %v13143_v35 = vpop.permute.xlu1 %13142 }
 0x916   : > { %v1588_v26 = vsel %vm19041_vm1, %v15030_v5, 0.0  ;;  %13782 = vpow2.f32 %v1572_v14  ;;  %v13145_v56 = vunpack.i.h.bf16 %v13143_v35 }
 0x917   : > { %1592 = vadd.xlane.f32.xlu0 %v1591_v45 }
 0x918   : > { %12688 = vmatpush3.bf16.msra.mxu1 %v12685_v57 }
 0x919   : > { %12690 = vmatprep.subr.bf16.mxu1 %v12689_v58 }
 0x91b   : > { %1589 = vadd.xlane.f32.xlu0 %v1588_v26 }
 0x91c   : > { %12692 = vmatpush3.bf16.msra.mxu1 %v12689_v58  ;;  %v13144_v58 = vunpack.i.l.bf16 %v13143_v35 }
 0x91d   : > { %12694 = vmatprep.subr.bf16.mxu1 %v12693_v44  ;;  %v15048_v61 = vpop.eup %13780 }
 0x91e   : > { %v1597_v32 = vsel %vm19041_vm1, %v15048_v61, 0.0  ;;  %v12703_v42 = vpack.c.bf16 %v13145_v56, %v13144_v58 }
 0x920   : > { %13152 = vrot.lane.b32.xlu1 %v14816_v53, %s18920_s24  ;;  %12696 = vmatpush3.bf16.msra.mxu1 %v12693_v44  ;;  %v15054_v54 = vpop.eup %13782 }
 0x921   : > { %12699 = vmatprep.subr.msk.bf16.mxu1 %vm14822_vm5, %v12697_v46  ;;  %v1594_v29 = vsel %vm19041_vm1, %v15054_v54, 0.0 }
 0x931   : > { %13147 = vrot.lane.b32.xlu0 %v14808_v51, %s18920_s24  ;;  %s18923_s24 = smov 76  }
 0x935   : > { %1769 = vrot.lane.b32.xlu0 %v14778_v33, %s18951_s29 }
 0x939   : > { %1773 = vrot.lane.b32.xlu0 %v14780_v34, %s18951_s29 }
 0x93d   : > { %1777 = vrot.lane.b32.xlu0 %v14800_v48, %s18951_s29 }
 0x941   : > { %1781 = vrot.lane.b32.xlu0 %v14810_v52, %s18951_s29 }
 0x944   : > { %1598 = vadd.xlane.f32.xlu1 %v1597_v32 }
 0x948   : > { %1595 = vadd.xlane.f32.xlu1 %v1594_v29 }
 0x959   : > { %1771 = vrot.lane.b32.xlu1 %v14784_v39, %s18951_s29 }
 0x95d   : > { %1775 = vrot.lane.b32.xlu1 %v14782_v36, %s18951_s29 }
 0x961   : > { %1779 = vrot.lane.b32.xlu1 %v14802_v49, %s18951_s29 }
 0x965   : > { %1783 = vrot.lane.b32.xlu1 %v14804_v50, %s18951_s29  ;;  %s18966_s29 = smov 24  }
 0x997   : > { %v1581_v24 = vpop.xlane.xlu1 %1580 }
 0x998   : > { %13784 = vrcp.f32 %v1581_v24  ;;  %v1578_v21 = vpop.xlane.xlu0 %1577 }
 0x999   : > { %13786 = vrcp.f32 %v1578_v21 }
 0x99c   : > { %v1587_v57 = vpop.xlane.xlu1 %1586 }
 0x99d   : > { %13788 = vrcp.f32 %v1587_v57 }
 0x9a0   : > { %v1584_v31 = vpop.xlane.xlu0 %1583 }
 0x9a1   : > { %13790 = vrcp.f32 %v1584_v31 }
 0x9a2   : > { %v13785_v45 = vpop.eup %13784 }
 0x9a3   : > { %v13787_v11 = vpop.eup %13786  ;;  %v1609_v47 = vmul.f32 %v13785_v45, %v15010_v30 }
 0x9a4   : > { %v1593_v37 = vpop.xlane.xlu0 %1592  ;;  %v1608_v26 = vmul.f32 %v13787_v11, %v15012_v25 }
 0x9a5   : > { %13792 = vrcp.f32 %v1593_v37 }
 0x9a6   : > { %11873 = vmatprep.mubr.msk.f32.mxu1 %vm19041_vm1, %v1608_v26 }
 0x9a7   : > { %11874 = vmatmul.mubr.msk.f32.vlgmr.msra.gmra.mrb[16].mxu1 %vm19041_vm1, %v1609_v47  ;;  %v13789_v23 = vpop.eup %13788 }
 0x9a8   : > { %12702 = vmatpush3.bf16.xpose.msk.msra.mxu1 %vm14822_vm5, %v12697_v46  ;;  %v1590_v44 = vpop.xlane.xlu0 %1589  ;;  %v1611_v32 = vmul.f32 %v13789_v23, %v15018_v38  ;;  %v13153_v46 = vpop.permute.xlu1 %13152 }
 0x9a9   : > { %13794 = vrcp.f32 %v1590_v44  ;;  %12705 = vmatprep.subr.msk.bf16.mxu1 %vm14822_vm5, %v12703_v42  ;;  %v13155_v21 = vunpack.i.h.bf16 %v13153_v46 }
 0x9ab   : > { %v13791_v43 = vpop.eup %13790 }
 0x9ac   : > { %v13148_v10 = vpop.permute.xlu0 %13147  ;;  %v1610_v25 = vmul.f32 %v13791_v43, %v15022_v22  ;;  %v13154_v22 = vunpack.i.l.bf16 %v13153_v46 }
 0x9ad   : > { %v13150_v30 = vunpack.i.h.bf16 %v13148_v10  ;;  %v13149_v14 = vunpack.i.l.bf16 %v13148_v10 }
 0x9ae   : > { %11876 = vmatprep.mubr.msk.f32.mxu1 %vm19041_vm1, %v1610_v25  ;;  %v12715_v31 = vpack.c.bf16 %v13155_v21, %v13154_v22 }
 0x9af   : > { %v12709_v29 = vpack.c.bf16 %v13150_v30, %v13149_v14  ;;  %11877 = vmatmul.mubr.msk.f32.gmra.mrb[18].mxu1 %vm19041_vm1, %v1611_v32  ;;  %v13793_v35 = vpop.eup %13792 }
 0x9b0   : > { %12708 = vmatpush3.bf16.xpose.msk.msra.mxu1 %vm14822_vm5, %v12703_v42  ;;  %v1613_v38 = vmul.f32 %v13793_v35, %v15026_v17 }
 0x9b1   : > { %12711 = vmatprep.subr.msk.bf16.mxu1 %vm14822_vm5, %v12709_v29 }
 0x9b3   : > { %v13795_v24 = vpop.eup %13794 }
 0x9b4   : > { %v1612_v57 = vmul.f32 %v13795_v24, %v15030_v5  ;;  %v1770_v5 = vpop.permute.xlu0 %1769 }
 0x9b6   : > { %11879 = vmatprep.mubr.msk.f32.mxu1 %vm19041_vm1, %v1612_v57 }
 0x9b7   : > { %11880 = vmatmul.mubr.msk.f32.gmra.mrb[20].mxu1 %vm19041_vm1, %v1613_v38 }
 0x9b8   : > { %12714 = vmatpush3.bf16.xpose.msk.msra.mxu1 %vm14822_vm5, %v12709_v29  ;;  %v1774_v47 = vpop.permute.xlu0 %1773 }
 0x9b9   : > { %12717 = vmatprep.subr.msk.bf16.mxu1 %vm14822_vm5, %v12715_v31 }
 0x9bc   : > { %v1778_v44 = vpop.permute.xlu0 %1777 }
 0x9c0   : > { %12720 = vmatpush3.bf16.xpose.msk.msra.mxu1 %vm14822_vm5, %v12715_v31 }
 0x9d1   : > { %v1599_v45 = vpop.xlane.xlu1 %1598 }
 0x9d2   : > { %13796 = vrcp.f32 %v1599_v45 }
 0x9d5   : > { %v1596_v11 = vpop.xlane.xlu1 %1595 }
 0x9d6   : > { %13798 = vrcp.f32 %v1596_v11 }
 0x9d9   : > { %v1772_v58 = vpop.permute.xlu1 %1771 }
 0x9dc   : > { %v13797_v17 = vpop.eup %13796 }
 0x9dd   : > { %v1615_v26 = vmul.f32 %v13797_v17, %v15048_v61  ;;  %v1776_v42 = vpop.permute.xlu1 %1775 }
 0x9e0   : > { %v13799_v56 = vpop.eup %13798 }
 0x9e1   : > { %v1614_v37 = vmul.f32 %v13799_v56, %v15054_v54  ;;  %v1780_v23 = vpop.permute.xlu1 %1779  ;;  %v1782_v54 = vpop.permute.xlu0 %1781 }
 0x9e3   : > { %11882 = vmatprep.mubr.msk.f32.mxu1 %vm19041_vm1, %v1614_v37 }
 0x9e4   : > { %11883 = vmatmul.mubr.msk.f32.gmra.mrb[22].mxu1 %vm19041_vm1, %v1615_v26 }
 0x9e5   : > { %11901 = vmatprep.mubr.msk.f32.mxu1 %vm964_vm4, %v1770_v5  ;;  %v1784_v61 = vpop.permute.xlu1 %1783 }
 0x9e8   : > { %11902 = vmatmul.mubr.msk.f32.vlgmr.msra.gmra.mrb[24].mxu1 %vm964_vm4, %v1772_v58 }
 0x9e9   : > { %11904 = vmatprep.mubr.msk.f32.mxu1 %vm964_vm4, %v1774_v47 }
 0x9ec   : > { %11905 = vmatmul.mubr.msk.f32.gmra.mrb[26].mxu1 %vm964_vm4, %v1776_v42 }
 0x9ed   : > { %11907 = vmatprep.mubr.msk.f32.mxu1 %vm964_vm4, %v1778_v44 }
 0x9f0   : > { %11908 = vmatmul.mubr.msk.f32.gmra.mrb[28].mxu1 %vm964_vm4, %v1780_v23 }
 0x9f1   : > { %11910 = vmatprep.mubr.msk.f32.mxu1 %vm964_vm4, %v1782_v54 }
 0x9f4   : > { %11911 = vmatmul.mubr.msk.f32.gmra.mrb[30].mxu1 %vm964_vm4, %v1784_v61 }
 0xa7a   : > { %v15104_v43 = vpop.f32.mrb[16].mxu1 }
 0xa7b   : > { %v15106_v10 = vpop.f32.mrb[17].mxu1 }
 0xa82   : > { %v15110_v30 = vpop.f32.mrb[18].mxu1 }
 0xa83   : > { %v15112_v14 = vpop.f32.mrb[19].mxu1 }
 0xa8a   : > { %v15116_v29 = vpop.f32.mrb[20].mxu1 }
 0xa8b   : > { %v15118_v46 = vpop.f32.mrb[21].mxu1 }
 0xab7   : > { %v15122_v24 = vpop.f32.mrb[22].mxu1 }
 0xab8   : > { %v15124_v21 = vpop.f32.mrb[23].mxu1 }
 0xabb   : > { %v11903_v57 = vpop.f32.mrb[24].mxu1 }
 0xabc   : > { %v1939_v38 = vmul.f32 0.5, %v11903_v57  ;;  %v1899_v31 = vpop.f32.mrb[25].mxu1 }
 0xabd   : > { %v1938_v45 = vmul.f32 0.5, %v1899_v31 }
 0xabe   : > { %v1949_v11 = vsel %vm19041_vm1, %v1939_v38, -inf }
 0xabf   : > { %1950 = vmax.xlane.f32.xlu1 %v1949_v11  ;;  %v11906_v5 = vpop.f32.mrb[26].mxu1  ;;  %v1946_v17 = vsel %vm19041_vm1, %v1938_v45, -inf }
 0xac0   : > { %v1941_v56 = vmul.f32 0.5, %v11906_v5  ;;  %1947 = vmax.xlane.f32.xlu0 %v1946_v17  ;;  %v1909_v58 = vpop.f32.mrb[27].mxu1 }
 0xac1   : > { %v1940_v26 = vmul.f32 0.5, %v1909_v58 }
 0xac2   : > { %v1955_v37 = vsel %vm19041_vm1, %v1941_v56, -inf }
 0xac3   : > { %v11909_v47 = vpop.f32.mrb[28].mxu1  ;;  %v1952_v57 = vsel %vm19041_vm1, %v1940_v26, -inf }
 0xac4   : > { %v1943_v42 = vmul.f32 0.5, %v11909_v47  ;;  %1956 = vmax.xlane.f32.xlu0 %v1955_v37  ;;  %v1919_v44 = vpop.f32.mrb[29].mxu1 }
 0xac5   : > { %v1942_v54 = vmul.f32 0.5, %v1919_v44 }
 0xac6   : > { %v1961_v23 = vsel %vm19041_vm1, %v1943_v42, -inf }
 0xac7   : > { %1962 = vmax.xlane.f32.xlu1 %v1961_v23  ;;  %v11912_v61 = vpop.f32.mrb[30].mxu1  ;;  %v1958_v58 = vsel %vm19041_vm1, %v1942_v54, -inf }
 0xac8   : > { %v15133_v31 = vmul.f32 0.5, %v11912_v61  ;;  %1953 = vmax.xlane.f32.xlu0 %v1952_v57  ;;  %v1929_v11 = vpop.f32.mrb[31].mxu1 }
 0xac9   : > { %v15137_v17 = vmul.f32 0.5, %v1929_v11 }
 0xaca   : > { %v1967_v5 = vsel %vm19041_vm1, %v15133_v31, -inf }
 0xacb   : > { %1968 = vmax.xlane.f32.xlu1 %v1967_v5  ;;  %v1964_v37 = vsel %vm19041_vm1, %v15137_v17, -inf }
 0xacc   : > { %1959 = vmax.xlane.f32.xlu0 %v1958_v58 }
 0xad0   : > { %1965 = vmax.xlane.f32.xlu0 %v1964_v37 }
 0xadc   : > { %13162 = vrot.lane.b32.xlu1 %v14790_v40, %s14430_s13 }
 0xae0   : > { %13167 = vrot.lane.b32.xlu1 %v14808_v51, %s14430_s13 }
 0xae4   : > { %13172 = vrot.lane.b32.xlu1 %v14816_v53, %s14430_s13 }
 0xae6   : > { %13157 = vrot.lane.b32.xlu0 %v14794_v41, %s14430_s13  ;;  %s18949_s13 = smov 116  }
 0xae8   : > { %13182 = vrot.lane.b32.xlu1 %v14790_v40, %s18908_s22 }
 0xaea   : > { %13177 = vrot.lane.b32.xlu0 %v14794_v41, %s18908_s22 }
 0xb4c   : > { %v1951_v47 = vpop.xlane.xlu1 %1950 }
 0xb4d   : > { %v1971_v44 = vsub.f32 %v1939_v38, %v1951_v47  ;;  %v1948_v23 = vpop.xlane.xlu0 %1947 }
 0xb4e   : > { %v1970_v61 = vsub.f32 %v1938_v45, %v1948_v23 }
 0xb4f   : > { %v1980_v57 = vmul.f32 1.442695, %v1971_v44 }
 0xb50   : > { %v1978_v11 = vmul.f32 1.442695, %v1970_v61 }
 0xb51   : > { %13800 = vpow2.f32 %v1980_v57  ;;  %v1957_v5 = vpop.xlane.xlu0 %1956 }
 0xb52   : > { %13802 = vpow2.f32 %v1978_v11  ;;  %v1973_v58 = vsub.f32 %v1941_v56, %v1957_v5 }
 0xb54   : > { %v1984_v37 = vmul.f32 1.442695, %v1973_v58  ;;  %v1963_v15 = vpop.xlane.xlu1 %1962 }
 0xb55   : > { %v1975_v3 = vsub.f32 %v1943_v42, %v1963_v15  ;;  %v1954_v35 = vpop.xlane.xlu0 %1953 }
 0xb56   : > { %13804 = vpow2.f32 %v1984_v37  ;;  %v1972_v22 = vsub.f32 %v1940_v26, %v1954_v35 }
 0xb57   : > { %v1988_v25 = vmul.f32 1.442695, %v1975_v3 }
 0xb58   : > { %v1982_v32 = vmul.f32 1.442695, %v1972_v22  ;;  %v1969_v6 = vpop.xlane.xlu1 %1968 }
 0xb59   : > { %v1960_v55 = vpop.xlane.xlu0 %1959 }
 0xb5a   : > { %13806 = vpow2.f32 %v1982_v32  ;;  %v1974_v38 = vsub.f32 %v1942_v54, %v1960_v55 }
 0xb5b   : > { %v15150_v47 = vpop.eup %13800  ;;  %13808 = vpow2.f32 %v1988_v25 }
 0xb5c   : > { %v15152_v45 = vpop.eup %13802  ;;  %v1986_v44 = vmul.f32 1.442695, %v1974_v38  ;;  %v13163_v23 = vpop.permute.xlu1 %13162  ;;  %v1997_v56 = vsel %vm19041_vm1, %v15150_v47, 0.0 }
 0xb5d   : > { %1998 = vadd.xlane.f32.xlu1 %v1997_v56  ;;  %v1966_v15 = vpop.xlane.xlu0 %1965  ;;  %v1994_v3 = vsel %vm19041_vm1, %v15152_v45, 0.0  ;;  %v13165_v25 = vunpack.i.h.bf16 %v13163_v23  ;;  %v13164_v26 = vunpack.i.l.bf16 %v13163_v23 }
 0xb5e   : > { %1995 = vadd.xlane.f32.xlu0 %v1994_v3  ;;  %13810 = vpow2.f32 %v1986_v44 }
 0xb5f   : > { %v12725_v38 = vpack.c.bf16 %v13165_v25, %v13164_v26 }
 0xb60   : > { %v15158_v35 = vpop.eup %13804  ;;  %v13168_v55 = vpop.permute.xlu1 %13167 }
 0xb61   : > { %v13158_v32 = vpop.permute.xlu0 %13157  ;;  %v2003_v22 = vsel %vm19041_vm1, %v15158_v35, 0.0  ;;  %v13170_v58 = vunpack.i.h.bf16 %v13168_v55  ;;  %v13169_v37 = vunpack.i.l.bf16 %v13168_v55 }
 0xb62   : > { %v13160_v42 = vunpack.i.h.bf16 %v13158_v32  ;;  %v13159_v54 = vunpack.i.l.bf16 %v13158_v32  ;;  %2004 = vadd.xlane.f32.xlu1 %v2003_v22 }
 0xb63   : > { %v12729_v22 = vpack.c.bf16 %v13170_v58, %v13169_v37  ;;  %v1976_v37 = vsub.f32 %v15137_v17, %v1966_v15 }
 0xb64   : > { %v15162_v61 = vpop.eup %13806  ;;  %v12721_v57 = vpack.c.bf16 %v13160_v42, %v13159_v54  ;;  %v13173_v44 = vpop.permute.xlu1 %13172 }
 0xb65   : > { %v2000_v11 = vsel %vm19041_vm1, %v15162_v61, 0.0  ;;  %v15166_v5 = vpop.eup %13808  ;;  %v13175_v3 = vunpack.i.h.bf16 %v13173_v44  ;;  %v13174_v32 = vunpack.i.l.bf16 %v13173_v44  ;;  %v13178_v42 = vpop.permute.xlu0 %13177 }
 0xb66   : > { %2001 = vadd.xlane.f32.xlu0 %v2000_v11  ;;  %12722 = vmatprep.subr.bf16.mxu0 %v12721_v57  ;;  %v2009_v23 = vsel %vm19041_vm1, %v15166_v5, 0.0  ;;  %v13180_v54 = vunpack.i.h.bf16 %v13178_v42  ;;  %v13179_v25 = vunpack.i.l.bf16 %v13178_v42  ;;  %v1977_v11 = vsub.f32 %v15133_v31, %v1969_v6 }
 0xb67   : > { %12724 = vmatpush3.bf16.msra.mxu0 %v12721_v57  ;;  %v12733_v26 = vpack.c.bf16 %v13175_v3, %v13174_v32 }
 0xb68   : > { %12726 = vmatprep.subr.bf16.mxu0 %v12725_v38  ;;  %v15170_v56 = vpop.eup %13810  ;;  %v12737_v57 = vpack.c.bf16 %v13180_v54, %v13179_v25  ;;  %v1992_v58 = vmul.f32 1.442695, %v1977_v11  ;;  %v13183_v44 = vpop.permute.xlu1 %13182 }
 0xb69   : > { %v2006_v55 = vsel %vm19041_vm1, %v15170_v56, 0.0  ;;  %v13185_v54 = vunpack.i.h.bf16 %v13183_v44  ;;  %v13184_v25 = vunpack.i.l.bf16 %v13183_v44 }
 0xb6a   : > { %2010 = vadd.xlane.f32.xlu0 %v2009_v23  ;;  %13812 = vpow2.f32 %v1992_v58 }
 0xb6b   : > { %12728 = vmatpush3.bf16.msra.mxu0 %v12725_v38  ;;  %v1990_v38 = vmul.f32 1.442695, %v1976_v37  ;;  %v12743_v37 = vpack.c.bf16 %v13185_v54, %v13184_v25 }
 0xb6c   : > { %12730 = vmatprep.subr.bf16.mxu0 %v12729_v22 }
 0xb6d   : > { %13814 = vpow2.f32 %v1990_v38 }
 0xb6e   : > { %2007 = vadd.xlane.f32.xlu0 %v2006_v55 }
 0xb6f   : > { %12732 = vmatpush3.bf16.msra.mxu0 %v12729_v22 }
 0xb70   : > { %12734 = vmatprep.subr.bf16.mxu0 %v12733_v26 }
 0xb73   : > { %13192 = vrot.lane.b32.xlu1 %v14816_v53, %s18908_s22  ;;  %12736 = vmatpush3.bf16.msra.mxu0 %v12733_v26 }
 0xb74   : > { %12739 = vmatprep.subr.msk.bf16.mxu0 %vm14822_vm5, %v12737_v57  ;;  %v15188_v6 = vpop.eup %13812 }
 0xb75   : > { %v2015_v31 = vsel %vm19041_vm1, %v15188_v6, 0.0 }
 0xb77   : > { %v15194_v17 = vpop.eup %13814 }
 0xb78   : > { %v2012_v15 = vsel %vm19041_vm1, %v15194_v17, 0.0 }
 0xb84   : > { %13187 = vrot.lane.b32.xlu0 %v14808_v51, %s18908_s22  ;;  %s18919_s22 = smov 80  }
 0xb88   : > { %2187 = vrot.lane.b32.xlu0 %v14778_v33, %s18949_s13 }
 0xb8c   : > { %2191 = vrot.lane.b32.xlu0 %v14780_v34, %s18949_s13 }
 0xb90   : > { %2195 = vrot.lane.b32.xlu0 %v14800_v48, %s18949_s13 }
 0xb94   : > { %2199 = vrot.lane.b32.xlu0 %v14810_v52, %s18949_s13 }
 0xb97   : > { %2016 = vadd.xlane.f32.xlu1 %v2015_v31 }
 0xb9b   : > { %2013 = vadd.xlane.f32.xlu1 %v2012_v15 }
 0xbac   : > { %2189 = vrot.lane.b32.xlu1 %v14784_v39, %s18949_s13 }
 0xbb0   : > { %2193 = vrot.lane.b32.xlu1 %v14782_v36, %s18949_s13 }
 0xbb4   : > { %2197 = vrot.lane.b32.xlu1 %v14802_v49, %s18949_s13 }
 0xbb8   : > { %2201 = vrot.lane.b32.xlu1 %v14804_v50, %s18949_s13  ;;  %s18953_s13 = smov 20  }
 0xbea   : > { %v1999_v23 = vpop.xlane.xlu1 %1998 }
 0xbeb   : > { %13816 = vrcp.f32 %v1999_v23  ;;  %v1996_v3 = vpop.xlane.xlu0 %1995 }
 0xbec   : > { %13818 = vrcp.f32 %v1996_v3 }
 0xbef   : > { %v2005_v32 = vpop.xlane.xlu1 %2004 }
 0xbf0   : > { %13820 = vrcp.f32 %v2005_v32 }
 0xbf3   : > { %v2002_v22 = vpop.xlane.xlu0 %2001 }
 0xbf4   : > { %13822 = vrcp.f32 %v2002_v22 }
 0xbf5   : > { %v13817_v42 = vpop.eup %13816 }
 0xbf6   : > { %v13819_v55 = vpop.eup %13818  ;;  %v2027_v58 = vmul.f32 %v13817_v42, %v15150_v47 }
 0xbf7   : > { %v2011_v26 = vpop.xlane.xlu0 %2010  ;;  %v2026_v11 = vmul.f32 %v13819_v55, %v15152_v45 }
 0xbf8   : > { %13824 = vrcp.f32 %v2011_v26 }
 0xbf9   : > { %11929 = vmatprep.mubr.msk.f32.mxu0 %vm19041_vm1, %v2026_v11 }
 0xbfa   : > { %11930 = vmatmul.mubr.msk.f32.vlgmr.msra.gmra.mrb[26].mxu0 %vm19041_vm1, %v2027_v58  ;;  %v13821_v31 = vpop.eup %13820 }
 0xbfb   : > { %12742 = vmatpush3.bf16.xpose.msk.msra.mxu0 %vm14822_vm5, %v12737_v57  ;;  %v2008_v38 = vpop.xlane.xlu0 %2007  ;;  %v2029_v3 = vmul.f32 %v13821_v31, %v15158_v35  ;;  %v13193_v57 = vpop.permute.xlu1 %13192 }
 0xbfc   : > { %13826 = vrcp.f32 %v2008_v38  ;;  %12745 = vmatprep.subr.msk.bf16.mxu0 %vm14822_vm5, %v12743_v37  ;;  %v13195_v55 = vunpack.i.h.bf16 %v13193_v57 }
 0xbfe   : > { %v13823_v15 = vpop.eup %13822 }
 0xbff   : > { %v13188_v44 = vpop.permute.xlu0 %13187  ;;  %v2028_v45 = vmul.f32 %v13823_v15, %v15162_v61  ;;  %v13194_v61 = vunpack.i.l.bf16 %v13193_v57 }
 0xc00   : > { %v13190_v47 = vunpack.i.h.bf16 %v13188_v44  ;;  %v13189_v23 = vunpack.i.l.bf16 %v13188_v44 }
 0xc01   : > { %11932 = vmatprep.mubr.msk.f32.mxu0 %vm19041_vm1, %v2028_v45  ;;  %v12755_v25 = vpack.c.bf16 %v13195_v55, %v13194_v61 }
 0xc02   : > { %v12749_v32 = vpack.c.bf16 %v13190_v47, %v13189_v23  ;;  %11933 = vmatmul.mubr.msk.f32.gmra.mrb[28].mxu0 %vm19041_vm1, %v2029_v3  ;;  %v13825_v22 = vpop.eup %13824 }
 0xc03   : > { %12748 = vmatpush3.bf16.xpose.msk.msra.mxu0 %vm14822_vm5, %v12743_v37  ;;  %v2031_v35 = vmul.f32 %v13825_v22, %v15166_v5 }
 0xc04   : > { %12751 = vmatprep.subr.msk.bf16.mxu0 %vm14822_vm5, %v12749_v32 }
 0xc06   : > { %v13827_v42 = vpop.eup %13826 }
 0xc07   : > { %v2030_v54 = vmul.f32 %v13827_v42, %v15170_v56  ;;  %v2188_v56 = vpop.permute.xlu0 %2187 }
 0xc09   : > { %11935 = vmatprep.mubr.msk.f32.mxu0 %vm19041_vm1, %v2030_v54 }
 0xc0a   : > { %11936 = vmatmul.mubr.msk.f32.gmra.mrb[30].mxu0 %vm19041_vm1, %v2031_v35 }
 0xc0b   : > { %12754 = vmatpush3.bf16.xpose.msk.msra.mxu0 %vm14822_vm5, %v12749_v32  ;;  %v2192_v15 = vpop.permute.xlu0 %2191 }
 0xc0c   : > { %12757 = vmatprep.subr.msk.bf16.mxu0 %vm14822_vm5, %v12755_v25 }
 0xc0f   : > { %v2196_v45 = vpop.permute.xlu0 %2195 }
 0xc13   : > { %12760 = vmatpush3.bf16.xpose.msk.msra.mxu0 %vm14822_vm5, %v12755_v25 }
 0xc24   : > { %v2017_v26 = vpop.xlane.xlu1 %2016 }
 0xc25   : > { %13828 = vrcp.f32 %v2017_v26 }
 0xc28   : > { %v2014_v11 = vpop.xlane.xlu1 %2013 }
 0xc29   : > { %13830 = vrcp.f32 %v2014_v11 }
 0xc2c   : > { %v2190_v37 = vpop.permute.xlu1 %2189 }
 0xc2f   : > { %v13829_v5 = vpop.eup %13828 }
 0xc30   : > { %v2033_v31 = vmul.f32 %v13829_v5, %v15188_v6  ;;  %v2194_v44 = vpop.permute.xlu1 %2193 }
 0xc33   : > { %v13831_v58 = vpop.eup %13830 }
 0xc34   : > { %v2032_v38 = vmul.f32 %v13831_v58, %v15194_v17  ;;  %v2198_v47 = vpop.permute.xlu1 %2197  ;;  %v2200_v17 = vpop.permute.xlu0 %2199 }
 0xc36   : > { %11938 = vmatprep.mubr.msk.f32.mxu0 %vm19041_vm1, %v2032_v38 }
 0xc37   : > { %11939 = vmatmul.mubr.msk.f32.gmra.mrb[32].mxu0 %vm19041_vm1, %v2033_v31 }
 0xc38   : > { %11957 = vmatprep.mubr.msk.f32.mxu0 %vm964_vm4, %v2188_v56  ;;  %v2202_v6 = vpop.permute.xlu1 %2201 }
 0xc3b   : > { %11958 = vmatmul.mubr.msk.f32.vlgmr.msra.gmra.mrb[34].mxu0 %vm964_vm4, %v2190_v37 }
 0xc3c   : > { %11960 = vmatprep.mubr.msk.f32.mxu0 %vm964_vm4, %v2192_v15 }
 0xc3f   : > { %11961 = vmatmul.mubr.msk.f32.gmra.mrb[36].mxu0 %vm964_vm4, %v2194_v44 }
 0xc40   : > { %11963 = vmatprep.mubr.msk.f32.mxu0 %vm964_vm4, %v2196_v45 }
 0xc43   : > { %11964 = vmatmul.mubr.msk.f32.gmra.mrb[38].mxu0 %vm964_vm4, %v2198_v47 }
 0xc44   : > { %11966 = vmatprep.mubr.msk.f32.mxu0 %vm964_vm4, %v2200_v17 }
 0xc47   : > { %11967 = vmatmul.mubr.msk.f32.gmra.mrb[40].mxu0 %vm964_vm4, %v2202_v6 }
 0xccd   : > { %v15244_v23 = vpop.f32.mrb[26].mxu0 }
 0xcce   : > { %v15246_v3 = vpop.f32.mrb[27].mxu0 }
 0xcd5   : > { %v15250_v57 = vpop.f32.mrb[28].mxu0 }
 0xcd6   : > { %v15252_v22 = vpop.f32.mrb[29].mxu0 }
 0xcdd   : > { %v15256_v55 = vpop.f32.mrb[30].mxu0 }
 0xcde   : > { %19073 = vst [vmem:[#allocation24_spill] sm:$0xff] %v15256_v55  ;;  %v15258_v61 = vpop.f32.mrb[31].mxu0 }
 0xcdf   : > { %19074 = vst [vmem:[#allocation25_spill] sm:$0xff] %v15258_v61 }
 0xd0a   : > { %v15262_v35 = vpop.f32.mrb[32].mxu0 }
 0xd0b   : > { %v15264_v25 = vpop.f32.mrb[33].mxu0 }
 0xd0e   : > { %v11959_v11 = vpop.f32.mrb[34].mxu0 }
 0xd0f   : > { %v2357_v56 = vmul.f32 0.5, %v11959_v11  ;;  %v2317_v5 = vpop.f32.mrb[35].mxu0 }
 0xd10   : > { %v2356_v58 = vmul.f32 0.5, %v2317_v5 }
 0xd11   : > { %v2367_v37 = vsel %vm19041_vm1, %v2357_v56, -inf }
 0xd12   : > { %2368 = vmax.xlane.f32.xlu1 %v2367_v37  ;;  %v11962_v38 = vpop.f32.mrb[36].mxu0  ;;  %v2364_v31 = vsel %vm19041_vm1, %v2356_v58, -inf }
 0xd13   : > { %v2359_v15 = vmul.f32 0.5, %v11962_v38  ;;  %2365 = vmax.xlane.f32.xlu0 %v2364_v31  ;;  %v2327_v44 = vpop.f32.mrb[37].mxu0 }
 0xd14   : > { %v2358_v47 = vmul.f32 0.5, %v2327_v44 }
 0xd15   : > { %v2373_v45 = vsel %vm19041_vm1, %v2359_v15, -inf }
 0xd16   : > { %v11965_v17 = vpop.f32.mrb[38].mxu0  ;;  %v2370_v37 = vsel %vm19041_vm1, %v2358_v47, -inf }
 0xd17   : > { %v2361_v6 = vmul.f32 0.5, %v11965_v17  ;;  %2374 = vmax.xlane.f32.xlu0 %v2373_v45  ;;  %v2337_v54 = vpop.f32.mrb[39].mxu0 }
 0xd18   : > { %v2360_v26 = vmul.f32 0.5, %v2337_v54 }
 0xd19   : > { %v2379_v11 = vsel %vm19041_vm1, %v2361_v6, -inf }
 0xd1a   : > { %2380 = vmax.xlane.f32.xlu1 %v2379_v11  ;;  %v11968_v5 = vpop.f32.mrb[40].mxu0  ;;  %v2376_v44 = vsel %vm19041_vm1, %v2360_v26, -inf }
 0xd1b   : > { %v15273_v32 = vmul.f32 0.5, %v11968_v5  ;;  %2371 = vmax.xlane.f32.xlu0 %v2370_v37  ;;  %v2347_v38 = vpop.f32.mrb[41].mxu0 }
 0xd1c   : > { %v15277_v42 = vmul.f32 0.5, %v2347_v38 }
 0xd1d   : > { %v2385_v31 = vsel %vm19041_vm1, %v15273_v32, -inf }
 0xd1e   : > { %2386 = vmax.xlane.f32.xlu1 %v2385_v31  ;;  %v2382_v54 = vsel %vm19041_vm1, %v15277_v42, -inf }
 0xd1f   : > { %2377 = vmax.xlane.f32.xlu0 %v2376_v44 }
 0xd23   : > { %2383 = vmax.xlane.f32.xlu0 %v2382_v54 }
 0xd2f   : > { %13202 = vrot.lane.b32.xlu1 %v14790_v40, %s14433_s12 }
 0xd33   : > { %13207 = vrot.lane.b32.xlu1 %v14808_v51, %s14433_s12 }
 0xd37   : > { %13212 = vrot.lane.b32.xlu1 %v14816_v53, %s14433_s12 }
 0xd39   : > { %13197 = vrot.lane.b32.xlu0 %v14794_v41, %s14433_s12  ;;  %s18947_s12 = smov 112  }
 0xd3b   : > { %13222 = vrot.lane.b32.xlu1 %v14790_v40, %s18919_s22 }
 0xd3d   : > { %13217 = vrot.lane.b32.xlu0 %v14794_v41, %s18919_s22 }
 0xd9f   : > { %v2369_v45 = vpop.xlane.xlu1 %2368 }
 0xda0   : > { %v2389_v17 = vsub.f32 %v2357_v56, %v2369_v45  ;;  %v2366_v11 = vpop.xlane.xlu0 %2365 }
 0xda1   : > { %v2388_v5 = vsub.f32 %v2356_v58, %v2366_v11 }
 0xda2   : > { %v2398_v37 = vmul.f32 1.442695, %v2389_v17 }
 0xda3   : > { %v2396_v38 = vmul.f32 1.442695, %v2388_v5 }
 0xda4   : > { %13832 = vpow2.f32 %v2398_v37  ;;  %v2375_v31 = vpop.xlane.xlu0 %2374 }
 0xda5   : > { %13834 = vpow2.f32 %v2396_v38  ;;  %v2391_v44 = vsub.f32 %v2359_v15, %v2375_v31 }
 0xda7   : > { %v2402_v54 = vmul.f32 1.442695, %v2391_v44  ;;  %v2381_v18 = vpop.xlane.xlu1 %2380 }
 0xda8   : > { %v2393_v16 = vsub.f32 %v2361_v6, %v2381_v18  ;;  %v2372_v12 = vpop.xlane.xlu0 %2371 }
 0xda9   : > { %13836 = vpow2.f32 %v2402_v54  ;;  %v2390_v19 = vsub.f32 %v2358_v47, %v2372_v12 }
 0xdaa   : > { %v2406_v13 = vmul.f32 1.442695, %v2393_v16 }
 0xdab   : > { %v2400_v20 = vmul.f32 1.442695, %v2390_v19  ;;  %v2387_v2 = vpop.xlane.xlu1 %2386 }
 0xdac   : > { %v2378_v8 = vpop.xlane.xlu0 %2377 }
 0xdad   : > { %13838 = vpow2.f32 %v2400_v20  ;;  %v2392_v56 = vsub.f32 %v2360_v26, %v2378_v8 }
 0xdae   : > { %v15290_v45 = vpop.eup %13832  ;;  %13840 = vpow2.f32 %v2406_v13 }
 0xdaf   : > { %v15292_v58 = vpop.eup %13834  ;;  %v2404_v17 = vmul.f32 1.442695, %v2392_v56  ;;  %v13203_v11 = vpop.permute.xlu1 %13202  ;;  %v2415_v15 = vsel %vm19041_vm1, %v15290_v45, 0.0 }
 0xdb0   : > { %2416 = vadd.xlane.f32.xlu1 %v2415_v15  ;;  %v2384_v18 = vpop.xlane.xlu0 %2383  ;;  %v2412_v16 = vsel %vm19041_vm1, %v15292_v58, 0.0  ;;  %v13205_v13 = vunpack.i.h.bf16 %v13203_v11  ;;  %v13204_v26 = vunpack.i.l.bf16 %v13203_v11 }
 0xdb1   : > { %2413 = vadd.xlane.f32.xlu0 %v2412_v16  ;;  %13842 = vpow2.f32 %v2404_v17 }
 0xdb2   : > { %v12765_v56 = vpack.c.bf16 %v13205_v13, %v13204_v26 }
 0xdb3   : > { %v15298_v12 = vpop.eup %13836  ;;  %v13208_v8 = vpop.permute.xlu1 %13207 }
 0xdb4   : > { %v13198_v19 = vpop.permute.xlu0 %13197  ;;  %v2421_v20 = vsel %vm19041_vm1, %v15298_v12, 0.0  ;;  %v13210_v44 = vunpack.i.h.bf16 %v13208_v8  ;;  %v13209_v54 = vunpack.i.l.bf16 %v13208_v8 }
 0xdb5   : > { %v13200_v47 = vunpack.i.h.bf16 %v13198_v19  ;;  %v13199_v6 = vunpack.i.l.bf16 %v13198_v19  ;;  %2422 = vadd.xlane.f32.xlu1 %v2421_v20 }
 0xdb6   : > { %v12769_v20 = vpack.c.bf16 %v13210_v44, %v13209_v54  ;;  %v2394_v54 = vsub.f32 %v15277_v42, %v2384_v18 }
 0xdb7   : > { %v15302_v5 = vpop.eup %13838  ;;  %v12761_v37 = vpack.c.bf16 %v13200_v47, %v13199_v6  ;;  %v13213_v17 = vpop.permute.xlu1 %13212 }
 0xdb8   : > { %v2418_v38 = vsel %vm19041_vm1, %v15302_v5, 0.0  ;;  %v15306_v31 = vpop.eup %13840  ;;  %v13215_v16 = vunpack.i.h.bf16 %v13213_v17  ;;  %v13214_v19 = vunpack.i.l.bf16 %v13213_v17  ;;  %v13218_v47 = vpop.permute.xlu0 %13217 }
 0xdb9   : > { %2419 = vadd.xlane.f32.xlu0 %v2418_v38  ;;  %12762 = vmatprep.subr.bf16.mxu1 %v12761_v37  ;;  %v2427_v11 = vsel %vm19041_vm1, %v15306_v31, 0.0  ;;  %v13220_v6 = vunpack.i.h.bf16 %v13218_v47  ;;  %v13219_v13 = vunpack.i.l.bf16 %v13218_v47  ;;  %v2395_v38 = vsub.f32 %v15273_v32, %v2387_v2 }
 0xdba   : > { %12764 = vmatpush3.bf16.msra.mxu1 %v12761_v37  ;;  %v12773_v26 = vpack.c.bf16 %v13215_v16, %v13214_v19 }
 0xdbb   : > { %12766 = vmatprep.subr.bf16.mxu1 %v12765_v56  ;;  %v15310_v15 = vpop.eup %13842  ;;  %v12777_v37 = vpack.c.bf16 %v13220_v6, %v13219_v13  ;;  %v2410_v44 = vmul.f32 1.442695, %v2395_v38  ;;  %v13223_v17 = vpop.permute.xlu1 %13222 }
 0xdbc   : > { %v2424_v8 = vsel %vm19041_vm1, %v15310_v15, 0.0  ;;  %v13225_v6 = vunpack.i.h.bf16 %v13223_v17  ;;  %v13224_v13 = vunpack.i.l.bf16 %v13223_v17 }
 0xdbd   : > { %2428 = vadd.xlane.f32.xlu0 %v2427_v11  ;;  %13844 = vpow2.f32 %v2410_v44 }
 0xdbe   : > { %12768 = vmatpush3.bf16.msra.mxu1 %v12765_v56  ;;  %v2408_v56 = vmul.f32 1.442695, %v2394_v54  ;;  %v12783_v54 = vpack.c.bf16 %v13225_v6, %v13224_v13 }
 0xdbf   : > { %12770 = vmatprep.subr.bf16.mxu1 %v12769_v20 }
 0xdc0   : > { %13846 = vpow2.f32 %v2408_v56 }
 0xdc1   : > { %2425 = vadd.xlane.f32.xlu0 %v2424_v8 }
 0xdc2   : > { %12772 = vmatpush3.bf16.msra.mxu1 %v12769_v20 }
 0xdc3   : > { %12774 = vmatprep.subr.bf16.mxu1 %v12773_v26 }
 0xdc6   : > { %13232 = vrot.lane.b32.xlu1 %v14816_v53, %s18919_s22  ;;  %12776 = vmatpush3.bf16.msra.mxu1 %v12773_v26 }
 0xdc7   : > { %12779 = vmatprep.subr.msk.bf16.mxu1 %vm14822_vm5, %v12777_v37  ;;  %v15328_v2 = vpop.eup %13844 }
 0xdc8   : > { %v2433_v32 = vsel %vm19041_vm1, %v15328_v2, 0.0 }
 0xdca   : > { %v15334_v42 = vpop.eup %13846 }
 0xdcb   : > { %v2430_v18 = vsel %vm19041_vm1, %v15334_v42, 0.0 }
 0xdd7   : > { %13227 = vrot.lane.b32.xlu0 %v14808_v51, %s18919_s22  ;;  %s14436_s22 = smov 48  }
 0xddb   : > { %2605 = vrot.lane.b32.xlu0 %v14778_v33, %s18947_s12 }
 0xddf   : > { %2609 = vrot.lane.b32.xlu0 %v14780_v34, %s18947_s12 }
 0xde3   : > { %2613 = vrot.lane.b32.xlu0 %v14800_v48, %s18947_s12 }
 0xde7   : > { %2617 = vrot.lane.b32.xlu0 %v14810_v52, %s18947_s12 }
 0xdea   : > { %2434 = vadd.xlane.f32.xlu1 %v2433_v32 }
 0xdee   : > { %2431 = vadd.xlane.f32.xlu1 %v2430_v18 }
 0xdff   : > { %2607 = vrot.lane.b32.xlu1 %v14784_v39, %s18947_s12 }
 0xe03   : > { %2611 = vrot.lane.b32.xlu1 %v14782_v36, %s18947_s12 }
 0xe07   : > { %2615 = vrot.lane.b32.xlu1 %v14802_v49, %s18947_s12 }
 0xe0b   : > { %2619 = vrot.lane.b32.xlu1 %v14804_v50, %s18947_s12  ;;  %s18955_s12 = smov 16  }
 0xe3d   : > { %v2417_v11 = vpop.xlane.xlu1 %2416 }
 0xe3e   : > { %13848 = vrcp.f32 %v2417_v11  ;;  %v2414_v16 = vpop.xlane.xlu0 %2413 }
 0xe3f   : > { %13850 = vrcp.f32 %v2414_v16 }
 0xe42   : > { %v2423_v19 = vpop.xlane.xlu1 %2422 }
 0xe43   : > { %13852 = vrcp.f32 %v2423_v19 }
 0xe46   : > { %v2420_v20 = vpop.xlane.xlu0 %2419 }
 0xe47   : > { %13854 = vrcp.f32 %v2420_v20 }
 0xe48   : > { %v13849_v47 = vpop.eup %13848 }
 0xe49   : > { %v13851_v8 = vpop.eup %13850  ;;  %v2445_v44 = vmul.f32 %v13849_v47, %v15290_v45 }
 0xe4a   : > { %v2429_v26 = vpop.xlane.xlu0 %2428  ;;  %v2444_v38 = vmul.f32 %v13851_v8, %v15292_v58 }
 0xe4b   : > { %13856 = vrcp.f32 %v2429_v26 }
 0xe4c   : > { %11985 = vmatprep.mubr.msk.f32.mxu1 %vm19041_vm1, %v2444_v38 }
 0xe4d   : > { %11986 = vmatmul.mubr.msk.f32.vlgmr.msra.gmra.mrb[32].mxu1 %vm19041_vm1, %v2445_v44  ;;  %v13853_v32 = vpop.eup %13852 }
 0xe4e   : > { %12782 = vmatpush3.bf16.xpose.msk.msra.mxu1 %vm14822_vm5, %v12777_v37  ;;  %v2426_v56 = vpop.xlane.xlu0 %2425  ;;  %v2447_v16 = vmul.f32 %v13853_v32, %v15298_v12  ;;  %v13233_v37 = vpop.permute.xlu1 %13232 }
 0xe4f   : > { %13858 = vrcp.f32 %v2426_v56  ;;  %12785 = vmatprep.subr.msk.bf16.mxu1 %vm14822_vm5, %v12783_v54  ;;  %v13235_v8 = vunpack.i.h.bf16 %v13233_v37 }
 0xe51   : > { %v13855_v18 = vpop.eup %13854 }
 0xe52   : > { %v13228_v17 = vpop.permute.xlu0 %13227  ;;  %v2446_v58 = vmul.f32 %v13855_v18, %v15302_v5  ;;  %v13234_v5 = vunpack.i.l.bf16 %v13233_v37 }
 0xe53   : > { %v13230_v45 = vunpack.i.h.bf16 %v13228_v17  ;;  %v13229_v11 = vunpack.i.l.bf16 %v13228_v17 }
 0xe54   : > { %11988 = vmatprep.mubr.msk.f32.mxu1 %vm19041_vm1, %v2446_v58  ;;  %v12795_v13 = vpack.c.bf16 %v13235_v8, %v13234_v5 }
 0xe55   : > { %v12789_v19 = vpack.c.bf16 %v13230_v45, %v13229_v11  ;;  %11989 = vmatmul.mubr.msk.f32.gmra.mrb[34].mxu1 %vm19041_vm1, %v2447_v16  ;;  %v13857_v20 = vpop.eup %13856 }
 0xe56   : > { %12788 = vmatpush3.bf16.xpose.msk.msra.mxu1 %vm14822_vm5, %v12783_v54  ;;  %v2449_v12 = vmul.f32 %v13857_v20, %v15306_v31 }
 0xe57   : > { %12791 = vmatprep.subr.msk.bf16.mxu1 %vm14822_vm5, %v12789_v19 }
 0xe59   : > { %v13859_v47 = vpop.eup %13858 }
 0xe5a   : > { %v2448_v6 = vmul.f32 %v13859_v47, %v15310_v15  ;;  %v2606_v15 = vpop.permute.xlu0 %2605 }
 0xe5c   : > { %11991 = vmatprep.mubr.msk.f32.mxu1 %vm19041_vm1, %v2448_v6 }
 0xe5d   : > { %11992 = vmatmul.mubr.msk.f32.gmra.mrb[36].mxu1 %vm19041_vm1, %v2449_v12 }
 0xe5e   : > { %12794 = vmatpush3.bf16.xpose.msk.msra.mxu1 %vm14822_vm5, %v12789_v19  ;;  %v2610_v18 = vpop.permute.xlu0 %2609 }
 0xe5f   : > { %12797 = vmatprep.subr.msk.bf16.mxu1 %vm14822_vm5, %v12795_v13 }
 0xe62   : > { %v2614_v58 = vpop.permute.xlu0 %2613 }
 0xe66   : > { %12800 = vmatpush3.bf16.xpose.msk.msra.mxu1 %vm14822_vm5, %v12795_v13 }
 0xe77   : > { %v2435_v26 = vpop.xlane.xlu1 %2434 }
 0xe78   : > { %13860 = vrcp.f32 %v2435_v26 }
 0xe7b   : > { %v2432_v38 = vpop.xlane.xlu1 %2431 }
 0xe7c   : > { %13862 = vrcp.f32 %v2432_v38 }
 0xe7f   : > { %v2608_v54 = vpop.permute.xlu1 %2607 }
 0xe82   : > { %v13861_v31 = vpop.eup %13860 }
 0xe83   : > { %v2451_v32 = vmul.f32 %v13861_v31, %v15328_v2  ;;  %v2612_v17 = vpop.permute.xlu1 %2611 }
 0xe86   : > { %v13863_v44 = vpop.eup %13862 }
 0xe87   : > { %v2450_v56 = vmul.f32 %v13863_v44, %v15334_v42  ;;  %v2616_v45 = vpop.permute.xlu1 %2615  ;;  %v2618_v42 = vpop.permute.xlu0 %2617 }
 0xe89   : > { %11994 = vmatprep.mubr.msk.f32.mxu1 %vm19041_vm1, %v2450_v56 }
 0xe8a   : > { %11995 = vmatmul.mubr.msk.f32.gmra.mrb[38].mxu1 %vm19041_vm1, %v2451_v32 }
 0xe8b   : > { %12013 = vmatprep.mubr.msk.f32.mxu1 %vm964_vm4, %v2606_v15  ;;  %v2620_v2 = vpop.permute.xlu1 %2619 }
 0xe8e   : > { %12014 = vmatmul.mubr.msk.f32.vlgmr.msra.gmra.mrb[40].mxu1 %vm964_vm4, %v2608_v54 }
 0xe8f   : > { %12016 = vmatprep.mubr.msk.f32.mxu1 %vm964_vm4, %v2610_v18 }
 0xe92   : > { %12017 = vmatmul.mubr.msk.f32.gmra.mrb[42].mxu1 %vm964_vm4, %v2612_v17 }
 0xe93   : > { %12019 = vmatprep.mubr.msk.f32.mxu1 %vm964_vm4, %v2614_v58 }
 0xe96   : > { %12020 = vmatmul.mubr.msk.f32.gmra.mrb[44].mxu1 %vm964_vm4, %v2616_v45 }
 0xe97   : > { %12022 = vmatprep.mubr.msk.f32.mxu1 %vm964_vm4, %v2618_v42 }
 0xe9a   : > { %12023 = vmatmul.mubr.msk.f32.gmra.mrb[46].mxu1 %vm964_vm4, %v2620_v2 }
 0xf20   : > { %v15384_v11 = vpop.f32.mrb[32].mxu1 }
 0xf21   : > { %v15386_v16 = vpop.f32.mrb[33].mxu1 }
 0xf28   : > { %v15390_v37 = vpop.f32.mrb[34].mxu1 }
 0xf29   : > { %v15392_v20 = vpop.f32.mrb[35].mxu1 }
 0xf30   : > { %v15396_v8 = vpop.f32.mrb[36].mxu1 }
 0xf31   : > { %19075 = vst [vmem:[#allocation26_spill] sm:$0xff] %v15396_v8  ;;  %v15398_v5 = vpop.f32.mrb[37].mxu1 }
 0xf32   : > { %19076 = vst [vmem:[#allocation27_spill] sm:$0xff] %v15398_v5 }
 0xf5d   : > { %v15402_v12 = vpop.f32.mrb[38].mxu1 }
 0xf5e   : > { %19077 = vst [vmem:[#allocation28_spill] sm:$0xff] %v15402_v12  ;;  %v15404_v13 = vpop.f32.mrb[39].mxu1 }
 0xf5f   : > { %19078 = vst [vmem:[#allocation29_spill] sm:$0xff] %v15404_v13 }
 0xf61   : > { %v12015_v38 = vpop.f32.mrb[40].mxu1 }
 0xf62   : > { %v2775_v15 = vmul.f32 0.5, %v12015_v38  ;;  %v2735_v31 = vpop.f32.mrb[41].mxu1 }
 0xf63   : > { %v2774_v44 = vmul.f32 0.5, %v2735_v31 }
 0xf64   : > { %v2785_v54 = vsel %vm19041_vm1, %v2775_v15, -inf }
 0xf65   : > { %2786 = vmax.xlane.f32.xlu1 %v2785_v54  ;;  %v12018_v56 = vpop.f32.mrb[42].mxu1  ;;  %v2782_v32 = vsel %vm19041_vm1, %v2774_v44, -inf }
 0xf66   : > { %v2777_v18 = vmul.f32 0.5, %v12018_v56  ;;  %2783 = vmax.xlane.f32.xlu0 %v2782_v32  ;;  %v2745_v17 = vpop.f32.mrb[43].mxu1 }
 0xf67   : > { %v2776_v45 = vmul.f32 0.5, %v2745_v17 }
 0xf68   : > { %v2791_v58 = vsel %vm19041_vm1, %v2777_v18, -inf }
 0xf69   : > { %v12021_v42 = vpop.f32.mrb[44].mxu1  ;;  %v2788_v54 = vsel %vm19041_vm1, %v2776_v45, -inf }
 0xf6a   : > { %v2779_v2 = vmul.f32 0.5, %v12021_v42  ;;  %2792 = vmax.xlane.f32.xlu0 %v2791_v58  ;;  %v2755_v6 = vpop.f32.mrb[45].mxu1 }
 0xf6b   : > { %v2778_v26 = vmul.f32 0.5, %v2755_v6 }
 0xf6c   : > { %v2797_v38 = vsel %vm19041_vm1, %v2779_v2, -inf }
 0xf6d   : > { %2798 = vmax.xlane.f32.xlu1 %v2797_v38  ;;  %v12024_v31 = vpop.f32.mrb[46].mxu1  ;;  %v2794_v17 = vsel %vm19041_vm1, %v2778_v26, -inf }
 0xf6e   : > { %v15413_v19 = vmul.f32 0.5, %v12024_v31  ;;  %2789 = vmax.xlane.f32.xlu0 %v2788_v54  ;;  %v2765_v56 = vpop.f32.mrb[47].mxu1 }
 0xf6f   : > { %v15417_v47 = vmul.f32 0.5, %v2765_v56 }
 0xf70   : > { %v2803_v32 = vsel %vm19041_vm1, %v15413_v19, -inf }
 0xf71   : > { %2804 = vmax.xlane.f32.xlu1 %v2803_v32  ;;  %v2800_v6 = vsel %vm19041_vm1, %v15417_v47, -inf }
 0xf72   : > { %2795 = vmax.xlane.f32.xlu0 %v2794_v17 }
 0xf76   : > { %2801 = vmax.xlane.f32.xlu0 %v2800_v6 }
 0xf82   : > { %13242 = vrot.lane.b32.xlu1 %v14790_v40, %s14436_s22 }
 0xf86   : > { %13247 = vrot.lane.b32.xlu1 %v14808_v51, %s14436_s22 }
 0xf8a   : > { %13252 = vrot.lane.b32.xlu1 %v14816_v53, %s14436_s22 }
 0xf8c   : > { %13237 = vrot.lane.b32.xlu0 %v14794_v41, %s14436_s22  ;;  %s18945_s22 = smov 108  }
 0xf8e   : > { %13262 = vrot.lane.b32.xlu1 %v14790_v40, %s18923_s24 }
 0xf90   : > { %13257 = vrot.lane.b32.xlu0 %v14794_v41, %s18923_s24 }
 0xff2   : > { %v2787_v58 = vpop.xlane.xlu1 %2786 }
 0xff3   : > { %v2807_v42 = vsub.f32 %v2775_v15, %v2787_v58  ;;  %v2784_v38 = vpop.xlane.xlu0 %2783 }
 0xff4   : > { %v2806_v31 = vsub.f32 %v2774_v44, %v2784_v38 }
 0xff5   : > { %v2816_v54 = vmul.f32 1.442695, %v2807_v42 }
 0xff6   : > { %v2814_v56 = vmul.f32 1.442695, %v2806_v31 }
 0xff7   : > { %13864 = vpow2.f32 %v2816_v54  ;;  %v2793_v32 = vpop.xlane.xlu0 %2792 }
 0xff8   : > { %13866 = vpow2.f32 %v2814_v56  ;;  %v2809_v17 = vsub.f32 %v2777_v18, %v2793_v32 }
 0xffa   : > { %v2820_v6 = vmul.f32 1.442695, %v2809_v17  ;;  %v2799_v4 = vpop.xlane.xlu1 %2798 }
 0xffb   : > { %v2811_v9 = vsub.f32 %v2779_v2, %v2799_v4  ;;  %v2790_v7 = vpop.xlane.xlu0 %2789 }
 0xffc   : > { %13868 = vpow2.f32 %v2820_v6  ;;  %v2808_v1 = vsub.f32 %v2776_v45, %v2790_v7 }
 0xffd   : > { %v2824_v28 = vmul.f32 1.442695, %v2811_v9 }
 0xffe   : > { %v2818_v0 = vmul.f32 1.442695, %v2808_v1  ;;  %v2805_v63 = vpop.xlane.xlu1 %2804 }
 0xfff   : > { %v2796_v62 = vpop.xlane.xlu0 %2795 }
0x1000   : > { %13870 = vpow2.f32 %v2818_v0  ;;  %v2810_v15 = vsub.f32 %v2778_v26, %v2796_v62 }
0x1001   : > { %v15430_v58 = vpop.eup %13864  ;;  %13872 = vpow2.f32 %v2824_v28 }
0x1002   : > { %v15432_v44 = vpop.eup %13866  ;;  %v2822_v42 = vmul.f32 1.442695, %v2810_v15  ;;  %v13243_v38 = vpop.permute.xlu1 %13242  ;;  %v2833_v18 = vsel %vm19041_vm1, %v15430_v58, 0.0 }
0x1003   : > { %2834 = vadd.xlane.f32.xlu1 %v2833_v18  ;;  %v2802_v4 = vpop.xlane.xlu0 %2801  ;;  %v2830_v9 = vsel %vm19041_vm1, %v15432_v44, 0.0  ;;  %v13245_v28 = vunpack.i.h.bf16 %v13243_v38  ;;  %v13244_v26 = vunpack.i.l.bf16 %v13243_v38 }
0x1004   : > { %2831 = vadd.xlane.f32.xlu0 %v2830_v9  ;;  %13874 = vpow2.f32 %v2822_v42 }
0x1005   : > { %v12805_v15 = vpack.c.bf16 %v13245_v28, %v13244_v26 }
0x1006   : > { %v15438_v1 = vpop.eup %13868  ;;  %v13248_v62 = vpop.permute.xlu1 %13247 }
0x1007   : > { %v13238_v0 = vpop.permute.xlu0 %13237  ;;  %v2839_v7 = vsel %vm19041_vm1, %v15438_v1, 0.0  ;;  %v13250_v17 = vunpack.i.h.bf16 %v13248_v62  ;;  %v13249_v6 = vunpack.i.l.bf16 %v13248_v62 }
0x1008   : > { %v13240_v45 = vunpack.i.h.bf16 %v13238_v0  ;;  %v13239_v2 = vunpack.i.l.bf16 %v13238_v0  ;;  %2840 = vadd.xlane.f32.xlu1 %v2839_v7 }
0x1009   : > { %v12809_v7 = vpack.c.bf16 %v13250_v17, %v13249_v6  ;;  %v2812_v6 = vsub.f32 %v15417_v47, %v2802_v4 }
0x100a   : > { %v15442_v31 = vpop.eup %13870  ;;  %v12801_v54 = vpack.c.bf16 %v13240_v45, %v13239_v2  ;;  %v13253_v42 = vpop.permute.xlu1 %13252 }
0x100b   : > { %v2836_v56 = vsel %vm19041_vm1, %v15442_v31, 0.0  ;;  %v15446_v32 = vpop.eup %13872  ;;  %v13255_v9 = vunpack.i.h.bf16 %v13253_v42  ;;  %v13254_v0 = vunpack.i.l.bf16 %v13253_v42  ;;  %v13258_v45 = vpop.permute.xlu0 %13257 }
0x100c   : > { %2837 = vadd.xlane.f32.xlu0 %v2836_v56  ;;  %12802 = vmatprep.subr.bf16.mxu0 %v12801_v54  ;;  %v2845_v38 = vsel %vm19041_vm1, %v15446_v32, 0.0  ;;  %v13260_v2 = vunpack.i.h.bf16 %v13258_v45  ;;  %v13259_v28 = vunpack.i.l.bf16 %v13258_v45  ;;  %v2813_v56 = vsub.f32 %v15413_v19, %v2805_v63 }
0x100d   : > { %12804 = vmatpush3.bf16.msra.mxu0 %v12801_v54  ;;  %v12813_v26 = vpack.c.bf16 %v13255_v9, %v13254_v0 }
0x100e   : > { %12806 = vmatprep.subr.bf16.mxu0 %v12805_v15  ;;  %v15450_v18 = vpop.eup %13874  ;;  %v12817_v54 = vpack.c.bf16 %v13260_v2, %v13259_v28  ;;  %v2828_v17 = vmul.f32 1.442695, %v2813_v56  ;;  %v13263_v42 = vpop.permute.xlu1 %13262 }
0x100f   : > { %v2842_v62 = vsel %vm19041_vm1, %v15450_v18, 0.0  ;;  %v13265_v2 = vunpack.i.h.bf16 %v13263_v42  ;;  %v13264_v28 = vunpack.i.l.bf16 %v13263_v42 }
0x1010   : > { %2846 = vadd.xlane.f32.xlu0 %v2845_v38  ;;  %13876 = vpow2.f32 %v2828_v17 }
0x1011   : > { %12808 = vmatpush3.bf16.msra.mxu0 %v12805_v15  ;;  %v2826_v15 = vmul.f32 1.442695, %v2812_v6  ;;  %v12823_v6 = vpack.c.bf16 %v13265_v2, %v13264_v28 }
0x1012   : > { %12810 = vmatprep.subr.bf16.mxu0 %v12809_v7 }
0x1013   : > { %13878 = vpow2.f32 %v2826_v15 }
0x1014   : > { %2843 = vadd.xlane.f32.xlu0 %v2842_v62 }
0x1015   : > { %12812 = vmatpush3.bf16.msra.mxu0 %v12809_v7 }
0x1016   : > { %12814 = vmatprep.subr.bf16.mxu0 %v12813_v26 }
0x1019   : > { %13272 = vrot.lane.b32.xlu1 %v14816_v53, %s18923_s24  ;;  %12816 = vmatpush3.bf16.msra.mxu0 %v12813_v26 }
0x101a   : > { %12819 = vmatprep.subr.msk.bf16.mxu0 %vm14822_vm5, %v12817_v54  ;;  %v15468_v63 = vpop.eup %13876 }
0x101b   : > { %v2851_v19 = vsel %vm19041_vm1, %v15468_v63, 0.0 }
0x101d   : > { %v15474_v47 = vpop.eup %13878 }
0x101e   : > { %v2848_v4 = vsel %vm19041_vm1, %v15474_v47, 0.0 }
0x102a   : > { %13267 = vrot.lane.b32.xlu0 %v14808_v51, %s18923_s24  ;;  %s14439_s24 = smov 44  }
0x102e   : > { %3023 = vrot.lane.b32.xlu0 %v14778_v33, %s18945_s22 }
0x1032   : > { %3027 = vrot.lane.b32.xlu0 %v14780_v34, %s18945_s22 }
0x1036   : > { %3031 = vrot.lane.b32.xlu0 %v14800_v48, %s18945_s22 }
0x103a   : > { %3035 = vrot.lane.b32.xlu0 %v14810_v52, %s18945_s22 }
0x103d   : > { %2852 = vadd.xlane.f32.xlu1 %v2851_v19 }
0x1041   : > { %2849 = vadd.xlane.f32.xlu1 %v2848_v4 }
0x1052   : > { %3025 = vrot.lane.b32.xlu1 %v14784_v39, %s18945_s22 }
0x1056   : > { %3029 = vrot.lane.b32.xlu1 %v14782_v36, %s18945_s22 }
0x105a   : > { %3033 = vrot.lane.b32.xlu1 %v14802_v49, %s18945_s22 }
0x105e   : > { %3037 = vrot.lane.b32.xlu1 %v14804_v50, %s18945_s22  ;;  %s18959_s22 = smov 8  }
0x1090   : > { %v2835_v38 = vpop.xlane.xlu1 %2834 }
0x1091   : > { %13880 = vrcp.f32 %v2835_v38  ;;  %v2832_v9 = vpop.xlane.xlu0 %2831 }
0x1092   : > { %13882 = vrcp.f32 %v2832_v9 }
0x1095   : > { %v2841_v0 = vpop.xlane.xlu1 %2840 }
0x1096   : > { %13884 = vrcp.f32 %v2841_v0 }
0x1099   : > { %v2838_v7 = vpop.xlane.xlu0 %2837 }
0x109a   : > { %13886 = vrcp.f32 %v2838_v7 }
0x109b   : > { %v13881_v45 = vpop.eup %13880 }
0x109c   : > { %v13883_v62 = vpop.eup %13882  ;;  %v2863_v17 = vmul.f32 %v13881_v45, %v15430_v58 }
0x109d   : > { %v2847_v26 = vpop.xlane.xlu0 %2846  ;;  %v2862_v56 = vmul.f32 %v13883_v62, %v15432_v44 }
0x109e   : > { %13888 = vrcp.f32 %v2847_v26 }
0x109f   : > { %12041 = vmatprep.mubr.msk.f32.mxu0 %vm19041_vm1, %v2862_v56 }
0x10a0   : > { %12042 = vmatmul.mubr.msk.f32.vlgmr.msra.gmra.mrb[42].mxu0 %vm19041_vm1, %v2863_v17  ;;  %v13885_v19 = vpop.eup %13884 }
0x10a1   : > { %12822 = vmatpush3.bf16.xpose.msk.msra.mxu0 %vm14822_vm5, %v12817_v54  ;;  %v2844_v15 = vpop.xlane.xlu0 %2843  ;;  %v2865_v9 = vmul.f32 %v13885_v19, %v15438_v1  ;;  %v13273_v54 = vpop.permute.xlu1 %13272 }
0x10a2   : > { %13890 = vrcp.f32 %v2844_v15  ;;  %12825 = vmatprep.subr.msk.bf16.mxu0 %vm14822_vm5, %v12823_v6  ;;  %v13275_v62 = vunpack.i.h.bf16 %v13273_v54 }
0x10a4   : > { %v13887_v4 = vpop.eup %13886 }
0x10a5   : > { %v13268_v42 = vpop.permute.xlu0 %13267  ;;  %v2864_v44 = vmul.f32 %v13887_v4, %v15442_v31  ;;  %v13274_v31 = vunpack.i.l.bf16 %v13273_v54 }
0x10a6   : > { %v13270_v58 = vunpack.i.h.bf16 %v13268_v42  ;;  %v13269_v38 = vunpack.i.l.bf16 %v13268_v42 }
0x10a7   : > { %12044 = vmatprep.mubr.msk.f32.mxu0 %vm19041_vm1, %v2864_v44  ;;  %v12835_v28 = vpack.c.bf16 %v13275_v62, %v13274_v31 }
0x10a8   : > { %v12829_v0 = vpack.c.bf16 %v13270_v58, %v13269_v38  ;;  %12045 = vmatmul.mubr.msk.f32.gmra.mrb[44].mxu0 %vm19041_vm1, %v2865_v9  ;;  %v13889_v7 = vpop.eup %13888 }
0x10a9   : > { %12828 = vmatpush3.bf16.xpose.msk.msra.mxu0 %vm14822_vm5, %v12823_v6  ;;  %v2867_v1 = vmul.f32 %v13889_v7, %v15446_v32 }
0x10aa   : > { %12831 = vmatprep.subr.msk.bf16.mxu0 %vm14822_vm5, %v12829_v0 }
0x10ac   : > { %v13891_v45 = vpop.eup %13890 }
0x10ad   : > { %v2866_v2 = vmul.f32 %v13891_v45, %v15450_v18  ;;  %v3024_v18 = vpop.permute.xlu0 %3023 }
0x10af   : > { %12047 = vmatprep.mubr.msk.f32.mxu0 %vm19041_vm1, %v2866_v2 }
0x10b0   : > { %12048 = vmatmul.mubr.msk.f32.gmra.mrb[46].mxu0 %vm19041_vm1, %v2867_v1 }
0x10b1   : > { %12834 = vmatpush3.bf16.xpose.msk.msra.mxu0 %vm14822_vm5, %v12829_v0  ;;  %v3028_v4 = vpop.permute.xlu0 %3027 }
0x10b2   : > { %12837 = vmatprep.subr.msk.bf16.mxu0 %vm14822_vm5, %v12835_v28 }
0x10b5   : > { %v3032_v44 = vpop.permute.xlu0 %3031 }
0x10b9   : > { %12840 = vmatpush3.bf16.xpose.msk.msra.mxu0 %vm14822_vm5, %v12835_v28 }
0x10ca   : > { %v2853_v26 = vpop.xlane.xlu1 %2852 }
0x10cb   : > { %13892 = vrcp.f32 %v2853_v26 }
0x10ce   : > { %v2850_v56 = vpop.xlane.xlu1 %2849 }
0x10cf   : > { %13894 = vrcp.f32 %v2850_v56 }
0x10d2   : > { %v3026_v6 = vpop.permute.xlu1 %3025 }
0x10d5   : > { %v13893_v32 = vpop.eup %13892 }
0x10d6   : > { %v2869_v19 = vmul.f32 %v13893_v32, %v15468_v63  ;;  %v3030_v42 = vpop.permute.xlu1 %3029 }
0x10d9   : > { %v13895_v17 = vpop.eup %13894 }
0x10da   : > { %v2868_v15 = vmul.f32 %v13895_v17, %v15474_v47  ;;  %v3034_v58 = vpop.permute.xlu1 %3033  ;;  %v3036_v47 = vpop.permute.xlu0 %3035 }
0x10dc   : > { %12050 = vmatprep.mubr.msk.f32.mxu0 %vm19041_vm1, %v2868_v15 }
0x10dd   : > { %12051 = vmatmul.mubr.msk.f32.gmra.mrb[48].mxu0 %vm19041_vm1, %v2869_v19 }
0x10de   : > { %12069 = vmatprep.mubr.msk.f32.mxu0 %vm964_vm4, %v3024_v18  ;;  %v3038_v63 = vpop.permute.xlu1 %3037 }
0x10e1   : > { %12070 = vmatmul.mubr.msk.f32.vlgmr.msra.gmra.mrb[50].mxu0 %vm964_vm4, %v3026_v6 }
0x10e2   : > { %12072 = vmatprep.mubr.msk.f32.mxu0 %vm964_vm4, %v3028_v4 }
0x10e5   : > { %12073 = vmatmul.mubr.msk.f32.gmra.mrb[52].mxu0 %vm964_vm4, %v3030_v42 }
0x10e6   : > { %12075 = vmatprep.mubr.msk.f32.mxu0 %vm964_vm4, %v3032_v44 }
0x10e9   : > { %12076 = vmatmul.mubr.msk.f32.gmra.mrb[54].mxu0 %vm964_vm4, %v3034_v58 }
0x10ea   : > { %12078 = vmatprep.mubr.msk.f32.mxu0 %vm964_vm4, %v3036_v47 }
0x10ed   : > { %12079 = vmatmul.mubr.msk.f32.gmra.mrb[56].mxu0 %vm964_vm4, %v3038_v63 }
0x1173   : > { %v15524_v38 = vpop.f32.mrb[42].mxu0 }
0x1174   : > { %v15526_v9 = vpop.f32.mrb[43].mxu0 }
0x117b   : > { %v15530_v54 = vpop.f32.mrb[44].mxu0 }
0x117c   : > { %v15532_v7 = vpop.f32.mrb[45].mxu0 }
0x1183   : > { %v15536_v62 = vpop.f32.mrb[46].mxu0 }
0x1184   : > { %19079 = vst [vmem:[#allocation30_spill] sm:$0xff] %v15536_v62  ;;  %v15538_v31 = vpop.f32.mrb[47].mxu0 }
0x1185   : > { %19080 = vst [vmem:[#allocation31_spill] sm:$0xff] %v15538_v31 }
0x11b0   : > { %v15542_v1 = vpop.f32.mrb[48].mxu0 }
0x11b1   : > { %19081 = vst [vmem:[#allocation32_spill] sm:$0xff] %v15542_v1  ;;  %v15544_v28 = vpop.f32.mrb[49].mxu0 }
0x11b2   : > { %19082 = vst [vmem:[#allocation33_spill] sm:$0xff] %v15544_v28 }
0x11b4   : > { %v12071_v56 = vpop.f32.mrb[50].mxu0 }
0x11b5   : > { %v3193_v18 = vmul.f32 0.5, %v12071_v56  ;;  %v3153_v32 = vpop.f32.mrb[51].mxu0 }
0x11b6   : > { %v3192_v17 = vmul.f32 0.5, %v3153_v32 }
0x11b7   : > { %v3203_v6 = vsel %vm19041_vm1, %v3193_v18, -inf }
0x11b8   : > { %3204 = vmax.xlane.f32.xlu1 %v3203_v6  ;;  %v12074_v15 = vpop.f32.mrb[52].mxu0  ;;  %v3200_v19 = vsel %vm19041_vm1, %v3192_v17, -inf }
0x11b9   : > { %v3195_v4 = vmul.f32 0.5, %v12074_v15  ;;  %3201 = vmax.xlane.f32.xlu0 %v3200_v19  ;;  %v3163_v42 = vpop.f32.mrb[53].mxu0 }
0x11ba   : > { %v3194_v58 = vmul.f32 0.5, %v3163_v42 }
0x11bb   : > { %v3209_v44 = vsel %vm19041_vm1, %v3195_v4, -inf }
0x11bc   : > { %v12077_v47 = vpop.f32.mrb[54].mxu0  ;;  %v3206_v6 = vsel %vm19041_vm1, %v3194_v58, -inf }
0x11bd   : > { %v3197_v63 = vmul.f32 0.5, %v12077_v47  ;;  %3210 = vmax.xlane.f32.xlu0 %v3209_v44  ;;  %v3173_v2 = vpop.f32.mrb[55].mxu0 }
0x11be   : > { %v3196_v26 = vmul.f32 0.5, %v3173_v2 }
0x11bf   : > { %v3215_v56 = vsel %vm19041_vm1, %v3197_v63, -inf }
0x11c0   : > { %3216 = vmax.xlane.f32.xlu1 %v3215_v56  ;;  %v12080_v32 = vpop.f32.mrb[56].mxu0  ;;  %v3212_v42 = vsel %vm19041_vm1, %v3196_v26, -inf }
0x11c1   : > { %v15553_v0 = vmul.f32 0.5, %v12080_v32  ;;  %3207 = vmax.xlane.f32.xlu0 %v3206_v6  ;;  %v3183_v15 = vpop.f32.mrb[57].mxu0 }
0x11c2   : > { %v15557_v45 = vmul.f32 0.5, %v3183_v15 }
0x11c3   : > { %v3221_v19 = vsel %vm19041_vm1, %v15553_v0, -inf }
0x11c4   : > { %3222 = vmax.xlane.f32.xlu1 %v3221_v19  ;;  %v3218_v2 = vsel %vm19041_vm1, %v15557_v45, -inf }
0x11c5   : > { %3213 = vmax.xlane.f32.xlu0 %v3212_v42 }
0x11c9   : > { %3219 = vmax.xlane.f32.xlu0 %v3218_v2 }
0x11d5   : > { %13282 = vrot.lane.b32.xlu1 %v14790_v40, %s14439_s24 }
0x11d9   : > { %13287 = vrot.lane.b32.xlu1 %v14808_v51, %s14439_s24 }
0x11dd   : > { %13292 = vrot.lane.b32.xlu1 %v14816_v53, %s14439_s24 }
0x11df   : > { %13277 = vrot.lane.b32.xlu0 %v14794_v41, %s14439_s24  ;;  %s18932_s24 = smov 104  }
0x11e1   : > { %13302 = vrot.lane.b32.xlu1 %v14790_v40, %s18931_s15 }
0x11e3   : > { %13297 = vrot.lane.b32.xlu0 %v14794_v41, %s18931_s15 }
0x1245   : > { %v3205_v44 = vpop.xlane.xlu1 %3204 }
0x1246   : > { %v3225_v47 = vsub.f32 %v3193_v18, %v3205_v44  ;;  %v3202_v56 = vpop.xlane.xlu0 %3201 }
0x1247   : > { %v3224_v32 = vsub.f32 %v3192_v17, %v3202_v56 }
0x1248   : > { %v3234_v6 = vmul.f32 1.442695, %v3225_v47 }
0x1249   : > { %v3232_v15 = vmul.f32 1.442695, %v3224_v32 }
0x124a   : > { %13896 = vpow2.f32 %v3234_v6  ;;  %v3211_v19 = vpop.xlane.xlu0 %3210 }
0x124b   : > { %13898 = vpow2.f32 %v3232_v15  ;;  %v3227_v42 = vsub.f32 %v3195_v4, %v3211_v19 }
0x124d   : > { %v3238_v2 = vmul.f32 1.442695, %v3227_v42  ;;  %v3217_v60 = vpop.xlane.xlu1 %3216 }
0x124e   : > { %v3229_v59 = vsub.f32 %v3197_v63, %v3217_v60  ;;  %v3208_v31 = vpop.xlane.xlu0 %3207 }
0x124f   : > { %13900 = vpow2.f32 %v3238_v2  ;;  %v3226_v62 = vsub.f32 %v3194_v58, %v3208_v31 }
0x1250   : > { %v3242_v28 = vmul.f32 1.442695, %v3229_v59 }
0x1251   : > { %v3236_v1 = vmul.f32 1.442695, %v3226_v62  ;;  %v3223_v5 = vpop.xlane.xlu1 %3222 }
0x1252   : > { %v3214_v8 = vpop.xlane.xlu0 %3213 }
0x1253   : > { %13902 = vpow2.f32 %v3236_v1  ;;  %v3228_v18 = vsub.f32 %v3196_v26, %v3214_v8 }
0x1254   : > { %v15570_v44 = vpop.eup %13896  ;;  %13904 = vpow2.f32 %v3242_v28 }
0x1255   : > { %v15572_v17 = vpop.eup %13898  ;;  %v3240_v47 = vmul.f32 1.442695, %v3228_v18  ;;  %v13283_v56 = vpop.permute.xlu1 %13282  ;;  %v3251_v4 = vsel %vm19041_vm1, %v15570_v44, 0.0 }
0x1256   : > { %3252 = vadd.xlane.f32.xlu1 %v3251_v4  ;;  %v3220_v60 = vpop.xlane.xlu0 %3219  ;;  %v3248_v59 = vsel %vm19041_vm1, %v15572_v17, 0.0  ;;  %v13285_v28 = vunpack.i.h.bf16 %v13283_v56  ;;  %v13284_v26 = vunpack.i.l.bf16 %v13283_v56 }
0x1257   : > { %3249 = vadd.xlane.f32.xlu0 %v3248_v59  ;;  %13906 = vpow2.f32 %v3240_v47 }
0x1258   : > { %v12845_v18 = vpack.c.bf16 %v13285_v28, %v13284_v26 }
0x1259   : > { %v15578_v62 = vpop.eup %13900  ;;  %v13288_v8 = vpop.permute.xlu1 %13287 }
0x125a   : > { %v13278_v31 = vpop.permute.xlu0 %13277  ;;  %v3257_v1 = vsel %vm19041_vm1, %v15578_v62, 0.0  ;;  %v13290_v42 = vunpack.i.h.bf16 %v13288_v8  ;;  %v13289_v2 = vunpack.i.l.bf16 %v13288_v8 }
0x125b   : > { %v13280_v58 = vunpack.i.h.bf16 %v13278_v31  ;;  %v13279_v63 = vunpack.i.l.bf16 %v13278_v31  ;;  %3258 = vadd.xlane.f32.xlu1 %v3257_v1 }
0x125c   : > { %v12849_v1 = vpack.c.bf16 %v13290_v42, %v13289_v2  ;;  %v3230_v2 = vsub.f32 %v15557_v45, %v3220_v60 }
0x125d   : > { %v15582_v32 = vpop.eup %13902  ;;  %v12841_v6 = vpack.c.bf16 %v13280_v58, %v13279_v63  ;;  %v13293_v47 = vpop.permute.xlu1 %13292 }
0x125e   : > { %v3254_v15 = vsel %vm19041_vm1, %v15582_v32, 0.0  ;;  %v15586_v19 = vpop.eup %13904  ;;  %v13295_v59 = vunpack.i.h.bf16 %v13293_v47  ;;  %v13294_v31 = vunpack.i.l.bf16 %v13293_v47  ;;  %v13298_v58 = vpop.permute.xlu0 %13297 }
0x125f   : > { %3255 = vadd.xlane.f32.xlu0 %v3254_v15  ;;  %12842 = vmatprep.subr.bf16.mxu1 %v12841_v6  ;;  %v3263_v56 = vsel %vm19041_vm1, %v15586_v19, 0.0  ;;  %v13300_v63 = vunpack.i.h.bf16 %v13298_v58  ;;  %v13299_v28 = vunpack.i.l.bf16 %v13298_v58  ;;  %v3231_v15 = vsub.f32 %v15553_v0, %v3223_v5 }
0x1260   : > { %12844 = vmatpush3.bf16.msra.mxu1 %v12841_v6  ;;  %v12853_v26 = vpack.c.bf16 %v13295_v59, %v13294_v31 }
0x1261   : > { %12846 = vmatprep.subr.bf16.mxu1 %v12845_v18  ;;  %v15590_v4 = vpop.eup %13906  ;;  %v12857_v6 = vpack.c.bf16 %v13300_v63, %v13299_v28  ;;  %v3246_v42 = vmul.f32 1.442695, %v3231_v15  ;;  %v13303_v47 = vpop.permute.xlu1 %13302 }
0x1262   : > { %v3260_v8 = vsel %vm19041_vm1, %v15590_v4, 0.0  ;;  %v13305_v63 = vunpack.i.h.bf16 %v13303_v47  ;;  %v13304_v28 = vunpack.i.l.bf16 %v13303_v47 }
0x1263   : > { %3264 = vadd.xlane.f32.xlu0 %v3263_v56  ;;  %13908 = vpow2.f32 %v3246_v42 }
0x1264   : > { %12848 = vmatpush3.bf16.msra.mxu1 %v12845_v18  ;;  %v3244_v18 = vmul.f32 1.442695, %v3230_v2  ;;  %v12863_v2 = vpack.c.bf16 %v13305_v63, %v13304_v28 }
0x1265   : > { %12850 = vmatprep.subr.bf16.mxu1 %v12849_v1 }
0x1266   : > { %13910 = vpow2.f32 %v3244_v18 }
0x1267   : > { %3261 = vadd.xlane.f32.xlu0 %v3260_v8 }
0x1268   : > { %12852 = vmatpush3.bf16.msra.mxu1 %v12849_v1 }
0x1269   : > { %12854 = vmatprep.subr.bf16.mxu1 %v12853_v26 }
0x126c   : > { %13312 = vrot.lane.b32.xlu1 %v14816_v53, %s18931_s15  ;;  %12856 = vmatpush3.bf16.msra.mxu1 %v12853_v26 }
0x126d   : > { %12859 = vmatprep.subr.msk.bf16.mxu1 %vm14822_vm5, %v12857_v6  ;;  %v15608_v5 = vpop.eup %13908 }
0x126e   : > { %v3269_v0 = vsel %vm19041_vm1, %v15608_v5, 0.0 }
0x1270   : > { %v15614_v45 = vpop.eup %13910 }
0x1271   : > { %v3266_v60 = vsel %vm19041_vm1, %v15614_v45, 0.0 }
0x127d   : > { %13307 = vrot.lane.b32.xlu0 %v14808_v51, %s18931_s15  ;;  %s14442_s15 = smov 40  }
0x1281   : > { %3441 = vrot.lane.b32.xlu0 %v14778_v33, %s18932_s24 }
0x1285   : > { %3445 = vrot.lane.b32.xlu0 %v14780_v34, %s18932_s24 }
0x1289   : > { %3449 = vrot.lane.b32.xlu0 %v14800_v48, %s18932_s24 }
0x128d   : > { %3453 = vrot.lane.b32.xlu0 %v14810_v52, %s18932_s24 }
0x1290   : > { %3270 = vadd.xlane.f32.xlu1 %v3269_v0 }
0x1294   : > { %3267 = vadd.xlane.f32.xlu1 %v3266_v60 }
0x12a5   : > { %3443 = vrot.lane.b32.xlu1 %v14784_v39, %s18932_s24 }
0x12a9   : > { %3447 = vrot.lane.b32.xlu1 %v14782_v36, %s18932_s24 }
0x12ad   : > { %3451 = vrot.lane.b32.xlu1 %v14802_v49, %s18932_s24 }
0x12b1   : > { %3455 = vrot.lane.b32.xlu1 %v14804_v50, %s18932_s24  ;;  %s18942_s24 = smov 68  }
0x12e3   : > { %v3253_v56 = vpop.xlane.xlu1 %3252 }
0x12e4   : > { %13912 = vrcp.f32 %v3253_v56  ;;  %v3250_v59 = vpop.xlane.xlu0 %3249 }
0x12e5   : > { %13914 = vrcp.f32 %v3250_v59 }
0x12e8   : > { %v3259_v31 = vpop.xlane.xlu1 %3258 }
0x12e9   : > { %13916 = vrcp.f32 %v3259_v31 }
0x12ec   : > { %v3256_v1 = vpop.xlane.xlu0 %3255 }
0x12ed   : > { %13918 = vrcp.f32 %v3256_v1 }
0x12ee   : > { %v13913_v58 = vpop.eup %13912 }
0x12ef   : > { %v13915_v8 = vpop.eup %13914  ;;  %v3281_v42 = vmul.f32 %v13913_v58, %v15570_v44 }
0x12f0   : > { %v3265_v26 = vpop.xlane.xlu0 %3264  ;;  %v3280_v15 = vmul.f32 %v13915_v8, %v15572_v17 }
0x12f1   : > { %13920 = vrcp.f32 %v3265_v26 }
0x12f2   : > { %12097 = vmatprep.mubr.msk.f32.mxu1 %vm19041_vm1, %v3280_v15 }
0x12f3   : > { %12098 = vmatmul.mubr.msk.f32.vlgmr.msra.gmra.mrb[48].mxu1 %vm19041_vm1, %v3281_v42  ;;  %v13917_v0 = vpop.eup %13916 }
0x12f4   : > { %12862 = vmatpush3.bf16.xpose.msk.msra.mxu1 %vm14822_vm5, %v12857_v6  ;;  %v3262_v18 = vpop.xlane.xlu0 %3261  ;;  %v3283_v59 = vmul.f32 %v13917_v0, %v15578_v62  ;;  %v13313_v6 = vpop.permute.xlu1 %13312 }
0x12f5   : > { %13922 = vrcp.f32 %v3262_v18  ;;  %12865 = vmatprep.subr.msk.bf16.mxu1 %vm14822_vm5, %v12863_v2  ;;  %v13315_v8 = vunpack.i.h.bf16 %v13313_v6 }
0x12f7   : > { %v13919_v60 = vpop.eup %13918 }
0x12f8   : > { %v13308_v47 = vpop.permute.xlu0 %13307  ;;  %v3282_v17 = vmul.f32 %v13919_v60, %v15582_v32  ;;  %v13314_v32 = vunpack.i.l.bf16 %v13313_v6 }
0x12f9   : > { %v13310_v44 = vunpack.i.h.bf16 %v13308_v47  ;;  %v13309_v56 = vunpack.i.l.bf16 %v13308_v47 }
0x12fa   : > { %12100 = vmatprep.mubr.msk.f32.mxu1 %vm19041_vm1, %v3282_v17  ;;  %v12875_v28 = vpack.c.bf16 %v13315_v8, %v13314_v32 }
0x12fb   : > { %v12869_v31 = vpack.c.bf16 %v13310_v44, %v13309_v56  ;;  %12101 = vmatmul.mubr.msk.f32.gmra.mrb[50].mxu1 %vm19041_vm1, %v3283_v59  ;;  %v13921_v1 = vpop.eup %13920 }
0x12fc   : > { %12868 = vmatpush3.bf16.xpose.msk.msra.mxu1 %vm14822_vm5, %v12863_v2  ;;  %v3285_v62 = vmul.f32 %v13921_v1, %v15586_v19 }
0x12fd   : > { %12871 = vmatprep.subr.msk.bf16.mxu1 %vm14822_vm5, %v12869_v31 }
0x12ff   : > { %v13923_v58 = vpop.eup %13922 }
0x1300   : > { %v3284_v63 = vmul.f32 %v13923_v58, %v15590_v4  ;;  %v3442_v4 = vpop.permute.xlu0 %3441 }
0x1302   : > { %12103 = vmatprep.mubr.msk.f32.mxu1 %vm19041_vm1, %v3284_v63 }
0x1303   : > { %12104 = vmatmul.mubr.msk.f32.gmra.mrb[52].mxu1 %vm19041_vm1, %v3285_v62 }
0x1304   : > { %12874 = vmatpush3.bf16.xpose.msk.msra.mxu1 %vm14822_vm5, %v12869_v31  ;;  %v3446_v60 = vpop.permute.xlu0 %3445 }
0x1305   : > { %12877 = vmatprep.subr.msk.bf16.mxu1 %vm14822_vm5, %v12875_v28 }
0x1308   : > { %v3450_v17 = vpop.permute.xlu0 %3449 }
0x130c   : > { %12880 = vmatpush3.bf16.xpose.msk.msra.mxu1 %vm14822_vm5, %v12875_v28 }
0x131d   : > { %v3271_v26 = vpop.xlane.xlu1 %3270 }
0x131e   : > { %13924 = vrcp.f32 %v3271_v26 }
0x1321   : > { %v3268_v15 = vpop.xlane.xlu1 %3267 }
0x1322   : > { %13926 = vrcp.f32 %v3268_v15 }
0x1325   : > { %v3444_v2 = vpop.permute.xlu1 %3443 }
0x1328   : > { %v13925_v19 = vpop.eup %13924 }
0x1329   : > { %v3287_v0 = vmul.f32 %v13925_v19, %v15608_v5  ;;  %v3448_v47 = vpop.permute.xlu1 %3447 }
0x132c   : > { %v13927_v42 = vpop.eup %13926 }
0x132d   : > { %v3286_v18 = vmul.f32 %v13927_v42, %v15614_v45  ;;  %v3452_v44 = vpop.permute.xlu1 %3451  ;;  %v3454_v45 = vpop.permute.xlu0 %3453 }
0x132f   : > { %12106 = vmatprep.mubr.msk.f32.mxu1 %vm19041_vm1, %v3286_v18 }
0x1330   : > { %12107 = vmatmul.mubr.msk.f32.gmra.mrb[54].mxu1 %vm19041_vm1, %v3287_v0 }
0x1331   : > { %12125 = vmatprep.mubr.msk.f32.mxu1 %vm964_vm4, %v3442_v4  ;;  %v3456_v5 = vpop.permute.xlu1 %3455 }
0x1334   : > { %12126 = vmatmul.mubr.msk.f32.vlgmr.msra.gmra.mrb[56].mxu1 %vm964_vm4, %v3444_v2 }
0x1335   : > { %12128 = vmatprep.mubr.msk.f32.mxu1 %vm964_vm4, %v3446_v60 }
0x1338   : > { %12129 = vmatmul.mubr.msk.f32.gmra.mrb[58].mxu1 %vm964_vm4, %v3448_v47 }
0x1339   : > { %12131 = vmatprep.mubr.msk.f32.mxu1 %vm964_vm4, %v3450_v17 }
0x133c   : > { %12132 = vmatmul.mubr.msk.f32.gmra.mrb[60].mxu1 %vm964_vm4, %v3452_v44 }
0x133d   : > { %12134 = vmatprep.mubr.msk.f32.mxu1 %vm964_vm4, %v3454_v45 }
0x1340   : > { %12135 = vmatmul.mubr.msk.f32.gmra.mrb[62].mxu1 %vm964_vm4, %v3456_v5 }
0x13c6   : > { %v15664_v56 = vpop.f32.mrb[48].mxu1 }
0x13c7   : > { %v15666_v59 = vpop.f32.mrb[49].mxu1 }
0x13ce   : > { %v15670_v6 = vpop.f32.mrb[50].mxu1 }
0x13cf   : > { %v15672_v1 = vpop.f32.mrb[51].mxu1 }
0x13d6   : > { %v15676_v8 = vpop.f32.mrb[52].mxu1 }
0x13d7   : > { %19083 = vst [vmem:[#allocation34_spill] sm:$0xff] %v15676_v8  ;;  %v15678_v32 = vpop.f32.mrb[53].mxu1 }
0x13d8   : > { %19084 = vst [vmem:[#allocation35_spill] sm:$0xff] %v15678_v32 }
0x1403   : > { %v15682_v62 = vpop.f32.mrb[54].mxu1 }
0x1404   : > { %19085 = vst [vmem:[#allocation36_spill] sm:$0xff] %v15682_v62  ;;  %v15684_v28 = vpop.f32.mrb[55].mxu1 }
0x1405   : > { %19086 = vst [vmem:[#allocation37_spill] sm:$0xff] %v15684_v28 }
0x1407   : > { %v12127_v15 = vpop.f32.mrb[56].mxu1 }
0x1408   : > { %v3611_v4 = vmul.f32 0.5, %v12127_v15  ;;  %v3571_v19 = vpop.f32.mrb[57].mxu1 }
0x1409   : > { %v3610_v42 = vmul.f32 0.5, %v3571_v19 }
0x140a   : > { %v3621_v2 = vsel %vm19041_vm1, %v3611_v4, -inf }
0x140b   : > { %3622 = vmax.xlane.f32.xlu1 %v3621_v2  ;;  %v12130_v18 = vpop.f32.mrb[58].mxu1  ;;  %v3618_v0 = vsel %vm19041_vm1, %v3610_v42, -inf }
0x140c   : > { %v3613_v60 = vmul.f32 0.5, %v12130_v18  ;;  %3619 = vmax.xlane.f32.xlu0 %v3618_v0  ;;  %v3581_v47 = vpop.f32.mrb[59].mxu1 }
0x140d   : > { %v3612_v44 = vmul.f32 0.5, %v3581_v47 }
0x140e   : > { %v3627_v17 = vsel %vm19041_vm1, %v3613_v60, -inf }
0x140f   : > { %v12133_v45 = vpop.f32.mrb[60].mxu1  ;;  %v3624_v2 = vsel %vm19041_vm1, %v3612_v44, -inf }
0x1410   : > { %v3615_v5 = vmul.f32 0.5, %v12133_v45  ;;  %3628 = vmax.xlane.f32.xlu0 %v3627_v17  ;;  %v3591_v63 = vpop.f32.mrb[61].mxu1 }
0x1411   : > { %v3614_v26 = vmul.f32 0.5, %v3591_v63 }
0x1412   : > { %v3633_v15 = vsel %vm19041_vm1, %v3615_v5, -inf }
0x1413   : > { %3634 = vmax.xlane.f32.xlu1 %v3633_v15  ;;  %v12136_v19 = vpop.f32.mrb[62].mxu1  ;;  %v3630_v47 = vsel %vm19041_vm1, %v3614_v26, -inf }
0x1414   : > { %v15693_v31 = vmul.f32 0.5, %v12136_v19  ;;  %3625 = vmax.xlane.f32.xlu0 %v3624_v2  ;;  %v3601_v18 = vpop.f32.mrb[63].mxu1 }
0x1415   : > { %v15697_v58 = vmul.f32 0.5, %v3601_v18 }
0x1416   : > { %v3639_v0 = vsel %vm19041_vm1, %v15693_v31, -inf }
0x1417   : > { %3640 = vmax.xlane.f32.xlu1 %v3639_v0  ;;  %v3636_v63 = vsel %vm19041_vm1, %v15697_v58, -inf }
0x1418   : > { %3631 = vmax.xlane.f32.xlu0 %v3630_v47 }
0x141c   : > { %3637 = vmax.xlane.f32.xlu0 %v3636_v63 }
0x1428   : > { %13322 = vrot.lane.b32.xlu1 %v14790_v40, %s14442_s15 }
0x142c   : > { %13327 = vrot.lane.b32.xlu1 %v14808_v51, %s14442_s15 }
0x1430   : > { %13332 = vrot.lane.b32.xlu1 %v14816_v53, %s14442_s15 }
0x1432   : > { %13317 = vrot.lane.b32.xlu0 %v14794_v41, %s14442_s15  ;;  %s18943_s15 = smov 100  }
0x1434   : > { %13342 = vrot.lane.b32.xlu1 %v14790_v40, %s18942_s24 }
0x1436   : > { %13337 = vrot.lane.b32.xlu0 %v14794_v41, %s18942_s24 }
0x1498   : > { %v3623_v17 = vpop.xlane.xlu1 %3622 }
0x1499   : > { %v3643_v45 = vsub.f32 %v3611_v4, %v3623_v17  ;;  %v3620_v15 = vpop.xlane.xlu0 %3619 }
0x149a   : > { %v3642_v19 = vsub.f32 %v3610_v42, %v3620_v15 }
0x149b   : > { %v3652_v2 = vmul.f32 1.442695, %v3643_v45 }
0x149c   : > { %v3650_v18 = vmul.f32 1.442695, %v3642_v19 }
0x149d   : > { %13928 = vpow2.f32 %v3652_v2  ;;  %v3629_v0 = vpop.xlane.xlu0 %3628 }
0x149e   : > { %13930 = vpow2.f32 %v3650_v18  ;;  %v3645_v47 = vsub.f32 %v3613_v60, %v3629_v0 }
0x14a0   : > { %v3656_v63 = vmul.f32 1.442695, %v3645_v47  ;;  %v3635_v32 = vpop.xlane.xlu1 %3634 }
0x14a1   : > { %v3647_v8 = vsub.f32 %v3615_v5, %v3635_v32  ;;  %v3626_v28 = vpop.xlane.xlu0 %3625 }
0x14a2   : > { %13932 = vpow2.f32 %v3656_v63  ;;  %v3644_v62 = vsub.f32 %v3612_v44, %v3626_v28 }
0x14a3   : > { %v3660_v13 = vmul.f32 1.442695, %v3647_v8 }
0x14a4   : > { %v3654_v12 = vmul.f32 1.442695, %v3644_v62  ;;  %v3641_v61 = vpop.xlane.xlu1 %3640 }
0x14a5   : > { %v3632_v55 = vpop.xlane.xlu0 %3631 }
0x14a6   : > { %13934 = vpow2.f32 %v3654_v12  ;;  %v3646_v4 = vsub.f32 %v3614_v26, %v3632_v55 }
0x14a7   : > { %v15710_v17 = vpop.eup %13928  ;;  %13936 = vpow2.f32 %v3660_v13 }
0x14a8   : > { %v15712_v42 = vpop.eup %13930  ;;  %v3658_v45 = vmul.f32 1.442695, %v3646_v4  ;;  %v13323_v15 = vpop.permute.xlu1 %13322  ;;  %v3669_v60 = vsel %vm19041_vm1, %v15710_v17, 0.0 }
0x14a9   : > { %3670 = vadd.xlane.f32.xlu1 %v3669_v60  ;;  %v3638_v32 = vpop.xlane.xlu0 %3637  ;;  %v3666_v8 = vsel %vm19041_vm1, %v15712_v42, 0.0  ;;  %v13325_v13 = vunpack.i.h.bf16 %v13323_v15  ;;  %v13324_v26 = vunpack.i.l.bf16 %v13323_v15 }
0x14aa   : > { %3667 = vadd.xlane.f32.xlu0 %v3666_v8  ;;  %13938 = vpow2.f32 %v3658_v45 }
0x14ab   : > { %v12885_v4 = vpack.c.bf16 %v13325_v13, %v13324_v26 }
0x14ac   : > { %v15718_v62 = vpop.eup %13932  ;;  %v13328_v55 = vpop.permute.xlu1 %13327 }
0x14ad   : > { %v13318_v12 = vpop.permute.xlu0 %13317  ;;  %v3675_v28 = vsel %vm19041_vm1, %v15718_v62, 0.0  ;;  %v13330_v47 = vunpack.i.h.bf16 %v13328_v55  ;;  %v13329_v63 = vunpack.i.l.bf16 %v13328_v55 }
0x14ae   : > { %v13320_v44 = vunpack.i.h.bf16 %v13318_v12  ;;  %v13319_v5 = vunpack.i.l.bf16 %v13318_v12  ;;  %3676 = vadd.xlane.f32.xlu1 %v3675_v28 }
0x14af   : > { %v12889_v28 = vpack.c.bf16 %v13330_v47, %v13329_v63  ;;  %v3648_v63 = vsub.f32 %v15697_v58, %v3638_v32 }
0x14b0   : > { %v15722_v19 = vpop.eup %13934  ;;  %v12881_v2 = vpack.c.bf16 %v13320_v44, %v13319_v5  ;;  %v13333_v45 = vpop.permute.xlu1 %13332 }
0x14b1   : > { %v3672_v18 = vsel %vm19041_vm1, %v15722_v19, 0.0  ;;  %v15726_v0 = vpop.eup %13936  ;;  %v13335_v8 = vunpack.i.h.bf16 %v13333_v45  ;;  %v13334_v12 = vunpack.i.l.bf16 %v13333_v45  ;;  %v13338_v44 = vpop.permute.xlu0 %13337 }
0x14b2   : > { %3673 = vadd.xlane.f32.xlu0 %v3672_v18  ;;  %12882 = vmatprep.subr.bf16.mxu0 %v12881_v2  ;;  %v3681_v15 = vsel %vm19041_vm1, %v15726_v0, 0.0  ;;  %v13340_v5 = vunpack.i.h.bf16 %v13338_v44  ;;  %v13339_v13 = vunpack.i.l.bf16 %v13338_v44  ;;  %v3649_v18 = vsub.f32 %v15693_v31, %v3641_v61 }
0x14b3   : > { %12884 = vmatpush3.bf16.msra.mxu0 %v12881_v2  ;;  %v12893_v26 = vpack.c.bf16 %v13335_v8, %v13334_v12 }
0x14b4   : > { %12886 = vmatprep.subr.bf16.mxu0 %v12885_v4  ;;  %v15730_v60 = vpop.eup %13938  ;;  %v12897_v2 = vpack.c.bf16 %v13340_v5, %v13339_v13  ;;  %v3664_v47 = vmul.f32 1.442695, %v3649_v18 }
0x14b5   : > { %v3678_v55 = vsel %vm19041_vm1, %v15730_v60, 0.0 }
0x14b6   : > { %3682 = vadd.xlane.f32.xlu0 %v3681_v15  ;;  %13940 = vpow2.f32 %v3664_v47 }
0x14b7   : > { %12888 = vmatpush3.bf16.msra.mxu0 %v12885_v4  ;;  %v3662_v4 = vmul.f32 1.442695, %v3648_v63 }
0x14b8   : > { %12890 = vmatprep.subr.bf16.mxu0 %v12889_v28 }
0x14b9   : > { %13942 = vpow2.f32 %v3662_v4 }
0x14ba   : > { %3679 = vadd.xlane.f32.xlu0 %v3678_v55 }
0x14bb   : > { %12892 = vmatpush3.bf16.msra.mxu0 %v12889_v28 }
0x14bc   : > { %12894 = vmatprep.subr.bf16.mxu0 %v12893_v26 }
0x14bf   : > { %13352 = vrot.lane.b32.xlu1 %v14816_v53, %s18942_s24  ;;  %12896 = vmatpush3.bf16.msra.mxu0 %v12893_v26 }
0x14c0   : > { %12899 = vmatprep.subr.msk.bf16.mxu0 %vm14822_vm5, %v12897_v2 }
0x14c3   : > { %3861 = vrot.lane.b32.xlu1 %v14784_v39, %s18943_s15  ;;  %v15752_v39 = vpop.eup %13940 }
0x14c4   : > { %v15756_v61 = vpop.eup %13942 }
0x14d0   : > { %13347 = vrot.lane.b32.xlu0 %v14808_v51, %s18942_s24  ;;  %s14445_s24 = smov 36  }
0x14d4   : > { %3859 = vrot.lane.b32.xlu0 %v14778_v33, %s18943_s15  ;;  %v3687_v33 = vsel %vm19041_vm1, %v15752_v39, 0.0 }
0x14d8   : > { %3863 = vrot.lane.b32.xlu0 %v14780_v34, %s18943_s15  ;;  %v3684_v34 = vsel %vm19041_vm1, %v15756_v61, 0.0 }
0x14dc   : > { %3867 = vrot.lane.b32.xlu0 %v14800_v48, %s18943_s15  ;;  %v13343_v48 = vpop.permute.xlu1 %13342 }
0x14dd   : > { %v13345_v8 = vunpack.i.h.bf16 %v13343_v48  ;;  %v13344_v12 = vunpack.i.l.bf16 %v13343_v48 }
0x14e0   : > { %3871 = vrot.lane.b32.xlu0 %v14810_v52, %s18943_s15 }
0x14e7   : > { %3688 = vadd.xlane.f32.xlu1 %v3687_v33 }
0x14eb   : > { %3685 = vadd.xlane.f32.xlu1 %v3684_v34 }
0x14fc   : > { %3865 = vrot.lane.b32.xlu1 %v14782_v36, %s18943_s15 }
0x1500   : > { %3869 = vrot.lane.b32.xlu1 %v14802_v49, %s18943_s15 }
0x1504   : > { %3873 = vrot.lane.b32.xlu1 %v14804_v50, %s18943_s15  ;;  %v12903_v50 = vpack.c.bf16 %v13345_v8, %v13344_v12  ;;  %s18961_s15 = smov 4  }
0x1536   : > { %v3671_v52 = vpop.xlane.xlu1 %3670 }
0x1537   : > { %13944 = vrcp.f32 %v3671_v52  ;;  %v3668_v31 = vpop.xlane.xlu0 %3667  ;;  %v19087_v52 = vmov 0.0  }
0x1538   : > { %13946 = vrcp.f32 %v3668_v31 }
0x153b   : > { %v3677_v58 = vpop.xlane.xlu1 %3676 }
0x153c   : > { %13948 = vrcp.f32 %v3677_v58 }
0x153f   : > { %v3674_v32 = vpop.xlane.xlu0 %3673 }
0x1540   : > { %13950 = vrcp.f32 %v3674_v32 }
0x1541   : > { %v13945_v45 = vpop.eup %13944 }
0x1542   : > { %v13947_v15 = vpop.eup %13946  ;;  %v3699_v49 = vmul.f32 %v13945_v45, %v15710_v17 }
0x1543   : > { %v3683_v36 = vpop.xlane.xlu0 %3682  ;;  %v3698_v28 = vmul.f32 %v13947_v15, %v15712_v42 }
0x1544   : > { %13952 = vrcp.f32 %v3683_v36 }
0x1545   : > { %12153 = vmatprep.mubr.msk.f32.mxu0 %vm19041_vm1, %v3698_v28 }
0x1546   : > { %12154 = vmatmul.mubr.msk.f32.vlgmr.msra.gmra.mrb[58].mxu0 %vm19041_vm1, %v3699_v49  ;;  %v13949_v55 = vpop.eup %13948 }
0x1547   : > { %12902 = vmatpush3.bf16.xpose.msk.msra.mxu0 %vm14822_vm5, %v12897_v2  ;;  %v3680_v44 = vpop.xlane.xlu0 %3679  ;;  %v3701_v18 = vmul.f32 %v13949_v55, %v15718_v62  ;;  %v13353_v2 = vpop.permute.xlu1 %13352 }
0x1548   : > { %13954 = vrcp.f32 %v3680_v44  ;;  %12905 = vmatprep.subr.msk.bf16.mxu0 %vm14822_vm5, %v12903_v50  ;;  %v13355_v33 = vunpack.i.h.bf16 %v13353_v2 }
0x154a   : > { %v13951_v5 = vpop.eup %13950 }
0x154b   : > { %v13348_v13 = vpop.permute.xlu0 %13347  ;;  %v3700_v42 = vmul.f32 %v13951_v5, %v15722_v19  ;;  %v13354_v19 = vunpack.i.l.bf16 %v13353_v2  ;;  %v3862_v31 = vpop.permute.xlu1 %3861 }
0x154c   : > { %v13350_v17 = vunpack.i.h.bf16 %v13348_v13  ;;  %v13349_v26 = vunpack.i.l.bf16 %v13348_v13 }
0x154d   : > { %12156 = vmatprep.mubr.msk.f32.mxu0 %vm19041_vm1, %v3700_v42  ;;  %v12915_v48 = vpack.c.bf16 %v13355_v33, %v13354_v19 }
0x154e   : > { %v12909_v47 = vpack.c.bf16 %v13350_v17, %v13349_v26  ;;  %12157 = vmatmul.mubr.msk.f32.gmra.mrb[60].mxu0 %vm19041_vm1, %v3701_v18  ;;  %v13953_v63 = vpop.eup %13952 }
0x154f   : > { %12908 = vmatpush3.bf16.xpose.msk.msra.mxu0 %vm14822_vm5, %v12903_v50  ;;  %v3703_v62 = vmul.f32 %v13953_v63, %v15726_v0  ;;  %v3860_v58 = vpop.permute.xlu0 %3859 }
0x1550   : > { %12911 = vmatprep.subr.msk.bf16.mxu0 %vm14822_vm5, %v12909_v47 }
0x1552   : > { %v13955_v4 = vpop.eup %13954 }
0x1553   : > { %v3702_v34 = vmul.f32 %v13955_v4, %v15730_v60  ;;  %v3864_v12 = vpop.permute.xlu0 %3863 }
0x1555   : > { %12159 = vmatprep.mubr.msk.f32.mxu0 %vm19041_vm1, %v3702_v34 }
0x1556   : > { %12160 = vmatmul.mubr.msk.f32.gmra.mrb[62].mxu0 %vm19041_vm1, %v3703_v62 }
0x1557   : > { %12914 = vmatpush3.bf16.xpose.msk.msra.mxu0 %vm14822_vm5, %v12909_v47  ;;  %v3868_v36 = vpop.permute.xlu0 %3867 }
0x1558   : > { %12917 = vmatprep.subr.msk.bf16.mxu0 %vm14822_vm5, %v12915_v48 }
0x155f   : > { %12920 = vmatpush3.bf16.xpose.msk.msra.mxu0 %vm14822_vm5, %v12915_v48 }
0x1560   : > { %12233 = vmatprep.subr.bf16.mxu0 %v19087_v52 }
0x1574   : > { %v3689_v60 = vpop.xlane.xlu1 %3688 }
0x1575   : > { %13956 = vrcp.f32 %v3689_v60 }
0x1578   : > { %v3686_v0 = vpop.xlane.xlu1 %3685 }
0x1579   : > { %13958 = vrcp.f32 %v3686_v0 }
0x157c   : > { %v3866_v27 = vpop.permute.xlu1 %3865 }
0x157f   : > { %v13957_v32 = vpop.eup %13956 }
0x1580   : > { %v3705_v8 = vmul.f32 %v13957_v32, %v15752_v39  ;;  %v3870_v28 = vpop.permute.xlu1 %3869 }
0x1583   : > { %v13959_v45 = vpop.eup %13958 }
0x1584   : > { %v3704_v15 = vmul.f32 %v13959_v45, %v15756_v61  ;;  %v3872_v61 = vpop.permute.xlu0 %3871  ;;  %v3874_v39 = vpop.permute.xlu1 %3873 }
0x1586   : > { %12162 = vmatprep.mubr.msk.f32.mxu0 %vm19041_vm1, %v3704_v15 }
0x1587   : > { %12163 = vmatmul.mubr.msk.f32.gmra.mrb[64].mxu0 %vm19041_vm1, %v3705_v8 }
0x1588   : > { %12181 = vmatprep.mubr.msk.f32.mxu0 %vm964_vm4, %v3860_v58 }
0x158b   : > { %12182 = vmatmul.mubr.msk.f32.vlgmr.msra.gmra.mrb[66].mxu0 %vm964_vm4, %v3862_v31 }
0x158c   : > { %12184 = vmatprep.mubr.msk.f32.mxu0 %vm964_vm4, %v3864_v12 }
0x158f   : > { %12185 = vmatmul.mubr.msk.f32.gmra.mrb[68].mxu0 %vm964_vm4, %v3866_v27 }
0x1590   : > { %12187 = vmatprep.mubr.msk.f32.mxu0 %vm964_vm4, %v3868_v36 }
0x1593   : > { %12188 = vmatmul.mubr.msk.f32.gmra.mrb[70].mxu0 %vm964_vm4, %v3870_v28 }
0x1594   : > { %12190 = vmatprep.mubr.msk.f32.mxu0 %vm964_vm4, %v3872_v61 }
0x1597   : > { %12191 = vmatmul.mubr.msk.f32.gmra.mrb[72].mxu0 %vm964_vm4, %v3874_v39 }
0x1598   : > { %12241 = vmatprep.mubr.msk.bf16.mxu0 %vm19042_vm0, %v19087_v52 }
0x1619   : > { %v15807_v49 = vpop.f32.mrb[58].mxu0 }
0x161a   : > { %v15809_v50 = vpop.f32.mrb[59].mxu0 }
0x161b   : > { %v13426_v44 = vpack.i.bf16 %v15807_v49, %v15809_v50  ;;  %v19119_v49 = vld [vmem:[#allocation34_spill] sm:$0xff]  ;;  %v19120_v50 = vld [vmem:[#allocation35_spill] sm:$0xff] }
0x1621   : > { %v15813_v55 = vpop.f32.mrb[60].mxu0 }
0x1622   : > { %v15815_v5 = vpop.f32.mrb[61].mxu0 }
0x1623   : > { %v13431_v13 = vpack.i.bf16 %v15813_v55, %v15815_v5 }
0x1629   : > { %v15819_v42 = vpop.f32.mrb[62].mxu0 }
0x162a   : > { %v15821_v17 = vpop.f32.mrb[63].mxu0 }
0x165a   : > { %v15825_v18 = vpop.f32.mrb[64].mxu0 }
0x165b   : > { %v15827_v47 = vpop.f32.mrb[65].mxu0 }
0x165e   : > { %v12183_v63 = vpop.f32.mrb[66].mxu0 }
0x165f   : > { %v4029_v4 = vmul.f32 0.5, %v12183_v63  ;;  %v3989_v33 = vpop.f32.mrb[67].mxu0 }
0x1660   : > { %v4028_v19 = vmul.f32 0.5, %v3989_v33 }
0x1661   : > { %v4039_v34 = vsel %vm19041_vm1, %v4029_v4, -inf }
0x1662   : > { %4040 = vmax.xlane.f32.xlu1 %v4039_v34  ;;  %v12186_v62 = vpop.f32.mrb[68].mxu0  ;;  %v4036_v48 = vsel %vm19041_vm1, %v4028_v19, -inf }
0x1663   : > { %v4031_v31 = vmul.f32 0.5, %v12186_v62  ;;  %4037 = vmax.xlane.f32.xlu0 %v4036_v48  ;;  %v3999_v60 = vpop.f32.mrb[69].mxu0 }
0x1664   : > { %v4030_v58 = vmul.f32 0.5, %v3999_v60 }
0x1665   : > { %v4045_v0 = vsel %vm19041_vm1, %v4031_v31, -inf }
0x1666   : > { %v12189_v32 = vpop.f32.mrb[70].mxu0  ;;  %v4042_v36 = vsel %vm19041_vm1, %v4030_v58, -inf }
0x1667   : > { %v4033_v45 = vmul.f32 0.5, %v12189_v32  ;;  %4046 = vmax.xlane.f32.xlu0 %v4045_v0  ;;  %v4009_v15 = vpop.f32.mrb[71].mxu0 }
0x1668   : > { %v4032_v12 = vmul.f32 0.5, %v4009_v15 }
0x1669   : > { %v4051_v8 = vsel %vm19041_vm1, %v4033_v45, -inf }
0x166a   : > { %4052 = vmax.xlane.f32.xlu1 %v4051_v8  ;;  %v12192_v27 = vpop.f32.mrb[72].mxu0  ;;  %v4048_v33 = vsel %vm19041_vm1, %v4032_v12, -inf }
0x166b   : > { %v4035_v28 = vmul.f32 0.5, %v12192_v27  ;;  %4043 = vmax.xlane.f32.xlu0 %v4042_v36  ;;  %v4019_v61 = vpop.f32.mrb[73].mxu0 }
0x166c   : > { %v4034_v63 = vmul.f32 0.5, %v4019_v61 }
0x166d   : > { %v4057_v39 = vsel %vm19041_vm1, %v4035_v28, -inf }
0x166e   : > { %4058 = vmax.xlane.f32.xlu1 %v4057_v39  ;;  %v4054_v34 = vsel %vm19041_vm1, %v4034_v63, -inf }
0x166f   : > { %4049 = vmax.xlane.f32.xlu0 %v4048_v33 }
0x1673   : > { %4055 = vmax.xlane.f32.xlu0 %v4054_v34 }
0x167f   : > { %13362 = vrot.lane.b32.xlu1 %v14790_v40, %s14445_s24 }
0x1689   : > { %13357 = vrot.lane.b32.xlu0 %v14794_v41, %s14445_s24 }
0x16ef   : > { %v4041_v62 = vpop.xlane.xlu1 %4040 }
0x16f0   : > { %v4061_v48 = vsub.f32 %v4029_v4, %v4041_v62  ;;  %v4038_v60 = vpop.xlane.xlu0 %4037 }
0x16f1   : > { %v4060_v0 = vsub.f32 %v4028_v19, %v4038_v60 }
0x16f2   : > { %v4070_v32 = vmul.f32 1.442695, %v4061_v48 }
0x16f3   : > { %v4068_v15 = vmul.f32 1.442695, %v4060_v0 }
0x16f4   : > { %13960 = vpow2.f32 %v4070_v32  ;;  %v4047_v8 = vpop.xlane.xlu0 %4046 }
0x16f5   : > { %13962 = vpow2.f32 %v4068_v15  ;;  %v4063_v27 = vsub.f32 %v4031_v31, %v4047_v8 }
0x16f7   : > { %v4074_v36 = vmul.f32 1.442695, %v4063_v27  ;;  %v4053_v61 = vpop.xlane.xlu1 %4052 }
0x16f8   : > { %v4065_v39 = vsub.f32 %v4033_v45, %v4053_v61  ;;  %v4044_v33 = vpop.xlane.xlu0 %4043 }
0x16f9   : > { %13964 = vpow2.f32 %v4074_v36  ;;  %v4062_v34 = vsub.f32 %v4030_v58, %v4044_v33 }
0x16fa   : > { %v4078_v40 = vmul.f32 1.442695, %v4065_v39 }
0x16fb   : > { %v4072_v2 = vmul.f32 1.442695, %v4062_v34  ;;  %v4059_v26 = vpop.xlane.xlu1 %4058 }
0x16fc   : > { %13966 = vpow2.f32 %v4078_v40  ;;  %v4067_v41 = vsub.f32 %v4035_v28, %v4059_v26  ;;  %v4050_v4 = vpop.xlane.xlu0 %4049 }
0x16fd   : > { %13968 = vpow2.f32 %v4072_v2  ;;  %v4064_v19 = vsub.f32 %v4032_v12, %v4050_v4 }
0x16fe   : > { %v15843_v62 = vpop.eup %13960  ;;  %v4082_v48 = vmul.f32 1.442695, %v4067_v41 }
0x16ff   : > { %v15845_v60 = vpop.eup %13962  ;;  %v4076_v31 = vmul.f32 1.442695, %v4064_v19  ;;  %v4087_v45 = vsel %vm19041_vm1, %v15843_v62, 0.0  ;;  %v13363_v12 = vpop.permute.xlu1 %13362 }
0x1700   : > { %13970 = vpow2.f32 %v4082_v48  ;;  %4088 = vadd.xlane.f32.xlu1 %v4087_v45  ;;  %v4056_v58 = vpop.xlane.xlu0 %4055  ;;  %v4084_v0 = vsel %vm19041_vm1, %v15845_v60, 0.0  ;;  %v13365_v61 = vunpack.i.h.bf16 %v13363_v12  ;;  %v13364_v39 = vunpack.i.l.bf16 %v13363_v12 }
0x1701   : > { %13972 = vpow2.f32 %v4076_v31  ;;  %v4066_v26 = vsub.f32 %v4034_v63, %v4056_v58  ;;  %4085 = vadd.xlane.f32.xlu0 %v4084_v0  ;;  %v19088_v0 = vpack.i.bf16 %v15110_v30, %v15112_v14  ;;  %v19090_v12 = vpack.i.bf16 %v15250_v57, %v15252_v22 }
0x1702   : > { %v12925_v4 = vpack.c.bf16 %v13365_v61, %v13364_v39  ;;  %v19095_v30 = vpack.i.bf16 %v15524_v38, %v15526_v9  ;;  %v19096_v14 = vpack.i.bf16 %v15670_v6, %v15672_v1  ;;  %v19099_v57 = vpack.i.bf16 %v15116_v29, %v15118_v46  ;;  %v19105_v38 = vld [vmem:[#allocation29_spill] sm:$0xff]  ;;  %v19108_v9 = vld [vmem:[#allocation27_spill] sm:$0xff]  ;;  %v19110_v46 = vld [vmem:[#allocation32_spill] sm:$0xff] }
0x1703   : > { %v15851_v2 = vpop.eup %13964  ;;  %v4080_v28 = vmul.f32 1.442695, %v4066_v26  ;;  %v19089_v26 = vpack.i.bf16 %v15104_v43, %v15106_v10  ;;  %v19093_v43 = vpack.i.bf16 %v15384_v11, %v15386_v16  ;;  %v19094_v10 = vpack.i.bf16 %v15530_v54, %v15532_v7  ;;  %v19101_v11 = vld [vmem:[#allocation24_spill] sm:$0xff]  ;;  %v19102_v16 = vld [vmem:[#allocation25_spill] sm:$0xff]  ;;  %v19114_v7 = vld [vmem:[#allocation31_spill] sm:$0xff] }
0x1704   : > { %v13358_v32 = vpop.permute.xlu0 %13357  ;;  %v4093_v15 = vsel %vm19041_vm1, %v15851_v2, 0.0  ;;  %v19100_v22 = vpack.i.bf16 %v15262_v35, %v15264_v25  ;;  %v19111_v54 = vld [vmem:[#allocation33_spill] sm:$0xff]  ;;  %v19113_v25 = vld [vmem:[#allocation30_spill] sm:$0xff] }
0x1705   : > { %13974 = vpow2.f32 %v4080_v28  ;;  %v13360_v8 = vunpack.i.h.bf16 %v13358_v32  ;;  %v13359_v27 = vunpack.i.l.bf16 %v13358_v32  ;;  %4094 = vadd.xlane.f32.xlu1 %v4093_v15  ;;  %v19112_v35 = vpack.i.bf16 %v19110_v46, %v19111_v54  ;;  %v19117_v6 = vld [vmem:[#allocation37_spill] sm:$0xff] }
0x1706   : > { %v15855_v36 = vpop.eup %13966 }
0x1707   : > { %v15857_v33 = vpop.eup %13968  ;;  %v4099_v63 = vsel %vm19041_vm1, %v15855_v36, 0.0  ;;  %v12921_v34 = vpack.c.bf16 %v13360_v8, %v13359_v27 }
0x1708   : > { %v4090_v40 = vsel %vm19041_vm1, %v15857_v33, 0.0 }
0x1709   : > { %4100 = vadd.xlane.f32.xlu1 %v4099_v63  ;;  %4091 = vadd.xlane.f32.xlu0 %v4090_v40 }
0x170a   : > { %v15863_v41 = vpop.eup %13970  ;;  %12922 = vmatprep.subr.bf16.mxu1 %v12921_v34 }
0x170b   : > { %v15865_v19 = vpop.eup %13972  ;;  %12924 = vmatpush3.bf16.msra.mxu1 %v12921_v34  ;;  %v4105_v48 = vsel %vm19041_vm1, %v15863_v41, 0.0 }
0x170c   : > { %12926 = vmatprep.subr.bf16.mxu1 %v12925_v4  ;;  %v4096_v31 = vsel %vm19041_vm1, %v15865_v19, 0.0 }
0x170d   : > { %4106 = vadd.xlane.f32.xlu1 %v4105_v48  ;;  %4097 = vadd.xlane.f32.xlu0 %v4096_v31 }
0x170f   : > { %v15871_v45 = vpop.eup %13974  ;;  %12928 = vmatpush3.bf16.msra.mxu1 %v12925_v4 }
0x1710   : > { %v4102_v58 = vsel %vm19041_vm1, %v15871_v45, 0.0 }
0x1711   : > { %4103 = vadd.xlane.f32.xlu1 %v4102_v58 }
0x1722   : > { %13372 = vrot.lane.b32.xlu1 %v14816_v53, %s14445_s24  ;;  %v19092_v53 = vpack.i.bf16 %v15390_v37, %v15392_v20  ;;  %v19103_v37 = vpack.i.bf16 %v19101_v11, %v19102_v16  ;;  %v19104_v20 = vld [vmem:[#allocation28_spill] sm:$0xff] }
0x1723   : > { %13367 = vrot.lane.b32.xlu0 %v14808_v51, %s14445_s24  ;;  %v19091_v51 = vpack.i.bf16 %v15244_v23, %v15246_v3  ;;  %s18957_s24 = smov 12   ;;  %v19097_v23 = vpack.i.bf16 %v15664_v56, %v15666_v59  ;;  %v19098_v3 = vpack.i.bf16 %v15122_v24, %v15124_v21  ;;  %v19106_v24 = vpack.i.bf16 %v19104_v20, %v19105_v38  ;;  %v19107_v21 = vld [vmem:[#allocation26_spill] sm:$0xff]  ;;  %v19116_v59 = vld [vmem:[#allocation36_spill] sm:$0xff] }
0x1724   : > { %v19109_v29 = vpack.i.bf16 %v19107_v21, %v19108_v9  ;;  %v19115_v56 = vpack.i.bf16 %v19113_v25, %v19114_v7  ;;  %v19118_v1 = vpack.i.bf16 %v19116_v59, %v19117_v6  ;;  %v19123_v21 = vpack.i.bf16 %v15825_v18, %v15827_v47 }
0x1726   : > { %13382 = vrot.lane.b32.xlu1 %v19088_v0, %s18961_s15 }
0x1727   : > { %13377 = vrot.lane.b32.xlu0 %v19089_v26, %s18961_s15 }
0x172a   : > { %13392 = vrot.lane.b32.xlu1 %v19090_v12, %s18959_s22 }
0x172b   : > { %13387 = vrot.lane.b32.xlu0 %v19091_v51, %s18959_s22 }
0x172e   : > { %13402 = vrot.lane.b32.xlu1 %v19092_v53, %s18957_s24 }
0x172f   : > { %13397 = vrot.lane.b32.xlu0 %v19093_v43, %s18957_s24 }
0x1732   : > { %13412 = vrot.lane.b32.xlu1 %v19094_v10, %s18955_s12 }
0x1733   : > { %13407 = vrot.lane.b32.xlu0 %v19095_v30, %s18955_s12 }
0x1736   : > { %13422 = vrot.lane.b32.xlu1 %v19096_v14, %s18953_s13 }
0x1737   : > { %13417 = vrot.lane.b32.xlu0 %v19097_v23, %s18953_s13 }
0x173a   : > { %13432 = vrot.lane.b32.xlu1 %v13431_v13, %s18966_s29 }
0x173b   : > { %13427 = vrot.lane.b32.xlu0 %v13426_v44, %s18966_s29  ;;  %v19121_v44 = vpack.i.bf16 %v19119_v49, %v19120_v50 }
0x173e   : > { %13442 = vrot.lane.b32.xlu1 %v19098_v3, %s18961_s15 }
0x173f   : > { %13437 = vrot.lane.b32.xlu0 %v19099_v57, %s18961_s15  ;;  %s18964_s15 = smov 28  }
0x1742   : > { %13452 = vrot.lane.b32.xlu1 %v19100_v22, %s18959_s22 }
0x1743   : > { %13447 = vrot.lane.b32.xlu0 %v19103_v37, %s18959_s22  ;;  %v19122_v37 = vpack.i.bf16 %v15819_v42, %v15821_v17  ;;  %v14352_v42 = vld [vmem:[%s18893_s5] ss:$0 sm:$0xff]  ;;  %s18963_s22 = smov 32  }
0x1746   : > { %13462 = vrot.lane.b32.xlu1 %v19106_v24, %s18957_s24 }
0x1747   : > { %13457 = vrot.lane.b32.xlu0 %v19109_v29, %s18957_s24  ;;  %s19155_s24 = smov 108  }
0x174a   : > { %13472 = vrot.lane.b32.xlu1 %v19112_v35, %s18955_s12 }
0x174b   : > { %13467 = vrot.lane.b32.xlu0 %v19115_v56, %s18955_s12  ;;  %s19154_s12 = smov 112  }
0x174e   : > { %13482 = vrot.lane.b32.xlu1 %v19118_v1, %s18953_s13 }
0x174f   : > { %13477 = vrot.lane.b32.xlu0 %v19121_v44, %s18953_s13  ;;  %s19156_s13 = smov 104  }
0x178d   : > { %v4089_v55 = vpop.xlane.xlu1 %4088 }
0x178e   : > { %v4086_v5 = vpop.xlane.xlu0 %4085 }
0x178f   : > { %13976 = vrcp.f32 %v4086_v5 }
0x1790   : > { %13978 = vrcp.f32 %v4089_v55 }
0x1792   : > { %v4095_v13 = vpop.xlane.xlu1 %4094 }
0x1796   : > { %v4101_v28 = vpop.xlane.xlu1 %4100  ;;  %v4092_v32 = vpop.xlane.xlu0 %4091 }
0x1797   : > { %13980 = vrcp.f32 %v4092_v32 }
0x1798   : > { %13982 = vrcp.f32 %v4095_v13 }
0x1799   : > { %v13977_v15 = vpop.eup %13976 }
0x179a   : > { %v4107_v8 = vpop.xlane.xlu1 %4106  ;;  %v4098_v27 = vpop.xlane.xlu0 %4097  ;;  %v4116_v61 = vmul.f32 %v13977_v15, %v15845_v60 }
0x179b   : > { %13984 = vrcp.f32 %v4098_v27  ;;  %v13979_v60 = vpop.eup %13978 }
0x179c   : > { %12209 = vmatprep.mubr.msk.f32.mxu1 %vm19041_vm1, %v4116_v61  ;;  %13986 = vrcp.f32 %v4101_v28  ;;  %v4117_v12 = vmul.f32 %v13979_v60, %v15843_v62 }
0x179e   : > { %v4104_v39 = vpop.xlane.xlu1 %4103  ;;  %v13368_v63 = vpop.permute.xlu0 %13367 }
0x179f   : > { %v13370_v34 = vunpack.i.h.bf16 %v13368_v63  ;;  %v13369_v40 = vunpack.i.l.bf16 %v13368_v63  ;;  %13988 = vrcp.f32 %v4104_v39 }
0x17a0   : > { %13990 = vrcp.f32 %v4107_v8 }
0x17a1   : > { %v12929_v4 = vpack.c.bf16 %v13370_v34, %v13369_v40  ;;  %v13981_v26 = vpop.eup %13980  ;;  %v19124_v40 = vld [vmem:[#allocation16_spill] sm:$0xff] }
0x17a2   : > { %v13373_v48 = vpop.permute.xlu1 %13372  ;;  %v13983_v51 = vpop.eup %13982  ;;  %v4118_v53 = vmul.f32 %v13981_v26, %v15857_v33  ;;  %v19126_v26 = vld [vmem:[#allocation18_spill] sm:$0xff] }
0x17a3   : > { %v13375_v31 = vunpack.i.h.bf16 %v13373_v48  ;;  %v13374_v58 = vunpack.i.l.bf16 %v13373_v48  ;;  %12930 = vmatprep.subr.bf16.mxu1 %v12929_v4  ;;  %v4119_v10 = vmul.f32 %v13983_v51, %v15851_v2  ;;  %v13658_v2 = vld [vmem:[%s18896_s8] sm:$0xff]   ;;  %v13378_v17 = vpop.permute.xlu0 %13377  ;;  %v19127_v51 = vld [vmem:[#allocation19_spill] sm:$0xff] }
0x17a4   : > { %12932 = vmatpush3.bf16.msra.mxu1 %v12929_v4  ;;  %v13380_v13 = vunpack.i.h.bf16 %v13378_v17  ;;  %v13379_v28 = vunpack.i.l.bf16 %v13378_v17  ;;  %v19125_v48 = vld [vmem:[#allocation17_spill] sm:$0xff] }
0x17a5   : > { %v12933_v0 = vpack.c.bf16 %v13375_v31, %v13374_v58  ;;  %v13985_v43 = vpop.eup %13984 }
0x17a6   : > { %v13987_v30 = vpop.eup %13986  ;;  %v4120_v14 = vmul.f32 %v13985_v43, %v15865_v19  ;;  %v13383_v54 = vpop.permute.xlu1 %13382  ;;  %v4502_v4 = vsel %vm964_vm4, %v19124_v40, %v13380_v13  ;;  %v4501_v31 = vsel %vm964_vm4, %v19125_v48, %v13379_v28 }
0x17a7   : > { %12934 = vmatprep.subr.bf16.mxu1 %v12933_v0  ;;  %v4121_v62 = vmul.f32 %v13987_v30, %v15855_v36  ;;  %v13659_v36 = vld [vmem:[%s18896_s8 + $0x8] sm:$0xff]   ;;  %v13388_v35 = vpop.permute.xlu0 %13387  ;;  %v13385_v15 = vunpack.i.h.bf16 %v13383_v54  ;;  %v13384_v8 = vunpack.i.l.bf16 %v13383_v54 }
0x17a8   : > { %12936 = vmatpush3.bf16.msra.mxu1 %v12933_v0  ;;  %v13389_v27 = vunpack.i.l.bf16 %v13388_v35  ;;  %v13390_v61 = vunpack.i.h.bf16 %v13388_v35 }
0x17a9   : > { %v13989_v23 = vpop.eup %13988  ;;  %12221 = vmatprep.subr.bf16.mxu1 %v13658_v2 }
0x17aa   : > { %v13991_v3 = vpop.eup %13990  ;;  %v4122_v33 = vmul.f32 %v13989_v23, %v15871_v45  ;;  %v13393_v25 = vpop.permute.xlu1 %13392  ;;  %v4510_v43 = vsel %vm4509_vm6, %v4501_v31, %v13389_v27  ;;  %v4511_v30 = vsel %vm4509_vm6, %v4502_v4, %v13390_v61  ;;  %v19128_v27 = vld [vmem:[#allocation20_spill] sm:$0xff]  ;;  %v19131_v31 = vld [vmem:[#allocation23_spill] sm:$0xff] }
0x17ab   : > { %12210 = vmatmul.mubr.msk.f32.vlgmr.msra.gmra.mrb[64].mxu1 %vm19041_vm1, %v4117_v12  ;;  %v4123_v57 = vmul.f32 %v13991_v3, %v15863_v41  ;;  %v13398_v18 = vpop.permute.xlu0 %13397  ;;  %v13395_v39 = vunpack.i.h.bf16 %v13393_v25  ;;  %v13394_v63 = vunpack.i.l.bf16 %v13393_v25  ;;  %v4504_v12 = vsel %vm964_vm4, %v19126_v26, %v13385_v15 }
0x17ac   : > { %12212 = vmatprep.mubr.msk.f32.mxu1 %vm19041_vm1, %v4118_v53  ;;  %12222 = vmatpush3.bf16.msra.mxu1 %v13658_v2  ;;  %v13399_v34 = vunpack.i.l.bf16 %v13398_v18  ;;  %v13400_v58 = vunpack.i.h.bf16 %v13398_v18  ;;  %v4503_v53 = vsel %vm964_vm4, %v19127_v51, %v13384_v8 }
0x17ad   : > { %12223 = vmatprep.subr.bf16.mxu1 %v13659_v36 }
0x17ae   : > { %v13403_v47 = vpop.permute.xlu1 %13402  ;;  %v4519_v2 = vsel %vm4518_vm7, %v4510_v43, %v13399_v34  ;;  %v19130_v34 = vld [vmem:[#allocation22_spill] sm:$0xff] }
0x17af   : > { %12213 = vmatmul.mubr.msk.f32.gmra.mrb[66].mxu1 %vm19041_vm1, %v4119_v10  ;;  %v13408_v7 = vpop.permute.xlu0 %13407  ;;  %v13404_v0 = vunpack.i.l.bf16 %v13403_v47  ;;  %v13405_v10 = vunpack.i.h.bf16 %v13403_v47 }
0x17b0   : > { %12215 = vmatprep.mubr.msk.f32.mxu1 %vm19041_vm1, %v4120_v14  ;;  %12224 = vmatpush3.bf16.msra.mxu1 %v13659_v36  ;;  %v13410_v14 = vunpack.i.h.bf16 %v13408_v7  ;;  %v13409_v23 = vunpack.i.l.bf16 %v13408_v7 }
0x17b1   : > { %12257 = vmatprep.subr.bf16.mxu1 %v19087_v52 }
0x17b2   : > { %v13413_v56 = vpop.permute.xlu1 %13412 }
0x17b3   : > { %12216 = vmatmul.mubr.msk.f32.gmra.mrb[68].mxu1 %vm19041_vm1, %v4121_v62  ;;  %v13418_v59 = vpop.permute.xlu0 %13417  ;;  %v13414_v62 = vunpack.i.l.bf16 %v13413_v56  ;;  %v13415_v36 = vunpack.i.h.bf16 %v13413_v56 }
0x17b4   : > { %12218 = vmatprep.mubr.msk.f32.mxu1 %vm19041_vm1, %v4122_v33  ;;  %v4512_v33 = vsel %vm4509_vm6, %v4503_v53, %v13394_v63  ;;  %v19129_v63 = vld [vmem:[#allocation21_spill] sm:$0xff] }
0x17b6   : > { %v16006_v6 = vpop.permute.xlu1 %13422 }
0x17b7   : > { %12219 = vmatmul.mubr.msk.f32.gmra.mrb[70].mxu1 %vm19041_vm1, %v4123_v57  ;;  %v16008_v1 = vpop.permute.xlu0 %13427  ;;  %v4513_v57 = vsel %vm4509_vm6, %v4504_v12, %v13395_v39 }
0x17ba   : > { %v16010_v49 = vpop.permute.xlu1 %13432 }
0x17bb   : > { %v16012_v50 = vpop.permute.xlu0 %13437  ;;  %v13434_v17 = vunpack.i.l.bf16 %v16010_v49 }
0x17bc   : > { %v13440_v54 = vunpack.i.h.bf16 %v16012_v50  ;;  %v13439_v18 = vunpack.i.l.bf16 %v16012_v50 }
0x17be   : > { %v16014_v44 = vpop.permute.xlu1 %13442  ;;  %v4506_v61 = vsel %vm964_vm4, %v19128_v27, %v13440_v54 }
0x17bf   : > { %v16016_v55 = vpop.permute.xlu0 %13447  ;;  %v13445_v47 = vunpack.i.h.bf16 %v16014_v44 }
0x17c0   : > { %v13450_v13 = vunpack.i.h.bf16 %v16016_v55  ;;  %v13449_v28 = vunpack.i.l.bf16 %v16016_v55 }
0x17c1   : > { %v4508_v40 = vsel %vm964_vm4, %v19130_v34, %v13445_v47 }
0x17c2   : > { %v16018_v5 = vpop.permute.xlu1 %13452  ;;  %v4515_v51 = vsel %vm4509_vm6, %v4506_v61, %v13450_v13 }
0x17c3   : > { %v16020_v32 = vpop.permute.xlu0 %13457  ;;  %v13454_v15 = vunpack.i.l.bf16 %v16018_v5  ;;  %v13455_v39 = vunpack.i.h.bf16 %v16018_v5 }
0x17c4   : > { %v13459_v4 = vunpack.i.l.bf16 %v16020_v32 }
0x17c6   : > { %v16026_v60 = vpop.permute.xlu1 %13462 }
0x17c7   : > { %v16034_v3 = vpop.permute.xlu0 %13467 }
0x17c8   : > { %v13469_v43 = vunpack.i.l.bf16 %v16034_v3 }
0x17cb   : > { %v13478_v7 = vpop.permute.xlu0 %13477 }
0x187e   : > { %v12211_v19 = vpop.f32.mrb[64].mxu1 }
0x187f   : > { %v4238_v45 = vpop.f32.mrb[65].mxu1 }
0x1880   : > { %v13486_v22 = vpack.i.bf16 %v12211_v19, %v4238_v45  ;;  %v4520_v19 = vsel %vm4518_vm7, %v4511_v30, %v13400_v58  ;;  %v4521_v45 = vsel %vm4518_vm7, %v4512_v33, %v13404_v0  ;;  %v13460_v0 = vunpack.i.h.bf16 %v16020_v32 }
0x1881   : > { %v13470_v30 = vunpack.i.h.bf16 %v16034_v3  ;;  %v13479_v33 = vunpack.i.l.bf16 %v13478_v7 }
0x1882   : > { %13487 = vrot.lane.b32.xlu0 %v13486_v22, %s18964_s15  ;;  %v12214_v41 = vpop.f32.mrb[66].mxu1  ;;  %v13420_v22 = vunpack.i.h.bf16 %v13418_v59 }
0x1883   : > { %v4248_v11 = vpop.f32.mrb[67].mxu1 }
0x1884   : > { %v13496_v16 = vpack.i.bf16 %v12214_v41, %v4248_v11  ;;  %v13419_v41 = vunpack.i.l.bf16 %v13418_v59  ;;  %v4522_v11 = vsel %vm4518_vm7, %v4513_v57, %v13405_v10  ;;  %v4517_v10 = vsel %vm4509_vm6, %v4508_v40, %v13455_v39 }
0x1886   : > { %13492 = vrot.lane.b32.xlu0 %v19122_v37, %s18966_s29  ;;  %13497 = vrot.lane.b32.xlu1 %v13496_v16, %s18964_s15  ;;  %v12217_v20 = vpop.f32.mrb[68].mxu1  ;;  %v13425_v16 = vunpack.i.h.bf16 %v16006_v6  ;;  %v13424_v37 = vunpack.i.l.bf16 %v16006_v6 }
0x1887   : > { %v4258_v38 = vpop.f32.mrb[69].mxu1 }
0x1888   : > { %v13506_v24 = vpack.i.bf16 %v12217_v20, %v4258_v38  ;;  %v13429_v20 = vunpack.i.l.bf16 %v16008_v1  ;;  %v4528_v38 = vsel %vm4527_vm8, %v4519_v2, %v13409_v23 }
0x1889   : > { %v4537_v35 = vsel %vm4536_vm9, %v4528_v38, %v13419_v41 }
0x188a   : > { %13502 = vrot.lane.b32.xlu1 %v19123_v21, %s18966_s29  ;;  %13507 = vrot.lane.b32.xlu0 %v13506_v24, %s18964_s15  ;;  %v12220_v9 = vpop.f32.mrb[70].mxu1  ;;  %v4529_v24 = vsel %vm4527_vm8, %v4520_v19, %v13410_v14  ;;  %v4530_v21 = vsel %vm4527_vm8, %v4521_v45, %v13414_v62  ;;  %v4546_v6 = vsel %vm4545_vm10, %v4537_v35, %v13429_v20  ;;  %v13480_v62 = vunpack.i.h.bf16 %v13478_v7  ;;  %s19149_s29 = smov 96  }
0x188b   : > { %v4268_v29 = vpop.f32.mrb[71].mxu1  ;;  %v4538_v25 = vsel %vm4536_vm9, %v4529_v24, %v13420_v22  ;;  %v4539_v56 = vsel %vm4536_vm9, %v4530_v21, %v13424_v37  ;;  %v4524_v19 = vsel %vm4518_vm7, %v4515_v51, %v13460_v0  ;;  %v13465_v45 = vunpack.i.h.bf16 %v16026_v60 }
0x188c   : > { %v13511_v46 = vpack.i.bf16 %v12220_v9, %v4268_v29  ;;  %v13430_v9 = vunpack.i.h.bf16 %v16008_v1  ;;  %v16049_v29 = vpop.permute.xlu1 %13472  ;;  %v13444_v1 = vunpack.i.l.bf16 %v16014_v44  ;;  %v4548_v50 = vsel %vm4545_vm10, %v4539_v56, %v13434_v17 }
0x188d   : > { %v4505_v44 = vsel %vm964_vm4, %v19129_v63, %v13439_v18  ;;  %v4533_v20 = vsel %vm4527_vm8, %v4524_v19, %v13470_v30  ;;  %v13475_v38 = vunpack.i.h.bf16 %v16049_v29 }
0x188e   : > { %13512 = vrot.lane.b32.xlu1 %v13511_v46, %s18964_s15  ;;  %4583 = vrot.lane.b32.xlu0 %v14352_v42, %s18963_s22  ;;  %v4531_v46 = vsel %vm4527_vm8, %v4522_v11, %v13415_v36  ;;  %v13435_v42 = vunpack.i.h.bf16 %v16010_v49  ;;  %v4547_v49 = vsel %vm4545_vm10, %v4538_v25, %v13430_v9  ;;  %v4507_v58 = vsel %vm964_vm4, %v19131_v31, %v13444_v1  ;;  %v13661_v31 = vld [vmem:[%s18896_s8 + $0x28] sm:$0xff]   ;;  %s10615_s15 = sshll.u32 %s14592_s14, 3  ;;  %s19153_s22 = smov 116  }
0x188f   : > { %v4540_v59 = vsel %vm4536_vm9, %v4531_v46, %v13425_v16  ;;  %v4514_v5 = vsel %vm4509_vm6, %v4505_v44, %v13449_v28  ;;  %v4516_v53 = vsel %vm4509_vm6, %v4507_v58, %v13454_v15  ;;  %v13464_v11 = vunpack.i.l.bf16 %v16026_v60  ;;  %v13662_v58 = vld [vmem:[%s18896_s8 + $0x30] sm:$0xff]   ;;  %s423_s1 = scalar_lea.vmem %s19132_s2, %s10615_s15  ;;  %s19152_s15 = smov 120  }
0x1890   : > { %v4549_v8 = vsel %vm4545_vm10, %v4540_v59, %v13435_v42  ;;  %v13483_v55 = vpop.permute.xlu1 %13482  ;;  %v4523_v32 = vsel %vm4518_vm7, %v4514_v5, %v13459_v4  ;;  %v13474_v9 = vunpack.i.l.bf16 %v16049_v29  ;;  %v4542_v60 = vsel %vm4536_vm9, %v4533_v20, %v13480_v62  ;;  %v439_v0 = vld [vmem:[%s423_s1] sm:$0xff]  ;;  %s19158_s1 = smov 92   ;;  %s19273_s2 = sshll.u32 %s14592_s14, 6 }
0x1891   : > { %v4532_v3 = vsel %vm4527_vm8, %v4523_v32, %v13469_v43  ;;  %v13485_v35 = vunpack.i.h.bf16 %v13483_v55  ;;  %v13484_v25 = vunpack.i.l.bf16 %v13483_v55  ;;  %v4525_v29 = vsel %vm4518_vm7, %v4516_v53, %v13464_v11  ;;  %s14455_s14 = smov [#allocation2]  }
0x1892   : > { %v4541_v46 = vsel %vm4536_vm9, %v4532_v3, %v13479_v33  ;;  %v4526_v1 = vsel %vm4518_vm7, %v4517_v10, %v13465_v45  ;;  %v4534_v28 = vsel %vm4527_vm8, %v4525_v29, %v13474_v9  ;;  %v19135_v33 = vld [vmem:[#allocation9_spill] sm:$0xff] }
0x1893   : > { %v4535_v15 = vsel %vm4527_vm8, %v4526_v1, %v13475_v38  ;;  %v4543_v27 = vsel %vm4536_vm9, %v4534_v28, %v13484_v25  ;;  %v13664_v1 = vld [vmem:[%s18895_s7 + $0x10] sm:$0xff]  }
0x1894   : > { %v4544_v61 = vsel %vm4536_vm9, %v4535_v15, %v13485_v35  ;;  %v19145_v35 = vld [vmem:[#allocation14_spill] sm:$0xff] }
0x18f4   : > { %v13488_v48 = vpop.permute.xlu0 %13487 }
0x18f5   : > { %v13490_v26 = vunpack.i.h.bf16 %v13488_v48  ;;  %v13489_v12 = vunpack.i.l.bf16 %v13488_v48  ;;  %v13660_v48 = vld [vmem:[%s18896_s8 + $0x20] sm:$0xff]  }
0x18f6   : > { %12234 = vmatpush3.bf16.msra.mxu0 %v13660_v48 }
0x18f7   : > { %v4556_v14 = vsel %vm4554_vm11, %v4547_v49, %v13490_v26  ;;  %v4555_v23 = vsel %vm4554_vm11, %v4546_v6, %v13489_v12  ;;  %12235 = vmatprep.subr.bf16.mxu0 %v19087_v52  ;;  %v13663_v26 = vld [vmem:[%s18896_s8 + $0x38] sm:$0xff]   ;;  %v4671_v12 = vpack.c.bf16 %v439_v0, %v439_v0 }
0x18f8   : > { %v13493_v57 = vpop.permute.xlu0 %13492  ;;  %v13498_v2 = vpop.permute.xlu1 %13497  ;;  %v4567_v36 = vpack.c.bf16 %v4556_v14, %v4555_v23  ;;  %v19133_v14 = vld [vmem:[#allocation11_spill] sm:$0xff] }
0x18f9   : > { %v13500_v22 = vunpack.i.h.bf16 %v13498_v2  ;;  %v13499_v41 = vunpack.i.l.bf16 %v13498_v2  ;;  %v13495_v16 = vunpack.i.h.bf16 %v13493_v57  ;;  %v13494_v37 = vunpack.i.l.bf16 %v13493_v57 }
0x18fa   : > { %12225 = vmatprep.mubr.msk.bf16.mxu1 %vm19040_vm2, %v4567_v36  ;;  %12236 = vmatpush3.bf16.msra.mxu0 %v13661_v31  ;;  %v19137_v36 = vld [vmem:[#allocation10_spill] sm:$0xff] }
0x18fb   : > { %v4558_v24 = vsel %vm4554_vm11, %v4549_v8, %v13500_v22  ;;  %v4557_v21 = vsel %vm4554_vm11, %v4548_v50, %v13499_v41  ;;  %v4551_v7 = vsel %vm4545_vm10, %v4542_v60, %v13495_v16  ;;  %v4550_v56 = vsel %vm4545_vm10, %v4541_v46, %v13494_v37  ;;  %12237 = vmatprep.subr.bf16.mxu0 %v19087_v52  ;;  %v19139_v22 = vld [vmem:[#allocation8_spill] sm:$0xff] }
0x18fc   : > { %v4568_v42 = vpack.c.bf16 %v4558_v24, %v4557_v21  ;;  %v13503_v17 = vpop.permute.xlu1 %13502  ;;  %v13508_v54 = vpop.permute.xlu0 %13507  ;;  %v19141_v21 = vld [vmem:[#allocation15_spill] sm:$0xff] }
0x18fd   : > { %v13510_v18 = vunpack.i.h.bf16 %v13508_v54  ;;  %v13509_v47 = vunpack.i.l.bf16 %v13508_v54  ;;  %v13505_v59 = vunpack.i.h.bf16 %v13503_v17  ;;  %v13504_v6 = vunpack.i.l.bf16 %v13503_v17 }
0x18fe   : > { %12226 = vmatmul.mubr.msk.bf16.vlgmr.msra.gmra.mrb[72].mxu1 %vm19040_vm2, %v4568_v42  ;;  %12238 = vmatpush3.bf16.msra.mxu0 %v13662_v58  ;;  %v19143_v42 = vld [vmem:[#allocation13_spill] sm:$0xff] }
0x18ff   : > { %v4560_v49 = vsel %vm4554_vm11, %v4551_v7, %v13510_v18  ;;  %v4559_v13 = vsel %vm4554_vm11, %v4550_v56, %v13509_v47  ;;  %v4553_v44 = vsel %vm4545_vm10, %v4544_v61, %v13505_v59  ;;  %v4552_v34 = vsel %vm4545_vm10, %v4543_v27, %v13504_v6  ;;  %12239 = vmatprep.subr.bf16.mxu0 %v19087_v52  ;;  %v19147_v47 = vld [vmem:[#allocation12_spill] sm:$0xff] }
0x1900   : > { %v13513_v50 = vpop.permute.xlu1 %13512  ;;  %v4569_v8 = vpack.c.bf16 %v4560_v49, %v4559_v13  ;;  %v4584_v5 = vpop.permute.xlu0 %4583  ;;  %v13665_v49 = vld [vmem:[%s18895_s7 + $0x18] sm:$0xff]  }
0x1901   : > { %v13515_v39 = vunpack.i.h.bf16 %v13513_v50  ;;  %v13514_v63 = vunpack.i.l.bf16 %v13513_v50 }
0x1902   : > { %12229 = vmatprep.mubr.msk.bf16.mxu1 %vm19040_vm2, %v4569_v8  ;;  %12240 = vmatpush3.bf16.msra.mxu0 %v13663_v26 }
0x1903   : > { %v4562_v40 = vsel %vm4554_vm11, %v4553_v44, %v13515_v39  ;;  %v4561_v4 = vsel %vm4554_vm11, %v4552_v34, %v13514_v63  ;;  %12245 = vmatprep.subr.bf16.mxu0 %v13664_v1 }
0x1904   : > { %v4570_v55 = vpack.c.bf16 %v4562_v40, %v4561_v4 }
0x1905   : > { %12242 = vmatmul.mubr.msk.bf16.vlgmr.msra.gmra.mrb[76].mxu0 %vm19041_vm1, %v4671_v12 }
0x1906   : > { %12230 = vmatmul.mubr.msk.bf16.gmra.mrb[76].mxu1 %vm19040_vm2, %v4570_v55  ;;  %12246 = vmatpush3.bf16.msra.mxu0 %v13664_v1 }
0x1907   : > { %12261 = vmatprep.mubr.msk.bf16.mxu1 %vm19042_vm0, %v19087_v52  ;;  %12247 = vmatprep.subr.bf16.mxu0 %v13665_v49 }
0x190a   : > { %12248 = vmatpush3.bf16.msra.mxu0 %v13665_v49 }
0x19d1   : > { %v12227_v51 = vpop.f32.mrb[72].mxu1 }
0x19d2   : > { %v4641_v53 = vadd.f32 %v12227_v51, %v4584_v5  ;;  %v4632_v43 = vpop.f32.mrb[73].mxu1 }
0x19d3   : > { %v4633_v10 = vadd.f32 %v4632_v43, %v4584_v5  ;;  %v12228_v30 = vpop.f32.mrb[74].mxu1 }
0x19d4   : > { %v16141_v23 = vadd.f32 %v4641_v53, %v19133_v14  ;;  %v4644_v32 = vadd.f32 %v12228_v30, %v4584_v5  ;;  %v4635_v62 = vpop.f32.mrb[75].mxu1 }
0x19d5   : > { %v16144_v57 = vadd.f32 %v4633_v10, %v19135_v33  ;;  %v4636_v2 = vadd.f32 %v4635_v62, %v4584_v5 }
0x19d6   : > { %19134 = vst [vmem:[#allocation24_spill] sm:$0xff] %v16141_v23  ;;  %v16147_v19 = vadd.f32 %v19137_v36, %v4644_v32  ;;  %v4758_v45 = vsel %vm19040_vm2, %v16141_v23, 0.0 }
0x19d7   : > { %19136 = vst [vmem:[#allocation25_spill] sm:$0xff] %v16144_v57  ;;  %v16152_v41 = vadd.f32 %v19139_v22, %v4636_v2  ;;  %4759 = vadd.xlane.f32.xlu0 %v4758_v45  ;;  %v4752_v11 = vsel %vm19040_vm2, %v16144_v57, 0.0 }
0x19d8   : > { %19138 = vst [vmem:[#allocation28_spill] sm:$0xff] %v16147_v19  ;;  %4753 = vadd.xlane.f32.xlu1 %v4752_v11  ;;  %v4761_v18 = vsel %vm19040_vm2, %v16147_v19, 0.0 }
0x19d9   : > { %19140 = vst [vmem:[#allocation29_spill] sm:$0xff] %v16152_v41  ;;  %v12231_v3 = vpop.f32.mrb[76].mxu1  ;;  %v4755_v16 = vsel %vm19040_vm2, %v16152_v41, 0.0 }
0x19da   : > { %v4657_v37 = vadd.f32 %v12231_v3, %v4584_v5  ;;  %v4648_v20 = vpop.f32.mrb[77].mxu1 }
0x19db   : > { %v4649_v38 = vadd.f32 %v4648_v20, %v4584_v5  ;;  %v12232_v24 = vpop.f32.mrb[78].mxu1  ;;  %4756 = vadd.xlane.f32.xlu0 %v4755_v16 }
0x19dc   : > { %v16159_v9 = vadd.f32 %v4657_v37, %v19141_v21  ;;  %v4660_v46 = vadd.f32 %v12232_v24, %v4584_v5  ;;  %v4651_v60 = vpop.f32.mrb[79].mxu1  ;;  %v4746_v24 = vpop.f32.mrb[76].mxu0 }
0x19dd   : > { %v16162_v17 = vadd.f32 %v4649_v38, %v19143_v42  ;;  %v4652_v54 = vadd.f32 %v4651_v60, %v4584_v5  ;;  %v12243_v21 = vpop.f32.mrb[77].mxu0  ;;  %v16239_v42 = vld [vmem:[%s18893_s5 + $0x1] ss:$0 sm:$0xff] }
0x19de   : > { %19142 = vst [vmem:[#allocation26_spill] sm:$0xff] %v16159_v9  ;;  %v16165_v25 = vadd.f32 %v19145_v35, %v4660_v46  ;;  %v4770_v6 = vsel %vm19040_vm2, %v16159_v9, 0.0  ;;  %v4749_v46 = vpop.f32.mrb[78].mxu0 }
0x19df   : > { %19144 = vst [vmem:[#allocation27_spill] sm:$0xff] %v16162_v17  ;;  %v16170_v7 = vadd.f32 %v19147_v47, %v4652_v54  ;;  %4762 = vadd.xlane.f32.xlu0 %v4761_v18  ;;  %v4764_v56 = vsel %vm19040_vm2, %v16162_v17, 0.0  ;;  %v12244_v60 = vpop.f32.mrb[79].mxu0 }
0x19e0   : > { %19146 = vst [vmem:[#allocation32_spill] sm:$0xff] %v16165_v25  ;;  %4765 = vadd.xlane.f32.xlu1 %v4764_v56  ;;  %v4773_v29 = vsel %vm19040_vm2, %v16165_v25, 0.0 }
0x19e1   : > { %19148 = vst [vmem:[#allocation33_spill] sm:$0xff] %v16170_v7  ;;  %v4767_v59 = vsel %vm19040_vm2, %v16170_v7, 0.0 }
0x19e3   : > { %4768 = vadd.xlane.f32.xlu0 %v4767_v59 }
0x19e4   : > { %4771 = vadd.xlane.f32.xlu1 %v4770_v6 }
0x19e7   : > { %4774 = vadd.xlane.f32.xlu0 %v4773_v29 }
0x1a64   : > { %v4760_v13 = vpop.xlane.xlu0 %4759 }
0x1a65   : > { %v4778_v28 = vmul.f32 0.03125, %v4760_v13  ;;  %v4754_v15 = vpop.xlane.xlu1 %4753 }
0x1a66   : > { %v4776_v50 = vmul.f32 0.03125, %v4754_v15 }
0x1a67   : > { %v16187_v8 = vsub.f32 %v16141_v23, %v4778_v28 }
0x1a68   : > { %v16190_v27 = vsub.f32 %v16144_v57, %v4776_v50  ;;  %v4757_v61 = vpop.xlane.xlu0 %4756 }
0x1a69   : > { %v4794_v39 = vmul.f32 %v16187_v8, %v16187_v8  ;;  %v4777_v63 = vmul.f32 0.03125, %v4757_v61 }
0x1a6a   : > { %v4792_v34 = vmul.f32 %v16190_v27, %v16190_v27 }
0x1a6b   : > { %v4806_v44 = vsel %vm19040_vm2, %v4794_v39, 0.0  ;;  %v16198_v48 = vsub.f32 %v16152_v41, %v4777_v63 }
0x1a6c   : > { %v4763_v40 = vpop.xlane.xlu0 %4762  ;;  %4807 = vadd.xlane.f32.xlu1 %v4806_v44  ;;  %v4800_v58 = vsel %vm19040_vm2, %v4792_v34, 0.0 }
0x1a6d   : > { %v4779_v4 = vmul.f32 0.03125, %v4763_v40  ;;  %v4766_v55 = vpop.xlane.xlu1 %4765  ;;  %v4793_v10 = vmul.f32 %v16198_v48, %v16198_v48  ;;  %v10838_v40 = vld [vmem:[%s18891_s3 + $0x4c] ss:$0 sm:$0xff] }
0x1a6e   : > { %v4780_v0 = vmul.f32 0.03125, %v4766_v55 }
0x1a6f   : > { %v16201_v31 = vsub.f32 %v16147_v19, %v4779_v4  ;;  %v4803_v45 = vsel %vm19040_vm2, %v4793_v10, 0.0 }
0x1a70   : > { %v4769_v26 = vpop.xlane.xlu0 %4768  ;;  %4801 = vadd.xlane.f32.xlu1 %v4800_v58  ;;  %v16210_v30 = vsub.f32 %v16162_v17, %v4780_v0 }
0x1a71   : > { %v4772_v12 = vpop.xlane.xlu1 %4771  ;;  %v4795_v5 = vmul.f32 %v16201_v31, %v16201_v31  ;;  %v4781_v53 = vmul.f32 0.03125, %v4769_v26 }
0x1a72   : > { %v4782_v51 = vmul.f32 0.03125, %v4772_v12  ;;  %v4796_v11 = vmul.f32 %v16210_v30, %v16210_v30 }
0x1a73   : > { %v4809_v43 = vsel %vm19040_vm2, %v4795_v5, 0.0  ;;  %v16218_v2 = vsub.f32 %v16170_v7, %v4781_v53  ;;  %v4747_v5 = vadd.f32 %v10838_v40, %v4746_v24 }
0x1a74   : > { %v16213_v14 = vsub.f32 %v16159_v9, %v4782_v51  ;;  %4810 = vadd.xlane.f32.xlu0 %v4809_v43  ;;  %v4775_v32 = vpop.xlane.xlu0 %4774  ;;  %v4812_v20 = vsel %vm19040_vm2, %v4796_v11, 0.0 }
0x1a75   : > { %v4783_v62 = vmul.f32 0.03125, %v4775_v32  ;;  %v4797_v37 = vmul.f32 %v16218_v2, %v16218_v2 }
0x1a76   : > { %v4798_v33 = vmul.f32 %v16213_v14, %v16213_v14 }
0x1a77   : > { %v16221_v36 = vsub.f32 %v16165_v25, %v4783_v62  ;;  %v4815_v38 = vsel %vm19040_vm2, %v4797_v37, 0.0 }
0x1a78   : > { %4804 = vadd.xlane.f32.xlu0 %v4803_v45  ;;  %v4818_v22 = vsel %vm19040_vm2, %v4798_v33, 0.0  ;;  %v4988_v45 = vpack.c.bf16 %v4747_v5, %v4747_v5 }
0x1a79   : > { %4819 = vadd.xlane.f32.xlu1 %v4818_v22  ;;  %v4799_v3 = vmul.f32 %v16221_v36, %v16221_v36  ;;  %v10844_v22 = vld [vmem:[%s18891_s3 + $0x47] ss:$0 sm:$0xff] }
0x1a7b   : > { %v4821_v16 = vsel %vm19040_vm2, %v4799_v3, 0.0 }
0x1a7c   : > { %4822 = vadd.xlane.f32.xlu0 %v4821_v16 }
0x1a7d   : > { %4813 = vadd.xlane.f32.xlu1 %v4812_v20 }
0x1a80   : > { %4816 = vadd.xlane.f32.xlu0 %v4815_v38 }
0x1a8e   : > { %4989 = vrot.lane.b32.xlu1 %v13664_v1, %s19149_s29 }
0x1a92   : > { %4995 = vrot.lane.b32.xlu1 %v16239_v42, %s19149_s29 }
0x1a96   : > { %4991 = vrot.lane.b32.xlu0 %v13665_v49, %s19149_s29 }
0x1af9   : > { %v4808_v54 = vpop.xlane.xlu1 %4807 }
0x1afa   : > { %v4826_v35 = vmul.f32 0.03125, %v4808_v54 }
0x1afc   : > { %v4834_v59 = vadd.f32 1e-05, %v4826_v35 }
0x1afd   : > { %v4802_v18 = vpop.xlane.xlu1 %4801 }
0x1afe   : > { %v4824_v47 = vmul.f32 0.03125, %v4802_v18 }
0x1b00   : > { %v4832_v56 = vadd.f32 1e-05, %v4824_v47 }
0x1b01   : > { %v4811_v6 = vpop.xlane.xlu0 %4810 }
0x1b02   : > { %v4827_v29 = vmul.f32 0.03125, %v4811_v6  ;;  %13992 = vrsqrt.f32 %v4832_v56 }
0x1b03   : > { %13994 = vrsqrt.f32 %v4834_v59 }
0x1b04   : > { %v4835_v1 = vadd.f32 1e-05, %v4827_v29 }
0x1b05   : > { %v4805_v49 = vpop.xlane.xlu0 %4804 }
0x1b06   : > { %13996 = vrsqrt.f32 %v4835_v1  ;;  %v4825_v13 = vmul.f32 0.03125, %v4805_v49  ;;  %v4820_v28 = vpop.xlane.xlu1 %4819 }
0x1b07   : > { %v4830_v15 = vmul.f32 0.03125, %v4820_v28 }
0x1b08   : > { %v4833_v50 = vadd.f32 1e-05, %v4825_v13 }
0x1b09   : > { %v4838_v61 = vadd.f32 1e-05, %v4830_v15  ;;  %v4823_v39 = vpop.xlane.xlu0 %4822 }
0x1b0a   : > { %13998 = vrsqrt.f32 %v4833_v50  ;;  %v4831_v63 = vmul.f32 0.03125, %v4823_v39  ;;  %v4814_v44 = vpop.xlane.xlu1 %4813 }
0x1b0b   : > { %v4828_v34 = vmul.f32 0.03125, %v4814_v44  ;;  %14000 = vrsqrt.f32 %v4838_v61 }
0x1b0c   : > { %v4839_v4 = vadd.f32 1e-05, %v4831_v63  ;;  %v13993_v0 = vpop.eup %13992 }
0x1b0d   : > { %v4836_v55 = vadd.f32 1e-05, %v4828_v34  ;;  %v4817_v58 = vpop.xlane.xlu0 %4816  ;;  %v13995_v51 = vpop.eup %13994  ;;  %v4848_v62 = vmul.f32 %v13993_v0, %v16190_v27 }
0x1b0e   : > { %14002 = vrsqrt.f32 %v4839_v4  ;;  %v4829_v26 = vmul.f32 0.03125, %v4817_v58  ;;  %v4990_v12 = vpop.permute.xlu1 %4989  ;;  %v4850_v33 = vmul.f32 %v13995_v51, %v16187_v8  ;;  %v10845_v8 = vld [vmem:[%s18891_s3 + $0x4a] ss:$0 sm:$0xff] }
0x1b0f   : > { %14004 = vrsqrt.f32 %v4836_v55  ;;  %12258 = vmatpush3.bf16.msra.mxu1 %v4990_v12  ;;  %v4861_v37 = vmul.f32 %v10844_v22, %v4848_v62 }
0x1b10   : > { %v13997_v53 = vpop.eup %13996  ;;  %v4837_v43 = vadd.f32 1e-05, %v4829_v26  ;;  %12259 = vmatprep.subr.bf16.mxu1 %v19087_v52  ;;  %v4863_v20 = vmul.f32 %v10844_v22, %v4850_v33 }
0x1b11   : > { %v4851_v10 = vmul.f32 %v13997_v53, %v16201_v31  ;;  %v4992_v32 = vpop.permute.xlu0 %4991  ;;  %v4874_v46 = vadd.f32 %v10845_v8, %v4861_v37 }
0x1b12   : > { %14006 = vrsqrt.f32 %v4837_v43  ;;  %v4876_v35 = vadd.f32 %v10845_v8, %v4863_v20 }
0x1b13   : > { %12260 = vmatpush3.bf16.msra.mxu1 %v4992_v32  ;;  %v4864_v3 = vmul.f32 %v10844_v22, %v4851_v10 }
0x1b14   : > { %v13999_v11 = vpop.eup %13998 }
0x1b15   : > { %v4849_v16 = vmul.f32 %v13999_v11, %v16198_v48  ;;  %v14001_v31 = vpop.eup %14000  ;;  %v4877_v24 = vadd.f32 %v10845_v8, %v4864_v3 }
0x1b16   : > { %12262 = vmatmul.mubr.msk.bf16.vlgmr.msra.gmra.mrb[80].mxu1 %vm19040_vm2, %v4988_v45  ;;  %v4854_v18 = vmul.f32 %v14001_v31, %v16213_v14  ;;  %v4996_v14 = vpop.permute.xlu1 %4995 }
0x1b17   : > { %v4862_v38 = vmul.f32 %v10844_v22, %v4849_v16  ;;  %v4890_v59 = vpack.c.bf16 %v4877_v24, %v4876_v35 }
0x1b18   : > { %v14003_v27 = vpop.eup %14002  ;;  %v4867_v49 = vmul.f32 %v10844_v22, %v4854_v18 }
0x1b19   : > { %v14005_v21 = vpop.eup %14004  ;;  %v4875_v60 = vadd.f32 %v10845_v8, %v4862_v38  ;;  %v4855_v54 = vmul.f32 %v14003_v27, %v16221_v36 }
0x1b1a   : > { %v4852_v48 = vmul.f32 %v14005_v21, %v16210_v30  ;;  %v4880_v50 = vadd.f32 %v10845_v8, %v4867_v49 }
0x1b1b   : > { %v4889_v47 = vpack.c.bf16 %v4875_v60, %v4874_v46  ;;  %v4868_v6 = vmul.f32 %v10844_v22, %v4855_v54 }
0x1b1c   : > { %v14007_v56 = vpop.eup %14006  ;;  %v4865_v1 = vmul.f32 %v10844_v22, %v4852_v48 }
0x1b1d   : > { %12249 = vmatprep.mubr.msk.bf16.mxu0 %vm19040_vm2, %v4889_v47  ;;  %v4853_v29 = vmul.f32 %v14007_v56, %v16218_v2  ;;  %v4881_v28 = vadd.f32 %v10845_v8, %v4868_v6 }
0x1b1e   : > { %12250 = vmatmul.mubr.msk.bf16.vlgmr.msra.gmra.mrb[80].mxu0 %vm19040_vm2, %v4890_v59  ;;  %v4878_v36 = vadd.f32 %v10845_v8, %v4865_v1 }
0x1b1f   : > { %v4866_v13 = vmul.f32 %v10844_v22, %v4853_v29  ;;  %v4892_v61 = vpack.c.bf16 %v4881_v28, %v4880_v50 }
0x1b21   : > { %v4879_v15 = vadd.f32 %v10845_v8, %v4866_v13 }
0x1b23   : > { %v4891_v30 = vpack.c.bf16 %v4879_v15, %v4878_v36 }
0x1b25   : > { %12253 = vmatprep.mubr.msk.bf16.mxu0 %vm19040_vm2, %v4891_v30 }
0x1b26   : > { %12254 = vmatmul.mubr.msk.bf16.gmra.mrb[84].mxu0 %vm19040_vm2, %v4892_v61 }
0x1be9   : > { %v5035_v39 = vpop.f32.mrb[80].mxu1 }
0x1bea   : > { %v16266_v63 = vadd.f32 %v5035_v39, %v4996_v14  ;;  %v12263_v2 = vpop.f32.mrb[81].mxu1 }
0x1beb   : > { %v5038_v44 = vpop.f32.mrb[82].mxu1 }
0x1bec   : > { %19150 = vst [vmem:[#allocation30_spill] sm:$0xff] %v16266_v63  ;;  %v12264_v34 = vpop.f32.mrb[83].mxu1  ;;  %5417 = vrot.lane.b32.xlu1 %v16266_v63, %s19151_s16  ;;  %12265 = vmatprep.subr.msk.mxu1 %vm964_vm4, %v16266_v63 }
0x1bed   : > { %12266 = vmatpush3.xpose.msk.msra.mxu1 %vm964_vm4, %v16266_v63 }
0x1bf0   : > { %5786 = vrot.lane.b32.xlu1 %v16266_v63, %s19152_s15 }
0x1bf1   : > { %v12251_v40 = vpop.f32.mrb[80].mxu0 }
0x1bf2   : > { %v16277_v4 = vadd.f32 %v12251_v40, %v16239_v42  ;;  %v4957_v55 = vpop.f32.mrb[81].mxu0 }
0x1bf3   : > { %v16280_v58 = vadd.f32 %v16239_v42, %v4957_v55  ;;  %v12252_v0 = vpop.f32.mrb[82].mxu0 }
0x1bf4   : > { %5774 = vrot.lane.b32.xlu0 %v16277_v4, %s19152_s15  ;;  %v4960_v26 = vpop.f32.mrb[83].mxu0  ;;  %5405 = vrot.lane.b32.xlu1 %v16277_v4, %s19151_s16  ;;  %v16298_v5 = vadd.f32 %v12252_v0, %v16239_v42 }
0x1bf5   : > { %v16287_v12 = vadd.f32 %v16239_v42, %v4960_v26  ;;  %12267 = vmatprep.mubr.msk.f32.mxu1 %vm964_vm4, %v16280_v58 }
0x1bf7   : > { %12268 = vmatmul.mubr.msk.f32.vlgmr.msra.gmra.mrb[84].mxu1 %vm964_vm4, %v16287_v12 }
0x1bf8   : > { %5770 = vrot.lane.b32.xlu0 %v16280_v58, %s19152_s15  ;;  %5401 = vrot.lane.b32.xlu1 %v16280_v58, %s19151_s16 }
0x1bf9   : > { %12270 = vmatprep.mubr.msk.f32.mxu1 %vm964_vm4, %v16277_v4  ;;  %v12255_v51 = vpop.f32.mrb[84].mxu0 }
0x1bfa   : > { %v4973_v53 = vpop.f32.mrb[85].mxu0  ;;  %v16317_v33 = vadd.f32 %v12255_v51, %v16239_v42 }
0x1bfb   : > { %v16303_v43 = vadd.f32 %v16239_v42, %v4973_v53  ;;  %v12256_v10 = vpop.f32.mrb[86].mxu0  ;;  %12271 = vmatmul.mubr.msk.f32.gmra.mrb[86].mxu1 %vm964_vm4, %v16298_v5 }
0x1bfc   : > { %5407 = vrot.lane.b32.xlu0 %v16298_v5, %s19151_s16  ;;  %v4976_v32 = vpop.f32.mrb[87].mxu0  ;;  %5772 = vrot.lane.b32.xlu1 %v16287_v12, %s19152_s15  ;;  %v16326_v45 = vadd.f32 %v12256_v10, %v16239_v42 }
0x1bfd   : > { %v16312_v62 = vadd.f32 %v16239_v42, %v4976_v32  ;;  %12273 = vmatprep.mubr.msk.f32.mxu1 %vm964_vm4, %v16303_v43 }
0x1bff   : > { %12274 = vmatmul.mubr.msk.f32.gmra.mrb[88].mxu1 %vm964_vm4, %v16312_v62 }
0x1c00   : > { %5403 = vrot.lane.b32.xlu0 %v16287_v12, %s19151_s16  ;;  %5413 = vrot.lane.b32.xlu1 %v16317_v33, %s19151_s16 }
0x1c01   : > { %12276 = vmatprep.mubr.msk.f32.mxu1 %vm964_vm4, %v16317_v33 }
0x1c03   : > { %12277 = vmatmul.mubr.msk.f32.gmra.mrb[90].mxu1 %vm964_vm4, %v16326_v45 }
0x1c04   : > { %5415 = vrot.lane.b32.xlu0 %v16326_v45, %s19151_s16  ;;  %5409 = vrot.lane.b32.xlu1 %v16303_v43, %s19151_s16 }
0x1c08   : > { %5411 = vrot.lane.b32.xlu0 %v16312_v62, %s19151_s16  ;;  %5776 = vrot.lane.b32.xlu1 %v16298_v5, %s19152_s15  ;;  %s19160_s16 = smov 84  }
0x1c0c   : > { %5778 = vrot.lane.b32.xlu0 %v16303_v43, %s19152_s15  ;;  %5784 = vrot.lane.b32.xlu1 %v16326_v45, %s19152_s15 }
0x1c10   : > { %5782 = vrot.lane.b32.xlu0 %v16317_v33, %s19152_s15  ;;  %6139 = vrot.lane.b32.xlu1 %v16280_v58, %s19153_s22 }
0x1c14   : > { %6155 = vrot.lane.b32.xlu0 %v16266_v63, %s19153_s22  ;;  %5780 = vrot.lane.b32.xlu1 %v16312_v62, %s19152_s15  ;;  %s19161_s15 = smov 80  }
0x1c18   : > { %6141 = vrot.lane.b32.xlu0 %v16287_v12, %s19153_s22  ;;  %6143 = vrot.lane.b32.xlu1 %v16277_v4, %s19153_s22 }
0x1c1c   : > { %6145 = vrot.lane.b32.xlu0 %v16298_v5, %s19153_s22  ;;  %6147 = vrot.lane.b32.xlu1 %v16303_v43, %s19153_s22 }
0x1c20   : > { %6153 = vrot.lane.b32.xlu0 %v16326_v45, %s19153_s22  ;;  %6151 = vrot.lane.b32.xlu1 %v16317_v33, %s19153_s22 }
0x1c24   : > { %6508 = vrot.lane.b32.xlu0 %v16280_v58, %s19154_s12  ;;  %6524 = vrot.lane.b32.xlu1 %v16266_v63, %s19154_s12 }
0x1c28   : > { %6149 = vrot.lane.b32.xlu0 %v16312_v62, %s19153_s22  ;;  %6510 = vrot.lane.b32.xlu1 %v16287_v12, %s19154_s12  ;;  %s19203_s22 = smov 76  }
0x1c2c   : > { %6512 = vrot.lane.b32.xlu0 %v16277_v4, %s19154_s12  ;;  %6514 = vrot.lane.b32.xlu1 %v16298_v5, %s19154_s12 }
0x1c30   : > { %6516 = vrot.lane.b32.xlu0 %v16303_v43, %s19154_s12  ;;  %6522 = vrot.lane.b32.xlu1 %v16326_v45, %s19154_s12 }
0x1c34   : > { %6520 = vrot.lane.b32.xlu0 %v16317_v33, %s19154_s12  ;;  %6518 = vrot.lane.b32.xlu1 %v16312_v62, %s19154_s12  ;;  %s19212_s12 = smov 68  }
0x1c38   : > { %6893 = vrot.lane.b32.xlu0 %v16266_v63, %s19155_s24  ;;  %6877 = vrot.lane.b32.xlu1 %v16280_v58, %s19155_s24 }
0x1c3c   : > { %6879 = vrot.lane.b32.xlu0 %v16287_v12, %s19155_s24  ;;  %6881 = vrot.lane.b32.xlu1 %v16277_v4, %s19155_s24 }
0x1c40   : > { %6883 = vrot.lane.b32.xlu0 %v16298_v5, %s19155_s24  ;;  %6885 = vrot.lane.b32.xlu1 %v16303_v43, %s19155_s24 }
0x1c44   : > { %6891 = vrot.lane.b32.xlu0 %v16326_v45, %s19155_s24  ;;  %6889 = vrot.lane.b32.xlu1 %v16317_v33, %s19155_s24 }
0x1c48   : > { %6887 = vrot.lane.b32.xlu0 %v16312_v62, %s19155_s24  ;;  %7262 = vrot.lane.b32.xlu1 %v16266_v63, %s19156_s13  ;;  %s19227_s24 = smov 4  }
0x1c4c   : > { %7246 = vrot.lane.b32.xlu0 %v16280_v58, %s19156_s13  ;;  %7248 = vrot.lane.b32.xlu1 %v16287_v12, %s19156_s13 }
0x1c50   : > { %7250 = vrot.lane.b32.xlu0 %v16277_v4, %s19156_s13  ;;  %7252 = vrot.lane.b32.xlu1 %v16298_v5, %s19156_s13 }
0x1c54   : > { %7254 = vrot.lane.b32.xlu0 %v16303_v43, %s19156_s13  ;;  %7256 = vrot.lane.b32.xlu1 %v16312_v62, %s19156_s13 }
0x1c58   : > { %7258 = vrot.lane.b32.xlu0 %v16317_v33, %s19156_s13  ;;  %7260 = vrot.lane.b32.xlu1 %v16326_v45, %s19156_s13  ;;  %s19228_s13 = smov 8  }
0x1c5c   : > { %7631 = vrot.lane.b32.xlu0 %v16266_v63, %s19157_s0  ;;  %7615 = vrot.lane.b32.xlu1 %v16280_v58, %s19157_s0 }
0x1c5e   : > { %v5418_v42 = vpop.permute.xlu1 %5417 }
0x1c5f   : > { %12293 = vmatprep.subr.msk.mxu1 %vm964_vm4, %v5418_v42 }
0x1c60   : > { %7617 = vrot.lane.b32.xlu0 %v16287_v12, %s19157_s0  ;;  %7619 = vrot.lane.b32.xlu1 %v16277_v4, %s19157_s0 }
0x1c61   : > { %12294 = vmatpush3.xpose.msk.msra.mxu1 %vm964_vm4, %v5418_v42 }
0x1c62   : > { %v5787_v22 = vpop.permute.xlu1 %5786 }
0x1c63   : > { %12321 = vmatprep.subr.msk.mxu1 %vm964_vm4, %v5787_v22 }
0x1c64   : > { %7621 = vrot.lane.b32.xlu0 %v16298_v5, %s19157_s0  ;;  %7623 = vrot.lane.b32.xlu1 %v16303_v43, %s19157_s0 }
0x1c66   : > { %v5775_v11 = vpop.permute.xlu0 %5774  ;;  %v5406_v3 = vpop.permute.xlu1 %5405 }
0x1c68   : > { %7625 = vrot.lane.b32.xlu0 %v16312_v62, %s19157_s0  ;;  %7627 = vrot.lane.b32.xlu1 %v16317_v33, %s19157_s0 }
0x1c6a   : > { %v5771_v16 = vpop.permute.xlu0 %5770  ;;  %v5402_v37 = vpop.permute.xlu1 %5401 }
0x1c6b   : > { %12295 = vmatprep.mubr.msk.f32.mxu1 %vm964_vm4, %v5402_v37 }
0x1c6c   : > { %7629 = vrot.lane.b32.xlu0 %v16326_v45, %s19157_s0  ;;  %5269 = vrot.lane.b32.xlu1 %v16266_v63, %s19149_s29  ;;  %s19201_s29 = smov 72   ;;  %s19230_s0 = smov 12  }
0x1c6e   : > { %v5408_v20 = vpop.permute.xlu0 %5407  ;;  %v5773_v31 = vpop.permute.xlu1 %5772 }
0x1c70   : > { %5638 = vrot.lane.b32.xlu0 %v16266_v63, %s19158_s1  ;;  %6007 = vrot.lane.b32.xlu1 %v16266_v63, %s19159_s30  ;;  %s19231_s1 = smov 16   ;;  %s19232_s30 = smov 20  }
0x1c72   : > { %v5404_v38 = vpop.permute.xlu0 %5403  ;;  %v5414_v8 = vpop.permute.xlu1 %5413 }
0x1c73   : > { %12296 = vmatmul.mubr.msk.f32.vlgmr.msra.gmra.mrb[92].mxu1 %vm964_vm4, %v5404_v38 }
0x1c74   : > { %12322 = vmatpush3.xpose.msk.msra.mxu1 %vm964_vm4, %v5787_v22  ;;  %6376 = vrot.lane.b32.xlu0 %v16266_v63, %s19160_s16  ;;  %s19233_s16 = smov 24  }
0x1c75   : > { %6745 = vrot.lane.b32.xlu1 %v16266_v63, %s19161_s15  ;;  %12298 = vmatprep.mubr.msk.f32.mxu1 %vm964_vm4, %v5406_v3  ;;  %s14360_s15 = sshll.u32 %s14455_s14, 4  ;;  %s14361_s15 = int_to_ptr.vmem [resolvable:$false] %s14360_s15 }
0x1c76   : > { %v5416_v27 = vpop.permute.xlu0 %5415  ;;  %v5410_v24 = vpop.permute.xlu1 %5409 }
0x1c77   : > { %12299 = vmatmul.mubr.msk.f32.gmra.mrb[94].mxu1 %vm964_vm4, %v5408_v20 }
0x1c78   : > { %12301 = vmatprep.mubr.msk.f32.mxu1 %vm964_vm4, %v5410_v24 }
0x1c7a   : > { %v5412_v21 = vpop.permute.xlu0 %5411  ;;  %v5777_v46 = vpop.permute.xlu1 %5776 }
0x1c7b   : > { %12302 = vmatmul.mubr.msk.f32.gmra.mrb[96].mxu1 %vm964_vm4, %v5412_v21 }
0x1c7c   : > { %12304 = vmatprep.mubr.msk.f32.mxu1 %vm964_vm4, %v5414_v8 }
0x1c7e   : > { %v5779_v60 = vpop.permute.xlu0 %5778  ;;  %v5785_v54 = vpop.permute.xlu1 %5784 }
0x1c7f   : > { %12305 = vmatmul.mubr.msk.f32.gmra.mrb[98].mxu1 %vm964_vm4, %v5416_v27 }
0x1c80   : > { %12323 = vmatprep.mubr.msk.f32.mxu1 %vm964_vm4, %v5771_v16 }
0x1c82   : > { %v5783_v35 = vpop.permute.xlu0 %5782  ;;  %v6140_v48 = vpop.permute.xlu1 %6139 }
0x1c83   : > { %12324 = vmatmul.mubr.msk.f32.vlgmr.msra.gmra.mrb[100].mxu1 %vm964_vm4, %v5773_v31 }
0x1c84   : > { %12326 = vmatprep.mubr.msk.f32.mxu1 %vm964_vm4, %v5775_v11 }
0x1c86   : > { %v6156_v18 = vpop.permute.xlu0 %6155  ;;  %v5781_v47 = vpop.permute.xlu1 %5780 }
0x1c87   : > { %12327 = vmatmul.mubr.msk.f32.gmra.mrb[102].mxu1 %vm964_vm4, %v5777_v46  ;;  %12349 = vmatprep.subr.msk.mxu1 %vm964_vm4, %v6156_v18 }
0x1c88   : > { %12329 = vmatprep.mubr.msk.f32.mxu1 %vm964_vm4, %v5779_v60  ;;  %12350 = vmatpush3.xpose.msk.msra.mxu1 %vm964_vm4, %v6156_v18 }
0x1c8a   : > { %v6142_v56 = vpop.permute.xlu0 %6141  ;;  %v6144_v59 = vpop.permute.xlu1 %6143 }
0x1c8b   : > { %12330 = vmatmul.mubr.msk.f32.gmra.mrb[104].mxu1 %vm964_vm4, %v5781_v47 }
0x1c8c   : > { %12332 = vmatprep.mubr.msk.f32.mxu1 %vm964_vm4, %v5783_v35 }
0x1c8e   : > { %v6146_v6 = vpop.permute.xlu0 %6145  ;;  %v6148_v29 = vpop.permute.xlu1 %6147 }
0x1c8f   : > { %12333 = vmatmul.mubr.msk.f32.gmra.mrb[106].mxu1 %vm964_vm4, %v5785_v54 }
0x1c90   : > { %12351 = vmatprep.mubr.msk.f32.mxu1 %vm964_vm4, %v6140_v48 }
0x1c92   : > { %v6154_v1 = vpop.permute.xlu0 %6153  ;;  %v6152_v49 = vpop.permute.xlu1 %6151 }
0x1c93   : > { %12352 = vmatmul.mubr.msk.f32.vlgmr.msra.gmra.mrb[108].mxu1 %vm964_vm4, %v6142_v56 }
0x1c94   : > { %12354 = vmatprep.mubr.msk.f32.mxu1 %vm964_vm4, %v6144_v59 }
0x1c96   : > { %v6509_v13 = vpop.permute.xlu0 %6508  ;;  %v6525_v28 = vpop.permute.xlu1 %6524 }
0x1c97   : > { %12355 = vmatmul.mubr.msk.f32.gmra.mrb[110].mxu1 %vm964_vm4, %v6146_v6  ;;  %12377 = vmatprep.subr.msk.mxu1 %vm964_vm4, %v6525_v28 }
0x1c98   : > { %12357 = vmatprep.mubr.msk.f32.mxu1 %vm964_vm4, %v6148_v29  ;;  %12378 = vmatpush3.xpose.msk.msra.mxu1 %vm964_vm4, %v6525_v28 }
0x1c9a   : > { %v6150_v36 = vpop.permute.xlu0 %6149  ;;  %v6511_v15 = vpop.permute.xlu1 %6510 }
0x1c9b   : > { %12358 = vmatmul.mubr.msk.f32.gmra.mrb[112].mxu1 %vm964_vm4, %v6150_v36 }
0x1c9c   : > { %12360 = vmatprep.mubr.msk.f32.mxu1 %vm964_vm4, %v6152_v49 }
0x1c9e   : > { %v6513_v50 = vpop.permute.xlu0 %6512  ;;  %v6515_v30 = vpop.permute.xlu1 %6514 }
0x1c9f   : > { %12361 = vmatmul.mubr.msk.f32.gmra.mrb[114].mxu1 %vm964_vm4, %v6154_v1 }
0x1ca0   : > { %12379 = vmatprep.mubr.msk.f32.mxu1 %vm964_vm4, %v6509_v13 }
0x1ca2   : > { %v6517_v61 = vpop.permute.xlu0 %6516  ;;  %v6523_v14 = vpop.permute.xlu1 %6522 }
0x1ca3   : > { %12380 = vmatmul.mubr.msk.f32.vlgmr.msra.gmra.mrb[116].mxu1 %vm964_vm4, %v6511_v15 }
0x1ca4   : > { %12382 = vmatprep.mubr.msk.f32.mxu1 %vm964_vm4, %v6513_v50 }
0x1ca6   : > { %v6521_v39 = vpop.permute.xlu0 %6520  ;;  %v6519_v2 = vpop.permute.xlu1 %6518 }
0x1ca7   : > { %12383 = vmatmul.mubr.msk.f32.gmra.mrb[118].mxu1 %vm964_vm4, %v6515_v30 }
0x1ca8   : > { %12385 = vmatprep.mubr.msk.f32.mxu1 %vm964_vm4, %v6517_v61 }
0x1caa   : > { %v6894_v44 = vpop.permute.xlu0 %6893  ;;  %v6878_v34 = vpop.permute.xlu1 %6877 }
0x1cab   : > { %12386 = vmatmul.mubr.msk.f32.gmra.mrb[120].mxu1 %vm964_vm4, %v6519_v2  ;;  %12405 = vmatprep.subr.msk.mxu1 %vm964_vm4, %v6894_v44 }
0x1cac   : > { %12388 = vmatprep.mubr.msk.f32.mxu1 %vm964_vm4, %v6521_v39  ;;  %12406 = vmatpush3.xpose.msk.msra.mxu1 %vm964_vm4, %v6894_v44 }
0x1cae   : > { %v6880_v40 = vpop.permute.xlu0 %6879  ;;  %v6882_v4 = vpop.permute.xlu1 %6881 }
0x1caf   : > { %12389 = vmatmul.mubr.msk.f32.gmra.mrb[122].mxu1 %vm964_vm4, %v6523_v14 }
0x1cb0   : > { %12407 = vmatprep.mubr.msk.f32.mxu1 %vm964_vm4, %v6878_v34 }
0x1cb2   : > { %v6884_v55 = vpop.permute.xlu0 %6883  ;;  %v6886_v58 = vpop.permute.xlu1 %6885 }
0x1cb3   : > { %12408 = vmatmul.mubr.msk.f32.vlgmr.msra.gmra.mrb[124].mxu1 %vm964_vm4, %v6880_v40 }
0x1cb4   : > { %12410 = vmatprep.mubr.msk.f32.mxu1 %vm964_vm4, %v6882_v4 }
0x1cb6   : > { %v6892_v0 = vpop.permute.xlu0 %6891  ;;  %v6890_v26 = vpop.permute.xlu1 %6889 }
0x1cb7   : > { %12411 = vmatmul.mubr.msk.f32.gmra.mrb[126].mxu1 %vm964_vm4, %v6884_v55 }
0x1cb8   : > { %12413 = vmatprep.mubr.msk.f32.mxu1 %vm964_vm4, %v6886_v58 }
0x1cba   : > { %v6888_v12 = vpop.permute.xlu0 %6887  ;;  %v7263_v5 = vpop.permute.xlu1 %7262 }
0x1cbb   : > { %12414 = vmatmul.mubr.msk.f32.gmra.mrb[128].mxu1 %vm964_vm4, %v6888_v12  ;;  %12433 = vmatprep.subr.msk.mxu1 %vm964_vm4, %v7263_v5 }
0x1cbc   : > { %12416 = vmatprep.mubr.msk.f32.mxu1 %vm964_vm4, %v6890_v26  ;;  %12434 = vmatpush3.xpose.msk.msra.mxu1 %vm964_vm4, %v7263_v5 }
0x1cbe   : > { %v7247_v51 = vpop.permute.xlu0 %7246  ;;  %v7249_v53 = vpop.permute.xlu1 %7248 }
0x1cbf   : > { %12417 = vmatmul.mubr.msk.f32.gmra.mrb[130].mxu1 %vm964_vm4, %v6892_v0 }
0x1cc0   : > { %12435 = vmatprep.mubr.msk.f32.mxu1 %vm964_vm4, %v7247_v51 }
0x1cc2   : > { %v7251_v43 = vpop.permute.xlu0 %7250  ;;  %v7253_v10 = vpop.permute.xlu1 %7252 }
0x1cc3   : > { %12436 = vmatmul.mubr.msk.f32.vlgmr.msra.gmra.mrb[132].mxu1 %vm964_vm4, %v7249_v53 }
0x1cc4   : > { %12438 = vmatprep.mubr.msk.f32.mxu1 %vm964_vm4, %v7251_v43 }
0x1cc6   : > { %v7255_v32 = vpop.permute.xlu0 %7254  ;;  %v7257_v62 = vpop.permute.xlu1 %7256 }
0x1cc7   : > { %12439 = vmatmul.mubr.msk.f32.gmra.mrb[134].mxu1 %vm964_vm4, %v7253_v10 }
0x1cc8   : > { %12441 = vmatprep.mubr.msk.f32.mxu1 %vm964_vm4, %v7255_v32 }
0x1cca   : > { %v7259_v33 = vpop.permute.xlu0 %7258  ;;  %v7261_v45 = vpop.permute.xlu1 %7260 }
0x1ccb   : > { %v12269_v42 = vpop.f32.mrb[84].mxu1  ;;  %12442 = vmatmul.mubr.msk.f32.gmra.mrb[136].mxu1 %vm964_vm4, %v7257_v62 }
0x1ccc   : > { %v16506_v22 = vmul.f32 0.5, %v12269_v42  ;;  %v5134_v11 = vpop.f32.mrb[85].mxu1  ;;  %12444 = vmatprep.mubr.msk.f32.mxu1 %vm964_vm4, %v7259_v33 }
0x1ccd   : > { %v16509_v3 = vmul.f32 0.5, %v5134_v11 }
0x1cce   : > { %v7632_v16 = vpop.permute.xlu0 %7631  ;;  %v7616_v37 = vpop.permute.xlu1 %7615  ;;  %v5184_v20 = vsel %vm4509_vm6, %v16506_v22, -inf }
0x1ccf   : > { %5185 = vmax.xlane.f32.xlu0 %v5184_v20  ;;  %v12272_v31 = vpop.f32.mrb[86].mxu1  ;;  %12445 = vmatmul.mubr.msk.f32.gmra.mrb[138].mxu1 %vm964_vm4, %v7261_v45  ;;  %v5181_v38 = vsel %vm4509_vm6, %v16509_v3, -inf }
0x1cd0   : > { %v16516_v8 = vmul.f32 0.5, %v12272_v31  ;;  %12461 = vmatprep.subr.msk.mxu1 %vm964_vm4, %v7632_v16  ;;  %5182 = vmax.xlane.f32.xlu1 %v5181_v38  ;;  %v5144_v27 = vpop.f32.mrb[87].mxu1 }
0x1cd1   : > { %12462 = vmatpush3.xpose.msk.msra.mxu1 %vm964_vm4, %v7632_v16  ;;  %12463 = vmatprep.mubr.msk.f32.mxu1 %vm964_vm4, %v7616_v37  ;;  %v16521_v24 = vmul.f32 0.5, %v5144_v27 }
0x1cd2   : > { %v7618_v21 = vpop.permute.xlu0 %7617  ;;  %v7620_v46 = vpop.permute.xlu1 %7619  ;;  %v5190_v60 = vsel %vm4509_vm6, %v16516_v8, -inf }
0x1cd3   : > { %5191 = vmax.xlane.f32.xlu0 %v5190_v60  ;;  %v12275_v54 = vpop.f32.mrb[88].mxu1  ;;  %v5187_v59 = vsel %vm4509_vm6, %v16521_v24, -inf }
0x1cd4   : > { %v5154_v35 = vpop.f32.mrb[89].mxu1  ;;  %12464 = vmatmul.mubr.msk.f32.vlgmr.msra.gmra.mrb[140].mxu1 %vm964_vm4, %v7618_v21  ;;  %v16529_v18 = vmul.f32 0.5, %v12275_v54 }
0x1cd5   : > { %v16526_v48 = vmul.f32 0.5, %v5154_v35  ;;  %12466 = vmatprep.mubr.msk.f32.mxu1 %vm964_vm4, %v7620_v46 }
0x1cd6   : > { %v7622_v47 = vpop.permute.xlu0 %7621  ;;  %v7624_v56 = vpop.permute.xlu1 %7623  ;;  %v5196_v15 = vsel %vm4509_vm6, %v16529_v18, -inf }
0x1cd7   : > { %5188 = vmax.xlane.f32.xlu0 %v5187_v59  ;;  %v12278_v6 = vpop.f32.mrb[90].mxu1  ;;  %v5193_v29 = vsel %vm4509_vm6, %v16526_v48, -inf }
0x1cd8   : > { %12467 = vmatmul.mubr.msk.f32.gmra.mrb[142].mxu1 %vm964_vm4, %v7622_v47  ;;  %5194 = vmax.xlane.f32.xlu1 %v5193_v29  ;;  %v5164_v1 = vpop.f32.mrb[91].mxu1  ;;  %v16539_v13 = vmul.f32 0.5, %v12278_v6 }
0x1cd9   : > { %v16536_v49 = vmul.f32 0.5, %v5164_v1  ;;  %12469 = vmatprep.mubr.msk.f32.mxu1 %vm964_vm4, %v7624_v56 }
0x1cda   : > { %v7626_v28 = vpop.permute.xlu0 %7625  ;;  %v7628_v36 = vpop.permute.xlu1 %7627  ;;  %v5202_v14 = vsel %vm4509_vm6, %v16539_v13, -inf }
0x1cdb   : > { %5197 = vmax.xlane.f32.xlu0 %v5196_v15  ;;  %v5199_v50 = vsel %vm4509_vm6, %v16536_v49, -inf }
0x1cdc   : > { %12470 = vmatmul.mubr.msk.f32.gmra.mrb[144].mxu1 %vm964_vm4, %v7626_v28  ;;  %5200 = vmax.xlane.f32.xlu1 %v5199_v50 }
0x1cdd   : > { %12472 = vmatprep.mubr.msk.f32.mxu1 %vm964_vm4, %v7628_v36 }
0x1cde   : > { %v7630_v30 = vpop.permute.xlu0 %7629  ;;  %v5270_v61 = vpop.permute.xlu1 %5269 }
0x1cdf   : > { %5203 = vmax.xlane.f32.xlu0 %v5202_v14  ;;  %12279 = vmatprep.subr.mxu0 %v5270_v61 }
0x1ce0   : > { %12473 = vmatmul.mubr.msk.f32.gmra.mrb[146].mxu1 %vm964_vm4, %v7630_v30  ;;  %12280 = vmatpush3.msra.mxu0 %v5270_v61 }
0x1ce2   : > { %v16550_v39 = vpop.permute.xlu0 %5638  ;;  %v16585_v38 = vpop.permute.xlu1 %6007 }
0x1ce3   : > { %12307 = vmatprep.subr.mxu0 %v16550_v39 }
0x1ce6   : > { %v16593_v54 = vpop.permute.xlu0 %6376 }
0x1ce7   : > { %19162 = vst [vmem:[#allocation31_spill] sm:$0xff] %v16593_v54  ;;  %v16601_v29 = vpop.permute.xlu1 %6745 }
0x1ce8   : > { %19163 = vst [vmem:[#allocation36_spill] sm:$0xff] %v16601_v29 }
0x1d46   : > { %v12297_v2 = vpop.f32.mrb[92].mxu1 }
0x1d47   : > { %v16553_v44 = vmul.f32 0.5, %v12297_v2  ;;  %v5503_v34 = vpop.f32.mrb[93].mxu1 }
0x1d48   : > { %v16555_v40 = vmul.f32 0.5, %v5503_v34 }
0x1d49   : > { %v5553_v4 = vsel %vm4509_vm6, %v16553_v44, -inf }
0x1d4a   : > { %5554 = vmax.xlane.f32.xlu0 %v5553_v4  ;;  %v12300_v55 = vpop.f32.mrb[94].mxu1  ;;  %v5550_v58 = vsel %vm4509_vm6, %v16555_v40, -inf }
0x1d4b   : > { %v16561_v0 = vmul.f32 0.5, %v12300_v55  ;;  %v5513_v26 = vpop.f32.mrb[95].mxu1  ;;  %5551 = vmax.xlane.f32.xlu1 %v5550_v58 }
0x1d4c   : > { %v16563_v12 = vmul.f32 0.5, %v5513_v26 }
0x1d4d   : > { %v5559_v5 = vsel %vm4509_vm6, %v16561_v0, -inf }
0x1d4e   : > { %5560 = vmax.xlane.f32.xlu0 %v5559_v5  ;;  %v12303_v51 = vpop.f32.mrb[96].mxu1  ;;  %v5556_v53 = vsel %vm4509_vm6, %v16563_v12, -inf }
0x1d4f   : > { %v16569_v43 = vmul.f32 0.5, %v12303_v51  ;;  %v5523_v10 = vpop.f32.mrb[97].mxu1  ;;  %5557 = vmax.xlane.f32.xlu1 %v5556_v53 }
0x1d50   : > { %v16571_v32 = vmul.f32 0.5, %v5523_v10 }
0x1d51   : > { %v5565_v62 = vsel %vm4509_vm6, %v16569_v43, -inf }
0x1d52   : > { %5566 = vmax.xlane.f32.xlu0 %v5565_v62  ;;  %v12306_v33 = vpop.f32.mrb[98].mxu1  ;;  %v5562_v45 = vsel %vm4509_vm6, %v16571_v32, -inf }
0x1d53   : > { %v16577_v42 = vmul.f32 0.5, %v12306_v33  ;;  %v5533_v11 = vpop.f32.mrb[99].mxu1  ;;  %5563 = vmax.xlane.f32.xlu1 %v5562_v45 }
0x1d54   : > { %v16579_v16 = vmul.f32 0.5, %v5533_v11 }
0x1d55   : > { %v5571_v37 = vsel %vm4509_vm6, %v16577_v42, -inf }
0x1d56   : > { %5572 = vmax.xlane.f32.xlu0 %v5571_v37  ;;  %v12325_v20 = vpop.f32.mrb[100].mxu1  ;;  %v5568_v31 = vsel %vm4509_vm6, %v16579_v16, -inf }
0x1d57   : > { %v16587_v27 = vmul.f32 0.5, %v12325_v20  ;;  %v5872_v21 = vpop.f32.mrb[101].mxu1  ;;  %5569 = vmax.xlane.f32.xlu1 %v5568_v31 }
0x1d58   : > { %v16589_v46 = vmul.f32 0.5, %v5872_v21 }
0x1d59   : > { %v5922_v60 = vsel %vm4509_vm6, %v16587_v27, -inf }
0x1d5a   : > { %5923 = vmax.xlane.f32.xlu0 %v5922_v60  ;;  %v12328_v35 = vpop.f32.mrb[102].mxu1  ;;  %v5919_v47 = vsel %vm4509_vm6, %v16589_v46, -inf }
0x1d5b   : > { %v16597_v56 = vmul.f32 0.5, %v12328_v35  ;;  %v5882_v59 = vpop.f32.mrb[103].mxu1  ;;  %5920 = vmax.xlane.f32.xlu1 %v5919_v47 }
0x1d5c   : > { %v16599_v6 = vmul.f32 0.5, %v5882_v59  ;;  %v5186_v28 = vpop.xlane.xlu0 %5185 }
0x1d5d   : > { %v5928_v1 = vsel %vm4509_vm6, %v16597_v56, -inf  ;;  %v5206_v14 = vsub.f32 %v16506_v22, %v5186_v28  ;;  %v5183_v34 = vpop.xlane.xlu1 %5182 }
0x1d5e   : > { %5929 = vmax.xlane.f32.xlu0 %v5928_v1  ;;  %v12331_v36 = vpop.f32.mrb[104].mxu1  ;;  %v5925_v15 = vsel %vm4509_vm6, %v16599_v6, -inf  ;;  %v5205_v53 = vsub.f32 %v16509_v3, %v5183_v34 }
0x1d5f   : > { %v16607_v50 = vmul.f32 0.5, %v12331_v36  ;;  %v5892_v30 = vpop.f32.mrb[105].mxu1  ;;  %5926 = vmax.xlane.f32.xlu1 %v5925_v15  ;;  %v5215_v51 = vmul.f32 1.442695, %v5206_v14 }
0x1d60   : > { %v16609_v61 = vmul.f32 0.5, %v5892_v30  ;;  %v5192_v11 = vpop.xlane.xlu0 %5191  ;;  %v5213_v20 = vmul.f32 1.442695, %v5205_v53 }
0x1d61   : > { %v5934_v2 = vsel %vm4509_vm6, %v16607_v50, -inf  ;;  %14008 = vpow2.f32 %v5215_v51  ;;  %v5208_v59 = vsub.f32 %v16516_v8, %v5192_v11 }
0x1d62   : > { %5935 = vmax.xlane.f32.xlu0 %v5934_v2  ;;  %v12334_v4 = vpop.f32.mrb[106].mxu1  ;;  %v5931_v55 = vsel %vm4509_vm6, %v16609_v61, -inf  ;;  %14010 = vpow2.f32 %v5213_v20 }
0x1d63   : > { %v16616_v58 = vmul.f32 0.5, %v12334_v4  ;;  %v5902_v26 = vpop.f32.mrb[107].mxu1  ;;  %5932 = vmax.xlane.f32.xlu1 %v5931_v55  ;;  %v5219_v34 = vmul.f32 1.442695, %v5208_v59 }
0x1d64   : > { %v16618_v5 = vmul.f32 0.5, %v5902_v26  ;;  %v5189_v28 = vpop.xlane.xlu0 %5188 }
0x1d65   : > { %v5940_v22 = vsel %vm4509_vm6, %v16616_v58, -inf  ;;  %v5207_v4 = vsub.f32 %v16521_v24, %v5189_v28  ;;  %14012 = vpow2.f32 %v5219_v34  ;;  %v5195_v59 = vpop.xlane.xlu1 %5194 }
0x1d66   : > { %5941 = vmax.xlane.f32.xlu0 %v5940_v22  ;;  %v12353_v10 = vpop.f32.mrb[108].mxu1  ;;  %v5937_v62 = vsel %vm4509_vm6, %v16618_v5, -inf  ;;  %v5209_v34 = vsub.f32 %v16526_v48, %v5195_v59 }
0x1d67   : > { %v16625_v33 = vmul.f32 0.5, %v12353_v10  ;;  %v6241_v45 = vpop.f32.mrb[109].mxu1  ;;  %5938 = vmax.xlane.f32.xlu1 %v5937_v62  ;;  %v5217_v10 = vmul.f32 1.442695, %v5207_v4 }
0x1d68   : > { %v16627_v37 = vmul.f32 0.5, %v6241_v45  ;;  %v5198_v24 = vpop.xlane.xlu0 %5197 }
0x1d69   : > { %v6291_v3 = vsel %vm4509_vm6, %v16625_v33, -inf  ;;  %14014 = vpow2.f32 %v5217_v10 }
0x1d6a   : > { %6292 = vmax.xlane.f32.xlu0 %v6291_v3  ;;  %v12356_v31 = vpop.f32.mrb[110].mxu1  ;;  %v6288_v21 = vsel %vm4509_vm6, %v16627_v37, -inf }
0x1d6b   : > { %v16633_v60 = vmul.f32 0.5, %v12356_v31  ;;  %v6251_v35 = vpop.f32.mrb[111].mxu1  ;;  %6289 = vmax.xlane.f32.xlu1 %v6288_v21  ;;  %v16651_v51 = vpop.eup %14008  ;;  %v5210_v21 = vsub.f32 %v16529_v18, %v5198_v24 }
0x1d6c   : > { %v16635_v47 = vmul.f32 0.5, %v6251_v35  ;;  %v5232_v11 = vsel %vm4509_vm6, %v16651_v51, 0.0  ;;  %v16659_v20 = vpop.eup %14010  ;;  %v5204_v24 = vpop.xlane.xlu0 %5203 }
0x1d6d   : > { %v6297_v1 = vsel %vm4509_vm6, %v16633_v60, -inf  ;;  %v5223_v4 = vmul.f32 1.442695, %v5210_v21 }
0x1d6e   : > { %6298 = vmax.xlane.f32.xlu0 %v6297_v1  ;;  %v12359_v36 = vpop.f32.mrb[112].mxu1  ;;  %v6294_v15 = vsel %vm4509_vm6, %v16635_v47, -inf }
0x1d6f   : > { %v16642_v30 = vmul.f32 0.5, %v12359_v36  ;;  %v6261_v14 = vpop.f32.mrb[113].mxu1  ;;  %6295 = vmax.xlane.f32.xlu1 %v6294_v15  ;;  %v5229_v36 = vsel %vm4509_vm6, %v16659_v20, 0.0  ;;  %14016 = vpow2.f32 %v5223_v4 }
0x1d70   : > { %v16644_v2 = vmul.f32 0.5, %v6261_v14 }
0x1d71   : > { %v6303_v8 = vsel %vm4509_vm6, %v16642_v30, -inf }
0x1d72   : > { %6304 = vmax.xlane.f32.xlu0 %v6303_v8  ;;  %v12362_v55 = vpop.f32.mrb[114].mxu1  ;;  %v6300_v26 = vsel %vm4509_vm6, %v16644_v2, -inf }
0x1d73   : > { %v16653_v53 = vmul.f32 0.5, %v12362_v55  ;;  %v6271_v22 = vpop.f32.mrb[115].mxu1  ;;  %6301 = vmax.xlane.f32.xlu1 %v6300_v26  ;;  %v16677_v26 = vpop.eup %14012 }
0x1d74   : > { %v16666_v1 = vmul.f32 0.5, %v6271_v22  ;;  %v16687_v21 = vpop.eup %14014 }
0x1d75   : > { %v6309_v62 = vsel %vm4509_vm6, %v16653_v53, -inf }
0x1d76   : > { %6310 = vmax.xlane.f32.xlu0 %v6309_v62  ;;  %v12381_v45 = vpop.f32.mrb[116].mxu1  ;;  %v6306_v55 = vsel %vm4509_vm6, %v16666_v1, -inf  ;;  %v5221_v62 = vmul.f32 1.442695, %v5209_v34  ;;  %v5201_v34 = vpop.xlane.xlu1 %5200 }
0x1d77   : > { %v16661_v3 = vmul.f32 0.5, %v12381_v45  ;;  %v6610_v31 = vpop.f32.mrb[117].mxu1  ;;  %5233 = vadd.xlane.f32.xlu1 %v5232_v11  ;;  %v5238_v11 = vsel %vm4509_vm6, %v16677_v26, 0.0 }
0x1d78   : > { %14018 = vpow2.f32 %v5221_v62  ;;  %v16696_v4 = vmul.f32 0.5, %v6610_v31  ;;  %v5211_v62 = vsub.f32 %v16536_v49, %v5201_v34 }
0x1d79   : > { %v6660_v35 = vsel %vm4509_vm6, %v16661_v3, -inf }
0x1d7a   : > { %6661 = vmax.xlane.f32.xlu0 %v6660_v35  ;;  %v12384_v28 = vpop.f32.mrb[118].mxu1  ;;  %v6657_v31 = vsel %vm4509_vm6, %v16696_v4, -inf  ;;  %v5225_v25 = vmul.f32 1.442695, %v5211_v62 }
0x1d7b   : > { %v16670_v15 = vmul.f32 0.5, %v12384_v28  ;;  %v6620_v14 = vpop.f32.mrb[119].mxu1  ;;  %5230 = vadd.xlane.f32.xlu1 %v5229_v36  ;;  %v5212_v28 = vsub.f32 %v16539_v13, %v5204_v24 }
0x1d7d   : > { %v6666_v18 = vsel %vm4509_vm6, %v16670_v15, -inf }
0x1d7e   : > { %6667 = vmax.xlane.f32.xlu0 %v6666_v18  ;;  %v12387_v8 = vpop.f32.mrb[120].mxu1 }
0x1d7f   : > { %v16679_v22 = vmul.f32 0.5, %v12387_v8  ;;  %v16681_v10 = vpop.f32.mrb[121].mxu1  ;;  %6307 = vmax.xlane.f32.xlu1 %v6306_v55  ;;  %v5235_v8 = vsel %vm4509_vm6, %v16687_v21, 0.0 }
0x1d81   : > { %v6672_v48 = vsel %vm4509_vm6, %v16679_v22, -inf }
0x1d82   : > { %6673 = vmax.xlane.f32.xlu0 %v6672_v48  ;;  %v12390_v45 = vpop.f32.mrb[122].mxu1 }
0x1d83   : > { %v16689_v35 = vmul.f32 0.5, %v12390_v45  ;;  %v16691_v59 = vpop.f32.mrb[123].mxu1  ;;  %5239 = vadd.xlane.f32.xlu1 %v5238_v11  ;;  %v5227_v45 = vmul.f32 1.442695, %v5212_v28  ;;  %v16709_v11 = vpop.eup %14016 }
0x1d84   : > { %v5244_v34 = vsel %vm4509_vm6, %v16709_v11, 0.0 }
0x1d85   : > { %v6678_v36 = vsel %vm4509_vm6, %v16689_v35, -inf  ;;  %14020 = vpow2.f32 %v5227_v45  ;;  %v16727_v45 = vmul.f32 0.5, %v6620_v14 }
0x1d86   : > { %6679 = vmax.xlane.f32.xlu0 %v6678_v36  ;;  %v12409_v18 = vpop.f32.mrb[124].mxu1  ;;  %14022 = vpow2.f32 %v5225_v25 }
0x1d87   : > { %v16700_v55 = vmul.f32 0.5, %v12409_v18  ;;  %v16702_v48 = vpop.f32.mrb[125].mxu1  ;;  %5236 = vadd.xlane.f32.xlu1 %v5235_v8  ;;  %v16719_v8 = vpop.eup %14018 }
0x1d89   : > { %v7029_v13 = vsel %vm4509_vm6, %v16700_v55, -inf }
0x1d8a   : > { %7030 = vmax.xlane.f32.xlu0 %v7029_v13  ;;  %v12412_v24 = vpop.f32.mrb[126].mxu1 }
0x1d8b   : > { %v16711_v36 = vmul.f32 0.5, %v12412_v24  ;;  %v16713_v18 = vpop.f32.mrb[127].mxu1  ;;  %6658 = vmax.xlane.f32.xlu1 %v6657_v31 }
0x1d8d   : > { %19164 = vst [vmem:[#allocation37_spill] sm:$0xff] %v16711_v36  ;;  %v7035_v49 = vsel %vm4509_vm6, %v16711_v36, -inf }
0x1d8e   : > { %7036 = vmax.xlane.f32.xlu0 %v7035_v49  ;;  %v12415_v28 = vpop.f32.mrb[128].mxu1  ;;  %v5241_v49 = vsel %vm4509_vm6, %v16719_v8, 0.0 }
0x1d8f   : > { %v16721_v13 = vmul.f32 0.5, %v12415_v28  ;;  %v6999_v7 = vpop.f32.mrb[129].mxu1  ;;  %5245 = vadd.xlane.f32.xlu1 %v5244_v34  ;;  %v16737_v34 = vpop.eup %14020 }
0x1d90   : > { %v16723_v24 = vmul.f32 0.5, %v6999_v7  ;;  %v6663_v7 = vsel %vm4509_vm6, %v16727_v45, -inf  ;;  %19167 = vst [vmem:[#allocation16_spill] sm:$0xff] %v16737_v34  ;;  %v16745_v41 = vpop.eup %14022 }
0x1d91   : > { %19165 = vst [vmem:[#allocation34_spill] sm:$0xff] %v16721_v13  ;;  %v7041_v62 = vsel %vm4509_vm6, %v16721_v13, -inf }
0x1d92   : > { %19166 = vst [vmem:[#allocation35_spill] sm:$0xff] %v16723_v24  ;;  %7042 = vmax.xlane.f32.xlu0 %v7041_v62  ;;  %v12418_v31 = vpop.f32.mrb[130].mxu1  ;;  %v7038_v28 = vsel %vm4509_vm6, %v16723_v24, -inf }
0x1d93   : > { %v7009_v9 = vpop.f32.mrb[131].mxu1  ;;  %5242 = vadd.xlane.f32.xlu1 %v5241_v49  ;;  %v16731_v17 = vmul.f32 0.5, %v12418_v31  ;;  %v5250_v49 = vsel %vm4509_vm6, %v16737_v34, 0.0 }
0x1d94   : > { %v16739_v62 = vmul.f32 0.5, %v7009_v9  ;;  %v16752_v9 = vmul.f32 0.5, %v16681_v10 }
0x1d95   : > { %v7047_v19 = vsel %vm4509_vm6, %v16731_v17, -inf }
0x1d96   : > { %7039 = vmax.xlane.f32.xlu0 %v7038_v28  ;;  %v12437_v25 = vpop.f32.mrb[132].mxu1  ;;  %v7044_v57 = vsel %vm4509_vm6, %v16739_v62, -inf  ;;  %v6669_v10 = vsel %vm4509_vm6, %v16752_v9, -inf }
0x1d97   : > { %v7348_v14 = vpop.f32.mrb[133].mxu1  ;;  %6664 = vmax.xlane.f32.xlu1 %v6663_v7  ;;  %v16747_v23 = vmul.f32 0.5, %v12437_v25  ;;  %v16761_v25 = vmul.f32 0.5, %v16691_v59 }
0x1d98   : > { %v16756_v29 = vmul.f32 0.5, %v7348_v14  ;;  %v16770_v14 = vmul.f32 0.5, %v16702_v48 }
0x1d99   : > { %19168 = vst [vmem:[#allocation17_spill] sm:$0xff] %v16747_v23  ;;  %v6675_v59 = vsel %vm4509_vm6, %v16761_v25, -inf }
0x1d9a   : > { %7048 = vmax.xlane.f32.xlu0 %v7047_v19  ;;  %v12440_v31 = vpop.f32.mrb[134].mxu1  ;;  %v5247_v19 = vsel %vm4509_vm6, %v16745_v41, 0.0  ;;  %19169 = vst [vmem:[#allocation18_spill] sm:$0xff] %v16756_v29  ;;  %v7026_v48 = vsel %vm4509_vm6, %v16770_v14, -inf }
0x1d9b   : > { %v7358_v28 = vpop.f32.mrb[135].mxu1  ;;  %5251 = vadd.xlane.f32.xlu1 %v5250_v49  ;;  %v7398_v49 = vsel %vm4509_vm6, %v16747_v23, -inf }
0x1d9c   : > { %v16774_v13 = vmul.f32 0.5, %v7358_v28 }
0x1d9e   : > { %v12443_v7 = vpop.f32.mrb[136].mxu1  ;;  %7045 = vmax.xlane.f32.xlu0 %v7044_v57  ;;  %v16765_v57 = vmul.f32 0.5, %v12440_v31  ;;  %19171 = vst [vmem:[#allocation20_spill] sm:$0xff] %v16774_v13  ;;  %v16779_v31 = vmul.f32 0.5, %v16713_v18 }
0x1d9f   : > { %v7368_v52 = vpop.f32.mrb[137].mxu1  ;;  %5248 = vadd.xlane.f32.xlu1 %v5247_v19  ;;  %v7395_v19 = vsel %vm4509_vm6, %v16756_v29, -inf  ;;  %v16783_v23 = vmul.f32 0.5, %v12443_v7 }
0x1da0   : > { %19170 = vst [vmem:[#allocation19_spill] sm:$0xff] %v16765_v57  ;;  %19172 = vst [vmem:[#allocation21_spill] sm:$0xff] %v16779_v31  ;;  %v7032_v28 = vsel %vm4509_vm6, %v16779_v31, -inf  ;;  %v16791_v36 = vmul.f32 0.5, %v7368_v52 }
0x1da2   : > { %v12446_v54 = vpop.f32.mrb[138].mxu1  ;;  %7399 = vmax.xlane.f32.xlu0 %v7398_v49 }
0x1da3   : > { %v7378_v63 = vpop.f32.mrb[139].mxu1  ;;  %6670 = vmax.xlane.f32.xlu1 %v6669_v10  ;;  %v7404_v10 = vsel %vm4509_vm6, %v16765_v57, -inf  ;;  %v16799_v31 = vmul.f32 0.5, %v12446_v54 }
0x1da6   : > { %7396 = vmax.xlane.f32.xlu0 %v7395_v19 }
0x1da7   : > { %v12465_v24 = vpop.f32.mrb[140].mxu1  ;;  %6676 = vmax.xlane.f32.xlu1 %v6675_v59  ;;  %v7401_v59 = vsel %vm4509_vm6, %v16774_v13, -inf }
0x1da8   : > { %v7717_v49 = vpop.f32.mrb[141].mxu1 }
0x1daa   : > { %7405 = vmax.xlane.f32.xlu0 %v7404_v10 }
0x1dab   : > { %v12468_v29 = vpop.f32.mrb[142].mxu1  ;;  %7027 = vmax.xlane.f32.xlu1 %v7026_v48  ;;  %v7410_v48 = vsel %vm4509_vm6, %v16783_v23, -inf }
0x1dac   : > { %v7727_v19 = vpop.f32.mrb[143].mxu1 }
0x1dae   : > { %7402 = vmax.xlane.f32.xlu0 %v7401_v59 }
0x1daf   : > { %v12471_v57 = vpop.f32.mrb[144].mxu1  ;;  %7033 = vmax.xlane.f32.xlu1 %v7032_v28 }
0x1db0   : > { %v16789_v18 = vmul.f32 0.5, %v12471_v57  ;;  %v7737_v10 = vpop.f32.mrb[145].mxu1  ;;  %v7407_v57 = vsel %vm4509_vm6, %v16791_v36, -inf }
0x1db1   : > { %v16795_v34 = vmul.f32 0.5, %v7737_v10  ;;  %v16807_v10 = vmul.f32 0.5, %v7378_v63 }
0x1db2   : > { %19173 = vst [vmem:[#allocation22_spill] sm:$0xff] %v16789_v18  ;;  %7411 = vmax.xlane.f32.xlu0 %v7410_v48  ;;  %v7779_v7 = vsel %vm4509_vm6, %v16789_v18, -inf  ;;  %v7416_v48 = vsel %vm4509_vm6, %v16799_v31, -inf }
0x1db3   : > { %19174 = vst [vmem:[#allocation23_spill] sm:$0xff] %v16795_v34  ;;  %v12474_v59 = vpop.f32.mrb[146].mxu1  ;;  %7780 = vmax.xlane.f32.xlu1 %v7779_v7  ;;  %v7776_v52 = vsel %vm4509_vm6, %v16795_v34, -inf  ;;  %v16815_v7 = vmul.f32 0.5, %v12465_v24 }
0x1db4   : > { %v7747_v13 = vpop.f32.mrb[147].mxu1  ;;  %v16803_v28 = vmul.f32 0.5, %v12474_v59  ;;  %v7413_v59 = vsel %vm4509_vm6, %v16807_v10, -inf }
0x1db5   : > { %v16811_v18 = vmul.f32 0.5, %v7747_v13  ;;  %v7767_v13 = vsel %vm4509_vm6, %v16815_v7, -inf }
0x1db6   : > { %19175 = vst [vmem:[#allocation11_spill] sm:$0xff] %v16803_v28  ;;  %7408 = vmax.xlane.f32.xlu0 %v7407_v57  ;;  %v7785_v54 = vsel %vm4509_vm6, %v16803_v28, -inf  ;;  %v16821_v57 = vmul.f32 0.5, %v7717_v49 }
0x1db7   : > { %7777 = vmax.xlane.f32.xlu1 %v7776_v52  ;;  %19176 = vst [vmem:[#allocation9_spill] sm:$0xff] %v16811_v18  ;;  %v7782_v63 = vsel %vm4509_vm6, %v16811_v18, -inf  ;;  %v16825_v52 = vmul.f32 0.5, %v12468_v29 }
0x1db8   : > { %19177 = vst [vmem:[#allocation10_spill] sm:$0xff] %v16821_v57  ;;  %v7764_v24 = vsel %vm4509_vm6, %v16821_v57, -inf }
0x1db9   : > { %19178 = vst [vmem:[#allocation8_spill] sm:$0xff] %v16825_v52 }
0x1dba   : > { %7417 = vmax.xlane.f32.xlu0 %v7416_v48  ;;  %v16829_v48 = vmul.f32 0.5, %v7727_v19 }
0x1dbb   : > { %7786 = vmax.xlane.f32.xlu1 %v7785_v54  ;;  %v7773_v54 = vsel %vm4509_vm6, %v16825_v52, -inf }
0x1dbc   : > { %19179 = vst [vmem:[#allocation15_spill] sm:$0xff] %v16829_v48  ;;  %v7770_v49 = vsel %vm4509_vm6, %v16829_v48, -inf }
0x1dbe   : > { %7414 = vmax.xlane.f32.xlu0 %v7413_v59 }
0x1dbf   : > { %7783 = vmax.xlane.f32.xlu1 %v7782_v63 }
0x1dc2   : > { %7768 = vmax.xlane.f32.xlu0 %v7767_v13 }
0x1dc6   : > { %7765 = vmax.xlane.f32.xlu0 %v7764_v24 }
0x1dca   : > { %7774 = vmax.xlane.f32.xlu0 %v7773_v54 }
0x1dce   : > { %7771 = vmax.xlane.f32.xlu0 %v7770_v49 }
0x1dd7   : > { %v5555_v59 = vpop.xlane.xlu0 %5554 }
0x1dd8   : > { %v5575_v63 = vsub.f32 %v16553_v44, %v5555_v59  ;;  %v5552_v13 = vpop.xlane.xlu1 %5551 }
0x1dd9   : > { %v5574_v29 = vsub.f32 %v16555_v40, %v5552_v13 }
0x1dda   : > { %v5584_v28 = vmul.f32 1.442695, %v5575_v63 }
0x1ddb   : > { %v5582_v18 = vmul.f32 1.442695, %v5574_v29  ;;  %v5561_v34 = vpop.xlane.xlu0 %5560 }
0x1ddc   : > { %14024 = vpow2.f32 %v5584_v28  ;;  %v5577_v19 = vsub.f32 %v16561_v0, %v5561_v34  ;;  %v5558_v24 = vpop.xlane.xlu1 %5557 }
0x1ddd   : > { %14026 = vpow2.f32 %v5582_v18  ;;  %v5576_v54 = vsub.f32 %v16563_v12, %v5558_v24 }
0x1dde   : > { %v5588_v52 = vmul.f32 1.442695, %v5577_v19 }
0x1ddf   : > { %v5567_v57 = vpop.xlane.xlu0 %5566  ;;  %v5586_v44 = vmul.f32 1.442695, %v5576_v54 }
0x1de0   : > { %v5564_v48 = vpop.xlane.xlu1 %5563  ;;  %v5579_v49 = vsub.f32 %v16569_v43, %v5567_v57  ;;  %14028 = vpow2.f32 %v5588_v52 }
0x1de1   : > { %v5578_v28 = vsub.f32 %v16571_v32, %v5564_v48  ;;  %14030 = vpow2.f32 %v5586_v44 }
0x1de2   : > { %v5592_v13 = vmul.f32 1.442695, %v5579_v49 }
0x1de3   : > { %v5573_v59 = vpop.xlane.xlu0 %5572  ;;  %v5590_v32 = vmul.f32 1.442695, %v5578_v28 }
0x1de4   : > { %v5581_v40 = vsub.f32 %v16577_v42, %v5573_v59  ;;  %v5570_v63 = vpop.xlane.xlu1 %5569 }
0x1de5   : > { %v5580_v0 = vsub.f32 %v16579_v16, %v5570_v63 }
0x1de6   : > { %v16843_v34 = vpop.eup %14024  ;;  %v5596_v18 = vmul.f32 1.442695, %v5581_v40 }
0x1de7   : > { %v5594_v12 = vmul.f32 1.442695, %v5580_v0  ;;  %v5924_v29 = vpop.xlane.xlu0 %5923  ;;  %v5601_v43 = vsel %vm4509_vm6, %v16843_v34, 0.0  ;;  %v16847_v57 = vpop.eup %14026 }
0x1de8   : > { %14032 = vpow2.f32 %v5596_v18  ;;  %v5944_v42 = vsub.f32 %v16587_v27, %v5924_v29  ;;  %5602 = vadd.xlane.f32.xlu1 %v5601_v43  ;;  %v5921_v52 = vpop.xlane.xlu1 %5920  ;;  %v5598_v24 = vsel %vm4509_vm6, %v16847_v57, 0.0 }
0x1de9   : > { %14034 = vpow2.f32 %v5592_v13  ;;  %v5943_v16 = vsub.f32 %v16589_v46, %v5921_v52 }
0x1dea   : > { %14036 = vpow2.f32 %v5594_v12  ;;  %v5953_v48 = vmul.f32 1.442695, %v5944_v42  ;;  %v16853_v54 = vpop.eup %14028 }
0x1deb   : > { %v5930_v19 = vpop.xlane.xlu0 %5929  ;;  %14038 = vpow2.f32 %v5590_v32  ;;  %v5951_v27 = vmul.f32 1.442695, %v5943_v16  ;;  %v5607_v46 = vsel %vm4509_vm6, %v16853_v54, 0.0  ;;  %v16859_v13 = vpop.eup %14030 }
0x1dec   : > { %v5946_v49 = vsub.f32 %v16597_v56, %v5930_v19  ;;  %5599 = vadd.xlane.f32.xlu1 %v5598_v24  ;;  %v5927_v44 = vpop.xlane.xlu1 %5926  ;;  %14040 = vpow2.f32 %v5953_v48  ;;  %v5604_v43 = vsel %vm4509_vm6, %v16859_v13, 0.0 }
0x1ded   : > { %v5945_v40 = vsub.f32 %v16599_v6, %v5927_v44  ;;  %14042 = vpow2.f32 %v5951_v27 }
0x1dee   : > { %v5957_v59 = vmul.f32 1.442695, %v5946_v49 }
0x1def   : > { %v5936_v63 = vpop.xlane.xlu0 %5935  ;;  %v5955_v18 = vmul.f32 1.442695, %v5945_v40 }
0x1df0   : > { %5608 = vadd.xlane.f32.xlu1 %v5607_v46  ;;  %v5933_v28 = vpop.xlane.xlu1 %5932  ;;  %v5948_v0 = vsub.f32 %v16607_v50, %v5936_v63  ;;  %14044 = vpow2.f32 %v5957_v59 }
0x1df1   : > { %v5947_v16 = vsub.f32 %v16609_v61, %v5933_v28  ;;  %14046 = vpow2.f32 %v5955_v18 }
0x1df2   : > { %v16862_v56 = vpop.eup %14032  ;;  %v5961_v32 = vmul.f32 1.442695, %v5948_v0 }
0x1df3   : > { %v16864_v12 = vpop.eup %14034  ;;  %v5942_v29 = vpop.xlane.xlu0 %5941  ;;  %v5619_v6 = vsel %vm4509_vm6, %v16862_v56, 0.0 }
0x1df4   : > { %v16870_v42 = vpop.eup %14036  ;;  %v5950_v52 = vsub.f32 %v16616_v58, %v5942_v29  ;;  %5620 = vadd.xlane.f32.xlu0 %v5619_v6  ;;  %5605 = vadd.xlane.f32.xlu1 %v5604_v43  ;;  %v5939_v50 = vpop.xlane.xlu1 %5938  ;;  %v5613_v27 = vsel %vm4509_vm6, %v16864_v12, 0.0 }
0x1df5   : > { %v5949_v48 = vsub.f32 %v16618_v5, %v5939_v50  ;;  %v16875_v24 = vpop.eup %14038  ;;  %v5616_v58 = vsel %vm4509_vm6, %v16870_v42, 0.0  ;;  %v5959_v5 = vmul.f32 1.442695, %v5947_v16 }
0x1df6   : > { %v5965_v19 = vmul.f32 1.442695, %v5950_v52  ;;  %v16881_v59 = vpop.eup %14040  ;;  %v5610_v18 = vsel %vm4509_vm6, %v16875_v24, 0.0 }
0x1df7   : > { %v5963_v49 = vmul.f32 1.442695, %v5949_v48  ;;  %v6293_v44 = vpop.xlane.xlu0 %6292  ;;  %v16885_v28 = vpop.eup %14042  ;;  %v5970_v29 = vsel %vm4509_vm6, %v16881_v59, 0.0 }
0x1df8   : > { %14048 = vpow2.f32 %v5965_v19  ;;  %v6313_v40 = vsub.f32 %v16625_v33, %v6293_v44  ;;  %5614 = vadd.xlane.f32.xlu1 %v5613_v27  ;;  %5617 = vadd.xlane.f32.xlu0 %v5616_v58  ;;  %v6290_v61 = vpop.xlane.xlu1 %6289  ;;  %v5967_v48 = vsel %vm4509_vm6, %v16885_v28, 0.0 }
0x1df9   : > { %14050 = vpow2.f32 %v5961_v32  ;;  %v6312_v63 = vsub.f32 %v16627_v37, %v6290_v61 }
0x1dfa   : > { %14052 = vpow2.f32 %v5963_v49  ;;  %v6322_v46 = vmul.f32 1.442695, %v6313_v40  ;;  %v16891_v6 = vpop.eup %14044 }
0x1dfb   : > { %v6299_v0 = vpop.xlane.xlu0 %6298  ;;  %14054 = vpow2.f32 %v5959_v5  ;;  %v6320_v37 = vmul.f32 1.442695, %v6312_v63  ;;  %v5976_v16 = vsel %vm4509_vm6, %v16891_v6, 0.0  ;;  %v16899_v19 = vpop.eup %14046 }
0x1dfc   : > { %v6315_v33 = vsub.f32 %v16633_v60, %v6299_v0  ;;  %5611 = vadd.xlane.f32.xlu1 %v5610_v18  ;;  %5971 = vadd.xlane.f32.xlu0 %v5970_v29  ;;  %v6296_v43 = vpop.xlane.xlu1 %6295  ;;  %14056 = vpow2.f32 %v6322_v46 }
0x1dfd   : > { %v6314_v52 = vsub.f32 %v16635_v47, %v6296_v43  ;;  %14058 = vpow2.f32 %v6320_v37 }
0x1dfe   : > { %v6326_v50 = vmul.f32 1.442695, %v6315_v33 }
0x1dff   : > { %v6305_v32 = vpop.xlane.xlu0 %6304  ;;  %v6324_v44 = vmul.f32 1.442695, %v6314_v52 }
0x1e00   : > { %v6317_v60 = vsub.f32 %v16642_v30, %v6305_v32  ;;  %5977 = vadd.xlane.f32.xlu0 %v5976_v16  ;;  %5968 = vadd.xlane.f32.xlu1 %v5967_v48  ;;  %v6302_v49 = vpop.xlane.xlu1 %6301  ;;  %14060 = vpow2.f32 %v6326_v50  ;;  %v5973_v30 = vsel %vm4509_vm6, %v16899_v19, 0.0 }
0x1e01   : > { %v6316_v40 = vsub.f32 %v16644_v2, %v6302_v49  ;;  %14062 = vpow2.f32 %v6324_v44 }
0x1e02   : > { %v16902_v27 = vpop.eup %14048  ;;  %v6330_v47 = vmul.f32 1.442695, %v6317_v60 }
0x1e03   : > { %v16904_v58 = vpop.eup %14050  ;;  %v6311_v61 = vpop.xlane.xlu0 %6310  ;;  %v5988_v5 = vsel %vm4509_vm6, %v16902_v27, 0.0  ;;  %v6328_v2 = vmul.f32 1.442695, %v6316_v40 }
0x1e04   : > { %v16911_v63 = vpop.eup %14052  ;;  %v6319_v46 = vsub.f32 %v16653_v53, %v6311_v61  ;;  %5989 = vadd.xlane.f32.xlu1 %v5988_v5  ;;  %5974 = vadd.xlane.f32.xlu0 %v5973_v30  ;;  %v5234_v0 = vpop.xlane.xlu1 %5233  ;;  %14064 = vpow2.f32 %v6330_v47  ;;  %v5982_v43 = vsel %vm4509_vm6, %v16904_v58, 0.0 }
0x1e05   : > { %v16914_v29 = vpop.eup %14054  ;;  %v5985_v37 = vsel %vm4509_vm6, %v16911_v63, 0.0  ;;  %14066 = vrcp.f32 %v5234_v0 }
0x1e06   : > { %v6334_v18 = vmul.f32 1.442695, %v6319_v46  ;;  %v16920_v52 = vpop.eup %14056  ;;  %v5979_v48 = vsel %vm4509_vm6, %v16914_v29, 0.0 }
0x1e07   : > { %v6662_v33 = vpop.xlane.xlu0 %6661  ;;  %v16922_v50 = vpop.eup %14058  ;;  %v6339_v60 = vsel %vm4509_vm6, %v16920_v52, 0.0 }
0x1e08   : > { %5983 = vadd.xlane.f32.xlu0 %v5982_v43  ;;  %5986 = vadd.xlane.f32.xlu1 %v5985_v37  ;;  %v5231_v53 = vpop.xlane.xlu1 %5230  ;;  %v6682_v32 = vsub.f32 %v16661_v3, %v6662_v33  ;;  %v6336_v46 = vsel %vm4509_vm6, %v16922_v50, 0.0 }
0x1e09   : > { %14068 = vrcp.f32 %v5231_v53 }
0x1e0a   : > { %14070 = vpow2.f32 %v6334_v18  ;;  %v16929_v49 = vpop.eup %14060  ;;  %v6691_v61 = vmul.f32 1.442695, %v6682_v32 }
0x1e0b   : > { %14072 = vpow2.f32 %v6328_v2  ;;  %v6668_v16 = vpop.xlane.xlu0 %6667  ;;  %v16932_v40 = vpop.eup %14062  ;;  %v6345_v3 = vsel %vm4509_vm6, %v16929_v49, 0.0 }
0x1e0c   : > { %5980 = vadd.xlane.f32.xlu0 %v5979_v48  ;;  %6340 = vadd.xlane.f32.xlu1 %v6339_v60  ;;  %v6308_v44 = vpop.xlane.xlu1 %6307  ;;  %v6342_v37 = vsel %vm4509_vm6, %v16932_v40, 0.0 }
0x1e0d   : > { %v6318_v47 = vsub.f32 %v16666_v1, %v6308_v44 }
0x1e0e   : > { %v16938_v0 = vpop.eup %14064 }
0x1e0f   : > { %v6332_v5 = vmul.f32 1.442695, %v6318_v47  ;;  %v6674_v30 = vpop.xlane.xlu0 %6673  ;;  %v14067_v2 = vpop.eup %14066  ;;  %v6351_v43 = vsel %vm4509_vm6, %v16938_v0, 0.0  ;;  %v6684_v47 = vsub.f32 %v16670_v15, %v6668_v16 }
0x1e10   : > { %6346 = vadd.xlane.f32.xlu1 %v6345_v3  ;;  %6337 = vadd.xlane.f32.xlu0 %v6336_v46  ;;  %v5240_v18 = vpop.xlane.xlu1 %5239  ;;  %v5262_v44 = vmul.f32 %v14067_v2, %v16651_v51  ;;  %v6686_v46 = vsub.f32 %v16679_v22, %v6674_v30 }
0x1e11   : > { %14074 = vpow2.f32 %v6332_v5  ;;  %v6695_v16 = vmul.f32 1.442695, %v6684_v47 }
0x1e12   : > { %14076 = vpow2.f32 %v6691_v61 }
0x1e13   : > { %v14069_v33 = vpop.eup %14068  ;;  %v16940_v1 = vpop.xlane.xlu0 %6679  ;;  %14078 = vrcp.f32 %v5240_v18 }
0x1e14   : > { %v16946_v53 = vpop.eup %14070  ;;  %6352 = vadd.xlane.f32.xlu0 %v6351_v43  ;;  %6343 = vadd.xlane.f32.xlu1 %v6342_v37  ;;  %v5237_v32 = vpop.xlane.xlu1 %5236  ;;  %v5261_v48 = vmul.f32 %v14069_v33, %v16659_v20 }
0x1e15   : > { %v16949_v60 = vpop.eup %14072  ;;  %14080 = vrcp.f32 %v5237_v32  ;;  %v6357_v5 = vsel %vm4509_vm6, %v16946_v53, 0.0 }
0x1e16   : > { %12281 = vmatprep.mubr.msk.f32.mxu0 %vm4509_vm6, %v5261_v48  ;;  %v6348_v20 = vsel %vm4509_vm6, %v16949_v60, 0.0 }
0x1e17   : > { %v16954_v61 = vpop.xlane.xlu0 %7030  ;;  %12282 = vmatmul.mubr.msk.f32.vlgmr.msra.gmra.mrb[74].mxu0 %vm4509_vm6, %v5262_v44 }
0x1e18   : > { %12308 = vmatpush3.msra.mxu0 %v16550_v39  ;;  %6358 = vadd.xlane.f32.xlu0 %v6357_v5  ;;  %v6659_v3 = vpop.xlane.xlu1 %6658 }
0x1e19   : > { %6349 = vadd.xlane.f32.xlu1 %v6348_v20  ;;  %12335 = vmatprep.subr.mxu0 %v16585_v38  ;;  %v6681_v51 = vsub.f32 %v16696_v4, %v6659_v3  ;;  %v6699_v4 = vmul.f32 1.442695, %v6686_v46 }
0x1e1b   : > { %v16964_v15 = vpop.eup %14074  ;;  %v6689_v18 = vmul.f32 1.442695, %v6681_v51  ;;  %v16967_v2 = vpop.xlane.xlu0 %7036 }
0x1e1c   : > { %v5246_v33 = vpop.xlane.xlu1 %5245  ;;  %v6354_v39 = vsel %vm4509_vm6, %v16964_v15, 0.0  ;;  %v16971_v43 = vpop.eup %14076 }
0x1e1d   : > { %14082 = vpow2.f32 %v6689_v18  ;;  %6355 = vadd.xlane.f32.xlu0 %v6354_v39  ;;  %v14079_v37 = vpop.eup %14078  ;;  %v6708_v22 = vsel %vm4509_vm6, %v16971_v43, 0.0 }
0x1e1e   : > { %14084 = vpow2.f32 %v6695_v16  ;;  %v5264_v47 = vmul.f32 %v14079_v37, %v16677_v26 }
0x1e1f   : > { %v14081_v32 = vpop.eup %14080  ;;  %v16973_v48 = vpop.xlane.xlu0 %7042  ;;  %14086 = vrcp.f32 %v5246_v33 }
0x1e20   : > { %v5243_v44 = vpop.xlane.xlu1 %5242  ;;  %v5263_v30 = vmul.f32 %v14081_v32, %v16687_v21 }
0x1e21   : > { %14088 = vrcp.f32 %v5243_v44  ;;  %6709 = vadd.xlane.f32.xlu0 %v6708_v22 }
0x1e22   : > { %12284 = vmatprep.mubr.msk.f32.mxu0 %vm4509_vm6, %v5263_v30  ;;  %14090 = vpow2.f32 %v6699_v4  ;;  %v6688_v30 = vsub.f32 %v16689_v35, %v16940_v1 }
0x1e23   : > { %v16980_v5 = vpop.xlane.xlu0 %7039  ;;  %12285 = vmatmul.mubr.msk.f32.gmra.mrb[88].mxu0 %vm4509_vm6, %v5264_v47 }
0x1e24   : > { %v6665_v20 = vpop.xlane.xlu1 %6664 }
0x1e25   : > { %v6683_v3 = vsub.f32 %v16727_v45, %v6665_v20 }
0x1e27   : > { %v16984_v51 = vpop.eup %14082  ;;  %v6693_v16 = vmul.f32 1.442695, %v6683_v3  ;;  %v7049_v46 = vpop.xlane.xlu0 %7048 }
0x1e28   : > { %v5252_v18 = vpop.xlane.xlu1 %5251  ;;  %v6705_v21 = vsel %vm4509_vm6, %v16984_v51, 0.0  ;;  %v16988_v33 = vpop.eup %14084 }
0x1e29   : > { %14092 = vpow2.f32 %v6693_v16  ;;  %6706 = vadd.xlane.f32.xlu0 %v6705_v21  ;;  %v14087_v26 = vpop.eup %14086  ;;  %v6714_v45 = vsel %vm4509_vm6, %v16988_v33, 0.0  ;;  %v7051_v16 = vsub.f32 %v16700_v55, %v16954_v61  ;;  %v7057_v21 = vsub.f32 %v16731_v17, %v7049_v46 }
0x1e2a   : > { %14094 = vrcp.f32 %v5252_v18  ;;  %v5266_v22 = vmul.f32 %v14087_v26, %v16709_v11  ;;  %v6703_v11 = vmul.f32 1.442695, %v6688_v30 }
0x1e2b   : > { %v14089_v39 = vpop.eup %14088  ;;  %v7046_v37 = vpop.xlane.xlu0 %7045  ;;  %v7072_v61 = vmul.f32 1.442695, %v7057_v21 }
0x1e2c   : > { %v5249_v32 = vpop.xlane.xlu1 %5248  ;;  %v5265_v4 = vmul.f32 %v14089_v39, %v16719_v8  ;;  %v16993_v44 = vpop.eup %14090 }
0x1e2d   : > { %14096 = vrcp.f32 %v5249_v32  ;;  %6715 = vadd.xlane.f32.xlu0 %v6714_v45  ;;  %v6720_v3 = vsel %vm4509_vm6, %v16993_v44, 0.0  ;;  %v7060_v45 = vmul.f32 1.442695, %v7051_v16 }
0x1e2e   : > { %12287 = vmatprep.mubr.msk.f32.mxu0 %vm4509_vm6, %v5265_v4  ;;  %v7056_v4 = vsub.f32 %v16739_v62, %v7046_v37  ;;  %v19182_v62 = vld [vmem:[#allocation17_spill] sm:$0xff] }
0x1e2f   : > { %v7400_v47 = vpop.xlane.xlu0 %7399  ;;  %12288 = vmatmul.mubr.msk.f32.gmra.mrb[90].mxu0 %vm4509_vm6, %v5266_v22 }
0x1e30   : > { %v6671_v20 = vpop.xlane.xlu1 %6670  ;;  %v7070_v16 = vmul.f32 1.442695, %v7056_v4  ;;  %v7420_v37 = vsub.f32 %v19182_v62, %v7400_v47  ;;  %v19185_v47 = vld [vmem:[#allocation34_spill] sm:$0xff]  ;;  %v19188_v62 = vld [vmem:[#allocation35_spill] sm:$0xff] }
0x1e31   : > { %v6685_v8 = vsub.f32 %v16752_v9, %v6671_v20  ;;  %6721 = vadd.xlane.f32.xlu0 %v6720_v3  ;;  %v19180_v3 = vld [vmem:[#allocation16_spill] sm:$0xff] }
0x1e33   : > { %v17005_v18 = vpop.eup %14092  ;;  %v6697_v26 = vmul.f32 1.442695, %v6685_v8  ;;  %v7397_v35 = vpop.xlane.xlu0 %7396 }
0x1e34   : > { %v6677_v1 = vpop.xlane.xlu1 %6676  ;;  %v6711_v39 = vsel %vm4509_vm6, %v17005_v18, 0.0  ;;  %v14095_v9 = vpop.eup %14094 }
0x1e35   : > { %14098 = vpow2.f32 %v6697_v26  ;;  %v6687_v32 = vsub.f32 %v16761_v25, %v6677_v1  ;;  %6712 = vadd.xlane.f32.xlu1 %v6711_v39  ;;  %v5268_v8 = vmul.f32 %v14095_v9, %v19180_v3  ;;  %v19181_v25 = vld [vmem:[#allocation37_spill] sm:$0xff]  ;;  %v7429_v9 = vmul.f32 1.442695, %v7420_v37 }
0x1e36   : > { %14100 = vpow2.f32 %v6703_v11  ;;  %v7053_v26 = vsub.f32 %v19181_v25, %v16967_v2  ;;  %v19184_v2 = vld [vmem:[#allocation21_spill] sm:$0xff]  ;;  %v7054_v37 = vsub.f32 %v19188_v62, %v16980_v5 }
0x1e37   : > { %v14097_v55 = vpop.eup %14096  ;;  %v6701_v22 = vmul.f32 1.442695, %v6687_v32  ;;  %v7406_v30 = vpop.xlane.xlu0 %7405 }
0x1e38   : > { %v7028_v17 = vpop.xlane.xlu1 %7027  ;;  %v5267_v46 = vmul.f32 %v14097_v55, %v16745_v41  ;;  %v7064_v1 = vmul.f32 1.442695, %v7053_v26  ;;  %v7066_v5 = vmul.f32 1.442695, %v7054_v37 }
0x1e39   : > { %14102 = vpow2.f32 %v6701_v22  ;;  %v7050_v20 = vsub.f32 %v16770_v14, %v7028_v17  ;;  %v19183_v14 = vld [vmem:[#allocation18_spill] sm:$0xff] }
0x1e3a   : > { %14104 = vpow2.f32 %v7060_v45  ;;  %12290 = vmatprep.mubr.msk.f32.mxu0 %vm4509_vm6, %v5267_v46  ;;  %v7419_v39 = vsub.f32 %v19183_v14, %v7397_v35  ;;  %v19186_v35 = vld [vmem:[#allocation19_spill] sm:$0xff] }
0x1e3b   : > { %14106 = vpow2.f32 %v7072_v61  ;;  %v7058_v11 = vmul.f32 1.442695, %v7050_v20  ;;  %12291 = vmatmul.mubr.msk.f32.gmra.mrb[92].mxu0 %vm4509_vm6, %v5268_v8  ;;  %v7403_v21 = vpop.xlane.xlu0 %7402  ;;  %v7055_v61 = vsub.f32 %v19185_v47, %v16973_v48  ;;  %v7422_v20 = vsub.f32 %v19186_v35, %v7406_v30 }
0x1e3c   : > { %v7034_v41 = vpop.xlane.xlu1 %7033  ;;  %14108 = vpow2.f32 %v7070_v16  ;;  %v7427_v22 = vmul.f32 1.442695, %v7419_v39 }
0x1e3d   : > { %14110 = vpow2.f32 %v7058_v11  ;;  %v7052_v45 = vsub.f32 %v19184_v2, %v7034_v41  ;;  %v7068_v48 = vmul.f32 1.442695, %v7055_v61  ;;  %v7433_v11 = vmul.f32 1.442695, %v7422_v20  ;;  %v19190_v2 = vld [vmem:[#allocation20_spill] sm:$0xff] }
0x1e3e   : > { %14112 = vpow2.f32 %v7064_v1 }
0x1e3f   : > { %v17021_v32 = vpop.eup %14098  ;;  %v7412_v17 = vpop.xlane.xlu0 %7411  ;;  %14114 = vpow2.f32 %v7429_v9  ;;  %v7062_v3 = vmul.f32 1.442695, %v7052_v45  ;;  %v7421_v45 = vsub.f32 %v19190_v2, %v7403_v21 }
0x1e40   : > { %v6717_v4 = vsel %vm4509_vm6, %v17021_v32, 0.0  ;;  %v17026_v55 = vpop.eup %14100  ;;  %14116 = vpow2.f32 %v7427_v22  ;;  %v7424_v30 = vsub.f32 %v16783_v23, %v7412_v17 }
0x1e41   : > { %6718 = vadd.xlane.f32.xlu0 %v6717_v4  ;;  %v6726_v25 = vsel %vm4509_vm6, %v17026_v55, 0.0  ;;  %14118 = vpow2.f32 %v7062_v3  ;;  %v7431_v35 = vmul.f32 1.442695, %v7421_v45 }
0x1e42   : > { %14120 = vpow2.f32 %v7068_v48  ;;  %v7437_v4 = vmul.f32 1.442695, %v7424_v30 }
0x1e43   : > { %v17030_v46 = vpop.eup %14102  ;;  %v7409_v1 = vpop.xlane.xlu0 %7408  ;;  %14122 = vpow2.f32 %v7433_v11 }
0x1e44   : > { %v17033_v8 = vpop.eup %14104  ;;  %v6723_v26 = vsel %vm4509_vm6, %v17030_v46, 0.0  ;;  %v7423_v23 = vsub.f32 %v16791_v36, %v7409_v1  ;;  %14124 = vpow2.f32 %v7066_v5 }
0x1e45   : > { %v17039_v16 = vpop.eup %14106  ;;  %6727 = vadd.xlane.f32.xlu0 %v6726_v25  ;;  %6724 = vadd.xlane.f32.xlu1 %v6723_v26  ;;  %v7077_v39 = vsel %vm4509_vm6, %v17033_v8, 0.0  ;;  %14126 = vpow2.f32 %v7437_v4  ;;  %v7781_v4 = vpop.xlane.xlu1 %7780 }
0x1e46   : > { %19187 = vst [vmem:[#allocation13_spill] sm:$0xff] %v17039_v16  ;;  %v17044_v41 = vpop.eup %14108  ;;  %v7095_v14 = vsel %vm4509_vm6, %v17039_v16, 0.0  ;;  %v7435_v21 = vmul.f32 1.442695, %v7423_v23  ;;  %14128 = vpow2.f32 %v7431_v35 }
0x1e47   : > { %19189 = vst [vmem:[#allocation14_spill] sm:$0xff] %v17044_v41  ;;  %v17050_v9 = vpop.eup %14110  ;;  %v7092_v61 = vsel %vm4509_vm6, %v17044_v41, 0.0  ;;  %v7418_v23 = vpop.xlane.xlu0 %7417 }
0x1e48   : > { %v17054_v47 = vpop.eup %14112  ;;  %v7074_v22 = vsel %vm4509_vm6, %v17050_v9, 0.0  ;;  %14130 = vpow2.f32 %v7435_v21 }
0x1e49   : > { %7096 = vadd.xlane.f32.xlu0 %v7095_v14  ;;  %7078 = vadd.xlane.f32.xlu1 %v7077_v39  ;;  %19191 = vst [vmem:[#allocation12_spill] sm:$0xff] %v17054_v47  ;;  %v17060_v17 = vpop.eup %14114  ;;  %v7083_v3 = vsel %vm4509_vm6, %v17054_v47, 0.0  ;;  %v7778_v35 = vpop.xlane.xlu1 %7777 }
0x1e4a   : > { %19192 = vst [vmem:[#allocation16_spill] sm:$0xff] %v17060_v17  ;;  %v17062_v20 = vpop.eup %14116  ;;  %v7446_v36 = vsel %vm4509_vm6, %v17060_v17, 0.0 }
0x1e4b   : > { %19193 = vst [vmem:[#allocation37_spill] sm:$0xff] %v17062_v20  ;;  %v17068_v25 = vpop.eup %14118  ;;  %v7443_v48 = vsel %vm4509_vm6, %v17062_v20, 0.0  ;;  %v7415_v21 = vpop.xlane.xlu0 %7414 }
0x1e4c   : > { %19194 = vst [vmem:[#allocation17_spill] sm:$0xff] %v17068_v25  ;;  %v17070_v26 = vpop.eup %14120  ;;  %v7080_v62 = vsel %vm4509_vm6, %v17068_v25, 0.0 }
0x1e4d   : > { %7093 = vadd.xlane.f32.xlu0 %v7092_v61  ;;  %7075 = vadd.xlane.f32.xlu1 %v7074_v22  ;;  %19195 = vst [vmem:[#allocation18_spill] sm:$0xff] %v17070_v26  ;;  %v17076_v37 = vpop.eup %14122  ;;  %v7089_v1 = vsel %vm4509_vm6, %v17070_v26, 0.0 }
0x1e4e   : > { %19196 = vst [vmem:[#allocation21_spill] sm:$0xff] %v17076_v37  ;;  %v17078_v11 = vpop.eup %14124  ;;  %v7452_v30 = vsel %vm4509_vm6, %v17076_v37, 0.0 }
0x1e4f   : > { %19197 = vst [vmem:[#allocation34_spill] sm:$0xff] %v17078_v11  ;;  %v17084_v14 = vpop.eup %14126  ;;  %v7086_v2 = vsel %vm4509_vm6, %v17078_v11, 0.0 }
0x1e50   : > { %19198 = vst [vmem:[#allocation19_spill] sm:$0xff] %v17084_v14  ;;  %v17086_v39 = vpop.eup %14128  ;;  %v7458_v5 = vsel %vm4509_vm6, %v17084_v14, 0.0  ;;  %v7426_v14 = vsub.f32 %v16799_v31, %v7418_v23  ;;  %v19205_v23 = vld [vmem:[#allocation10_spill] sm:$0xff] }
0x1e51   : > { %7447 = vadd.xlane.f32.xlu0 %v7446_v36  ;;  %7084 = vadd.xlane.f32.xlu1 %v7083_v3  ;;  %19199 = vst [vmem:[#allocation35_spill] sm:$0xff] %v17086_v39  ;;  %v7449_v22 = vsel %vm4509_vm6, %v17086_v39, 0.0  ;;  %v17098_v36 = vpop.xlane.xlu1 %7786  ;;  %v7769_v3 = vpop.xlane.xlu0 %7768 }
0x1e52   : > { %v17092_v45 = vpop.eup %14130  ;;  %v7441_v20 = vmul.f32 1.442695, %v7426_v14  ;;  %v7789_v26 = vsub.f32 %v16815_v7, %v7769_v3 }
0x1e53   : > { %19200 = vst [vmem:[#allocation20_spill] sm:$0xff] %v17092_v45  ;;  %v7455_v61 = vsel %vm4509_vm6, %v17092_v45, 0.0  ;;  %v7425_v45 = vsub.f32 %v16807_v10, %v7415_v21 }
0x1e54   : > { %v7798_v10 = vmul.f32 1.442695, %v7789_v26  ;;  %v19209_v26 = vld [vmem:[#allocation8_spill] sm:$0xff] }
0x1e55   : > { %7444 = vadd.xlane.f32.xlu0 %v7443_v48  ;;  %7081 = vadd.xlane.f32.xlu1 %v7080_v62  ;;  %v7784_v48 = vpop.xlane.xlu1 %7783  ;;  %v7766_v62 = vpop.xlane.xlu0 %7765  ;;  %v7439_v41 = vmul.f32 1.442695, %v7425_v45  ;;  %v19206_v45 = vld [vmem:[#allocation23_spill] sm:$0xff] }
0x1e56   : > { %v7788_v14 = vsub.f32 %v19205_v23, %v7766_v62  ;;  %v7792_v7 = vsub.f32 %v19206_v45, %v7778_v35 }
0x1e59   : > { %7453 = vadd.xlane.f32.xlu0 %v7452_v30  ;;  %7090 = vadd.xlane.f32.xlu1 %v7089_v1  ;;  %v19202_v30 = vld [vmem:[#allocation30_spill] sm:$0xff] }
0x1e5d   : > { %7459 = vadd.xlane.f32.xlu0 %v7458_v5  ;;  %7087 = vadd.xlane.f32.xlu1 %v7086_v2  ;;  %v7775_v5 = vpop.xlane.xlu0 %7774 }
0x1e61   : > { %7456 = vadd.xlane.f32.xlu0 %v7455_v61  ;;  %7450 = vadd.xlane.f32.xlu1 %v7449_v22  ;;  %v17104_v61 = vpop.xlane.xlu0 %7771 }
0x1e72   : > { %7483 = vrot.lane.b32.xlu1 %v19202_v30, %s19201_s29  ;;  %s14362_s29 = scalar_lea.vmem %s14361_s15, 2048 }
0x1e75   : > { %v5603_v1 = vpop.xlane.xlu1 %5602 }
0x1e76   : > { %14132 = vrcp.f32 %v5603_v1  ;;  %v19204_v1 = vld [vmem:[#allocation22_spill] sm:$0xff] }
0x1e77   : > { %7114 = vrot.lane.b32.xlu0 %v19202_v30, %s19203_s22  ;;  %v7793_v11 = vsub.f32 %v19204_v1, %v7781_v4  ;;  %s19235_s22 = smov 32  }
0x1e79   : > { %v5600_v2 = vpop.xlane.xlu1 %5599 }
0x1e7a   : > { %14134 = vrcp.f32 %v5600_v2 }
0x1e7d   : > { %v5609_v22 = vpop.xlane.xlu1 %5608 }
0x1e7e   : > { %14136 = vrcp.f32 %v5609_v22  ;;  %v19210_v22 = vld [vmem:[#allocation15_spill] sm:$0xff] }
0x1e80   : > { %v14133_v17 = vpop.eup %14132 }
0x1e81   : > { %v5621_v37 = vpop.xlane.xlu0 %5620  ;;  %v5606_v39 = vpop.xlane.xlu1 %5605  ;;  %v5631_v31 = vmul.f32 %v14133_v17, %v16843_v34  ;;  %v7796_v17 = vmul.f32 1.442695, %v7788_v14 }
0x1e82   : > { %14138 = vrcp.f32 %v5606_v39  ;;  %v7806_v39 = vmul.f32 1.442695, %v7793_v11  ;;  %v7791_v11 = vsub.f32 %v19209_v26, %v7775_v5 }
0x1e83   : > { %14140 = vpow2.f32 %v7441_v20 }
0x1e84   : > { %v14135_v16 = vpop.eup %14134  ;;  %14142 = vpow2.f32 %v7439_v41 }
0x1e85   : > { %v5618_v2 = vpop.xlane.xlu0 %5617  ;;  %v5615_v47 = vpop.xlane.xlu1 %5614  ;;  %v5630_v25 = vmul.f32 %v14135_v16, %v16847_v57  ;;  %v19207_v57 = vld [vmem:[#allocation31_spill] sm:$0xff]  ;;  %v19208_v16 = vld [vmem:[#allocation9_spill] sm:$0xff] }
0x1e86   : > { %14144 = vrcp.f32 %v5618_v2  ;;  %v7794_v41 = vsub.f32 %v19208_v16, %v7784_v48  ;;  %v7790_v48 = vsub.f32 %v19210_v22, %v17104_v61  ;;  %v7802_v2 = vmul.f32 1.442695, %v7791_v11 }
0x1e87   : > { %12309 = vmatprep.mubr.msk.f32.mxu0 %vm4509_vm6, %v5630_v25  ;;  %14146 = vrcp.f32 %v5615_v47  ;;  %v7804_v25 = vmul.f32 1.442695, %v7792_v7 }
0x1e88   : > { %12310 = vmatmul.mubr.msk.f32.vlgmr.msra.gmra.mrb[94].mxu0 %vm4509_vm6, %v5631_v31  ;;  %v14137_v34 = vpop.eup %14136  ;;  %v7808_v62 = vmul.f32 1.442695, %v7794_v41 }
0x1e89   : > { %12336 = vmatpush3.msra.mxu0 %v16585_v38  ;;  %v5972_v4 = vpop.xlane.xlu0 %5971  ;;  %v5612_v21 = vpop.xlane.xlu1 %5611  ;;  %v5633_v47 = vmul.f32 %v14137_v34, %v16853_v54 }
0x1e8a   : > { %12363 = vmatprep.subr.mxu0 %v19207_v57  ;;  %14148 = vrcp.f32 %v5612_v21 }
0x1e8b   : > { %14150 = vpow2.f32 %v7798_v10  ;;  %v7800_v10 = vmul.f32 1.442695, %v7790_v48 }
0x1e8c   : > { %v14139_v20 = vpop.eup %14138  ;;  %14152 = vpow2.f32 %v7806_v39 }
0x1e8d   : > { %v5978_v35 = vpop.xlane.xlu0 %5977  ;;  %v5969_v3 = vpop.xlane.xlu1 %5968  ;;  %14154 = vrcp.f32 %v5621_v37  ;;  %v5632_v38 = vmul.f32 %v14139_v20, %v16859_v13 }
0x1e8e   : > { %14156 = vrcp.f32 %v5969_v3  ;;  %v17125_v1 = vpop.eup %14140 }
0x1e8f   : > { %14158 = vpow2.f32 %v7796_v17  ;;  %12312 = vmatprep.mubr.msk.f32.mxu0 %vm4509_vm6, %v5632_v38  ;;  %v17128_v31 = vpop.eup %14142  ;;  %v7464_v39 = vsel %vm4509_vm6, %v17125_v1, 0.0 }
0x1e90   : > { %14160 = vpow2.f32 %v7804_v25  ;;  %12313 = vmatmul.mubr.msk.f32.gmra.mrb[96].mxu0 %vm4509_vm6, %v5633_v47  ;;  %v14145_v13 = vpop.eup %14144  ;;  %v7461_v45 = vsel %vm4509_vm6, %v17128_v31, 0.0 }
0x1e91   : > { %v5975_v5 = vpop.xlane.xlu0 %5974  ;;  %v5990_v37 = vpop.xlane.xlu1 %5989  ;;  %14162 = vrcp.f32 %v5972_v4  ;;  %v5636_v41 = vmul.f32 %v14145_v13, %v16870_v42 }
0x1e92   : > { %14164 = vrcp.f32 %v5975_v5  ;;  %v14147_v54 = vpop.eup %14146 }
0x1e93   : > { %14166 = vpow2.f32 %v7808_v62  ;;  %v5635_v34 = vmul.f32 %v14147_v54, %v16864_v12 }
0x1e94   : > { %v14149_v23 = vpop.eup %14148  ;;  %14168 = vpow2.f32 %v7802_v2 }
0x1e95   : > { %v5984_v61 = vpop.xlane.xlu0 %5983  ;;  %v5987_v14 = vpop.xlane.xlu1 %5986  ;;  %14170 = vrcp.f32 %v5978_v35  ;;  %v5634_v4 = vmul.f32 %v14149_v23, %v16875_v24 }
0x1e96   : > { %v17134_v7 = vpop.eup %14150  ;;  %7465 = vadd.xlane.f32.xlu0 %v7464_v39  ;;  %7462 = vadd.xlane.f32.xlu1 %v7461_v45  ;;  %14172 = vpow2.f32 %v7800_v10 }
0x1e97   : > { %v17137_v21 = vpop.eup %14152  ;;  %12315 = vmatprep.mubr.msk.f32.mxu0 %vm4509_vm6, %v5634_v4  ;;  %14174 = vrcp.f32 %v5984_v61  ;;  %v7815_v26 = vsel %vm4509_vm6, %v17134_v7, 0.0  ;;  %v19211_v61 = vld [vmem:[#allocation36_spill] sm:$0xff] }
0x1e98   : > { %v14155_v16 = vpop.eup %14154  ;;  %12316 = vmatmul.mubr.msk.f32.gmra.mrb[98].mxu0 %vm4509_vm6, %v5635_v34  ;;  %v7827_v12 = vsel %vm4509_vm6, %v17137_v21, 0.0 }
0x1e99   : > { %v14157_v17 = vpop.eup %14156  ;;  %v5981_v20 = vpop.xlane.xlu0 %5980  ;;  %12318 = vmatprep.mubr.msk.f32.mxu0 %vm4509_vm6, %v5636_v41  ;;  %v5637_v42 = vmul.f32 %v14155_v16, %v16862_v56 }
0x1e9a   : > { %v6341_v25 = vpop.xlane.xlu1 %6340  ;;  %v17145_v24 = vpop.eup %14158  ;;  %14176 = vrcp.f32 %v5981_v20  ;;  %7816 = vadd.xlane.f32.xlu1 %v7815_v26  ;;  %7828 = vadd.xlane.f32.xlu0 %v7827_v12  ;;  %v5999_v3 = vmul.f32 %v14157_v17, %v16885_v28 }
0x1e9b   : > { %v17150_v11 = vpop.eup %14160  ;;  %14178 = vrcp.f32 %v5987_v14  ;;  %v7812_v22 = vsel %vm4509_vm6, %v17145_v24, 0.0 }
0x1e9c   : > { %v14163_v35 = vpop.eup %14162  ;;  %12319 = vmatmul.mubr.msk.f32.gmra.mrb[100].mxu0 %vm4509_vm6, %v5637_v42  ;;  %14180 = vrcp.f32 %v5990_v37  ;;  %v7824_v56 = vsel %vm4509_vm6, %v17150_v11, 0.0 }
0x1e9d   : > { %v14165_v38 = vpop.eup %14164  ;;  %v6338_v47 = vpop.xlane.xlu0 %6337  ;;  %12337 = vmatprep.mubr.msk.f32.mxu0 %vm4509_vm6, %v5999_v3  ;;  %v6000_v28 = vmul.f32 %v14163_v35, %v16881_v59 }
0x1e9e   : > { %v6347_v62 = vpop.xlane.xlu1 %6346  ;;  %v17157_v48 = vpop.eup %14166  ;;  %7813 = vadd.xlane.f32.xlu1 %v7812_v22  ;;  %14182 = vrcp.f32 %v6338_v47  ;;  %7825 = vadd.xlane.f32.xlu0 %v7824_v56  ;;  %v6001_v13 = vmul.f32 %v14165_v38, %v16899_v19 }
0x1e9f   : > { %v17162_v2 = vpop.eup %14168  ;;  %14184 = vrcp.f32 %v6341_v25  ;;  %v7830_v19 = vsel %vm4509_vm6, %v17157_v48, 0.0 }
0x1ea0   : > { %v14171_v5 = vpop.eup %14170  ;;  %12338 = vmatmul.mubr.msk.f32.vlgmr.msra.gmra.mrb[102].mxu0 %vm4509_vm6, %v6000_v28  ;;  %v7821_v23 = vsel %vm4509_vm6, %v17162_v2, 0.0 }
0x1ea1   : > { %v6353_v54 = vpop.xlane.xlu0 %6352  ;;  %v17167_v37 = vpop.eup %14172  ;;  %12364 = vmatpush3.msra.mxu0 %v19207_v57  ;;  %12340 = vmatprep.mubr.msk.f32.mxu0 %vm4509_vm6, %v6001_v13  ;;  %v6002_v14 = vmul.f32 %v14171_v5, %v16891_v6 }
0x1ea2   : > { %v6344_v10 = vpop.xlane.xlu1 %6343  ;;  %v14175_v59 = vpop.eup %14174  ;;  %12391 = vmatprep.subr.mxu0 %v19211_v61  ;;  %7822 = vadd.xlane.f32.xlu1 %v7821_v23  ;;  %v7818_v16 = vsel %vm4509_vm6, %v17167_v37, 0.0 }
0x1ea3   : > { %14186 = vrcp.f32 %v6344_v10  ;;  %7831 = vadd.xlane.f32.xlu0 %v7830_v19  ;;  %v6004_v41 = vmul.f32 %v14175_v59, %v16904_v58 }
0x1ea4   : > { %v14177_v39 = vpop.eup %14176  ;;  %12341 = vmatmul.mubr.msk.f32.gmra.mrb[104].mxu0 %vm4509_vm6, %v6002_v14  ;;  %14188 = vrcp.f32 %v6347_v62 }
0x1ea5   : > { %v14179_v45 = vpop.eup %14178  ;;  %v6359_v57 = vpop.xlane.xlu0 %6358  ;;  %v6003_v4 = vmul.f32 %v14177_v39, %v16914_v29 }
0x1ea6   : > { %v6350_v34 = vpop.xlane.xlu1 %6349  ;;  %7819 = vadd.xlane.f32.xlu1 %v7818_v16  ;;  %v14181_v6 = vpop.eup %14180  ;;  %v6005_v17 = vmul.f32 %v14179_v45, %v16911_v63 }
0x1ea7   : > { %14190 = vrcp.f32 %v6350_v34  ;;  %12343 = vmatprep.mubr.msk.f32.mxu0 %vm4509_vm6, %v6003_v4  ;;  %v6006_v25 = vmul.f32 %v14181_v6, %v16902_v27 }
0x1ea8   : > { %v14183_v20 = vpop.eup %14182  ;;  %12344 = vmatmul.mubr.msk.f32.gmra.mrb[106].mxu0 %vm4509_vm6, %v6004_v41  ;;  %14192 = vrcp.f32 %v6353_v54 }
0x1ea9   : > { %12346 = vmatprep.mubr.msk.f32.mxu0 %vm4509_vm6, %v6005_v17  ;;  %v14185_v26 = vpop.eup %14184  ;;  %v6368_v12 = vmul.f32 %v14183_v20, %v16922_v50 }
0x1eaa   : > { %v6356_v29 = vpop.xlane.xlu0 %6355  ;;  %v6369_v58 = vmul.f32 %v14185_v26, %v16920_v52 }
0x1eab   : > { %14194 = vrcp.f32 %v6356_v29 }
0x1eac   : > { %12347 = vmatmul.mubr.msk.f32.gmra.mrb[108].mxu0 %vm4509_vm6, %v6006_v25  ;;  %14196 = vrcp.f32 %v6359_v57 }
0x1ead   : > { %v14187_v42 = vpop.eup %14186  ;;  %12365 = vmatprep.mubr.msk.f32.mxu0 %vm4509_vm6, %v6368_v12 }
0x1eae   : > { %v14189_v63 = vpop.eup %14188  ;;  %v6370_v35 = vmul.f32 %v14187_v42, %v16932_v40  ;;  %v6710_v38 = vpop.xlane.xlu0 %6709 }
0x1eaf   : > { %v6371_v27 = vmul.f32 %v14189_v63, %v16929_v49  ;;  %14198 = vrcp.f32 %v6710_v38 }
0x1eb0   : > { %12366 = vmatmul.mubr.msk.f32.vlgmr.msra.gmra.mrb[110].mxu0 %vm4509_vm6, %v6369_v58 }
0x1eb1   : > { %v14191_v3 = vpop.eup %14190  ;;  %12392 = vmatpush3.msra.mxu0 %v19211_v61  ;;  %12368 = vmatprep.mubr.msk.f32.mxu0 %vm4509_vm6, %v6370_v35 }
0x1eb2   : > { %v14193_v50 = vpop.eup %14192  ;;  %v6372_v47 = vmul.f32 %v14191_v3, %v16949_v60 }
0x1eb3   : > { %v6373_v22 = vmul.f32 %v14193_v50, %v16938_v0 }
0x1eb4   : > { %12369 = vmatmul.mubr.msk.f32.gmra.mrb[112].mxu0 %vm4509_vm6, %v6371_v27 }
0x1eb5   : > { %v14195_v62 = vpop.eup %14194  ;;  %12371 = vmatprep.mubr.msk.f32.mxu0 %vm4509_vm6, %v6372_v47 }
0x1eb6   : > { %v6707_v52 = vpop.xlane.xlu0 %6706  ;;  %v6374_v40 = vmul.f32 %v14195_v62, %v16964_v15  ;;  %v14197_v56 = vpop.eup %14196 }
0x1eb7   : > { %14200 = vrcp.f32 %v6707_v52  ;;  %7852 = vrot.lane.b32.xlu1 %v19202_v30, %s19212_s12  ;;  %v6375_v49 = vmul.f32 %v14197_v56, %v16946_v53  ;;  %v19213_v30 = vld [vmem:[#allocation11_spill] sm:$0xff] }
0x1eb8   : > { %12372 = vmatmul.mubr.msk.f32.gmra.mrb[114].mxu0 %vm4509_vm6, %v6373_v22  ;;  %v7795_v54 = vsub.f32 %v19213_v30, %v17098_v36  ;;  %v19214_v22 = vld [vmem:[#allocation17_spill] sm:$0xff] }
0x1eb9   : > { %12374 = vmatprep.mubr.msk.f32.mxu0 %vm4509_vm6, %v6374_v40  ;;  %v14199_v28 = vpop.eup %14198 }
0x1eba   : > { %v6716_v60 = vpop.xlane.xlu0 %6715  ;;  %v6738_v0 = vmul.f32 %v14199_v28, %v16971_v43  ;;  %v7810_v53 = vmul.f32 1.442695, %v7795_v54  ;;  %v19217_v54 = vld [vmem:[#allocation18_spill] sm:$0xff] }
0x1ebb   : > { %14202 = vrcp.f32 %v6716_v60 }
0x1ebc   : > { %12375 = vmatmul.mubr.msk.f32.gmra.mrb[116].mxu0 %vm4509_vm6, %v6375_v49 }
0x1ebe   : > { %v6722_v10 = vpop.xlane.xlu0 %6721 }
0x1ec1   : > { %v14201_v5 = vpop.eup %14200 }
0x1ec2   : > { %v6713_v15 = vpop.xlane.xlu1 %6712  ;;  %v6737_v13 = vmul.f32 %v14201_v5, %v16984_v51 }
0x1ec3   : > { %14204 = vrcp.f32 %v6713_v15 }
0x1ec4   : > { %12393 = vmatprep.mubr.msk.f32.mxu0 %vm4509_vm6, %v6737_v13  ;;  %14206 = vpow2.f32 %v7810_v53  ;;  %v19216_v13 = vld [vmem:[#allocation34_spill] sm:$0xff] }
0x1ec5   : > { %12394 = vmatmul.mubr.msk.f32.vlgmr.msra.gmra.mrb[118].mxu0 %vm4509_vm6, %v6738_v0  ;;  %v14203_v23 = vpop.eup %14202  ;;  %14208 = vrcp.f32 %v6722_v10 }
0x1ec6   : > { %v6740_v43 = vmul.f32 %v14203_v23, %v16988_v33  ;;  %v19218_v23 = vld [vmem:[#allocation14_spill] sm:$0xff] }
0x1ecd   : > { %v14205_v59 = vpop.eup %14204 }
0x1ece   : > { %v6719_v61 = vpop.xlane.xlu0 %6718  ;;  %v6739_v19 = vmul.f32 %v14205_v59, %v17005_v18  ;;  %v17217_v45 = vpop.eup %14206 }
0x1ecf   : > { %14210 = vrcp.f32 %v6719_v61  ;;  %v14209_v57 = vpop.eup %14208  ;;  %v7833_v33 = vsel %vm4509_vm6, %v17217_v45, 0.0 }
0x1ed0   : > { %12396 = vmatprep.mubr.msk.f32.mxu0 %vm4509_vm6, %v6739_v19  ;;  %v6742_v41 = vmul.f32 %v14209_v57, %v16993_v44  ;;  %v19219_v19 = vld [vmem:[#allocation13_spill] sm:$0xff] }
0x1ed1   : > { %12397 = vmatmul.mubr.msk.f32.gmra.mrb[120].mxu0 %vm4509_vm6, %v6740_v43 }
0x1ed2   : > { %v6728_v51 = vpop.xlane.xlu0 %6727  ;;  %v6725_v36 = vpop.xlane.xlu1 %6724 }
0x1ed3   : > { %14212 = vrcp.f32 %v6728_v51 }
0x1ed4   : > { %14214 = vrcp.f32 %v6725_v36  ;;  %v19220_v36 = vld [vmem:[#allocation37_spill] sm:$0xff] }
0x1ed6   : > { %v7097_v14 = vpop.xlane.xlu0 %7096  ;;  %v7079_v39 = vpop.xlane.xlu1 %7078 }
0x1ed9   : > { %v14211_v4 = vpop.eup %14210 }
0x1eda   : > { %v7094_v34 = vpop.xlane.xlu0 %7093  ;;  %v7076_v16 = vpop.xlane.xlu1 %7075  ;;  %v6741_v18 = vmul.f32 %v14211_v4, %v17021_v32  ;;  %v19221_v4 = vld [vmem:[#allocation16_spill] sm:$0xff] }
0x1edb   : > { %14216 = vrcp.f32 %v7076_v16  ;;  %7834 = vadd.xlane.f32.xlu1 %v7833_v33  ;;  %v19222_v33 = vld [vmem:[#allocation35_spill] sm:$0xff] }
0x1edc   : > { %12399 = vmatprep.mubr.msk.f32.mxu0 %vm4509_vm6, %v6741_v18  ;;  %14218 = vrcp.f32 %v7079_v39 }
0x1edd   : > { %v14213_v6 = vpop.eup %14212  ;;  %12400 = vmatmul.mubr.msk.f32.gmra.mrb[122].mxu0 %vm4509_vm6, %v6742_v41 }
0x1ede   : > { %v14215_v17 = vpop.eup %14214  ;;  %v7448_v20 = vpop.xlane.xlu0 %7447  ;;  %v6744_v25 = vmul.f32 %v14213_v6, %v17026_v55 }
0x1edf   : > { %v7085_v29 = vpop.xlane.xlu1 %7084  ;;  %v6743_v26 = vmul.f32 %v14215_v17, %v17030_v46  ;;  %v19223_v17 = vld [vmem:[#allocation21_spill] sm:$0xff] }
0x1ee1   : > { %12402 = vmatprep.mubr.msk.f32.mxu0 %vm4509_vm6, %v6743_v26 }
0x1ee2   : > { %12403 = vmatmul.mubr.msk.f32.gmra.mrb[124].mxu0 %vm4509_vm6, %v6744_v25  ;;  %v7445_v32 = vpop.xlane.xlu0 %7444  ;;  %v19224_v25 = vld [vmem:[#allocation20_spill] sm:$0xff] }
0x1ee3   : > { %v7082_v44 = vpop.xlane.xlu1 %7081 }
0x1ee4   : > { %14220 = vrcp.f32 %v7082_v44 }
0x1ee5   : > { %v14217_v12 = vpop.eup %14216  ;;  %14222 = vrcp.f32 %v7085_v29 }
0x1ee6   : > { %v7454_v42 = vpop.xlane.xlu0 %7453  ;;  %v7106_v63 = vmul.f32 %v14217_v12, %v17050_v9  ;;  %v14219_v50 = vpop.eup %14218 }
0x1ee7   : > { %v7091_v58 = vpop.xlane.xlu1 %7090  ;;  %v7107_v9 = vmul.f32 %v14219_v50, %v17033_v8  ;;  %v19215_v8 = vld [vmem:[#allocation12_spill] sm:$0xff] }
0x1ee8   : > { %12421 = vmatprep.mubr.msk.f32.mxu0 %vm4509_vm6, %v7106_v63 }
0x1eea   : > { %v17231_v35 = vpop.f32.mrb[74].mxu0  ;;  %v7460_v55 = vpop.xlane.xlu0 %7459 }
0x1eeb   : > { %v7088_v46 = vpop.xlane.xlu1 %7087  ;;  %v17233_v3 = vpop.f32.mrb[75].mxu0 }
0x1eec   : > { %14224 = vrcp.f32 %v7088_v46 }
0x1eed   : > { %14226 = vrcp.f32 %v7091_v58 }
0x1eee   : > { %v7457_v38 = vpop.xlane.xlu0 %7456  ;;  %14228 = vrcp.f32 %v7094_v34  ;;  %v14221_v47 = vpop.eup %14220 }
0x1eef   : > { %v7451_v27 = vpop.xlane.xlu1 %7450  ;;  %14230 = vrcp.f32 %v7097_v14  ;;  %v14223_v52 = vpop.eup %14222  ;;  %v7108_v56 = vmul.f32 %v14221_v47, %v19214_v22 }
0x1ef0   : > { %14232 = vrcp.f32 %v7445_v32  ;;  %v7109_v5 = vmul.f32 %v14223_v52, %v19215_v8  ;;  %v19225_v32 = vld [vmem:[#allocation19_spill] sm:$0xff] }
0x1ef1   : > { %14234 = vrcp.f32 %v7448_v20 }
0x1ef2   : > { %v7115_v62 = vpop.permute.xlu0 %7114  ;;  %14236 = vrcp.f32 %v7451_v27 }
0x1ef3   : > { %12419 = vmatprep.subr.mxu0 %v7115_v62  ;;  %v7484_v40 = vpop.permute.xlu1 %7483  ;;  %14238 = vrcp.f32 %v7454_v42 }
0x1ef4   : > { %12420 = vmatpush3.msra.mxu0 %v7115_v62  ;;  %14240 = vrcp.f32 %v7457_v38 }
0x1ef5   : > { %12422 = vmatmul.mubr.msk.f32.vlgmr.msra.gmra.mrb[126].mxu0 %vm4509_vm6, %v7107_v9  ;;  %12447 = vmatprep.subr.mxu0 %v7484_v40  ;;  %14242 = vrcp.f32 %v7460_v55 }
0x1ef6   : > { %v14225_v49 = vpop.eup %14224  ;;  %v17238_v60 = vpop.f32.mrb[88].mxu0  ;;  %12424 = vmatprep.mubr.msk.f32.mxu0 %vm4509_vm6, %v7108_v56  ;;  %12448 = vmatpush3.msra.mxu0 %v7484_v40 }
0x1ef7   : > { %v17241_v28 = vpop.f32.mrb[89].mxu0  ;;  %v14227_v15 = vpop.eup %14226  ;;  %v7110_v0 = vmul.f32 %v14225_v49, %v19216_v13 }
0x1ef8   : > { %v14229_v30 = vpop.eup %14228  ;;  %v7111_v53 = vmul.f32 %v14227_v15, %v19217_v54 }
0x1ef9   : > { %12425 = vmatmul.mubr.msk.f32.gmra.mrb[128].mxu0 %vm4509_vm6, %v7109_v5  ;;  %v14231_v10 = vpop.eup %14230  ;;  %v7112_v59 = vmul.f32 %v14229_v30, %v19218_v23 }
0x1efa   : > { %12427 = vmatprep.mubr.msk.f32.mxu0 %vm4509_vm6, %v7110_v0  ;;  %v14233_v61 = vpop.eup %14232  ;;  %v7113_v43 = vmul.f32 %v14231_v10, %v19219_v19 }
0x1efb   : > { %v14235_v51 = vpop.eup %14234  ;;  %v7475_v14 = vmul.f32 %v14233_v61, %v19220_v36 }
0x1efc   : > { %v14237_v39 = vpop.eup %14236  ;;  %v7476_v34 = vmul.f32 %v14235_v51, %v19221_v4 }
0x1efd   : > { %12428 = vmatmul.mubr.msk.f32.gmra.mrb[130].mxu0 %vm4509_vm6, %v7111_v53  ;;  %v14239_v18 = vpop.eup %14238  ;;  %v7477_v41 = vmul.f32 %v14237_v39, %v19222_v33 }
0x1efe   : > { %12430 = vmatprep.mubr.msk.f32.mxu0 %vm4509_vm6, %v7112_v59  ;;  %v14241_v6 = vpop.eup %14240  ;;  %v7478_v20 = vmul.f32 %v14239_v18, %v19223_v17  ;;  %v19229_v17 = vmov 0.0  }
0x1eff   : > { %v14243_v29 = vpop.eup %14242  ;;  %v7479_v26 = vmul.f32 %v14241_v6, %v19224_v25 }
0x1f00   : > { %v7480_v44 = vmul.f32 %v14243_v29, %v19225_v32 }
0x1f01   : > { %12431 = vmatmul.mubr.msk.f32.gmra.mrb[132].mxu0 %vm4509_vm6, %v7113_v43 }
0x1f02   : > { %v17254_v57 = vpop.f32.mrb[90].mxu0  ;;  %12449 = vmatprep.mubr.msk.f32.mxu0 %vm4509_vm6, %v7475_v14 }
0x1f03   : > { %v17258_v16 = vpop.f32.mrb[91].mxu0 }
0x1f05   : > { %12450 = vmatmul.mubr.msk.f32.vlgmr.msra.gmra.mrb[134].mxu0 %vm4509_vm6, %v7476_v34 }
0x1f06   : > { %12452 = vmatprep.mubr.msk.f32.mxu0 %vm4509_vm6, %v7477_v41 }
0x1f09   : > { %12453 = vmatmul.mubr.msk.f32.gmra.mrb[136].mxu0 %vm4509_vm6, %v7478_v20 }
0x1f0a   : > { %12455 = vmatprep.mubr.msk.f32.mxu0 %vm4509_vm6, %v7479_v26 }
0x1f0d   : > { %12456 = vmatmul.mubr.msk.f32.gmra.mrb[138].mxu0 %vm4509_vm6, %v7480_v44 }
0x1f0e   : > { %v17269_v12 = vpop.f32.mrb[92].mxu0 }
0x1f0f   : > { %v17271_v42 = vpop.f32.mrb[93].mxu0 }
0x1f23   : > { %v7466_v58 = vpop.xlane.xlu0 %7465  ;;  %v7463_v63 = vpop.xlane.xlu1 %7462 }
0x1f24   : > { %14244 = vrcp.f32 %v7466_v58 }
0x1f25   : > { %14246 = vrcp.f32 %v7463_v63 }
0x1f27   : > { %v7817_v55 = vpop.xlane.xlu1 %7816  ;;  %v7829_v46 = vpop.xlane.xlu0 %7828 }
0x1f28   : > { %14248 = vrcp.f32 %v7817_v55 }
0x1f2b   : > { %v7814_v38 = vpop.xlane.xlu1 %7813  ;;  %v7826_v62 = vpop.xlane.xlu0 %7825 }
0x1f2c   : > { %14250 = vrcp.f32 %v7814_v38 }
0x1f2d   : > { %14252 = vrcp.f32 %v7826_v62 }
0x1f2e   : > { %v14245_v27 = vpop.eup %14244 }
0x1f2f   : > { %v14247_v50 = vpop.eup %14246  ;;  %v7482_v47 = vmul.f32 %v14245_v27, %v17125_v1  ;;  %v7823_v9 = vpop.xlane.xlu1 %7822 }
0x1f30   : > { %v7481_v52 = vmul.f32 %v14247_v50, %v17128_v31  ;;  %14254 = vrcp.f32 %v7823_v9  ;;  %v7832_v49 = vpop.xlane.xlu0 %7831  ;;  %v19226_v31 = vmov 0.0|0.0  }
0x1f32   : > { %12458 = vmatprep.mubr.msk.f32.mxu0 %vm4509_vm6, %v7481_v52  ;;  %v14249_v22 = vpop.eup %14248 }
0x1f33   : > { %12459 = vmatmul.mubr.msk.f32.gmra.mrb[140].mxu0 %vm4509_vm6, %v7482_v47  ;;  %v7820_v40 = vpop.xlane.xlu1 %7819  ;;  %v7845_v1 = vmul.f32 %v14249_v22, %v17134_v7 }
0x1f34   : > { %14256 = vrcp.f32 %v7820_v40 }
0x1f35   : > { %14258 = vrcp.f32 %v7829_v46 }
0x1f36   : > { %v14251_v56 = vpop.eup %14250  ;;  %14260 = vrcp.f32 %v7832_v49 }
0x1f37   : > { %v7844_v8 = vmul.f32 %v14251_v56, %v17145_v24  ;;  %v7853_v5 = vpop.permute.xlu1 %7852  ;;  %v14253_v15 = vpop.eup %14252 }
0x1f38   : > { %12475 = vmatprep.subr.mxu0 %v7853_v5  ;;  %v7848_v7 = vmul.f32 %v14253_v15, %v17150_v11 }
0x1f39   : > { %12477 = vmatprep.mubr.msk.f32.mxu0 %vm4509_vm6, %v7844_v8  ;;  %12476 = vmatpush3.msra.mxu0 %v7853_v5 }
0x1f3a   : > { %12478 = vmatmul.mubr.msk.f32.vlgmr.msra.gmra.mrb[142].mxu0 %vm4509_vm6, %v7845_v1  ;;  %12937 = vmatprep.subr.bf16.mxu0 %v19226_v31  ;;  %v14255_v13 = vpop.eup %14254 }
0x1f3b   : > { %v7847_v24 = vmul.f32 %v14255_v13, %v17162_v2 }
0x1f3e   : > { %v14257_v0 = vpop.eup %14256 }
0x1f3f   : > { %v7846_v30 = vmul.f32 %v14257_v0, %v17167_v37  ;;  %v14259_v54 = vpop.eup %14258 }
0x1f40   : > { %v14261_v53 = vpop.eup %14260  ;;  %v7849_v10 = vmul.f32 %v14259_v54, %v17137_v21 }
0x1f41   : > { %12480 = vmatprep.mubr.msk.f32.mxu0 %vm4509_vm6, %v7846_v30  ;;  %v7850_v23 = vmul.f32 %v14261_v53, %v17157_v48 }
0x1f42   : > { %12481 = vmatmul.mubr.msk.f32.gmra.mrb[144].mxu0 %vm4509_vm6, %v7847_v24 }
0x1f43   : > { %12483 = vmatprep.mubr.msk.f32.mxu0 %vm4509_vm6, %v7848_v7 }
0x1f46   : > { %12484 = vmatmul.mubr.msk.f32.gmra.mrb[146].mxu0 %vm4509_vm6, %v7849_v10 }
0x1f47   : > { %12486 = vmatprep.mubr.msk.f32.mxu0 %vm4509_vm6, %v7850_v23 }
0x1f5b   : > { %v12311_v37 = vpop.f32.mrb[94].mxu0 }
0x1f5c   : > { %v5731_v2 = vpop.f32.mrb[95].mxu0 }
0x1f5d   : > { %v13516_v59 = vpack.i.bf16 %v12311_v37, %v5731_v2 }
0x1f5f   : > { %13517 = vrot.lane.b32.xlu0 %v13516_v59, %s19227_s24 }
0x1f63   : > { %v12314_v61 = vpop.f32.mrb[96].mxu0 }
0x1f64   : > { %v5741_v11 = vpop.f32.mrb[97].mxu0 }
0x1f65   : > { %v13521_v19 = vpack.i.bf16 %v12314_v61, %v5741_v11 }
0x1f67   : > { %13522 = vrot.lane.b32.xlu0 %v13521_v19, %s19227_s24 }
0x1f68   : > { %v7835_v43 = vpop.xlane.xlu1 %7834 }
0x1f69   : > { %14262 = vrcp.f32 %v7835_v43 }
0x1f6b   : > { %v12317_v51 = vpop.f32.mrb[98].mxu0 }
0x1f6c   : > { %v5751_v21 = vpop.f32.mrb[99].mxu0 }
0x1f6d   : > { %v13526_v36 = vpack.i.bf16 %v12317_v51, %v5751_v21 }
0x1f6f   : > { %13527 = vrot.lane.b32.xlu1 %v13526_v36, %s19227_s24  ;;  %v12320_v48 = vpop.f32.mrb[100].mxu0 }
0x1f70   : > { %v5761_v14 = vpop.f32.mrb[101].mxu0 }
0x1f71   : > { %v13531_v39 = vpack.i.bf16 %v12320_v48, %v5761_v14 }
0x1f73   : > { %v14263_v4 = vpop.eup %14262  ;;  %13532 = vrot.lane.b32.xlu0 %v13531_v39, %s19227_s24  ;;  %v12339_v34 = vpop.f32.mrb[102].mxu0  ;;  %s19234_s24 = smov 28  }
0x1f74   : > { %v6100_v18 = vpop.f32.mrb[103].mxu0  ;;  %v7851_v33 = vmul.f32 %v14263_v4, %v17217_v45 }
0x1f75   : > { %v13536_v41 = vpack.i.bf16 %v12339_v34, %v6100_v18 }
0x1f76   : > { %12487 = vmatmul.mubr.msk.f32.gmra.mrb[148].mxu0 %vm4509_vm6, %v7851_v33 }
0x1f77   : > { %13537 = vrot.lane.b32.xlu0 %v13536_v41, %s19228_s13  ;;  %v12342_v6 = vpop.f32.mrb[104].mxu0  ;;  %12517 = vmatprep.mubr.msk.f32.mxu0 %vm19042_vm0, %v19229_v17 }
0x1f78   : > { %v6110_v20 = vpop.f32.mrb[105].mxu0 }
0x1f79   : > { %v13541_v29 = vpack.i.bf16 %v12342_v6, %v6110_v20 }
0x1f7b   : > { %13542 = vrot.lane.b32.xlu0 %v13541_v29, %s19228_s13  ;;  %v17302_v25 = vpop.f32.mrb[106].mxu0 }
0x1f7c   : > { %v17304_v26 = vpop.f32.mrb[107].mxu0 }
0x1f7d   : > { %v13591_v45 = vpack.i.bf16 %v17302_v25, %v17304_v26  ;;  %v14353_v25 = vld [vmem:[%s18893_s5 + $0x1] ss:$0 sm:$0xff] }
0x1f7f   : > { %v17308_v32 = vpop.f32.mrb[108].mxu0 }
0x1f80   : > { %v17310_v44 = vpop.f32.mrb[109].mxu0 }
0x1f81   : > { %v13601_v58 = vpack.i.bf16 %v17308_v32, %v17310_v44 }
0x1f83   : > { %v12367_v63 = vpop.f32.mrb[110].mxu0 }
0x1f84   : > { %v6469_v55 = vpop.f32.mrb[111].mxu0 }
0x1f85   : > { %v13546_v46 = vpack.i.bf16 %v12367_v63, %v6469_v55 }
0x1f87   : > { %13547 = vrot.lane.b32.xlu1 %v13546_v46, %s19230_s0  ;;  %v12370_v38 = vpop.f32.mrb[112].mxu0 }
0x1f88   : > { %v6479_v27 = vpop.f32.mrb[113].mxu0 }
0x1f89   : > { %v13551_v50 = vpack.i.bf16 %v12370_v38, %v6479_v27 }
0x1f8b   : > { %13552 = vrot.lane.b32.xlu0 %v13551_v50, %s19230_s0  ;;  %v17316_v47 = vpop.f32.mrb[114].mxu0 }
0x1f8c   : > { %v17318_v62 = vpop.f32.mrb[115].mxu0 }
0x1f8d   : > { %v13606_v9 = vpack.i.bf16 %v17316_v47, %v17318_v62 }
0x1f8f   : > { %v17322_v52 = vpop.f32.mrb[116].mxu0 }
0x1f90   : > { %v17324_v40 = vpop.f32.mrb[117].mxu0 }
0x1f91   : > { %v13611_v22 = vpack.i.bf16 %v17322_v52, %v17324_v40 }
0x1f98   : > { %v12395_v56 = vpop.f32.mrb[118].mxu0 }
0x1f99   : > { %v6838_v49 = vpop.f32.mrb[119].mxu0 }
0x1f9a   : > { %v13556_v8 = vpack.i.bf16 %v12395_v56, %v6838_v49  ;;  %v13666_v49 = vld [vmem:[%s18896_s8 + $0x10] sm:$0xff]  }
0x1f9b   : > { %12489 = vmatprep.subr.bf16.mxu1 %v13666_v49 }
0x1f9c   : > { %13557 = vrot.lane.b32.xlu0 %v13556_v8, %s19231_s1  ;;  %12490 = vmatpush3.bf16.msra.mxu1 %v13666_v49 }
0x1fa4   : > { %v12398_v5 = vpop.f32.mrb[120].mxu0 }
0x1fa5   : > { %v6848_v1 = vpop.f32.mrb[121].mxu0 }
0x1fa6   : > { %v13561_v15 = vpack.i.bf16 %v12398_v5, %v6848_v1 }
0x1fa8   : > { %13562 = vrot.lane.b32.xlu0 %v13561_v15, %s19231_s1 }
0x1fb0   : > { %v12401_v13 = vpop.f32.mrb[122].mxu0 }
0x1fb1   : > { %v6858_v0 = vpop.f32.mrb[123].mxu0 }
0x1fb2   : > { %v13616_v30 = vpack.i.bf16 %v12401_v13, %v6858_v0 }
0x1fb5   : > { %v12404_v24 = vpop.f32.mrb[124].mxu0 }
0x1fb6   : > { %v6868_v54 = vpop.f32.mrb[125].mxu0 }
0x1fb7   : > { %v13621_v7 = vpack.i.bf16 %v12404_v24, %v6868_v54 }
0x1fc8   : > { %v12423_v53 = vpop.f32.mrb[126].mxu0 }
0x1fc9   : > { %v7207_v10 = vpop.f32.mrb[127].mxu0 }
0x1fca   : > { %v13566_v23 = vpack.i.bf16 %v12423_v53, %v7207_v10 }
0x1fcc   : > { %13567 = vrot.lane.b32.xlu0 %v13566_v23, %s19232_s30  ;;  %v12426_v37 = vpop.f32.mrb[128].mxu0 }
0x1fcd   : > { %v7217_v2 = vpop.f32.mrb[129].mxu0 }
0x1fce   : > { %v13571_v59 = vpack.i.bf16 %v12426_v37, %v7217_v2 }
0x1fd0   : > { %13572 = vrot.lane.b32.xlu0 %v13571_v59, %s19232_s30  ;;  %v12429_v61 = vpop.f32.mrb[130].mxu0 }
0x1fd1   : > { %v7227_v11 = vpop.f32.mrb[131].mxu0  ;;  %v17333_v34 = vpop.permute.xlu0 %13517 }
0x1fd2   : > { %v13626_v19 = vpack.i.bf16 %v12429_v61, %v7227_v11 }
0x1fd4   : > { %v12432_v43 = vpop.f32.mrb[132].mxu0 }
0x1fd5   : > { %v7237_v51 = vpop.f32.mrb[133].mxu0 }
0x1fd6   : > { %v13631_v21 = vpack.i.bf16 %v12432_v43, %v7237_v51 }
0x1fd8   : > { %v12451_v36 = vpop.f32.mrb[134].mxu0 }
0x1fd9   : > { %v7576_v48 = vpop.f32.mrb[135].mxu0  ;;  %v17336_v6 = vpop.permute.xlu0 %13522 }
0x1fda   : > { %v13576_v14 = vpack.i.bf16 %v12451_v36, %v7576_v48 }
0x1fdc   : > { %13577 = vrot.lane.b32.xlu1 %v13576_v14, %s19233_s16  ;;  %v12454_v39 = vpop.f32.mrb[136].mxu0 }
0x1fdd   : > { %v7586_v4 = vpop.f32.mrb[137].mxu0 }
0x1fde   : > { %v13581_v18 = vpack.i.bf16 %v12454_v39, %v7586_v4 }
0x1fe0   : > { %13582 = vrot.lane.b32.xlu0 %v13581_v18, %s19233_s16  ;;  %v12457_v33 = vpop.f32.mrb[138].mxu0  ;;  %v13525_v18 = vunpack.i.h.bf16 %v17336_v6 }
0x1fe1   : > { %v7596_v41 = vpop.f32.mrb[139].mxu0 }
0x1fe2   : > { %v13636_v20 = vpack.i.bf16 %v12457_v33, %v7596_v41 }
0x1fe5   : > { %v13533_v29 = vpop.permute.xlu0 %13532 }
0x1fe6   : > { %v13535_v63 = vunpack.i.h.bf16 %v13533_v29  ;;  %v13534_v55 = vunpack.i.l.bf16 %v13533_v29 }
0x1fe8   : > { %v17340_v46 = vsel %vm964_vm4, %v17269_v12, %v13535_v63  ;;  %v17344_v38 = vsel %vm964_vm4, %v17271_v42, %v13534_v55  ;;  %v13667_v12 = vld [vmem:[%s18896_s8 + $0x18] sm:$0xff]  }
0x1fe9   : > { %12491 = vmatprep.subr.bf16.mxu1 %v13667_v12  ;;  %v13538_v44 = vpop.permute.xlu0 %13537 }
0x1fea   : > { %12492 = vmatpush3.bf16.msra.mxu1 %v13667_v12  ;;  %v13540_v53 = vunpack.i.h.bf16 %v13538_v44  ;;  %v13539_v10 = vunpack.i.l.bf16 %v13538_v44 }
0x2006   : > { %v12460_v27 = vpop.f32.mrb[140].mxu0 }
0x2007   : > { %v7606_v50 = vpop.f32.mrb[141].mxu0 }
0x2008   : > { %v13641_v56 = vpack.i.bf16 %v12460_v27, %v7606_v50 }
0x200d   : > { %v12479_v8 = vpop.f32.mrb[142].mxu0 }
0x200e   : > { %v7945_v5 = vpop.f32.mrb[143].mxu0 }
0x200f   : > { %v13586_v1 = vpack.i.bf16 %v12479_v8, %v7945_v5 }
0x2011   : > { %13587 = vrot.lane.b32.xlu1 %v13586_v1, %s19234_s24 }
0x2015   : > { %13592 = vrot.lane.b32.xlu1 %v13591_v45, %s19228_s13  ;;  %v12482_v42 = vpop.f32.mrb[144].mxu0 }
0x2016   : > { %v7955_v15 = vpop.f32.mrb[145].mxu0 }
0x2017   : > { %v13596_v13 = vpack.i.bf16 %v12482_v42, %v7955_v15 }
0x2019   : > { %13607 = vrot.lane.b32.xlu1 %v13606_v9, %s19230_s0  ;;  %13597 = vrot.lane.b32.xlu0 %v13596_v13, %s19234_s24  ;;  %v12485_v0 = vpop.f32.mrb[146].mxu0  ;;  %v17382_v9 = vpop.permute.xlu1 %13527 }
0x201a   : > { %v7965_v24 = vpop.f32.mrb[147].mxu0 }
0x201b   : > { %v13646_v54 = vpack.i.bf16 %v12485_v0, %v7965_v24  ;;  %v8211_v24 = vsel %vm964_vm4, %v17238_v60, %v13525_v18 }
0x201d   : > { %13617 = vrot.lane.b32.xlu1 %v13616_v30, %s19231_s1  ;;  %13602 = vrot.lane.b32.xlu0 %v13601_v58, %s19228_s13  ;;  %v13543_v58 = vpop.permute.xlu0 %13542  ;;  %v13548_v40 = vpop.permute.xlu1 %13547  ;;  %v13519_v30 = vunpack.i.l.bf16 %v17333_v34 }
0x201e   : > { %v13550_v23 = vunpack.i.h.bf16 %v13548_v40  ;;  %v13549_v37 = vunpack.i.l.bf16 %v13548_v40  ;;  %v13545_v27 = vunpack.i.h.bf16 %v13543_v58  ;;  %v13544_v50 = vunpack.i.l.bf16 %v13543_v58 }
0x2021   : > { %13627 = vrot.lane.b32.xlu1 %v13626_v19, %s19232_s30  ;;  %13612 = vrot.lane.b32.xlu0 %v13611_v22, %s19230_s0  ;;  %v13553_v47 = vpop.permute.xlu0 %13552  ;;  %v13520_v22 = vunpack.i.h.bf16 %v17333_v34  ;;  %v8208_v19 = vsel %vm964_vm4, %v17233_v3, %v13519_v30 }
0x2022   : > { %v8216_v36 = vsel %vm4509_vm6, %v8208_v19, %v13539_v10  ;;  %v13555_v8 = vunpack.i.h.bf16 %v13553_v47  ;;  %v13554_v5 = vunpack.i.l.bf16 %v13553_v47  ;;  %v13530_v19 = vunpack.i.h.bf16 %v17382_v9 }
0x2023   : > { %v8209_v11 = vsel %vm964_vm4, %v17231_v35, %v13520_v22  ;;  %v8224_v4 = vsel %vm4518_vm7, %v8216_v36, %v13549_v37  ;;  %v13524_v35 = vunpack.i.l.bf16 %v17336_v6 }
0x2025   : > { %13637 = vrot.lane.b32.xlu1 %v13636_v20, %s19233_s16  ;;  %13622 = vrot.lane.b32.xlu0 %v13621_v7, %s19231_s1  ;;  %v13558_v62 = vpop.permute.xlu0 %13557  ;;  %s11137_s1 = sshll.u32 %s14538_s21, 10 }
0x2026   : > { %v13560_v59 = vunpack.i.h.bf16 %v13558_v62  ;;  %v13559_v61 = vunpack.i.l.bf16 %v13558_v62 }
0x2028   : > { %v8232_v33 = vsel %vm4527_vm8, %v8224_v4, %v13559_v61 }
0x2029   : > { %13632 = vrot.lane.b32.xlu0 %v13631_v21, %s19232_s30  ;;  %13647 = vrot.lane.b32.xlu1 %v13646_v54, %s19234_s24  ;;  %v13563_v52 = vpop.permute.xlu0 %13562  ;;  %v8217_v21 = vsel %vm4509_vm6, %v8209_v11, %v13540_v53  ;;  %v8210_v54 = vsel %vm964_vm4, %v17241_v28, %v13524_v35 }
0x202a   : > { %v8225_v39 = vsel %vm4518_vm7, %v8217_v21, %v13550_v23  ;;  %v13565_v42 = vunpack.i.h.bf16 %v13563_v52  ;;  %v13564_v15 = vunpack.i.l.bf16 %v13563_v52 }
0x202b   : > { %v8233_v3 = vsel %vm4527_vm8, %v8225_v39, %v13560_v59 }
0x202d   : > { %13642 = vrot.lane.b32.xlu0 %v13641_v56, %s19233_s16  ;;  %8284 = vrot.lane.b32.xlu1 %v14353_v25, %s19235_s22  ;;  %s402_s22 = sand.u32 1, %s14410_s18   ;;  %s18840_s16 = scalar_lea.hbm %s18898_s10, %s11137_s1 }
0x202e   : > { %s10612_s0 = sshll.u32 %s402_s22, 6  ;;  %s18846_s21 = scalar_lea.sflag [#allocation3], %s402_s22 }
0x203e   : > { %v13568_v7 = vpop.permute.xlu0 %13567 }
0x203f   : > { %v13570_v43 = vunpack.i.h.bf16 %v13568_v7  ;;  %v13569_v51 = vunpack.i.l.bf16 %v13568_v7 }
0x2041   : > { %v8240_v20 = vsel %vm4536_vm9, %v8232_v33, %v13569_v51  ;;  %v8241_v29 = vsel %vm4536_vm9, %v8233_v3, %v13570_v43  ;;  %v13529_v43 = vunpack.i.l.bf16 %v17382_v9 }
0x2042   : > { %v13573_v34 = vpop.permute.xlu0 %13572 }
0x2043   : > { %v13575_v25 = vunpack.i.h.bf16 %v13573_v34  ;;  %v8212_v18 = vsel %vm964_vm4, %v17258_v16, %v13529_v43 }
0x2049   : > { %v12488_v26 = vpop.f32.mrb[148].mxu0 }
0x204a   : > { %v7975_v45 = vpop.f32.mrb[149].mxu0 }
0x204b   : > { %v13651_v32 = vpack.i.bf16 %v12488_v26, %v7975_v45  ;;  %v13574_v26 = vunpack.i.l.bf16 %v13573_v34  ;;  %v8219_v45 = vsel %vm4509_vm6, %v8211_v24, %v13545_v27  ;;  %v8213_v34 = vsel %vm964_vm4, %v17254_v57, %v13530_v19 }
0x204c   : > { %v8227_v47 = vsel %vm4518_vm7, %v8219_v45, %v13555_v8 }
0x204d   : > { %13652 = vrot.lane.b32.xlu0 %v13651_v32, %s19234_s24  ;;  %v8218_v32 = vsel %vm4509_vm6, %v8210_v54, %v13544_v50  ;;  %v8235_v52 = vsel %vm4527_vm8, %v8227_v47, %v13565_v42  ;;  %s18212_s24 = scalar_lea.vmem %s18899_s11, %s19273_s2 }
0x204e   : > { %v13578_v2 = vpop.permute.xlu1 %13577  ;;  %v8226_v62 = vsel %vm4518_vm7, %v8218_v32, %v13554_v5  ;;  %v8243_v22 = vsel %vm4536_vm9, %v8235_v52, %v13575_v25 }
0x204f   : > { %v13580_v48 = vunpack.i.h.bf16 %v13578_v2  ;;  %v13579_v14 = vunpack.i.l.bf16 %v13578_v2  ;;  %v8234_v60 = vsel %vm4527_vm8, %v8226_v62, %v13564_v15 }
0x2050   : > { %v8242_v30 = vsel %vm4536_vm9, %v8234_v60, %v13574_v26 }
0x2051   : > { %v8248_v56 = vsel %vm4545_vm10, %v8240_v20, %v13579_v14  ;;  %v8249_v49 = vsel %vm4545_vm10, %v8241_v29, %v13580_v48 }
0x2052   : > { %v13583_v6 = vpop.permute.xlu0 %13582 }
0x2053   : > { %v13585_v44 = vunpack.i.h.bf16 %v13583_v6  ;;  %v13584_v58 = vunpack.i.l.bf16 %v13583_v6 }
0x2055   : > { %v8251_v10 = vsel %vm4545_vm10, %v8243_v22, %v13585_v44  ;;  %v8250_v23 = vsel %vm4545_vm10, %v8242_v30, %v13584_v58 }
0x2083   : > { %v13588_v41 = vpop.permute.xlu1 %13587 }
0x2084   : > { %v13590_v63 = vunpack.i.h.bf16 %v13588_v41  ;;  %v13589_v55 = vunpack.i.l.bf16 %v13588_v41 }
0x2086   : > { %v8256_v1 = vsel %vm4554_vm11, %v8248_v56, %v13589_v55  ;;  %v8257_v12 = vsel %vm4554_vm11, %v8249_v49, %v13590_v63 }
0x2087   : > { %v8268_v13 = vpack.c.bf16 %v8257_v12, %v8256_v1  ;;  %v13593_v0 = vpop.permute.xlu1 %13592 }
0x2088   : > { %v13595_v51 = vunpack.i.h.bf16 %v13593_v0  ;;  %v13594_v21 = vunpack.i.l.bf16 %v13593_v0 }
0x2089   : > { %12493 = vmatprep.mubr.msk.bf16.mxu1 %vm19040_vm2, %v8268_v13 }
0x208a   : > { %v8220_v3 = vsel %vm4509_vm6, %v8212_v18, %v13594_v21  ;;  %v8221_v41 = vsel %vm4509_vm6, %v8213_v34, %v13595_v51  ;;  %v19238_v18 = vld [vmem:[#allocation24_spill] sm:$0xff] }
0x208b   : > { %v13598_v40 = vpop.permute.xlu0 %13597  ;;  %v13608_v28 = vpop.permute.xlu1 %13607 }
0x208c   : > { %v13600_v7 = vunpack.i.h.bf16 %v13598_v40  ;;  %v13599_v53 = vunpack.i.l.bf16 %v13598_v40  ;;  %v13610_v36 = vunpack.i.h.bf16 %v13608_v28  ;;  %v13609_v48 = vunpack.i.l.bf16 %v13608_v28 }
0x208e   : > { %v8259_v37 = vsel %vm4554_vm11, %v8251_v10, %v13600_v7  ;;  %v8258_v2 = vsel %vm4554_vm11, %v8250_v23, %v13599_v53  ;;  %v8228_v29 = vsel %vm4518_vm7, %v8220_v3, %v13609_v48  ;;  %v8229_v63 = vsel %vm4518_vm7, %v8221_v41, %v13610_v36  ;;  %v19240_v3 = vld [vmem:[#allocation29_spill] sm:$0xff] }
0x208f   : > { %v8269_v59 = vpack.c.bf16 %v8259_v37, %v8258_v2  ;;  %v13618_v61 = vpop.permute.xlu1 %13617  ;;  %v13603_v42 = vpop.permute.xlu0 %13602 }
0x2090   : > { %v13620_v14 = vunpack.i.h.bf16 %v13618_v61  ;;  %v13619_v39 = vunpack.i.l.bf16 %v13618_v61  ;;  %v13605_v24 = vunpack.i.h.bf16 %v13603_v42  ;;  %v13604_v54 = vunpack.i.l.bf16 %v13603_v42  ;;  %v19246_v42 = vld [vmem:[#allocation26_spill] sm:$0xff] }
0x2091   : > { %12494 = vmatmul.mubr.msk.bf16.vlgmr.msra.gmra.mrb[148].mxu1 %vm19040_vm2, %v8269_v59 }
0x2092   : > { %v8236_v55 = vsel %vm4527_vm8, %v8228_v29, %v13619_v39  ;;  %v8237_v27 = vsel %vm4527_vm8, %v8229_v63, %v13620_v14  ;;  %v8223_v62 = vsel %vm4509_vm6, %v17340_v46, %v13605_v24  ;;  %v8222_v52 = vsel %vm4509_vm6, %v17344_v38, %v13604_v54  ;;  %v19236_v39 = vld [vmem:[#allocation25_spill] sm:$0xff]  ;;  %v19242_v29 = vld [vmem:[#allocation28_spill] sm:$0xff] }
0x2093   : > { %v13628_v11 = vpop.permute.xlu1 %13627  ;;  %v13613_v15 = vpop.permute.xlu0 %13612  ;;  %v19250_v54 = vld [vmem:[#allocation32_spill] sm:$0xff] }
0x2094   : > { %v13630_v35 = vunpack.i.h.bf16 %v13628_v11  ;;  %v13629_v33 = vunpack.i.l.bf16 %v13628_v11  ;;  %v13615_v25 = vunpack.i.h.bf16 %v13613_v15  ;;  %v13614_v26 = vunpack.i.l.bf16 %v13613_v15 }
0x2096   : > { %v8244_v50 = vsel %vm4536_vm9, %v8236_v55, %v13629_v33  ;;  %v8245_v16 = vsel %vm4536_vm9, %v8237_v27, %v13630_v35  ;;  %v8230_v28 = vsel %vm4518_vm7, %v8222_v52, %v13614_v26  ;;  %v8231_v22 = vsel %vm4518_vm7, %v8223_v62, %v13615_v25 }
0x2097   : > { %v13638_v4 = vpop.permute.xlu1 %13637  ;;  %v13623_v13 = vpop.permute.xlu0 %13622 }
0x2098   : > { %v13640_v9 = vunpack.i.h.bf16 %v13638_v4  ;;  %v13639_v20 = vunpack.i.l.bf16 %v13638_v4  ;;  %v13625_v32 = vunpack.i.h.bf16 %v13623_v13  ;;  %v13624_v44 = vunpack.i.l.bf16 %v13623_v13  ;;  %v19248_v13 = vld [vmem:[#allocation33_spill] sm:$0xff] }
0x209a   : > { %v8252_v8 = vsel %vm4545_vm10, %v8244_v50, %v13639_v20  ;;  %v8253_v5 = vsel %vm4545_vm10, %v8245_v16, %v13640_v9  ;;  %v8238_v30 = vsel %vm4527_vm8, %v8230_v28, %v13624_v44  ;;  %v8239_v7 = vsel %vm4527_vm8, %v8231_v22, %v13625_v32 }
0x209b   : > { %v13648_v57 = vpop.permute.xlu1 %13647  ;;  %v13633_v0 = vpop.permute.xlu0 %13632 }
0x209c   : > { %v13650_v56 = vunpack.i.h.bf16 %v13648_v57  ;;  %v13649_v49 = vunpack.i.l.bf16 %v13648_v57  ;;  %v13635_v58 = vunpack.i.h.bf16 %v13633_v0  ;;  %v13634_v47 = vunpack.i.l.bf16 %v13633_v0 }
0x209e   : > { %v8260_v6 = vsel %vm4554_vm11, %v8252_v8, %v13649_v49  ;;  %v8261_v1 = vsel %vm4554_vm11, %v8253_v5, %v13650_v56  ;;  %v8246_v10 = vsel %vm4536_vm9, %v8238_v30, %v13634_v47  ;;  %v8247_v23 = vsel %vm4536_vm9, %v8239_v7, %v13635_v58  ;;  %v19244_v5 = vld [vmem:[#allocation27_spill] sm:$0xff] }
0x209f   : > { %v8270_v12 = vpack.c.bf16 %v8261_v1, %v8260_v6  ;;  %v13643_v45 = vpop.permute.xlu0 %13642  ;;  %v8285_v19 = vpop.permute.xlu1 %8284 }
0x20a0   : > { %v13645_v60 = vunpack.i.h.bf16 %v13643_v45  ;;  %v13644_v40 = vunpack.i.l.bf16 %v13643_v45 }
0x20a1   : > { %12497 = vmatprep.mubr.msk.bf16.mxu1 %vm19040_vm2, %v8270_v12 }
0x20a2   : > { %v8254_v2 = vsel %vm4545_vm10, %v8246_v10, %v13644_v40  ;;  %v8255_v38 = vsel %vm4545_vm10, %v8247_v23, %v13645_v60 }
0x20bf   : > { %v13653_v53 = vpop.permute.xlu0 %13652 }
0x20c0   : > { %v13655_v37 = vunpack.i.h.bf16 %v13653_v53  ;;  %v13654_v46 = vunpack.i.l.bf16 %v13653_v53 }
0x20c2   : > { %v8263_v59 = vsel %vm4554_vm11, %v8255_v38, %v13655_v37  ;;  %v8262_v61 = vsel %vm4554_vm11, %v8254_v2, %v13654_v46 }
0x20c3   : > { %v8271_v11 = vpack.c.bf16 %v8263_v59, %v8262_v61 }
0x20c5   : > { %12498 = vmatmul.mubr.msk.bf16.gmra.mrb[152].mxu1 %vm19040_vm2, %v8271_v11  ;;  %v8506_v11 = vld [vmem:[%s18892_s4 + $0x20] sm:$0xff] }
0x2164   : > { %v12495_v43 = vpop.f32.mrb[148].mxu1 }
0x2165   : > { %v8333_v51 = vpop.f32.mrb[149].mxu1  ;;  %v8342_v21 = vadd.f32 %v12495_v43, %v8285_v19 }
0x2166   : > { %v8334_v36 = vadd.f32 %v8333_v51, %v8285_v19  ;;  %v12496_v48 = vpop.f32.mrb[150].mxu1  ;;  %v8508_v51 = vld [vmem:[%s18892_s4 + $0x30] sm:$0xff] }
0x2167   : > { %v8336_v14 = vpop.f32.mrb[151].mxu1  ;;  %v17460_v35 = vadd.f32 %v8342_v21, %v19238_v18  ;;  %v8345_v33 = vadd.f32 %v12496_v48, %v8285_v19  ;;  %v8509_v21 = vld [vmem:[%s18892_s4 + $0x38] sm:$0xff]  ;;  %v8510_v48 = vld [vmem:[%s18892_s4 + $0x40] sm:$0xff] }
0x2168   : > { %v17457_v4 = vadd.f32 %v8334_v36, %v19236_v39  ;;  %v8337_v34 = vadd.f32 %v8336_v14, %v8285_v19  ;;  %v12941_v36 = vpack.c.bf16 %v8509_v21, %v8508_v51  ;;  %v8511_v14 = vld [vmem:[%s18892_s4 + $0x48] sm:$0xff]  ;;  %v13670_v18 = vld [vmem:[%s18897_s9 + $0x4] ss:$16 sps:$4 sm:$0xff]  }
0x2169   : > { %19239 = vst [vmem:[#allocation22_spill] sm:$0xff] %v17460_v35  ;;  %v17470_v63 = vadd.f32 %v8345_v33, %v19242_v29  ;;  %v8378_v55 = vsel %vm19040_vm2, %v17460_v35, 0.0  ;;  %v12944_v39 = vpack.c.bf16 %v8511_v14, %v8510_v48  ;;  %v8512_v33 = vld [vmem:[%s18892_s4 + $0x50] sm:$0xff]  ;;  %9021 = vmatprep.subr.bf16.mxu1 %v13670_v18 }
0x216a   : > { %19237 = vst [vmem:[#allocation30_spill] sm:$0xff] %v17457_v4  ;;  %v17463_v41 = vadd.f32 %v8337_v34, %v19240_v3  ;;  %v8372_v9 = vsel %vm19040_vm2, %v17457_v4, 0.0  ;;  %v13668_v34 = vld [vmem:[%s18897_s9] ss:$16 sps:$4 sm:$0xff]   ;;  %v8513_v3 = vld [vmem:[%s18892_s4 + $0x58] sm:$0xff] }
0x216b   : > { %8373 = vadd.xlane.f32.xlu0 %v8372_v9  ;;  %19243 = vst [vmem:[#allocation23_spill] sm:$0xff] %v17470_v63  ;;  %v8381_v27 = vsel %vm19040_vm2, %v17470_v63, 0.0  ;;  %v8502_v9 = vld [vmem:[%s18892_s4] sm:$0xff]  ;;  %9022 = vmatpush1.bf16.msra.mxu1 %v13668_v34  ;;  %v12947_v29 = vpack.c.bf16 %v8513_v3, %v8512_v33  ;;  %v17610_v33 = vld [vmem:[%s18891_s3 + $0x4b] ss:$0 sm:$0xff] }
0x216c   : > { %19241 = vst [vmem:[#allocation10_spill] sm:$0xff] %v17463_v41  ;;  %v8375_v20 = vsel %vm19040_vm2, %v17463_v41, 0.0 }
0x216d   : > { %8376 = vadd.xlane.f32.xlu1 %v8375_v20  ;;  %v8503_v20 = vld [vmem:[%s18892_s4 + $0x8] sm:$0xff] }
0x216f   : > { %8379 = vadd.xlane.f32.xlu0 %v8378_v55  ;;  %v13671_v55 = vld [vmem:[%s18897_s9 + $0x20] ss:$16 sps:$4 sm:$0xff]  }
0x2173   : > { %8382 = vadd.xlane.f32.xlu0 %v8381_v27  ;;  %v13673_v27 = vld [vmem:[%s18897_s9 + $0x24] ss:$16 sps:$4 sm:$0xff]  }
0x2174   : > { %9023 = vmatprep.subr.bf16.mxu1 %v13673_v27 }
0x2175   : > { %9024 = vmatpush1.bf16.msra.mxu1 %v13671_v55 }
0x2198   : > { %v12499_v57 = vpop.f32.mrb[152].mxu1 }
0x2199   : > { %v8349_v50 = vpop.f32.mrb[153].mxu1  ;;  %v8358_v16 = vadd.f32 %v12499_v57, %v8285_v19  ;;  %v12949_v57 = vpack.c.bf16 %v8503_v20, %v8502_v9 }
0x219a   : > { %v8350_v56 = vadd.f32 %v8349_v50, %v8285_v19  ;;  %v12500_v49 = vpop.f32.mrb[154].mxu1  ;;  %v14454_v50 = vmov 0  }
0x219b   : > { %v8352_v8 = vpop.f32.mrb[155].mxu1  ;;  %v8361_v1 = vadd.f32 %v12500_v49, %v8285_v19  ;;  %v17480_v15 = vadd.f32 %v8358_v16, %v19246_v42  ;;  %9053 = vmatprep.mubr.bf16.mxu1 %v14454_v50  ;;  %v8504_v16 = vld [vmem:[%s18892_s4 + $0x10] sm:$0xff] }
0x219c   : > { %v17477_v6 = vadd.f32 %v8350_v56, %v19244_v5  ;;  %v8353_v12 = vadd.f32 %v8352_v8, %v8285_v19  ;;  %v8507_v19 = vld [vmem:[%s18892_s4 + $0x28] sm:$0xff]  ;;  %v8505_v56 = vld [vmem:[%s18892_s4 + $0x18] sm:$0xff]  ;;  %v14354_v5 = vld [vmem:[%s14602_s25] sm:$0x1] }
0x219d   : > { %19247 = vst [vmem:[#allocation9_spill] sm:$0xff] %v17480_v15  ;;  %v17488_v25 = vadd.f32 %v8361_v1, %v19250_v54  ;;  %v8390_v45 = vsel %vm19040_vm2, %v17480_v15, 0.0  ;;  %v12938_v43 = vpack.c.bf16 %v8507_v19, %v8506_v11  ;;  %v12953_v49 = vpack.c.bf16 %v8505_v56, %v8504_v16  ;;  %v13679_v56 = vld [vmem:[%s18897_s9 + $0x2c] ss:$16 sps:$4 sm:$0xff]  }
0x219e   : > { %19245 = vst [vmem:[#allocation31_spill] sm:$0xff] %v17477_v6  ;;  %v17483_v0 = vadd.f32 %v8353_v12, %v19248_v13  ;;  %v8384_v24 = vsel %vm19040_vm2, %v17477_v6, 0.0 }
0x219f   : > { %8385 = vadd.xlane.f32.xlu1 %v8384_v24  ;;  %19251 = vst [vmem:[#allocation15_spill] sm:$0xff] %v17488_v25  ;;  %v8393_v32 = vsel %vm19040_vm2, %v17488_v25, 0.0  ;;  %12939 = vmatpush3.bf16.msra.mxu0 %v12938_v43 }
0x21a0   : > { %19249 = vst [vmem:[#allocation8_spill] sm:$0xff] %v17483_v0  ;;  %v8387_v26 = vsel %vm19040_vm2, %v17483_v0, 0.0  ;;  %12940 = vmatprep.subr.bf16.mxu0 %v19226_v31 }
0x21a1   : > { %8388 = vadd.xlane.f32.xlu0 %v8387_v26 }
0x21a3   : > { %8391 = vadd.xlane.f32.xlu1 %v8390_v45  ;;  %12942 = vmatpush3.bf16.msra.mxu0 %v12941_v36 }
0x21a4   : > { %12943 = vmatprep.subr.bf16.mxu0 %v19226_v31 }
0x21a5   : > { %8394 = vadd.xlane.f32.xlu0 %v8393_v32 }
0x21a7   : > { %12945 = vmatpush3.bf16.msra.mxu0 %v12944_v39  ;;  %v17604_v39 = vld [vmem:[%s18891_s3 + $0x48] ss:$0 sm:$0xff] }
0x21a8   : > { %12946 = vmatprep.subr.bf16.mxu0 %v19226_v31 }
0x21ab   : > { %12948 = vmatpush3.bf16.msra.mxu0 %v12947_v29 }
0x21ac   : > { %12950 = vmatprep.subr.bf16.mxu0 %v12949_v57 }
0x21ae   : > { %12518 = vmatmul.mubr.msk.f32.vlgmr.msra.gmra.mrb[150].mxu0 %vm19041_vm1, %v14354_v5  ;;  %v13677_v5 = vld [vmem:[%s18897_s9 + $0x28] ss:$16 sps:$4 sm:$0xff]  }
0x21af   : > { %12952 = vmatpush3.bf16.msra.mxu0 %v12949_v57 }
0x21b0   : > { %12954 = vmatprep.subr.bf16.mxu0 %v12953_v49 }
0x21b3   : > { %12956 = vmatpush3.bf16.msra.mxu0 %v12953_v49 }
0x21f8   : > { %v8374_v44 = vpop.xlane.xlu0 %8373 }
0x21f9   : > { %v8396_v58 = vmul.f32 0.03125, %v8374_v44 }
0x21fa   : > { %v8377_v47 = vpop.xlane.xlu1 %8376 }
0x21fb   : > { %v17497_v62 = vsub.f32 %v17457_v4, %v8396_v58  ;;  %v8397_v52 = vmul.f32 0.03125, %v8377_v47 }
0x21fc   : > { %v8380_v60 = vpop.xlane.xlu0 %8379 }
0x21fd   : > { %v17500_v40 = vsub.f32 %v17463_v41, %v8397_v52  ;;  %v8398_v28 = vmul.f32 0.03125, %v8380_v60  ;;  %v8412_v22 = vmul.f32 %v17497_v62, %v17497_v62 }
0x21ff   : > { %v17505_v30 = vsub.f32 %v17460_v35, %v8398_v28  ;;  %v8420_v7 = vsel %vm19040_vm2, %v8412_v22, 0.0  ;;  %v8413_v53 = vmul.f32 %v17500_v40, %v17500_v40 }
0x2200   : > { %v8383_v10 = vpop.xlane.xlu0 %8382  ;;  %8421 = vadd.xlane.f32.xlu1 %v8420_v7 }
0x2201   : > { %v8399_v23 = vmul.f32 0.03125, %v8383_v10  ;;  %v8423_v37 = vsel %vm19040_vm2, %v8413_v53, 0.0  ;;  %v8414_v46 = vmul.f32 %v17505_v30, %v17505_v30 }
0x2202   : > { %8424 = vadd.xlane.f32.xlu0 %v8423_v37 }
0x2203   : > { %v17514_v2 = vsub.f32 %v17470_v63, %v8399_v23  ;;  %v8426_v38 = vsel %vm19040_vm2, %v8414_v46, 0.0  ;;  %v13676_v23 = vld [vmem:[%s18897_s9 + $0xc] ss:$16 sps:$4 sm:$0xff]  }
0x2204   : > { %8427 = vadd.xlane.f32.xlu1 %v8426_v38  ;;  %9094 = vmatprep.subr.bf16.mxu0 %v13676_v23 }
0x2205   : > { %v8415_v59 = vmul.f32 %v17514_v2, %v17514_v2 }
0x2207   : > { %v8429_v61 = vsel %vm19040_vm2, %v8415_v59, 0.0 }
0x2208   : > { %8430 = vadd.xlane.f32.xlu0 %v8429_v61 }
0x222c   : > { %v8386_v8 = vpop.xlane.xlu1 %8385 }
0x222d   : > { %v8400_v1 = vmul.f32 0.03125, %v8386_v8 }
0x222e   : > { %v8389_v12 = vpop.xlane.xlu0 %8388 }
0x222f   : > { %v17575_v42 = vsub.f32 %v17477_v6, %v8400_v1  ;;  %v8401_v13 = vmul.f32 0.03125, %v8389_v12 }
0x2230   : > { %v8392_v24 = vpop.xlane.xlu1 %8391 }
0x2231   : > { %v17578_v54 = vsub.f32 %v17483_v0, %v8401_v13  ;;  %v8402_v26 = vmul.f32 0.03125, %v8392_v24  ;;  %v8416_v45 = vmul.f32 %v17575_v42, %v17575_v42 }
0x2232   : > { %v8395_v32 = vpop.xlane.xlu0 %8394 }
0x2233   : > { %v17583_v44 = vsub.f32 %v17480_v15, %v8402_v26  ;;  %v8403_v58 = vmul.f32 0.03125, %v8395_v32  ;;  %v8432_v47 = vsel %vm19040_vm2, %v8416_v45, 0.0  ;;  %v8417_v52 = vmul.f32 %v17578_v54, %v17578_v54 }
0x2234   : > { %8433 = vadd.xlane.f32.xlu1 %v8432_v47 }
0x2235   : > { %v17589_v60 = vsub.f32 %v17488_v25, %v8403_v58  ;;  %v8435_v28 = vsel %vm19040_vm2, %v8417_v52, 0.0  ;;  %v8418_v22 = vmul.f32 %v17583_v44, %v17583_v44 }
0x2236   : > { %8436 = vadd.xlane.f32.xlu0 %v8435_v28 }
0x2237   : > { %v8438_v7 = vsel %vm19040_vm2, %v8418_v22, 0.0  ;;  %v8419_v53 = vmul.f32 %v17589_v60, %v17589_v60 }
0x2238   : > { %8439 = vadd.xlane.f32.xlu1 %v8438_v7 }
0x2239   : > { %v8441_v10 = vsel %vm19040_vm2, %v8419_v53, 0.0 }
0x223a   : > { %8442 = vadd.xlane.f32.xlu0 %v8441_v10 }
0x228d   : > { %v8422_v37 = vpop.xlane.xlu1 %8421 }
0x228e   : > { %v8444_v46 = vmul.f32 0.03125, %v8422_v37 }
0x228f   : > { %v8425_v38 = vpop.xlane.xlu0 %8424 }
0x2290   : > { %v8452_v59 = vadd.f32 1e-05, %v8444_v46  ;;  %v8445_v61 = vmul.f32 0.03125, %v8425_v38 }
0x2291   : > { %v8428_v11 = vpop.xlane.xlu1 %8427 }
0x2292   : > { %14264 = vrsqrt.f32 %v8452_v59  ;;  %v8453_v19 = vadd.f32 1e-05, %v8445_v61  ;;  %v8446_v43 = vmul.f32 0.03125, %v8428_v11 }
0x2294   : > { %14266 = vrsqrt.f32 %v8453_v19  ;;  %v8454_v51 = vadd.f32 1e-05, %v8446_v43 }
0x2295   : > { %v8431_v21 = vpop.xlane.xlu0 %8430 }
0x2296   : > { %14268 = vrsqrt.f32 %v8454_v51  ;;  %v8447_v36 = vmul.f32 0.03125, %v8431_v21 }
0x2298   : > { %v8455_v48 = vadd.f32 1e-05, %v8447_v36 }
0x229a   : > { %14270 = vrsqrt.f32 %v8455_v48 }
0x229c   : > { %v14265_v14 = vpop.eup %14264 }
0x229d   : > { %v8468_v34 = vmul.f32 %v14265_v14, %v17497_v62  ;;  %v13674_v62 = vld [vmem:[%s18897_s9 + $0x8] ss:$16 sps:$4 sm:$0xff]   ;;  %v8580_v14 = vpop.f32.mrb[150].mxu0 }
0x229e   : > { %v14267_v18 = vpop.eup %14266 }
0x229f   : > { %v8469_v3 = vmul.f32 %v14267_v18, %v17500_v40  ;;  %v8481_v9 = vmul.f32 %v17604_v39, %v8468_v34  ;;  %v19252_v34 = vld [vmem:[#allocation5_spill] sm:$0xff] }
0x22a0   : > { %v14269_v20 = vpop.eup %14268  ;;  %v8955_v18 = vsub.s32 1, %v19252_v34 }
0x22a1   : > { %v8482_v29 = vmul.f32 %v17604_v39, %v8469_v3  ;;  %v8494_v55 = vadd.f32 %v17610_v33, %v8481_v9  ;;  %v8470_v27 = vmul.f32 %v14269_v20, %v17505_v30  ;;  %v19253_v3 = vld [vmem:[#allocation6_spill] sm:$0xff] }
0x22a2   : > { %v8587_v9 = vrot.slane %v8580_v14, %v19253_v3 }
0x22a3   : > { %v8495_v57 = vadd.f32 %v17610_v33, %v8482_v29  ;;  %12528 = vmatprep.mubr.msk.f32.mxu0 %vm19040_vm2, %v8494_v55  ;;  %v8483_v16 = vmul.f32 %v17604_v39, %v8470_v27 }
0x22a4   : > { %v14271_v40 = vpop.eup %14270 }
0x22a5   : > { %v8935_v49 = vpack.c.bf16 %v8495_v57, %v8494_v55  ;;  %12529 = vmatmul.mubr.msk.f32.vlgmr.msra.gmra.mrb[152].mxu0 %vm19040_vm2, %v8495_v57  ;;  %v8496_v30 = vadd.f32 %v17610_v33, %v8483_v16  ;;  %v8471_v8 = vmul.f32 %v14271_v40, %v17514_v2 }
0x22a6   : > { %9095 = vmatpush1.bf16.msra.mxu0 %v13674_v62 }
0x22a7   : > { %12531 = vmatprep.mubr.msk.f32.mxu0 %vm19040_vm2, %v8496_v30  ;;  %11036 = vmatmul.mubr.msk.bf16.vlgmr.msra.gmra.mrb[156].mxu1 %vm19040_vm2, %v8935_v49  ;;  %v8484_v1 = vmul.f32 %v17604_v39, %v8471_v8 }
0x22a8   : > { %9063 = vmatprep.mubr.bf16.mxu1 %v14454_v50  ;;  %9096 = vmatprep.subr.bf16.mxu0 %v13679_v56 }
0x22a9   : > { %v8497_v12 = vadd.f32 %v17610_v33, %v8484_v1 }
0x22aa   : > { %9097 = vmatpush1.bf16.msra.mxu0 %v13677_v5 }
0x22ab   : > { %12532 = vmatmul.mubr.msk.f32.gmra.mrb[154].mxu0 %vm19040_vm2, %v8497_v12  ;;  %v8936_v2 = vpack.c.bf16 %v8497_v12, %v8496_v30 }
0x22af   : > { %11037 = vmatmul.mubr.msk.bf16.gmra.mrb[160].mxu1 %vm19040_vm2, %v8936_v2 }
0x22b0   : > { %9073 = vmatprep.mubr.bf16.mxu1 %v14454_v50 }
0x22c1   : > { %v8434_v13 = vpop.xlane.xlu1 %8433 }
0x22c2   : > { %v8448_v24 = vmul.f32 0.03125, %v8434_v13 }
0x22c3   : > { %v8437_v26 = vpop.xlane.xlu0 %8436 }
0x22c4   : > { %v8456_v45 = vadd.f32 1e-05, %v8448_v24  ;;  %v8449_v32 = vmul.f32 0.03125, %v8437_v26 }
0x22c5   : > { %v8440_v58 = vpop.xlane.xlu1 %8439 }
0x22c6   : > { %14272 = vrsqrt.f32 %v8456_v45  ;;  %v8457_v47 = vadd.f32 1e-05, %v8449_v32  ;;  %v8450_v52 = vmul.f32 0.03125, %v8440_v58 }
0x22c7   : > { %v8443_v28 = vpop.xlane.xlu0 %8442 }
0x22c8   : > { %14274 = vrsqrt.f32 %v8457_v47  ;;  %v8458_v22 = vadd.f32 1e-05, %v8450_v52  ;;  %v8451_v7 = vmul.f32 0.03125, %v8443_v28 }
0x22ca   : > { %14276 = vrsqrt.f32 %v8458_v22  ;;  %v8459_v53 = vadd.f32 1e-05, %v8451_v7 }
0x22cc   : > { %14278 = vrsqrt.f32 %v8459_v53 }
0x22d0   : > { %v14273_v10 = vpop.eup %14272 }
0x22d1   : > { %v8472_v23 = vmul.f32 %v14273_v10, %v17575_v42 }
0x22d2   : > { %v14275_v37 = vpop.eup %14274 }
0x22d3   : > { %v8485_v46 = vmul.f32 %v17604_v39, %v8472_v23  ;;  %v8473_v38 = vmul.f32 %v14275_v37, %v17578_v54 }
0x22d4   : > { %v14277_v59 = vpop.eup %14276 }
0x22d5   : > { %v8498_v61 = vadd.f32 %v17610_v33, %v8485_v46  ;;  %v8486_v11 = vmul.f32 %v17604_v39, %v8473_v38  ;;  %v8474_v19 = vmul.f32 %v14277_v59, %v17583_v44  ;;  %v8959_v59 = vsub.s32 2, %v19252_v34 }
0x22d6   : > { %v14279_v43 = vpop.eup %14278 }
0x22d7   : > { %12534 = vmatprep.mubr.msk.f32.mxu0 %vm19040_vm2, %v8498_v61  ;;  %v8499_v51 = vadd.f32 %v17610_v33, %v8486_v11  ;;  %v8487_v21 = vmul.f32 %v17604_v39, %v8474_v19  ;;  %v8475_v42 = vmul.f32 %v14279_v43, %v17589_v60  ;;  %v8963_v19 = vsub.s32 3, %v19252_v34 }
0x22d9   : > { %12535 = vmatmul.mubr.msk.f32.gmra.mrb[156].mxu0 %vm19040_vm2, %v8499_v51  ;;  %v8500_v54 = vadd.f32 %v17610_v33, %v8487_v21  ;;  %v8937_v36 = vpack.c.bf16 %v8499_v51, %v8498_v61  ;;  %v8488_v48 = vmul.f32 %v17604_v39, %v8475_v42  ;;  %v12519_v39 = vpop.f32.mrb[151].mxu0 }
0x22db   : > { %12537 = vmatprep.mubr.msk.f32.mxu0 %vm19040_vm2, %v8500_v54  ;;  %11038 = vmatmul.mubr.msk.bf16.gmra.mrb[164].mxu1 %vm19040_vm2, %v8937_v36  ;;  %v8501_v44 = vadd.f32 %v17610_v33, %v8488_v48  ;;  %v17671_v33 = vld [vmem:[%s18894_s6] sm:$0xf] }
0x22dc   : > { %9083 = vmatprep.mubr.bf16.mxu1 %v14454_v50  ;;  %v17675_v20 = vrot.slane %v17671_v33, %v8955_v18 }
0x22dd   : > { %12538 = vmatmul.mubr.msk.f32.gmra.mrb[158].mxu0 %vm19040_vm2, %v8501_v44  ;;  %v8938_v60 = vpack.c.bf16 %v8501_v44, %v8500_v54 }
0x22de   : > { %9126 = vmatprep.mubr.bf16.mxu0 %v14454_v50 }
0x22e1   : > { %11040 = vmatmul.mubr.msk.bf16.vlgmr.msra.gmra.mrb[160].mxu0 %vm19040_vm2, %v8935_v49 }
0x22e2   : > { %9136 = vmatprep.mubr.bf16.mxu0 %v14454_v50 }
0x22e3   : > { %11039 = vmatmul.mubr.msk.bf16.gmra.mrb[168].mxu1 %vm19040_vm2, %v8938_v60 }
0x22e9   : > { %11041 = vmatmul.mubr.msk.bf16.gmra.mrb[164].mxu0 %vm19040_vm2, %v8936_v2 }
0x22ea   : > { %9146 = vmatprep.mubr.bf16.mxu0 %v14454_v50 }
0x22f1   : > { %11042 = vmatmul.mubr.msk.bf16.gmra.mrb[168].mxu0 %vm19040_vm2, %v8937_v36 }
0x22f2   : > { %9156 = vmatprep.mubr.bf16.mxu0 %v14454_v50 }
0x22f9   : > { %11043 = vmatmul.mubr.msk.bf16.gmra.mrb[172].mxu0 %vm19040_vm2, %v8938_v60  ;;  %v8960_v60 = vrot.slane %v17671_v33, %v8959_v59 }
0x2378   : > { %v12530_v29 = vpop.f32.mrb[152].mxu0 }
0x2379   : > { %v8684_v55 = vadd.f32 %v12530_v29, %v8587_v9  ;;  %v8678_v27 = vpop.f32.mrb[153].mxu0  ;;  %v8964_v29 = vrot.slane %v17671_v33, %v8963_v19 }
0x237a   : > { %v8679_v50 = vadd.f32 %v8678_v27, %v8587_v9  ;;  %v17677_v62 = vpop.f32.mrb[156].mxu1 }
0x237b   : > { %v17679_v57 = vmul.f32 0.25, %v8684_v55  ;;  %v9057_v16 = vpop.f32.mrb[157].mxu1 }
0x237c   : > { %v17681_v40 = vmul.f32 0.25, %v8679_v50  ;;  %v17684_v56 = vadd.f32 %v9057_v16, %v17675_v20  ;;  %v17686_v49 = vpop.f32.mrb[158].mxu1 }
0x237d   : > { %v11013_v30 = vclamps-f32 %v17679_v57, 20.0  ;;  %v9061_v8 = vpop.f32.mrb[159].mxu1 }
0x237e   : > { %v11012_v5 = vclamps-f32 %v17681_v40, 20.0  ;;  %v17691_v1 = vadd.f32 %v9061_v8, %v17675_v20  ;;  %v12533_v12 = vpop.f32.mrb[154].mxu0 }
0x237f   : > { %v8694_v2 = vadd.f32 %v12533_v12, %v8587_v9  ;;  %v8688_v13 = vpop.f32.mrb[155].mxu0  ;;  %v8746_v26 = vsel %vm964_vm4, %v11013_v30, -inf }
0x2380   : > { %v8689_v24 = vadd.f32 %v8688_v13, %v8587_v9  ;;  %8747 = vmax.xlane.f32.xlu0 %v8746_v26  ;;  %v8743_v32 = vsel %vm964_vm4, %v11012_v5, -inf }
0x2381   : > { %v17696_v45 = vmul.f32 0.25, %v8694_v2  ;;  %8744 = vmax.xlane.f32.xlu1 %v8743_v32 }
0x2382   : > { %v17701_v58 = vmul.f32 0.25, %v8689_v24  ;;  %v17703_v47 = vpop.f32.mrb[160].mxu1 }
0x2383   : > { %v19018_v52 = vclamps-f32 %v17696_v45, 20.0  ;;  %v9067_v28 = vpop.f32.mrb[161].mxu1 }
0x2384   : > { %v19017_v22 = vclamps-f32 %v17701_v58, 20.0  ;;  %v17708_v7 = vadd.f32 %v9067_v28, %v17675_v20  ;;  %v17710_v53 = vpop.f32.mrb[162].mxu1 }
0x2385   : > { %v9071_v10 = vpop.f32.mrb[163].mxu1  ;;  %v8752_v37 = vsel %vm964_vm4, %v19018_v52, -inf }
0x2386   : > { %v17713_v23 = vadd.f32 %v9071_v10, %v17675_v20  ;;  %8753 = vmax.xlane.f32.xlu0 %v8752_v37  ;;  %v8749_v46 = vsel %vm964_vm4, %v19017_v22, -inf }
0x2387   : > { %8750 = vmax.xlane.f32.xlu1 %v8749_v46 }
0x23ac   : > { %v12536_v38 = vpop.f32.mrb[156].mxu0 }
0x23ad   : > { %v8704_v61 = vadd.f32 %v12536_v38, %v8587_v9  ;;  %v8698_v11 = vpop.f32.mrb[157].mxu0 }
0x23ae   : > { %v8699_v43 = vadd.f32 %v8698_v11, %v8587_v9  ;;  %v17723_v51 = vpop.f32.mrb[164].mxu1 }
0x23af   : > { %v17725_v21 = vmul.f32 0.25, %v8704_v61  ;;  %v9077_v42 = vpop.f32.mrb[165].mxu1 }
0x23b0   : > { %v17727_v54 = vmul.f32 0.25, %v8699_v43  ;;  %v17730_v36 = vadd.f32 %v9077_v42, %v17675_v20  ;;  %v12539_v48 = vpop.f32.mrb[158].mxu0  ;;  %v17732_v44 = vpop.f32.mrb[166].mxu1 }
0x23b1   : > { %v19016_v14 = vclamps-f32 %v17725_v21, 20.0  ;;  %v8714_v39 = vadd.f32 %v12539_v48, %v8587_v9  ;;  %v8708_v34 = vpop.f32.mrb[159].mxu0  ;;  %v9081_v18 = vpop.f32.mrb[167].mxu1 }
0x23b2   : > { %v19014_v55 = vclamps-f32 %v17727_v54, 20.0  ;;  %v8709_v27 = vadd.f32 %v8708_v34, %v8587_v9  ;;  %v17739_v50 = vadd.f32 %v9081_v18, %v17675_v20 }
0x23b3   : > { %v8758_v16 = vsel %vm964_vm4, %v19016_v14, -inf  ;;  %v17747_v2 = vmul.f32 0.25, %v8714_v39 }
0x23b4   : > { %8759 = vmax.xlane.f32.xlu0 %v8758_v16  ;;  %v9128_v8 = vpop.f32.mrb[160].mxu0  ;;  %v8755_v12 = vsel %vm964_vm4, %v19014_v55, -inf  ;;  %v17755_v37 = vmul.f32 0.25, %v8709_v27 }
0x23b5   : > { %v17749_v13 = vadd.f32 %v9128_v8, %v8960_v60  ;;  %8756 = vmax.xlane.f32.xlu1 %v8755_v12  ;;  %v9130_v24 = vpop.f32.mrb[161].mxu0  ;;  %v19013_v38 = vclamps-f32 %v17747_v2, 20.0 }
0x23b6   : > { %v17751_v9 = vadd.f32 %v9130_v24, %v8964_v29  ;;  %v17753_v26 = vpop.f32.mrb[168].mxu1  ;;  %v9132_v32 = vpop.f32.mrb[162].mxu0  ;;  %v19015_v43 = vclamps-f32 %v17755_v37, 20.0 }
0x23b7   : > { %v9087_v28 = vpop.f32.mrb[169].mxu1  ;;  %v9134_v10 = vpop.f32.mrb[163].mxu0  ;;  %v17760_v59 = vadd.f32 %v9132_v32, %v8960_v60  ;;  %v8764_v48 = vsel %vm964_vm4, %v19013_v38, -inf }
0x23b8   : > { %v17757_v46 = vpop.f32.mrb[170].mxu1  ;;  %v17763_v61 = vadd.f32 %v9087_v28, %v17675_v20  ;;  %v17765_v19 = vadd.f32 %v9134_v10, %v8964_v29  ;;  %8765 = vmax.xlane.f32.xlu0 %v8764_v48  ;;  %v8761_v16 = vsel %vm964_vm4, %v19015_v43, -inf }
0x23b9   : > { %v9091_v11 = vpop.f32.mrb[171].mxu1  ;;  %8762 = vmax.xlane.f32.xlu1 %v8761_v16 }
0x23ba   : > { %19254 = vst [vmem:[#allocation36_spill] sm:$0xff] %v17763_v61  ;;  %v17772_v18 = vadd.f32 %v9091_v11, %v17675_v20 }
0x23bc   : > { %v9138_v42 = vpop.f32.mrb[164].mxu0 }
0x23bd   : > { %v9140_v39 = vpop.f32.mrb[165].mxu0  ;;  %v17777_v8 = vadd.f32 %v9138_v42, %v8960_v60 }
0x23be   : > { %v9142_v34 = vpop.f32.mrb[166].mxu0  ;;  %v17779_v12 = vadd.f32 %v9140_v39, %v8964_v29 }
0x23bf   : > { %v9144_v27 = vpop.f32.mrb[167].mxu0  ;;  %v17781_v24 = vadd.f32 %v9142_v34, %v8960_v60 }
0x23c0   : > { %v17783_v32 = vadd.f32 %v9144_v27, %v8964_v29 }
0x23c4   : > { %v9148_v28 = vpop.f32.mrb[168].mxu0 }
0x23c5   : > { %v9150_v10 = vpop.f32.mrb[169].mxu0  ;;  %v17785_v48 = vadd.f32 %v9148_v28, %v8960_v60 }
0x23c6   : > { %v17787_v20 = vadd.f32 %v9150_v10, %v8964_v29  ;;  %v9152_v11 = vpop.f32.mrb[170].mxu0  ;;  %v19259_v10 = vlaneseq }
0x23c7   : > { %19255 = vst [vmem:[#allocation11_spill] sm:$0xff] %v17785_v48  ;;  %v17789_v38 = vadd.f32 %v9152_v11, %v8960_v60  ;;  %v9154_v55 = vpop.f32.mrb[171].mxu0 }
0x23c8   : > { %19256 = vst [vmem:[#allocation17_spill] sm:$0xff] %v17787_v20  ;;  %v17791_v43 = vadd.f32 %v9154_v55, %v8964_v29  ;;  %v17802_v52 = vand.u32 127, %v19259_v10  ;;  %v19260_v10 = vclamps-f32 %v17696_v45, 20.0 }
0x23c9   : > { %19257 = vst [vmem:[#allocation12_spill] sm:$0xff] %v17789_v38 }
0x23ca   : > { %19258 = vst [vmem:[#allocation34_spill] sm:$0xff] %v17791_v43 }
0x23cc   : > { %v9158_v42 = vpop.f32.mrb[172].mxu0 }
0x23cd   : > { %v17793_v16 = vadd.f32 %v9158_v42, %v8960_v60  ;;  %v9160_v39 = vpop.f32.mrb[173].mxu0 }
0x23ce   : > { %v17795_v34 = vadd.f32 %v9160_v39, %v8964_v29  ;;  %v9162_v27 = vpop.f32.mrb[174].mxu0 }
0x23cf   : > { %v17797_v14 = vadd.f32 %v9162_v27, %v8960_v60  ;;  %v9164_v22 = vpop.f32.mrb[175].mxu0 }
0x23d0   : > { %v17799_v28 = vadd.f32 %v9164_v22, %v8964_v29 }
0x240d   : > { %v8748_v11 = vpop.xlane.xlu0 %8747 }
0x240e   : > { %vm8768_vm12 = vcmp.ge.f32.partialorder %v11013_v30, %v8748_v11  ;;  %v8745_v55 = vpop.xlane.xlu1 %8744 }
0x240f   : > { %v8776_v42 = vsel %vm8768_vm12, %v17802_v52, 4  ;;  %vm8767_vm13 = vcmp.ge.f32.partialorder %v11012_v5, %v8745_v55 }
0x2410   : > { %v17810_v39 = vsel %vm964_vm4, %v8776_v42, 2147483647  ;;  %v8775_v60 = vsel %vm8767_vm13, %v17802_v52, 4  ;;  %v19261_v42 = vclamps-f32 %v17701_v58, 20.0  ;;  %vm9771_vm13 = vcmask 1043456  }
0x2411   : > { %v8800_v22 = vshra.s32 %v17810_v39, 16  ;;  %v17815_v29 = vsel %vm964_vm4, %v8775_v60, 2147483647 }
0x2412   : > { %v8785_v27 = vshra.s32 %v17815_v29, 16 }
0x2413   : > { %v8754_v57 = vpop.xlane.xlu0 %8753  ;;  %v17818_v30 = vcvt.s32.f32 %v8800_v22 }
0x2414   : > { %vm8770_vm14 = vcmp.ge.f32.partialorder %v19260_v10, %v8754_v57  ;;  %v17822_v40 = vcvt.s32.f32 %v8785_v27  ;;  %v8751_v11 = vpop.xlane.xlu1 %8750 }
0x2415   : > { %v8778_v5 = vsel %vm8770_vm14, %v17802_v52, 4  ;;  %8803 = vmin.xlane.f32.xlu0 %v17818_v30  ;;  %vm8769_vm15 = vcmp.ge.f32.partialorder %v19261_v42, %v8751_v11 }
0x2416   : > { %v17827_v55 = vsel %vm964_vm4, %v8778_v5, 2147483647  ;;  %8788 = vmin.xlane.f32.xlu1 %v17822_v40  ;;  %v8777_v45 = vsel %vm8769_vm15, %v17802_v52, 4  ;;  %v19262_v5 = vclamps-f32 %v17725_v21, 20.0 }
0x2417   : > { %v8830_v60 = vshra.s32 %v17827_v55, 16  ;;  %v17835_v22 = vsel %vm964_vm4, %v8777_v45, 2147483647  ;;  %v19263_v45 = vclamps-f32 %v17727_v54, 20.0 }
0x2418   : > { %v8815_v27 = vshra.s32 %v17835_v22, 16 }
0x2419   : > { %v17838_v57 = vcvt.s32.f32 %v8830_v60 }
0x241a   : > { %v17841_v10 = vcvt.s32.f32 %v8815_v27 }
0x241b   : > { %8833 = vmin.xlane.f32.xlu0 %v17838_v57 }
0x241c   : > { %8818 = vmin.xlane.f32.xlu1 %v17841_v10 }
0x2441   : > { %v8760_v58 = vpop.xlane.xlu0 %8759 }
0x2442   : > { %vm8772_vm5 = vcmp.ge.f32.partialorder %v19262_v5, %v8760_v58  ;;  %v8757_v11 = vpop.xlane.xlu1 %8756  ;;  %v19264_v5 = vclamps-f32 %v17747_v2, 20.0 }
0x2443   : > { %v8780_v42 = vsel %vm8772_vm5, %v17802_v52, 4  ;;  %vm8771_vm6 = vcmp.ge.f32.partialorder %v19263_v45, %v8757_v11 }
0x2444   : > { %v17850_v25 = vsel %vm964_vm4, %v8780_v42, 2147483647  ;;  %v8779_v60 = vsel %vm8771_vm6, %v17802_v52, 4 }
0x2445   : > { %v8860_v27 = vshra.s32 %v17850_v25, 16  ;;  %v17855_v15 = vsel %vm964_vm4, %v8779_v60, 2147483647  ;;  %v8766_v54 = vpop.xlane.xlu0 %8765 }
0x2446   : > { %v8845_v0 = vshra.s32 %v17855_v15, 16  ;;  %vm8774_vm7 = vcmp.ge.f32.partialorder %v19264_v5, %v8766_v54  ;;  %v8763_v45 = vpop.xlane.xlu1 %8762  ;;  %v13681_v5 = vld [vmem:[%s18896_s8 + $0x40] sm:$0xff]  }
0x2447   : > { %v17858_v21 = vcvt.s32.f32 %v8860_v27  ;;  %v8782_v11 = vsel %vm8774_vm7, %v17802_v52, 4  ;;  %v19265_v27 = vclamps-f32 %v17755_v37, 20.0  ;;  %v13680_v37 = vld [vmem:[%s18896_s8 + $0x80] sm:$0xff]  }
0x2448   : > { %v17860_v58 = vcvt.s32.f32 %v8845_v0  ;;  %v17868_v42 = vsel %vm964_vm4, %v8782_v11, 2147483647  ;;  %v13682_v11 = vld [vmem:[%s18896_s8 + $0x88] sm:$0xff]   ;;  %11621 = vmatprep.subr.bf16.mxu0 %v13680_v37  ;;  %v8799_v37 = vand.u32 65535, %v17810_v39  ;;  %v8814_v39 = vand.u32 65535, %v17835_v22 }
0x2449   : > { %8863 = vmin.xlane.f32.xlu0 %v17858_v21  ;;  %v8890_v60 = vshra.s32 %v17868_v42, 16  ;;  %vm8773_vm8 = vcmp.ge.f32.partialorder %v19265_v27, %v8763_v45  ;;  %11622 = vmatpush3.bf16.msra.mxu0 %v13681_v5  ;;  %v13683_v45 = vld [vmem:[%s18896_s8 + $0x48] sm:$0xff]   ;;  %v13685_v27 = vld [vmem:[%s18896_s8 + $0x50] sm:$0xff]   ;;  %v8784_v5 = vand.u32 65535, %v17815_v29 }
0x244a   : > { %8848 = vmin.xlane.f32.xlu1 %v17860_v58  ;;  %v8781_v0 = vsel %vm8773_vm8, %v17802_v52, 4  ;;  %11623 = vmatprep.subr.bf16.mxu0 %v13682_v11  ;;  %v8816_v41 = vcvt.s32.f32 %v8814_v39  ;;  %v13690_v22 = vld [vmem:[%s18896_s8 + $0xa8] sm:$0xff]   ;;  %v8859_v39 = vand.u32 65535, %v17850_v25  ;;  %v8889_v25 = vand.u32 65535, %v17868_v42 }
0x244b   : > { %v17875_v6 = vsel %vm964_vm4, %v8781_v0, 2147483647  ;;  %v17877_v63 = vcvt.s32.f32 %v8890_v60  ;;  %v13684_v60 = vld [vmem:[%s18896_s8 + $0x90] sm:$0xff]   ;;  %v13686_v0 = vld [vmem:[%s18896_s8 + $0x98] sm:$0xff]   ;;  %v8786_v35 = vcvt.s32.f32 %v8784_v5 }
0x244c   : > { %v8875_v2 = vshra.s32 %v17875_v6, 16 }
0x244d   : > { %8893 = vmin.xlane.f32.xlu0 %v17877_v63  ;;  %11624 = vmatpush3.bf16.msra.mxu0 %v13683_v45  ;;  %v8801_v45 = vcvt.s32.f32 %v8799_v37 }
0x244e   : > { %v17881_v54 = vcvt.s32.f32 %v8875_v2  ;;  %11625 = vmatprep.subr.bf16.mxu0 %v13684_v60  ;;  %v13687_v2 = vld [vmem:[%s18896_s8 + $0x58] sm:$0xff]  }
0x2450   : > { %8878 = vmin.xlane.f32.xlu1 %v17881_v54 }
0x2451   : > { %11626 = vmatpush3.bf16.msra.mxu0 %v13685_v27  ;;  %v8829_v27 = vand.u32 65535, %v17827_v55  ;;  %v13689_v55 = vld [vmem:[%s18896_s8 + $0x60] sm:$0xff]  }
0x2452   : > { %11627 = vmatprep.subr.bf16.mxu0 %v13686_v0 }
0x2453   : > { %v8831_v37 = vcvt.s32.f32 %v8829_v27  ;;  %v13694_v27 = vld [vmem:[%s18896_s8 + $0xb8] sm:$0xff]  }
0x2455   : > { %11628 = vmatpush3.bf16.msra.mxu0 %v13687_v2 }
0x24a2   : > { %v17910_v11 = vpop.xlane.xlu0 %8803 }
0x24a3   : > { %vm8805_vm9 = vcmp.eq.f32.partialorder %v17818_v30, %v17910_v11  ;;  %v17914_v60 = vpop.xlane.xlu1 %8788 }
0x24a4   : > { %vm8790_vm10 = vcmp.eq.f32.partialorder %v17822_v40, %v17914_v60  ;;  %v8806_v0 = vsel %vm8805_vm9, %v8801_v45, inf  ;;  %v13693_v45 = vld [vmem:[%s18896_s8 + $0x70] sm:$0xff]  }
0x24a5   : > { %8807 = vmin.xlane.f32.xlu0 %v8806_v0  ;;  %v8791_v2 = vsel %vm8790_vm10, %v8786_v35, inf  ;;  %v13688_v35 = vld [vmem:[%s18896_s8 + $0xa0] sm:$0xff]   ;;  %v13695_v0 = vld [vmem:[%s18896_s8 + $0x78] sm:$0xff]  }
0x24a6   : > { %8792 = vmin.xlane.f32.xlu1 %v8791_v2  ;;  %11629 = vmatprep.subr.bf16.mxu0 %v13688_v35  ;;  %v13696_v2 = vld [vmem:[%s18896_s8 + $0x100] sm:$0xff]  }
0x24a7   : > { %11630 = vmatpush3.bf16.msra.mxu0 %v13689_v55 }
0x24a8   : > { %v17920_v29 = vpop.xlane.xlu0 %8833  ;;  %11631 = vmatprep.subr.bf16.mxu0 %v13690_v22 }
0x24a9   : > { %vm8835_vm11 = vcmp.eq.f32.partialorder %v17838_v57, %v17920_v29  ;;  %v17924_v30 = vpop.xlane.xlu1 %8818  ;;  %v13691_v57 = vld [vmem:[%s18896_s8 + $0x68] sm:$0xff]  }
0x24aa   : > { %v8836_v5 = vsel %vm8835_vm11, %v8831_v37, inf  ;;  %vm8820_vm12 = vcmp.eq.f32.partialorder %v17841_v10, %v17924_v30  ;;  %v13692_v10 = vld [vmem:[%s18896_s8 + $0xb0] sm:$0xff]   ;;  %v8844_v37 = vand.u32 65535, %v17855_v15  ;;  %v8874_v15 = vand.u32 65535, %v17875_v6 }
0x24ab   : > { %8837 = vmin.xlane.f32.xlu0 %v8836_v5  ;;  %v8821_v40 = vsel %vm8820_vm12, %v8816_v41, inf  ;;  %v9746_v41 = vld [vmem:[%s18891_s3 + $0x40] sm:$0xf]  ;;  %11632 = vmatpush3.bf16.msra.mxu0 %v13691_v57 }
0x24ac   : > { %8822 = vmin.xlane.f32.xlu1 %v8821_v40  ;;  %12540 = vmatprep.subr.msk.mxu1 %vm9771_vm13, %v9746_v41  ;;  %v8861_v40 = vcvt.s32.f32 %v8859_v39  ;;  %v8846_v55 = vcvt.s32.f32 %v8844_v37  ;;  %v9200_v39 = vmul.f32 0.044715, %v17684_v56  ;;  %v9204_v37 = vmul.f32 0.044715, %v17691_v1 }
0x24ad   : > { %12541 = vmatpush3.msk.msra.mxu1 %vm9771_vm13, %v9746_v41  ;;  %11633 = vmatprep.subr.bf16.mxu0 %v13692_v10  ;;  %v8891_v10 = vcvt.s32.f32 %v8889_v25 }
0x24ae   : > { %11661 = vmatprep.subr.bf16.mxu1 %v13696_v2 }
0x24af   : > { %11634 = vmatpush3.bf16.msra.mxu0 %v13693_v45  ;;  %v17976_v45 = vrot.slane %v17671_v33, %v19253_v3 }
0x24b0   : > { %11635 = vmatprep.subr.bf16.mxu0 %v13694_v27  ;;  %v8876_v27 = vcvt.s32.f32 %v8874_v15 }
0x24b1   : > { %v9056_v6 = vadd.f32 %v17677_v62, %v17976_v45  ;;  %v17988_v33 = vadd.f32 %v17703_v47, %v17976_v45 }
0x24b3   : > { %11636 = vmatpush3.bf16.msra.mxu0 %v13695_v0  ;;  %v9199_v0 = vmul.f32 0.044715, %v9056_v6  ;;  %v9207_v62 = vmul.f32 0.044715, %v17988_v33 }
0x24d6   : > { %v17960_v5 = vpop.xlane.xlu0 %8863 }
0x24d7   : > { %19266 = vst [vmem:[#allocation18_spill] sm:$0xff] %v17960_v5  ;;  %vm8865_vm14 = vcmp.eq.f32.partialorder %v17858_v21, %v17960_v5  ;;  %v17964_v35 = vpop.xlane.xlu1 %8848 }
0x24d8   : > { %19267 = vst [vmem:[#allocation14_spill] sm:$0xff] %v17964_v35  ;;  %vm8850_vm15 = vcmp.eq.f32.partialorder %v17860_v58, %v17964_v35  ;;  %v8866_v22 = vsel %vm8865_vm14, %v8861_v40, inf  ;;  %v9231_v40 = vmul.f32 %v9199_v0, %v9056_v6  ;;  %v9216_v35 = vmul.f32 0.044715, %v17730_v36 }
0x24d9   : > { %8867 = vmin.xlane.f32.xlu0 %v8866_v22  ;;  %v8851_v41 = vsel %vm8850_vm15, %v8846_v55, inf  ;;  %v9236_v22 = vmul.f32 %v9204_v37, %v17691_v1 }
0x24da   : > { %8852 = vmin.xlane.f32.xlu1 %v8851_v41  ;;  %v17970_v57 = vpop.xlane.xlu0 %8893  ;;  %v9208_v41 = vmul.f32 0.044715, %v17708_v7  ;;  %v9263_v47 = vmul.f32 %v9231_v40, %v9056_v6 }
0x24db   : > { %19268 = vst [vmem:[#allocation13_spill] sm:$0xff] %v17970_v57  ;;  %vm8895_vm5 = vcmp.eq.f32.partialorder %v17877_v63, %v17970_v57  ;;  %v9060_v63 = vadd.f32 %v17686_v49, %v17976_v45  ;;  %v9232_v49 = vmul.f32 %v9200_v39, %v17684_v56 }
0x24dc   : > { %v8896_v21 = vsel %vm8895_vm5, %v8891_v10, inf  ;;  %v9239_v10 = vmul.f32 %v9207_v62, %v17988_v33  ;;  %v9295_v0 = vadd.f32 %v9263_v47, %v9056_v6 }
0x24dd   : > { %v17978_v58 = vpop.xlane.xlu1 %8878  ;;  %8897 = vmin.xlane.f32.xlu0 %v8896_v21  ;;  %v9203_v2 = vmul.f32 0.044715, %v9060_v63  ;;  %v9264_v21 = vmul.f32 %v9232_v49, %v17684_v56 }
0x24de   : > { %19269 = vst [vmem:[#allocation37_spill] sm:$0xff] %v17978_v58  ;;  %vm8880_vm6 = vcmp.eq.f32.partialorder %v17881_v54, %v17978_v58  ;;  %v17994_v54 = vadd.f32 %v17710_v53, %v17976_v45  ;;  %v9268_v53 = vmul.f32 %v9236_v22, %v17691_v1  ;;  %v9271_v37 = vmul.f32 %v9239_v10, %v17988_v33 }
0x24df   : > { %v8881_v42 = vsel %vm8880_vm6, %v8876_v27, inf  ;;  %v9235_v55 = vmul.f32 %v9203_v2, %v9060_v63  ;;  %v9240_v27 = vmul.f32 %v9208_v41, %v17708_v7  ;;  %v9296_v40 = vadd.f32 %v9264_v21, %v17684_v56 }
0x24e0   : > { %8882 = vmin.xlane.f32.xlu1 %v8881_v42  ;;  %v9211_v25 = vmul.f32 0.044715, %v17994_v54  ;;  %v9212_v42 = vmul.f32 0.044715, %v17713_v23  ;;  %v9327_v3 = vmul.f32 0.7978846, %v9295_v0  ;;  %v9303_v4 = vadd.f32 %v9271_v37, %v17988_v33 }
0x24e1   : > { %v9267_v15 = vmul.f32 %v9235_v55, %v9060_v63  ;;  %v9300_v55 = vadd.f32 %v9268_v53, %v17691_v1  ;;  %v9272_v62 = vmul.f32 %v9240_v27, %v17708_v7  ;;  %v9328_v47 = vmul.f32 0.7978846, %v9296_v40 }
0x24e2   : > { %v9243_v2 = vmul.f32 %v9211_v25, %v17994_v54  ;;  %v9244_v49 = vmul.f32 %v9212_v42, %v17713_v23  ;;  %14280 = vtanh.f32 %v9327_v3  ;;  %v9335_v53 = vmul.f32 0.7978846, %v9303_v4 }
0x24e3   : > { %v9299_v39 = vadd.f32 %v9267_v15, %v9060_v63  ;;  %v9304_v25 = vadd.f32 %v9272_v62, %v17708_v7  ;;  %v9332_v10 = vmul.f32 0.7978846, %v9300_v55  ;;  %v9205_v40 = vmul.f32 0.044715, %v17760_v59 }
0x24e4   : > { %v9275_v22 = vmul.f32 %v9243_v2, %v17994_v54  ;;  %v9276_v15 = vmul.f32 %v9244_v49, %v17713_v23  ;;  %v9167_v4 = vmul.f32 0.5, %v9056_v6  ;;  %v9206_v6 = vmul.f32 0.044715, %v17765_v19 }
0x24e5   : > { %v9331_v41 = vmul.f32 0.7978846, %v9299_v39  ;;  %v9336_v42 = vmul.f32 0.7978846, %v9304_v25  ;;  %v9201_v39 = vmul.f32 0.044715, %v17749_v13  ;;  %v9237_v25 = vmul.f32 %v9205_v40, %v17760_v59 }
0x24e6   : > { %v9307_v21 = vadd.f32 %v9275_v22, %v17994_v54  ;;  %v9308_v27 = vadd.f32 %v9276_v15, %v17713_v23  ;;  %v9168_v22 = vmul.f32 0.5, %v17684_v56  ;;  %v9172_v15 = vmul.f32 0.5, %v17691_v1 }
0x24e7   : > { %14282 = vtanh.f32 %v9331_v41  ;;  %v9233_v49 = vmul.f32 %v9201_v39, %v17749_v13  ;;  %v9175_v56 = vmul.f32 0.5, %v17988_v33  ;;  %v9179_v40 = vmul.f32 0.5, %v17994_v54 }
0x24e8   : > { %14284 = vtanh.f32 %v9328_v47  ;;  %v9339_v0 = vmul.f32 0.7978846, %v9307_v21  ;;  %v9340_v2 = vmul.f32 0.7978846, %v9308_v27  ;;  %v9171_v47 = vmul.f32 0.5, %v9060_v63 }
0x24e9   : > { %14286 = vtanh.f32 %v9332_v10  ;;  %v9176_v27 = vmul.f32 0.5, %v17708_v7  ;;  %v18031_v63 = vadd.f32 %v17723_v51, %v17976_v45  ;;  %v9265_v1 = vmul.f32 %v9233_v49, %v17749_v13 }
0x24ea   : > { %14288 = vtanh.f32 %v9335_v53  ;;  %v9202_v53 = vmul.f32 0.044715, %v17751_v9  ;;  %v18044_v51 = vadd.f32 %v17732_v44, %v17976_v45  ;;  %v9209_v58 = vmul.f32 0.044715, %v17777_v8 }
0x24eb   : > { %14290 = vtanh.f32 %v9336_v42  ;;  %v9180_v42 = vmul.f32 0.5, %v17713_v23  ;;  %v9269_v23 = vmul.f32 %v9237_v25, %v17760_v59  ;;  %v9238_v54 = vmul.f32 %v9206_v6, %v17765_v19 }
0x24ec   : > { %14292 = vtanh.f32 %v9339_v0  ;;  %v14281_v37 = vpop.eup %14280  ;;  %19270 = vst [vmem:[#allocation16_spill] sm:$0xff] %v18044_v51  ;;  %v9234_v49 = vmul.f32 %v9202_v53, %v17751_v9 }
0x24ed   : > { %14294 = vtanh.f32 %v9340_v2  ;;  %v9391_v41 = vadd.f32 1.0, %v14281_v37  ;;  %v9210_v37 = vmul.f32 0.044715, %v17779_v12  ;;  %v9301_v53 = vadd.f32 %v9269_v23, %v17760_v59 }
0x24ef   : > { %v9333_v31 = vmul.f32 0.7978846, %v9301_v53 }
0x24f1   : > { %v14283_v3 = vpop.eup %14282 }
0x24f2   : > { %v14285_v55 = vpop.eup %14284  ;;  %v9395_v21 = vadd.f32 1.0, %v14283_v3  ;;  %v18036_v3 = vmul.f32 %v9391_v41, %v9167_v4 }
0x24f3   : > { %v14287_v62 = vpop.eup %14286  ;;  %v9392_v0 = vadd.f32 1.0, %v14285_v55  ;;  %v9214_v55 = vmul.f32 0.044715, %v17783_v32 }
0x24f4   : > { %v14289_v10 = vpop.eup %14288  ;;  %v9396_v2 = vadd.f32 1.0, %v14287_v62  ;;  %v18040_v33 = vmul.f32 %v9395_v21, %v9171_v47  ;;  %v9297_v47 = vadd.f32 %v9265_v1, %v17749_v13  ;;  %v9242_v21 = vmul.f32 %v9210_v37, %v17779_v12 }
0x24f5   : > { %v14291_v39 = vpop.eup %14290  ;;  %v9399_v62 = vadd.f32 1.0, %v14289_v10  ;;  %v18049_v57 = vmul.f32 %v9392_v0, %v9168_v22  ;;  %v9215_v10 = vmul.f32 0.044715, %v18031_v63  ;;  %v9246_v5 = vmul.f32 %v9214_v55, %v17783_v32 }
0x24f6   : > { %v14293_v7 = vpop.eup %14292  ;;  %v18051_v4 = vmul.f32 %v9396_v2, %v9172_v15  ;;  %v9400_v41 = vadd.f32 1.0, %v14291_v39  ;;  %v9219_v22 = vmul.f32 0.044715, %v18044_v51  ;;  %v9266_v15 = vmul.f32 %v9234_v49, %v17751_v9 }
0x24f7   : > { %v14295_v25 = vpop.eup %14294  ;;  %v9403_v44 = vadd.f32 1.0, %v14293_v7  ;;  %v18059_v6 = vmul.f32 %v9399_v62, %v9175_v56  ;;  %v9241_v0 = vmul.f32 %v9209_v58, %v17777_v8  ;;  %v9213_v2 = vmul.f32 0.044715, %v17781_v24 }
0x24f8   : > { %v18067_v39 = vadd.f32 %v17753_v26, %v17976_v45  ;;  %v9270_v1 = vmul.f32 %v9238_v54, %v17765_v19  ;;  %v9404_v37 = vadd.f32 1.0, %v14295_v25  ;;  %v18070_v7 = vmul.f32 %v9400_v41, %v9176_v27 }
0x24f9   : > { %19271 = vst [vmem:[#allocation35_spill] sm:$0xff] %v18059_v6  ;;  %v9247_v56 = vmul.f32 %v9215_v10, %v18031_v63  ;;  %v9329_v23 = vmul.f32 0.7978846, %v9297_v47  ;;  %v9274_v55 = vmul.f32 %v9242_v21, %v17779_v12  ;;  %v18074_v62 = vmul.f32 %v9403_v44, %v9179_v40 }
0x24fa   : > { %19272 = vst [vmem:[#allocation21_spill] sm:$0xff] %v18067_v39  ;;  %v9248_v58 = vmul.f32 %v9216_v35, %v17730_v36  ;;  %v9220_v49 = vmul.f32 0.044715, %v17739_v50  ;;  %v9278_v26 = vmul.f32 %v9246_v5, %v17783_v32  ;;  %v9251_v6 = vmul.f32 %v9219_v22, %v18044_v51 }
0x24fb   : > { %v9298_v54 = vadd.f32 %v9266_v15, %v17751_v9  ;;  %v9273_v27 = vmul.f32 %v9241_v0, %v17777_v8  ;;  %v9245_v41 = vmul.f32 %v9213_v2, %v17781_v24  ;;  %v9223_v25 = vmul.f32 0.044715, %v18067_v39 }
0x24fc   : > { %v9302_v40 = vadd.f32 %v9270_v1, %v17765_v19  ;;  %v18087_v35 = vadd.f32 %v17757_v46, %v17976_v45  ;;  %v18089_v10 = vmul.f32 %v9404_v37, %v9180_v42  ;;  %v9279_v5 = vmul.f32 %v9247_v56, %v18031_v63 }
0x24fd   : > { %14296 = vtanh.f32 %v9329_v23  ;;  %v9224_v47 = vmul.f32 0.044715, %v17763_v61  ;;  %v9306_v21 = vadd.f32 %v9274_v55, %v17779_v12  ;;  %v9280_v44 = vmul.f32 %v9248_v58, %v17730_v36 }
0x24fe   : > { %v9252_v53 = vmul.f32 %v9220_v49, %v17739_v50  ;;  %14298 = vtanh.f32 %v9333_v31  ;;  %v9310_v22 = vadd.f32 %v9278_v26, %v17783_v32  ;;  %v9283_v15 = vmul.f32 %v9251_v6, %v18044_v51 }
0x24ff   : > { %v9305_v46 = vadd.f32 %v9273_v27, %v17777_v8  ;;  %v9277_v45 = vmul.f32 %v9245_v41, %v17781_v24  ;;  %v9330_v42 = vmul.f32 0.7978846, %v9298_v54  ;;  %v9169_v0 = vmul.f32 0.5, %v17749_v13 }
0x2500   : > { %v9255_v2 = vmul.f32 %v9223_v25, %v18067_v39  ;;  %v9227_v1 = vmul.f32 0.044715, %v18087_v35  ;;  %v9334_v37 = vmul.f32 0.7978846, %v9302_v40  ;;  %v9256_v56 = vmul.f32 %v9224_v47, %v17763_v61 }
0x2501   : > { %v9228_v31 = vmul.f32 0.044715, %v17772_v18  ;;  %v9217_v23 = vmul.f32 0.044715, %v17785_v48  ;;  %v9338_v55 = vmul.f32 0.7978846, %v9306_v21  ;;  %v18107_v6 = vadd.f32 %v9279_v5, %v18031_v63 }
0x2502   : > { %v9218_v58 = vmul.f32 0.044715, %v17787_v20  ;;  %v9221_v49 = vmul.f32 0.044715, %v17789_v38  ;;  %v9342_v13 = vmul.f32 0.7978846, %v9310_v22  ;;  %v9309_v26 = vadd.f32 %v9277_v45, %v17781_v24 }
0x2503   : > { %v9222_v54 = vmul.f32 0.044715, %v17791_v43  ;;  %14300 = vtanh.f32 %v9330_v42  ;;  %v9337_v27 = vmul.f32 0.7978846, %v9305_v46  ;;  %v9312_v41 = vadd.f32 %v9280_v44, %v17730_v36 }
0x2504   : > { %v18115_v25 = vadd.f32 %v9283_v15, %v18044_v51  ;;  %v9284_v40 = vmul.f32 %v9252_v53, %v17739_v50  ;;  %14302 = vtanh.f32 %v9334_v37  ;;  %v9287_v5 = vmul.f32 %v9255_v2, %v18067_v39 }
0x2505   : > { %v9288_v47 = vmul.f32 %v9256_v56, %v17763_v61  ;;  %v9259_v21 = vmul.f32 %v9227_v1, %v18087_v35  ;;  %14304 = vtanh.f32 %v9338_v55  ;;  %v9260_v22 = vmul.f32 %v9228_v31, %v17772_v18 }
0x2506   : > { %v9249_v45 = vmul.f32 %v9217_v23, %v17785_v48  ;;  %v9250_v46 = vmul.f32 %v9218_v58, %v17787_v20  ;;  %14306 = vtanh.f32 %v9342_v13  ;;  %v9253_v15 = vmul.f32 %v9221_v49, %v17789_v38 }
0x2507   : > { %v14297_v44 = vpop.eup %14296  ;;  %v9254_v53 = vmul.f32 %v9222_v54, %v17791_v43  ;;  %v9341_v42 = vmul.f32 0.7978846, %v9309_v26  ;;  %14308 = vtanh.f32 %v9337_v27  ;;  %v9316_v37 = vadd.f32 %v9284_v40, %v17739_v50 }
0x2508   : > { %v14299_v2 = vpop.eup %14298  ;;  %v9173_v1 = vmul.f32 0.5, %v17760_v59  ;;  %v9225_v56 = vmul.f32 0.044715, %v17793_v16  ;;  %v9226_v31 = vmul.f32 0.044715, %v17795_v34  ;;  %v18131_v23 = vadd.f32 %v9287_v5, %v18067_v39 }
0x2509   : > { %v9320_v55 = vadd.f32 %v9288_v47, %v17763_v61  ;;  %v9291_v58 = vmul.f32 %v9259_v21, %v18087_v35  ;;  %v9230_v49 = vmul.f32 0.044715, %v17799_v28  ;;  %v9393_v13 = vadd.f32 1.0, %v14297_v44 }
0x250a   : > { %v9292_v26 = vmul.f32 %v9260_v22, %v17772_v18  ;;  %v9281_v54 = vmul.f32 %v9249_v45, %v17785_v48  ;;  %v9282_v59 = vmul.f32 %v9250_v46, %v17787_v20  ;;  %v9397_v27 = vadd.f32 1.0, %v14299_v2 }
0x250b   : > { %v9285_v40 = vmul.f32 %v9253_v15, %v17789_v38  ;;  %v9286_v51 = vmul.f32 %v9254_v53, %v17791_v43  ;;  %14310 = vtanh.f32 %v9341_v42  ;;  %v9257_v5 = vmul.f32 %v9225_v56, %v17793_v16 }
0x250c   : > { %v9258_v47 = vmul.f32 %v9226_v31, %v17795_v34  ;;  %v9229_v21 = vmul.f32 0.044715, %v17797_v14  ;;  %v9344_v39 = vmul.f32 0.7978846, %v9312_v41  ;;  %v18145_v22 = vadd.f32 %v9291_v58, %v18087_v35 }
0x250d   : > { %v14301_v44 = vpop.eup %14300  ;;  %v9262_v45 = vmul.f32 %v9230_v49, %v17799_v28  ;;  %v9170_v46 = vmul.f32 0.5, %v17751_v9  ;;  %v9348_v2 = vmul.f32 0.7978846, %v9316_v37  ;;  %v18149_v61 = vmul.f32 %v9393_v13, %v9169_v0 }
0x250e   : > { %v14303_v15 = vpop.eup %14302  ;;  %v9324_v53 = vadd.f32 %v9292_v26, %v17772_v18  ;;  %v18153_v42 = vadd.f32 %v9281_v54, %v17785_v48  ;;  %v9174_v56 = vmul.f32 0.5, %v17765_v19  ;;  %v18156_v31 = vmul.f32 %v9397_v27, %v9173_v1 }
0x250f   : > { %v14305_v41 = vpop.eup %14304  ;;  %v18159_v58 = vadd.f32 %v9282_v59, %v17787_v20  ;;  %v18162_v49 = vadd.f32 %v9285_v40, %v17789_v38  ;;  %v18165_v9 = vadd.f32 %v9286_v51, %v17791_v43  ;;  %v18168_v37 = vmul.f32 %v9257_v5, %v17793_v16 }
0x2510   : > { %v14307_v0 = vpop.eup %14306  ;;  %v18171_v13 = vmul.f32 %v9258_v47, %v17795_v34  ;;  %v18174_v19 = vmul.f32 %v9229_v21, %v17797_v14  ;;  %14312 = vtanh.f32 %v9344_v39  ;;  %v18177_v26 = vmul.f32 %v9262_v45, %v17799_v28 }
0x2511   : > { %v14309_v1 = vpop.eup %14308  ;;  %v8810_v54 = vcvt.f32.s32 %v17910_v11  ;;  %14314 = vtanh.f32 %v9348_v2  ;;  %v18181_v51 = vmul.f32 0.7978846, %v18107_v6  ;;  %v8795_v59 = vcvt.f32.s32 %v17914_v60 }
0x2512   : > { %v9394_v27 = vadd.f32 1.0, %v14301_v44  ;;  %v18185_v40 = vmul.f32 0.7978846, %v18115_v25  ;;  %v9178_v5 = vmul.f32 0.5, %v17779_v12  ;;  %v9398_v47 = vadd.f32 1.0, %v14303_v15 }
0x2513   : > { %v9182_v39 = vmul.f32 0.5, %v17783_v32  ;;  %v9402_v21 = vadd.f32 1.0, %v14305_v41  ;;  %v9406_v45 = vadd.f32 1.0, %v14307_v0  ;;  %v18189_v48 = vmul.f32 0.7978846, %v9320_v55 }
0x2514   : > { %v18191_v11 = vmul.f32 0.7978846, %v9324_v53  ;;  %v9177_v6 = vmul.f32 0.5, %v17777_v8  ;;  %v9401_v60 = vadd.f32 1.0, %v14309_v1  ;;  %v8811_v2 = vshll.u32 %v8810_v54, 16 }
0x2515   : > { %v14311_v44 = vpop.eup %14310  ;;  %v8840_v25 = vcvt.f32.s32 %v17920_v29  ;;  %v8825_v12 = vcvt.f32.s32 %v17924_v30  ;;  %v8796_v32 = vshll.u32 %v8795_v59, 16  ;;  %v18196_v0 = vmul.f32 %v9394_v27, %v9170_v46 }
0x2516   : > { %v18199_v55 = vmul.f32 0.5, %v17781_v24  ;;  %v18201_v20 = vmul.f32 %v9398_v47, %v9174_v56  ;;  %v18203_v8 = vmul.f32 %v9402_v21, %v9178_v5  ;;  %v18205_v1 = vmul.f32 %v9406_v45, %v9182_v39  ;;  %v13697_v47 = vld [vmem:[%s18896_s8 + $0xc0] sm:$0xff]  }
0x2517   : > { %v18217_v24 = vadd.f32 1.0, %v14311_v44  ;;  %v18219_v29 = vmul.f32 %v9401_v60, %v9177_v6  ;;  %v8841_v30 = vshll.u32 %v8840_v25, 16  ;;  %v8826_v46 = vshll.u32 %v8825_v12, 16  ;;  %v13698_v44 = vld [vmem:[%s18896_s8 + $0x108] sm:$0xff]  }
0x2518   : > { %v18234_v39 = vadd.s32 384, %v17802_v52  ;;  %14316 = vtanh.f32 %v18181_v51  ;;  %v13709_v51 = vld [vmem:[%s18896_s8 + $0xf0] sm:$0xff]  }
0x2519   : > { %14318 = vtanh.f32 %v18185_v40  ;;  %v9326_v40 = vadd.f32 %v18177_v26, %v17799_v28  ;;  %v9321_v26 = vadd.f32 %v18168_v37, %v17793_v16 }
0x251a   : > { %v18224_v54 = vpop.eup %14312  ;;  %14320 = vtanh.f32 %v18189_v48  ;;  %v9293_v48 = vmul.f32 %v18174_v19, %v17797_v14 }
0x251b   : > { %v18236_v21 = vpop.eup %14314  ;;  %14322 = vtanh.f32 %v18191_v11  ;;  %v13711_v11 = vld [vmem:[%s18896_s8 + $0xf8] sm:$0xff]  }
0x251c   : > { %v9325_v19 = vadd.f32 %v9293_v48, %v17797_v14 }
0x2532   : > { %v8808_v38 = vpop.xlane.xlu0 %8807 }
0x2533   : > { %v8809_v15 = vcvt.f32.s32 %v8808_v38  ;;  %v8793_v43 = vpop.xlane.xlu1 %8792 }
0x2534   : > { %v8794_v41 = vcvt.f32.s32 %v8793_v43  ;;  %v18215_v43 = vadd.s32 128, %v17802_v52 }
0x2535   : > { %v8812_v53 = vadd.s32 %v8811_v2, %v8809_v15  ;;  %v18248_v2 = vadd.s32 256, %v17802_v52 }
0x2536   : > { %v8797_v38 = vadd.s32 %v8796_v32, %v8794_v41  ;;  %v13699_v41 = vld [vmem:[%s18896_s8 + $0xc8] sm:$0xff]  }
0x2537   : > { %vm8904_vm7 = vcmp.eq.s32.totalorder %v17802_v52, %v8812_v53  ;;  %v18222_v56 = vmul.u32 128, %v8812_v53 }
0x2538   : > { %v11021_v59 = vsel %vm8904_vm7, 1.0, %v19229_v17  ;;  %v18227_v27 = vmul.u32 128, %v8797_v38  ;;  %v8838_v5 = vpop.xlane.xlu0 %8837  ;;  %vm8903_vm8 = vcmp.eq.s32.totalorder %v17802_v52, %v8797_v38 }
0x2539   : > { %8928 = vst.msk [vmem:[%s18212_s24 + $0x8] sm:$0xff] %vm964_vm4, %v11021_v59  ;;  %v8839_v45 = vcvt.f32.s32 %v8838_v5  ;;  %v11020_v6 = vsel %vm8903_vm8, 1.0, %v19229_v17  ;;  %v18242_v60 = vadd.s32 128, %v18222_v56  ;;  %v8823_v25 = vpop.xlane.xlu1 %8822  ;;  %vm9471_vm10 = vcmp.ge.s32.totalorder %v18215_v43, %v18222_v56 }
0x253a   : > { %8927 = vst.msk [vmem:[%s18212_s24] sm:$0xff] %vm964_vm4, %v11020_v6  ;;  %12542 = vmatprep.mubr.msk.f32.mxu1 %vm964_vm4, %v11020_v6  ;;  %vm9467_vm9 = vcmp.ge.s32.totalorder %v18215_v43, %v18227_v27  ;;  %v18258_v12 = vadd.s32 128, %v18227_v27  ;;  %vm9466_vm11 = vcmp.ge.s32.totalorder %v17802_v52, %v18227_v27  ;;  %v8824_v32 = vcvt.f32.s32 %v8823_v25 }
0x253b   : > { %v8842_v15 = vadd.s32 %v8841_v30, %v8839_v45  ;;  %12543 = vmatmul.mubr.msk.f32.vlgmr.msra.gmra.mrb[172].mxu1 %vm964_vm4, %v11021_v59  ;;  %vm9511_vm12 = vcmp.lt.s32.totalorder %v18215_v43, %v18242_v60  ;;  %vm9470_vm13 = vcmp.ge.s32.totalorder %v17802_v52, %v18222_v56  ;;  %vm9510_vm6 = vcmp.lt.s32.totalorder %v17802_v52, %v18242_v60  ;;  %v13700_v59 = vld [vmem:[%s18896_s8 + $0x110] sm:$0xff]  }
0x253c   : > { %vm9507_vm14 = vcmp.lt.s32.totalorder %v18215_v43, %v18258_v12  ;;  %vm9543_vm15 = vmand %vm9471_vm10, %vm9511_vm12  ;;  %vm9506_vm5 = vcmp.lt.s32.totalorder %v17802_v52, %v18258_v12  ;;  %11662 = vmatpush3.bf16.msra.mxu1 %v13697_v47  ;;  %vm9469_vm7 = vcmp.ge.s32.totalorder %v18234_v39, %v18227_v27  ;;  %v8827_v38 = vadd.s32 %v8826_v46, %v8824_v32 }
0x253d   : > { %v18278_v53 = vmul.u32 128, %v8842_v15  ;;  %vm8906_vm8 = vcmp.eq.s32.totalorder %v17802_v52, %v8842_v15  ;;  %vm9539_vm10 = vmand %vm9467_vm9, %vm9507_vm14  ;;  %v11049_v30 = vsel %vm9543_vm15, 1.0, %v19229_v17  ;;  %11663 = vmatprep.subr.bf16.mxu1 %v13698_v44  ;;  %vm9509_vm12 = vcmp.lt.s32.totalorder %v18234_v39, %v18258_v12 }
0x253e   : > { %v11023_v5 = vsel %vm8906_vm8, 1.0, %v19229_v17  ;;  %v11045_v47 = vsel %vm9539_vm10, 1.0, %v19229_v17  ;;  %v9639_v45 = vmul.f32 %v11049_v30, %v18051_v4  ;;  %vm9538_vm9 = vmand %vm9466_vm11, %vm9506_vm5  ;;  %v18299_v46 = vmul.u32 128, %v8827_v38  ;;  %v13702_v30 = vld [vmem:[%s18896_s8 + $0x118] sm:$0xff]  }
0x253f   : > { %vm8905_vm14 = vcmp.eq.s32.totalorder %v17802_v52, %v8827_v38  ;;  %8930 = vst.msk [vmem:[%s18212_s24 + $0x18] sm:$0xff] %vm964_vm4, %v11023_v5  ;;  %v9635_v6 = vmul.f32 %v11045_v47, %v18049_v57  ;;  %vm9542_vm15 = vmand %vm9470_vm13, %vm9510_vm6  ;;  %v11044_v4 = vsel %vm9538_vm9, 1.0, %v19229_v17  ;;  %v13701_v57 = vld [vmem:[%s18896_s8 + $0xd0] sm:$0xff]   ;;  %vm9473_vm11 = vcmp.ge.s32.totalorder %v18234_v39, %v18222_v56 }
0x2540   : > { %v11022_v44 = vsel %vm8905_vm14, 1.0, %v19229_v17  ;;  %v11048_v25 = vsel %vm9542_vm15, 1.0, %v19229_v17  ;;  %v9634_v15 = vmul.f32 %v11044_v4, %v18036_v3  ;;  %11664 = vmatpush3.bf16.msra.mxu1 %v13699_v41  ;;  %vm18323_vm13 = vmand %vm9469_vm7, %vm9509_vm12  ;;  %vm9479_vm5 = vcmp.ge.s32.totalorder %v18215_v43, %v18278_v53 }
0x2541   : > { %8929 = vst.msk [vmem:[%s18212_s24 + $0x10] sm:$0xff] %vm964_vm4, %v11022_v44  ;;  %12545 = vmatprep.mubr.msk.f32.mxu1 %vm964_vm4, %v11022_v44  ;;  %v9667_v3 = vpack.c.bf16 %v9639_v45, %v9635_v6  ;;  %v9638_v41 = vmul.f32 %v11048_v25, %v18040_v33  ;;  %v18334_v38 = vadd.s32 128, %v18299_v46  ;;  %11665 = vmatprep.subr.bf16.mxu1 %v13700_v59  ;;  %v18343_v47 = vadd.s32 128, %v18278_v53  ;;  %v13704_v44 = vld [vmem:[%s18896_s8 + $0x120] sm:$0xff]  }
0x2542   : > { %12546 = vmatmul.mubr.msk.f32.gmra.mrb[174].mxu1 %vm964_vm4, %v11023_v5  ;;  %vm9475_vm6 = vcmp.ge.s32.totalorder %v18215_v43, %v18299_v46  ;;  %vm9474_vm7 = vcmp.ge.s32.totalorder %v17802_v52, %v18299_v46  ;;  %vm9513_vm8 = vcmp.lt.s32.totalorder %v18234_v39, %v18242_v60  ;;  %v11047_v59 = vsel %vm18323_vm13, 1.0, %v19229_v17  ;;  %v13703_v5 = vld [vmem:[%s18896_s8 + $0xd8] sm:$0xff]  }
0x2543   : > { %10104 = vmatprep.mubr.bf16.mxu0 %v9667_v3  ;;  %v9666_v33 = vpack.c.bf16 %v9638_v41, %v9634_v15  ;;  %vm9515_vm10 = vcmp.lt.s32.totalorder %v18215_v43, %v18334_v38  ;;  %vm9514_vm9 = vcmp.lt.s32.totalorder %v17802_v52, %v18334_v38  ;;  %vm9545_vm12 = vmand %vm9473_vm11, %vm9513_vm8  ;;  %vm9519_vm14 = vcmp.lt.s32.totalorder %v18215_v43, %v18343_v47 }
0x2544   : > { %vm9547_vm15 = vmand %vm9475_vm6, %vm9515_vm10  ;;  %vm9518_vm2 = vcmp.lt.s32.totalorder %v17802_v52, %v18343_v47  ;;  %11666 = vmatpush3.bf16.msra.mxu1 %v13701_v57  ;;  %v11051_v45 = vsel %vm9545_vm12, 1.0, %v19229_v17  ;;  %v18368_v6 = vmul.f32 %v11047_v59, %v18196_v0  ;;  %vm9478_vm13 = vcmp.ge.s32.totalorder %v17802_v52, %v18278_v53 }
0x2545   : > { %10105 = vmatmul.mubr.bf16.vlgmr.msra.gmra.mrb[176].mxu0 %v9666_v33  ;;  %vm9551_vm11 = vmand %vm9479_vm5, %vm9519_vm14  ;;  %v11053_v4 = vsel %vm9547_vm15, 1.0, %v19229_v17  ;;  %11667 = vmatprep.subr.bf16.mxu1 %v13702_v30  ;;  %v18380_v25 = vmul.f32 %v11051_v45, %v18201_v20  ;;  %vm9468_vm6 = vcmp.ge.s32.totalorder %v18248_v2, %v18227_v27  ;;  %vm9508_vm8 = vcmp.lt.s32.totalorder %v18248_v2, %v18258_v12  ;;  %v19276_v12 = vld [vmem:[#allocation35_spill] sm:$0xff]  ;;  %v13706_v30 = vld [vmem:[%s18896_s8 + $0x128] sm:$0xff]  }
0x2546   : > { %v11057_v0 = vsel %vm9551_vm11, 1.0, %v19229_v17  ;;  %v9643_v15 = vmul.f32 %v11053_v4, %v18070_v7  ;;  %vm9546_vm5 = vmand %vm9474_vm7, %vm9514_vm9  ;;  %vm9512_vm10 = vcmp.lt.s32.totalorder %v18248_v2, %v18242_v60  ;;  %vm9472_vm7 = vcmp.ge.s32.totalorder %v18248_v2, %v18222_v56 }
0x2547   : > { %v9647_v20 = vmul.f32 %v11057_v0, %v18089_v10  ;;  %vm9550_vm12 = vmand %vm9478_vm13, %vm9518_vm2  ;;  %v11052_v7 = vsel %vm9546_vm5, 1.0, %v19229_v17  ;;  %v9669_v57 = vpack.c.bf16 %v18380_v25, %v18368_v6  ;;  %v13705_v10 = vld [vmem:[%s18896_s8 + $0xe0] sm:$0xff]   ;;  %vm9477_vm9 = vcmp.ge.s32.totalorder %v18234_v39, %v18299_v46 }
0x2548   : > { %v11056_v32 = vsel %vm9550_vm12, 1.0, %v19229_v17  ;;  %v9642_v3 = vmul.f32 %v11052_v7, %v19276_v12  ;;  %11668 = vmatpush3.bf16.msra.mxu1 %v13703_v5  ;;  %vm9540_vm2 = vmand %vm9468_vm6, %vm9508_vm8  ;;  %vm9517_vm14 = vcmp.lt.s32.totalorder %v18234_v39, %v18334_v38  ;;  %vm9521_vm11 = vcmp.lt.s32.totalorder %v18234_v39, %v18343_v47 }
0x2549   : > { %v9671_v56 = vpack.c.bf16 %v9647_v20, %v9643_v15  ;;  %v9646_v41 = vmul.f32 %v11056_v32, %v18074_v62  ;;  %11669 = vmatprep.subr.bf16.mxu1 %v13704_v44  ;;  %vm9544_vm15 = vmand %vm9472_vm7, %vm9512_vm10  ;;  %v11046_v27 = vsel %vm9540_vm2, 1.0, %v19229_v17  ;;  %vm9481_vm13 = vcmp.ge.s32.totalorder %v18234_v39, %v18278_v53  ;;  %v14317_v32 = vpop.eup %14316 }
0x254a   : > { %v11050_v33 = vsel %vm9544_vm15, 1.0, %v19229_v17  ;;  %v18429_v59 = vmul.f32 %v11046_v27, %v18149_v61  ;;  %vm9549_vm6 = vmand %vm9477_vm9, %vm9517_vm14  ;;  %vm9476_vm5 = vcmp.ge.s32.totalorder %v18248_v2, %v18299_v46  ;;  %vm9516_vm10 = vcmp.lt.s32.totalorder %v18248_v2, %v18334_v38  ;;  %v13707_v61 = vld [vmem:[%s18896_s8 + $0xe8] sm:$0xff]   ;;  %v14319_v37 = vpop.eup %14318 }
0x254b   : > { %10112 = vmatprep.mubr.bf16.mxu0 %v9671_v56  ;;  %v9670_v62 = vpack.c.bf16 %v9646_v41, %v9642_v3  ;;  %v18436_v60 = vmul.f32 %v11050_v33, %v18156_v31  ;;  %vm9553_vm8 = vmand %vm9481_vm13, %vm9521_vm11  ;;  %v11055_v5 = vsel %vm9549_vm6, 1.0, %v19229_v17  ;;  %vm9480_vm12 = vcmp.ge.s32.totalorder %v18248_v2, %v18278_v53  ;;  %v13708_v31 = vld [vmem:[%s18896_s8 + $0x130] sm:$0xff]   ;;  %v14321_v12 = vpop.eup %14320 }
0x254c   : > { %11670 = vmatpush3.bf16.msra.mxu1 %v13705_v10  ;;  %v11059_v45 = vsel %vm9553_vm8, 1.0, %v19229_v17  ;;  %v18446_v46 = vmul.f32 %v11055_v5, %v18203_v8  ;;  %vm9520_vm7 = vcmp.lt.s32.totalorder %v18248_v2, %v18343_v47  ;;  %vm9548_vm2 = vmand %vm9476_vm5, %vm9516_vm10  ;;  %v9437_v8 = vmul.f32 %v18217_v24, %v18199_v55  ;;  %v14323_v10 = vpop.eup %14322 }
0x254d   : > { %10113 = vmatmul.mubr.bf16.gmra.mrb[180].mxu0 %v9670_v62  ;;  %11671 = vmatprep.subr.bf16.mxu1 %v13706_v30  ;;  %v9668_v38 = vpack.c.bf16 %v18436_v60, %v18429_v59  ;;  %v18458_v4 = vmul.f32 %v11059_v45, %v18205_v1  ;;  %vm9552_vm9 = vmand %vm9480_vm12, %vm9520_vm7  ;;  %v11054_v53 = vsel %vm9548_vm2, 1.0, %v19229_v17  ;;  %v9351_v0 = vmul.f32 0.7978846, %v18131_v23  ;;  %v19278_v62 = vld [vmem:[#allocation16_spill] sm:$0xff] }
0x254e   : > { %v11058_v47 = vsel %vm9552_vm9, 1.0, %v19229_v17  ;;  %v18466_v44 = vmul.f32 %v11054_v53, %v18219_v29  ;;  %v9355_v55 = vmul.f32 0.7978846, %v18145_v22  ;;  %v9322_v24 = vadd.f32 %v18171_v13, %v17795_v34  ;;  %v13710_v22 = vld [vmem:[%s18896_s8 + $0x138] sm:$0xff]  }
0x254f   : > { %v9673_v1 = vpack.c.bf16 %v18458_v4, %v18446_v46  ;;  %v18472_v15 = vmul.f32 %v11058_v47, %v9437_v8  ;;  %v9346_v23 = vmul.f32 0.7978846, %v18159_v58  ;;  %v9350_v29 = vmul.f32 0.7978846, %v18165_v9  ;;  %v10215_v4 = vld [vmem:[%s18891_s3 + $0xb8] sm:$0xff] }
0x2550   : > { %11672 = vmatpush3.bf16.msra.mxu1 %v13707_v61  ;;  %14324 = vtanh.f32 %v9351_v0  ;;  %v9345_v58 = vmul.f32 0.7978846, %v18153_v42  ;;  %v9349_v20 = vmul.f32 0.7978846, %v18162_v49  ;;  %v9354_v7 = vmul.f32 0.7978846, %v9322_v24 }
0x2551   : > { %11673 = vmatprep.subr.bf16.mxu1 %v13708_v31  ;;  %v9672_v13 = vpack.c.bf16 %v18472_v15, %v18466_v44  ;;  %14326 = vtanh.f32 %v9355_v55  ;;  %v9358_v9 = vmul.f32 0.7978846, %v9326_v40  ;;  %v9353_v42 = vmul.f32 0.7978846, %v9321_v26  ;;  %v19279_v61 = vld [vmem:[#allocation36_spill] sm:$0xff]  ;;  %v19280_v0 = vld [vmem:[#allocation21_spill] sm:$0xff] }
0x2552   : > { %14328 = vtanh.f32 %v9346_v23  ;;  %v19277_v49 = vmov 0.0|0.0   ;;  %v9357_v3 = vmul.f32 0.7978846, %v9325_v19  ;;  %v9184_v41 = vmul.f32 0.5, %v17730_v36  ;;  %v19282_v23 = vld [vmem:[#allocation34_spill] sm:$0xff]  ;;  %v19284_v26 = vld [vmem:[#allocation12_spill] sm:$0xff] }
0x2553   : > { %14330 = vtanh.f32 %v9350_v29  ;;  %v9188_v30 = vmul.f32 0.5, %v17739_v50  ;;  %v9183_v33 = vmul.f32 0.5, %v18031_v63  ;;  %v9187_v5 = vmul.f32 0.5, %v19278_v62  ;;  %v19286_v62 = vld [vmem:[#allocation14_spill] sm:$0xff] }
0x2554   : > { %11674 = vmatpush3.bf16.msra.mxu1 %v13709_v51  ;;  %14332 = vtanh.f32 %v9345_v58  ;;  %v9192_v45 = vmul.f32 0.5, %v19279_v61  ;;  %v9196_v31 = vmul.f32 0.5, %v17772_v18  ;;  %v9408_v53 = vadd.f32 1.0, %v18224_v54  ;;  %v19281_v51 = vld [vmem:[#allocation17_spill] sm:$0xff]  ;;  %v19283_v18 = vld [vmem:[#allocation11_spill] sm:$0xff] }
0x2555   : > { %11675 = vmatprep.subr.bf16.mxu1 %v13710_v22  ;;  %14334 = vtanh.f32 %v9349_v20  ;;  %v9412_v47 = vadd.f32 1.0, %v18236_v21  ;;  %v9191_v55 = vmul.f32 0.5, %v19280_v0  ;;  %v9407_v24 = vadd.f32 1.0, %v14317_v32 }
0x2556   : > { %14336 = vtanh.f32 %v9354_v7  ;;  %v9195_v50 = vmul.f32 0.5, %v18087_v35  ;;  %v9186_v63 = vmul.f32 0.5, %v19281_v51  ;;  %v9190_v40 = vmul.f32 0.5, %v19282_v23  ;;  %v19285_v35 = vld [vmem:[#allocation18_spill] sm:$0xff] }
0x2557   : > { %14338 = vtanh.f32 %v9358_v9  ;;  %v9411_v29 = vadd.f32 1.0, %v14319_v37  ;;  %v9416_v48 = vadd.f32 1.0, %v14321_v12  ;;  %v9185_v58 = vmul.f32 0.5, %v19283_v18 }
0x2558   : > { %11676 = vmatpush3.bf16.msra.mxu1 %v13711_v11  ;;  %14340 = vtanh.f32 %v9353_v42  ;;  %v9189_v54 = vmul.f32 0.5, %v19284_v26  ;;  %v9420_v21 = vadd.f32 1.0, %v14323_v10  ;;  %v9194_v7 = vmul.f32 0.5, %v17795_v34  ;;  %v19287_v26 = vld [vmem:[#allocation13_spill] sm:$0xff] }
0x2559   : > { %12957 = vmatprep.subr.bf16.mxu1 %v19277_v49  ;;  %14342 = vtanh.f32 %v9357_v3  ;;  %v9198_v9 = vmul.f32 0.5, %v17799_v28  ;;  %v8870_v42 = vcvt.f32.s32 %v19285_v35  ;;  %v18519_v32 = vmul.f32 %v9408_v53, %v9184_v41 }
0x255a   : > { %v14325_v56 = vpop.eup %14324  ;;  %v18521_v3 = vmul.f32 %v9412_v47, %v9188_v30  ;;  %v9193_v37 = vmul.f32 0.5, %v17793_v16  ;;  %v8855_v61 = vcvt.f32.s32 %v19286_v62  ;;  %v18525_v0 = vmul.f32 %v9407_v24, %v9183_v33 }
0x255b   : > { %v14327_v27 = vpop.eup %14326  ;;  %v9415_v11 = vadd.f32 1.0, %v14325_v56  ;;  %v18527_v51 = vmul.f32 %v9411_v29, %v9187_v5  ;;  %v18529_v34 = vmul.f32 %v9416_v48, %v9192_v45  ;;  %v18532_v23 = vmul.f32 0.5, %v17797_v14 }
0x255c   : > { %v14329_v8 = vpop.eup %14328  ;;  %v9419_v10 = vadd.f32 1.0, %v14327_v27  ;;  %v18534_v53 = vmul.f32 %v9420_v21, %v9196_v31  ;;  %v8871_v33 = vshll.u32 %v8870_v42, 16  ;;  %v8856_v29 = vshll.u32 %v8855_v61, 16 }
0x255d   : > { %v14331_v36 = vpop.eup %14330  ;;  %v9410_v56 = vadd.f32 1.0, %v14329_v8  ;;  %v18536_v16 = vmul.f32 %v9415_v11, %v9191_v55  ;;  %v8900_v35 = vcvt.f32.s32 %v19287_v26 }
0x255e   : > { %v14333_v22 = vpop.eup %14332  ;;  %v9414_v28 = vadd.f32 1.0, %v14331_v36  ;;  %v18538_v48 = vmul.f32 %v9419_v10, %v9195_v50 }
0x255f   : > { %v14335_v20 = vpop.eup %14334  ;;  %v9409_v47 = vadd.f32 1.0, %v14333_v22  ;;  %v18540_v36 = vmul.f32 %v9410_v56, %v9186_v63  ;;  %v19288_v22 = vld [vmem:[#allocation37_spill] sm:$0xff] }
0x2560   : > { %v14337_v19 = vpop.eup %14336  ;;  %v9413_v18 = vadd.f32 1.0, %v14335_v20  ;;  %v18543_v21 = vmul.f32 %v9414_v28, %v9190_v40  ;;  %v8885_v20 = vcvt.f32.s32 %v19288_v22  ;;  %v18560_v40 = vld [vmem:[%s18891_s3 + $0x90] sm:$0xff] }
0x2561   : > { %v14339_v12 = vpop.eup %14338  ;;  %v9418_v8 = vadd.f32 1.0, %v14337_v19  ;;  %v18546_v42 = vmul.f32 %v9409_v47, %v9185_v58  ;;  %v18565_v58 = vld [vmem:[%s18891_s3 + $0x98] sm:$0xff] }
0x2562   : > { %v14341_v41 = vpop.eup %14340  ;;  %v9422_v5 = vadd.f32 1.0, %v14339_v12  ;;  %v18548_v19 = vmul.f32 %v9413_v18, %v9189_v54  ;;  %v8886_v28 = vshll.u32 %v8885_v20, 16 }
0x2563   : > { %v14343_v14 = vpop.eup %14342  ;;  %v9417_v55 = vadd.f32 1.0, %v14341_v41  ;;  %v18553_v50 = vmul.f32 %v9418_v8, %v9194_v7  ;;  %v8901_v7 = vshll.u32 %v8900_v35, 16 }
0x2564   : > { %v18555_v63 = vmul.f32 %v9422_v5, %v9198_v9  ;;  %v18569_v61 = vadd.f32 1.0, %v14343_v14 }
0x2565   : > { %v18575_v56 = vmul.f32 %v9417_v55, %v9193_v37 }
0x2566   : > { %v8868_v30 = vpop.xlane.xlu0 %8867 }
0x2567   : > { %v8869_v24 = vcvt.f32.s32 %v8868_v30  ;;  %v8853_v27 = vpop.xlane.xlu1 %8852  ;;  %v12958_v30 = vpack.c.bf16 %v18565_v58, %v18560_v40 }
0x2568   : > { %v8854_v45 = vcvt.f32.s32 %v8853_v27 }
0x2569   : > { %v8872_v31 = vadd.s32 %v8871_v33, %v8869_v24 }
0x256a   : > { %v8857_v11 = vadd.s32 %v8856_v29, %v8854_v45  ;;  %v8898_v37 = vpop.xlane.xlu0 %8897 }
0x256b   : > { %v18550_v12 = vmul.u32 128, %v8872_v31  ;;  %vm8908_vm14 = vcmp.eq.s32.totalorder %v17802_v52, %v8872_v31  ;;  %v8899_v47 = vcvt.f32.s32 %v8898_v37 }
0x256c   : > { %v9462_v54 = vmul.u32 128, %v8857_v11  ;;  %vm8907_vm15 = vcmp.eq.s32.totalorder %v17802_v52, %v8857_v11  ;;  %v11025_v62 = vsel %vm8908_vm14, 1.0, %v19229_v17 }
0x256d   : > { %v11024_v9 = vsel %vm8907_vm15, 1.0, %v19229_v17  ;;  %8932 = vst.msk [vmem:[%s18212_s24 + $0x28] sm:$0xff] %vm964_vm4, %v11025_v62  ;;  %v9503_v10 = vadd.s32 128, %v18550_v12  ;;  %vm9487_vm11 = vcmp.ge.s32.totalorder %v18215_v43, %v18550_v12  ;;  %vm9486_vm8 = vcmp.ge.s32.totalorder %v17802_v52, %v18550_v12  ;;  %v8883_v8 = vpop.xlane.xlu1 %8882 }
0x256e   : > { %8931 = vst.msk [vmem:[%s18212_s24 + $0x20] sm:$0xff] %vm964_vm4, %v11024_v9  ;;  %12548 = vmatprep.mubr.msk.f32.mxu1 %vm964_vm4, %v11024_v9  ;;  %v9502_v41 = vadd.s32 128, %v9462_v54  ;;  %vm9483_vm13 = vcmp.ge.s32.totalorder %v18215_v43, %v9462_v54  ;;  %vm9482_vm5 = vcmp.ge.s32.totalorder %v17802_v52, %v9462_v54  ;;  %vm9485_vm9 = vcmp.ge.s32.totalorder %v18234_v39, %v9462_v54 }
0x256f   : > { %12549 = vmatmul.mubr.msk.f32.gmra.mrb[176].mxu1 %vm964_vm4, %v11025_v62  ;;  %vm9527_vm6 = vcmp.lt.s32.totalorder %v18215_v43, %v9503_v10  ;;  %vm9526_vm2 = vcmp.lt.s32.totalorder %v17802_v52, %v9503_v10  ;;  %vm9489_vm15 = vcmp.ge.s32.totalorder %v18234_v39, %v18550_v12  ;;  %vm9484_vm0 = vcmp.ge.s32.totalorder %v18248_v2, %v9462_v54  ;;  %v18651_v54 = vld [vmem:[%s18891_s3 + $0xa0] sm:$0xff]  ;;  %v18656_v62 = vld [vmem:[%s18891_s3 + $0xa8] sm:$0xff] }
0x2570   : > { %vm9523_vm10 = vcmp.lt.s32.totalorder %v18215_v43, %v9502_v41  ;;  %vm9559_vm12 = vmand %vm9487_vm11, %vm9527_vm6  ;;  %vm9522_vm7 = vcmp.lt.s32.totalorder %v17802_v52, %v9502_v41  ;;  %vm9525_vm1 = vcmp.lt.s32.totalorder %v18234_v39, %v9502_v41  ;;  %vm9529_vm6 = vcmp.lt.s32.totalorder %v18234_v39, %v9503_v10 }
0x2571   : > { %vm9555_vm14 = vmand %vm9483_vm13, %vm9523_vm10  ;;  %v11065_v18 = vsel %vm9559_vm12, 1.0, %v19229_v17  ;;  %v8902_v27 = vadd.s32 %v8901_v7, %v8899_v47  ;;  %vm9524_vm10 = vcmp.lt.s32.totalorder %v18248_v2, %v9502_v41  ;;  %vm9528_vm12 = vcmp.lt.s32.totalorder %v18248_v2, %v9503_v10 }
0x2572   : > { %v11061_v33 = vsel %vm9555_vm14, 1.0, %v19229_v17  ;;  %v9655_v24 = vmul.f32 %v11065_v18, %v18521_v3  ;;  %vm9554_vm11 = vmand %vm9482_vm5, %vm9522_vm7  ;;  %v8884_v3 = vcvt.f32.s32 %v8883_v8  ;;  %v12961_v37 = vpack.c.bf16 %v18656_v62, %v18651_v54 }
0x2573   : > { %v9651_v5 = vmul.f32 %v11061_v33, %v18519_v32  ;;  %vm9558_vm13 = vmand %vm9486_vm8, %vm9526_vm2  ;;  %v11060_v29 = vsel %vm9554_vm11, 1.0, %v19229_v17  ;;  %v18619_v32 = vmul.u32 128, %v8902_v27  ;;  %vm8910_vm8 = vcmp.eq.s32.totalorder %v17802_v52, %v8902_v27 }
0x2574   : > { %v11064_v45 = vsel %vm9558_vm13, 1.0, %v19229_v17  ;;  %v9650_v14 = vmul.f32 %v11060_v29, %v18525_v0  ;;  %vm9557_vm5 = vmand %vm9485_vm9, %vm9525_vm1  ;;  %v8887_v0 = vadd.s32 %v8886_v28, %v8884_v3  ;;  %v11027_v31 = vsel %vm8910_vm8, 1.0, %v19229_v17 }
0x2575   : > { %v9675_v26 = vpack.c.bf16 %v9655_v24, %v9651_v5  ;;  %v9654_v35 = vmul.f32 %v11064_v45, %v18527_v51  ;;  %vm9561_vm7 = vmand %vm9489_vm15, %vm9529_vm6  ;;  %v11063_v55 = vsel %vm9557_vm5, 1.0, %v19229_v17  ;;  %8934 = vst.msk [vmem:[%s18212_s24 + $0x38] sm:$0xff] %vm964_vm4, %v11027_v31  ;;  %vm9495_vm2 = vcmp.ge.s32.totalorder %v18215_v43, %v18619_v32 }
0x2576   : > { %v11067_v22 = vsel %vm9561_vm7, 1.0, %v19229_v17  ;;  %vm18635_vm1 = vmand %vm9484_vm0, %vm9524_vm10  ;;  %v18644_v11 = vadd.s32 128, %v18619_v32  ;;  %vm9488_vm9 = vcmp.ge.s32.totalorder %v18248_v2, %v18550_v12  ;;  %v9464_v7 = vmul.u32 128, %v8887_v0 }
0x2577   : > { %10120 = vmatprep.mubr.bf16.mxu0 %v9675_v26  ;;  %v9674_v51 = vpack.c.bf16 %v9654_v35, %v9650_v14  ;;  %vm8909_vm0 = vcmp.eq.s32.totalorder %v17802_v52, %v8887_v0  ;;  %v18660_v9 = vmul.f32 %v11063_v55, %v18540_v36  ;;  %v18663_v28 = vmul.f32 %v11067_v22, %v18543_v21  ;;  %vm18667_vm14 = vmand %vm9488_vm9, %vm9528_vm12 }
0x2578   : > { %v11026_v41 = vsel %vm8909_vm0, 1.0, %v19229_v17  ;;  %vm9535_vm15 = vcmp.lt.s32.totalorder %v18215_v43, %v18644_v11  ;;  %vm9534_vm11 = vcmp.lt.s32.totalorder %v17802_v52, %v18644_v11  ;;  %v11062_v36 = vsel %vm18635_vm1, 1.0, %v19229_v17 }
0x2579   : > { %10121 = vmatmul.mubr.bf16.gmra.mrb[184].mxu0 %v9674_v51  ;;  %8933 = vst.msk [vmem:[%s18212_s24 + $0x30] sm:$0xff] %vm964_vm4, %v11026_v41  ;;  %12551 = vmatprep.mubr.msk.f32.mxu1 %vm964_vm4, %v11026_v41  ;;  %v9504_v21 = vadd.s32 128, %v9464_v7  ;;  %vm9567_vm6 = vmand %vm9495_vm2, %vm9535_vm15  ;;  %vm9494_vm13 = vcmp.ge.s32.totalorder %v17802_v52, %v18619_v32  ;;  %v9677_v10 = vpack.c.bf16 %v18663_v28, %v18660_v9  ;;  %v11066_v18 = vsel %vm18667_vm14, 1.0, %v19229_v17 }
0x257a   : > { %12552 = vmatmul.mubr.msk.f32.gmra.mrb[178].mxu1 %vm964_vm4, %v11027_v31  ;;  %vm9491_vm10 = vcmp.ge.s32.totalorder %v18215_v43, %v9464_v7  ;;  %v11073_v47 = vsel %vm9567_vm6, 1.0, %v19229_v17  ;;  %vm9566_vm5 = vmand %vm9494_vm13, %vm9534_vm11  ;;  %v9652_v33 = vmul.f32 %v11062_v36, %v18546_v42  ;;  %vm9490_vm7 = vcmp.ge.s32.totalorder %v17802_v52, %v9464_v7 }
0x257b   : > { %10169 = vmatprep.mubr.bf16.mxu1 %v9669_v57  ;;  %vm9531_vm12 = vcmp.lt.s32.totalorder %v18215_v43, %v9504_v21  ;;  %v9663_v24 = vmul.f32 %v11073_v47, %v18534_v53  ;;  %vm9530_vm4 = vcmp.lt.s32.totalorder %v17802_v52, %v9504_v21  ;;  %v11072_v27 = vsel %vm9566_vm5, 1.0, %v19229_v17 }
0x257c   : > { %vm9563_vm8 = vmand %vm9491_vm10, %vm9531_vm12  ;;  %v9656_v8 = vmul.f32 %v11066_v18, %v18548_v19  ;;  %vm9493_vm1 = vcmp.ge.s32.totalorder %v18234_v39, %v9464_v7  ;;  %vm9533_vm2 = vcmp.lt.s32.totalorder %v18234_v39, %v9504_v21  ;;  %v9662_v43 = vmul.f32 %v11072_v27, %v18538_v48 }
0x257d   : > { %v11069_v6 = vsel %vm9563_vm8, 1.0, %v19229_v17  ;;  %vm9562_vm9 = vmand %vm9490_vm7, %vm9530_vm4  ;;  %vm9497_vm0 = vcmp.ge.s32.totalorder %v18234_v39, %v18619_v32  ;;  %vm9537_vm14 = vcmp.lt.s32.totalorder %v18234_v39, %v18644_v11  ;;  %vm9532_vm11 = vcmp.lt.s32.totalorder %v18248_v2, %v9504_v21 }
0x257e   : > { %10170 = vmatmul.mubr.bf16.vlgmr.msra.gmra.mrb[180].mxu1 %v9668_v38  ;;  %v9659_v52 = vmul.f32 %v11069_v6, %v18529_v34  ;;  %v11068_v25 = vsel %vm9562_vm9, 1.0, %v19229_v17  ;;  %v9676_v57 = vpack.c.bf16 %v9656_v8, %v9652_v33  ;;  %vm9565_vm15 = vmand %vm9493_vm1, %vm9533_vm2  ;;  %vm9492_vm13 = vcmp.ge.s32.totalorder %v18248_v2, %v9464_v7  ;;  %v10214_v38 = vld [vmem:[%s18891_s3 + $0xb0] sm:$0xff] }
0x257f   : > { %10177 = vmatprep.mubr.bf16.mxu1 %v9673_v1  ;;  %v9658_v53 = vmul.f32 %v11068_v25, %v18536_v16  ;;  %vm9569_vm6 = vmand %vm9497_vm0, %vm9537_vm14  ;;  %v11071_v39 = vsel %vm9565_vm15, 1.0, %v19229_v17  ;;  %12959 = vmatpush3.bf16.msra.mxu1 %v12958_v30  ;;  %vm9536_vm10 = vcmp.lt.s32.totalorder %v18248_v2, %v18644_v11  ;;  %vm9496_vm5 = vcmp.ge.s32.totalorder %v18248_v2, %v18619_v32 }
0x2580   : > { %v9679_v59 = vpack.c.bf16 %v9663_v24, %v9659_v52  ;;  %v11075_v60 = vsel %vm9569_vm6, 1.0, %v19229_v17  ;;  %v9661_v46 = vmul.f32 %v11071_v39, %v18553_v50  ;;  %12960 = vmatprep.subr.bf16.mxu1 %v19277_v49  ;;  %vm9564_vm12 = vmand %vm9492_vm13, %vm9532_vm11  ;;  %v9453_v16 = vmul.f32 %v18569_v61, %v18532_v23  ;;  %v10216_v23 = vld [vmem:[%s18891_s3 + $0xc0] sm:$0xff]  ;;  %v19295_v52 = vld [vmem:[#allocation30_spill] sm:$0xff] }
0x2581   : > { %v9678_v1 = vpack.c.bf16 %v9662_v43, %v9658_v53  ;;  %v9665_v34 = vmul.f32 %v11075_v60, %v18555_v63  ;;  %vm9568_vm4 = vmand %vm9496_vm5, %vm9536_vm10  ;;  %v11070_v48 = vsel %vm9564_vm12, 1.0, %v19229_v17  ;;  %v12964_v40 = vpack.c.bf16 %v10215_v4, %v10214_v38  ;;  %v10217_v63 = vld [vmem:[%s18891_s3 + $0xc8] sm:$0xff] }
0x2582   : > { %10128 = vmatprep.mubr.bf16.mxu0 %v9679_v59  ;;  %v11074_v2 = vsel %vm9568_vm4, 1.0, %v19229_v17  ;;  %v9660_v42 = vmul.f32 %v11070_v48, %v18575_v56  ;;  %v12967_v61 = vpack.c.bf16 %v10217_v63, %v10216_v23  ;;  %vm19293_vm8 = vmmov 0   ;;  %v14355_v56 = vld [vmem:[%s14602_s25] sm:$0x1]  ;;  %s404_s25 = scalar_lea.vmem [#allocation2], %s10612_s0 }
0x2583   : > { %10129 = vmatmul.mubr.bf16.gmra.mrb[188].mxu0 %v9678_v1  ;;  %v9681_v19 = vpack.c.bf16 %v9665_v34, %v9661_v46  ;;  %12962 = vmatpush3.bf16.msra.mxu1 %v12961_v37  ;;  %v9664_v50 = vmul.f32 %v11074_v2, %v9453_v16  ;;  %vm19294_vm7 = vcmask 523264   ;;  %vm19296_vm1 = vcmask 261120   ;;  %s10497_s30 = sshll.u32 %s404_s25, 4  ;;  %s18842_s30 = int_to_ptr.vmem [resolvable:$true] %s10497_s30 }
0x2584   : > { %12963 = vmatprep.subr.bf16.mxu1 %v19277_v49  ;;  %vm19298_vm2 = vmmov %vm19296_vm1  ;;  %s14356_s12 = scalar_lea.vmem %s18842_s30, 1024  ;;  %p14363_p0 = scmp.lt.s32.totalorder %s18842_s30, %s14361_s15 }
0x2585   : > { %v9680_v58 = vpack.c.bf16 %v9664_v50, %v9660_v42  ;;  %vm19299_vm9 = vmmov %vm19296_vm1  ;;  %p14357_p11 = scmp.ne.s32.totalorder %s18842_s30, %s14356_s12  ;;  %p14364_p1 = scmp.lt.s32.totalorder %s14362_s29, %s14356_s12 }
0x2586   : > { %10178 = vmatmul.mubr.bf16.gmra.mrb[184].mxu1 %v9672_v13  ;;  %vm19300_vm0 = vmmov %vm19296_vm1 }
0x2587   : > { %10185 = vmatprep.mubr.bf16.mxu1 %v9677_v10  ;;  %12965 = vmatpush3.bf16.msra.mxu1 %v12964_v40  ;;  %vm19301_vm14 = vmmov %vm19300_vm0  ;;  %p14358_p12 = pnand %p14357_p11, %p14555_p5  ;;  %p14365_p2 = por %p14364_p1, %p14363_p0 }
0x2588   : > { %12966 = vmatprep.subr.bf16.mxu1 %v19277_v49  ;;  %vm19305_vm15 = vmmov %vm19300_vm0 }
0x2589   : > { %vm19306_vm11 = vmmov %vm19300_vm0  ;;  %p14359_p13 = pneg %p14358_p12 }
0x258a   : > { %vm19309_vm6 = vmmov %vm19300_vm0 }
0x258b   : > { %12968 = vmatpush3.bf16.msra.mxu1 %v12967_v61  ;;  %vm19310_vm13 = vmmov %vm19300_vm0  ;;  %p14366_p3 = pnand %p14365_p2, %p14359_p13 }
0x258c   : > { %vm19314_vm10 = vmmov %vm19300_vm0 }
0x258d   : > { %vm19316_vm5 = vmmov %vm19300_vm0 }
0x258e   : > { %10186 = vmatmul.mubr.bf16.gmra.mrb[188].mxu1 %v9676_v57  ;;  %vm19317_vm12 = vmmov %vm19300_vm0 }
0x258f   : > { %10193 = vmatprep.mubr.bf16.mxu1 %v9681_v19  ;;  %vm19318_vm4 = vmmov %vm19300_vm0 }
0x2596   : > { %10194 = vmatmul.mubr.bf16.gmra.mrb[192].mxu1 %v9680_v58 }
0x2597   : > { %12570 = vmatprep.mubr.msk.f32.mxu1 %vm19293_vm8, %v19229_v17  ;;  %vm19319_vm8 = vmmov %vm19300_vm0 }
0x259e   : > { %12571 = vmatmul.mubr.msk.f32.vlgmr.msra.gmra.mrb[196].mxu1 %vm19294_vm7, %v14355_v56  ;;  %vm19320_vm7 = vmmov %vm19300_vm0 }
0x260e   : > { %v12544_v30 = vpop.f32.mrb[172].mxu1 }
0x260f   : > { %v9841_v5 = vpop.f32.mrb[173].mxu1 }
0x2615   : > { %v12547_v29 = vpop.f32.mrb[174].mxu1 }
0x2616   : > { %v9851_v44 = vpop.f32.mrb[175].mxu1 }
0x2618   : > { %v11637_v15 = vpop.f32.mrb[176].mxu0 }
0x2619   : > { %v11638_v13 = vpop.f32.mrb[177].mxu0 }
0x261a   : > { %v11639_v3 = vadd.f32 %v11638_v13, %v11637_v15  ;;  %v11640_v45 = vpop.f32.mrb[178].mxu0 }
0x261b   : > { %v11641_v14 = vpop.f32.mrb[179].mxu0 }
0x261c   : > { %v10107_v49 = vadd.f32 %v11639_v3, %v9841_v5  ;;  %v11642_v32 = vadd.f32 %v11641_v14, %v11640_v45 }
0x261e   : > { %v10110_v26 = vadd.f32 %v12544_v30, %v11642_v32  ;;  %v10218_v32 = vld [vmem:[%s18891_s3 + $0x45] sm:$0x1] }
0x2620   : > { %v11643_v35 = vpop.f32.mrb[180].mxu0 }
0x2621   : > { %v11644_v0 = vpop.f32.mrb[181].mxu0 }
0x2622   : > { %v11645_v31 = vadd.f32 %v11644_v0, %v11643_v35  ;;  %v11646_v55 = vpop.f32.mrb[182].mxu0 }
0x2623   : > { %v11647_v17 = vpop.f32.mrb[183].mxu0 }
0x2624   : > { %v10115_v22 = vadd.f32 %v11645_v31, %v9851_v44  ;;  %v11648_v20 = vadd.f32 %v11647_v17, %v11646_v55  ;;  %v10290_v31 = vld [vmem:[%s18891_s3 + $0x28] sm:$0xff]  ;;  %v10289_v55 = vld [vmem:[%s18891_s3 + $0x20] sm:$0xff]  ;;  %v10292_v17 = vld [vmem:[%s18891_s3 + $0x38] sm:$0xff] }
0x2626   : > { %v10118_v51 = vadd.f32 %v12547_v29, %v11648_v20  ;;  %v19297_v20 = vld [vmem:[#allocation6_spill] sm:$0xff] }
0x2642   : > { %v12550_v11 = vpop.f32.mrb[176].mxu1 }
0x2643   : > { %v9861_v54 = vpop.f32.mrb[177].mxu1 }
0x264c   : > { %v11649_v62 = vpop.f32.mrb[184].mxu0 }
0x264d   : > { %v11650_v7 = vpop.f32.mrb[185].mxu0  ;;  %v12553_v9 = vpop.f32.mrb[178].mxu1 }
0x264e   : > { %v11651_v28 = vadd.f32 %v11650_v7, %v11649_v62  ;;  %v11652_v12 = vpop.f32.mrb[186].mxu0  ;;  %v9871_v41 = vpop.f32.mrb[179].mxu1 }
0x264f   : > { %v11653_v36 = vpop.f32.mrb[187].mxu0 }
0x2650   : > { %v10123_v21 = vadd.f32 %v11651_v28, %v9861_v54  ;;  %v11654_v10 = vadd.f32 %v11653_v36, %v11652_v12 }
0x2651   : > { %v11677_v37 = vpop.f32.mrb[180].mxu1 }
0x2652   : > { %v10126_v47 = vadd.f32 %v12550_v11, %v11654_v10  ;;  %v11678_v18 = vpop.f32.mrb[181].mxu1 }
0x2653   : > { %v11679_v33 = vadd.f32 %v11678_v18, %v11677_v37  ;;  %v11680_v24 = vpop.f32.mrb[182].mxu1 }
0x2654   : > { %v11681_v27 = vpop.f32.mrb[183].mxu1 }
0x2655   : > { %v10172_v8 = vadd.f32 %v11679_v33, %v10107_v49  ;;  %v11682_v6 = vadd.f32 %v11681_v27, %v11680_v24 }
0x2656   : > { %v11655_v43 = vpop.f32.mrb[188].mxu0 }
0x2657   : > { %v10202_v25 = vadd.f32 %v10172_v8, %v19295_v52  ;;  %v18765_v57 = vadd.f32 %v11682_v6, %v10110_v26  ;;  %v11656_v53 = vpop.f32.mrb[189].mxu0 }
0x2658   : > { %v11657_v39 = vadd.f32 %v11656_v53, %v11655_v43  ;;  %v11658_v59 = vpop.f32.mrb[190].mxu0 }
0x2659   : > { %v11683_v60 = vpop.f32.mrb[184].mxu1  ;;  %12581 = vmatprep.mubr.msk.f32.mxu0 %vm19296_vm1, %v10202_v25  ;;  %v11659_v46 = vpop.f32.mrb[191].mxu0  ;;  %vm19321_vm1 = vmmov %vm19300_vm0 }
0x265a   : > { %v11684_v38 = vpop.f32.mrb[185].mxu1  ;;  %v10131_v4 = vadd.f32 %v11657_v39, %v9871_v41  ;;  %v11660_v1 = vadd.f32 %v11659_v46, %v11658_v59 }
0x265b   : > { %v11685_v34 = vadd.f32 %v11684_v38, %v11683_v60  ;;  %v11686_v16 = vpop.f32.mrb[186].mxu1 }
0x265c   : > { %v11687_v48 = vpop.f32.mrb[187].mxu1  ;;  %v10134_v2 = vadd.f32 %v12553_v9, %v11660_v1 }
0x265d   : > { %v18768_v42 = vadd.f32 %v11685_v34, %v10115_v22  ;;  %v11688_v19 = vadd.f32 %v11687_v48, %v11686_v16  ;;  %v10291_v22 = vld [vmem:[%s18891_s3 + $0x30] sm:$0xff]  ;;  %v19303_v16 = vld [vmem:[#allocation10_spill] sm:$0xff] }
0x265e   : > { %v10203_v48 = vadd.f32 %v18765_v57, %v19303_v16 }
0x265f   : > { %v18770_v50 = vadd.f32 %v11688_v19, %v10118_v51 }
0x2661   : > { %v11689_v40 = vpop.f32.mrb[188].mxu1 }
0x2662   : > { %v11690_v23 = vpop.f32.mrb[189].mxu1 }
0x2663   : > { %v11691_v63 = vadd.f32 %v11690_v23, %v11689_v40  ;;  %v11692_v58 = vpop.f32.mrb[190].mxu1  ;;  %v19307_v40 = vld [vmem:[#allocation23_spill] sm:$0xff] }
0x2664   : > { %v11693_v61 = vpop.f32.mrb[191].mxu1  ;;  %v10205_v23 = vadd.f32 %v18770_v50, %v19307_v40 }
0x2665   : > { %v18772_v56 = vadd.f32 %v11691_v63, %v10123_v21  ;;  %v11694_v30 = vadd.f32 %v11693_v61, %v11692_v58  ;;  %v19308_v63 = vld [vmem:[#allocation31_spill] sm:$0xff]  ;;  %v19311_v61 = vld [vmem:[#allocation8_spill] sm:$0xff] }
0x2667   : > { %v18774_v5 = vadd.f32 %v11694_v30, %v10126_v47  ;;  %v10206_v58 = vadd.f32 %v18772_v56, %v19308_v63  ;;  %v19312_v30 = vld [vmem:[#allocation9_spill] sm:$0xff] }
0x2669   : > { %v11695_v29 = vpop.f32.mrb[192].mxu1  ;;  %v10207_v57 = vadd.f32 %v18774_v5, %v19311_v61 }
0x266a   : > { %v11696_v44 = vpop.f32.mrb[193].mxu1 }
0x266b   : > { %v11697_v15 = vadd.f32 %v11696_v44, %v11695_v29  ;;  %v11698_v13 = vpop.f32.mrb[194].mxu1  ;;  %v19315_v29 = vld [vmem:[#allocation15_spill] sm:$0xff] }
0x266c   : > { %v11699_v3 = vpop.f32.mrb[195].mxu1 }
0x266d   : > { %v18776_v45 = vadd.f32 %v11697_v15, %v10131_v4  ;;  %v11700_v14 = vadd.f32 %v11699_v3, %v11698_v13 }
0x266f   : > { %v18778_v49 = vadd.f32 %v11700_v14, %v10134_v2  ;;  %v19304_v2 = vld [vmem:[#allocation22_spill] sm:$0xff] }
0x2670   : > { %v10204_v19 = vadd.f32 %v18768_v42, %v19304_v2  ;;  %v10208_v42 = vadd.f32 %v18776_v45, %v19312_v30 }
0x2671   : > { %v10285_v26 = vpop.f32.mrb[196].mxu1  ;;  %v10209_v50 = vadd.f32 %v18778_v49, %v19315_v29 }
0x2672   : > { %v10286_v35 = vadd.f32 %v10285_v26, %v10218_v32  ;;  %v12572_v0 = vpop.f32.mrb[197].mxu1 }
0x2674   : > { %v10296_v51 = vrot.slane %v10286_v35, %v19297_v20 }
0x2676   : > { %v10298_v11 = vmul.f32 %v10296_v51, %v10290_v31  ;;  %v10297_v54 = vmul.f32 %v10296_v51, %v10289_v55  ;;  %v10300_v62 = vmul.f32 %v10296_v51, %v10292_v17  ;;  %v10299_v7 = vmul.f32 %v10296_v51, %v10291_v22 }
0x2678   : > { %v10302_v9 = vmul.f32 %v10298_v11, %v10298_v11  ;;  %v10301_v28 = vmul.f32 %v10297_v54, %v10297_v54  ;;  %v10304_v36 = vmul.f32 %v10300_v62, %v10300_v62  ;;  %v10303_v21 = vmul.f32 %v10299_v7, %v10299_v7 }
0x267a   : > { %v10308_v12 = vsel %vm19298_vm2, %v10302_v9, 0.0  ;;  %v10305_v41 = vsel %vm19299_vm9, %v10301_v28, 0.0  ;;  %v10314_v10 = vsel %vm19300_vm0, %v10304_v36, 0.0  ;;  %v10311_v37 = vsel %vm19301_vm14, %v10303_v21, 0.0  ;;  %vm19322_vm2 = vmmov %vm19300_vm0 }
0x267b   : > { %10309 = vadd.xlane.f32.xlu0 %v10308_v12  ;;  %10306 = vadd.xlane.f32.xlu1 %v10305_v41  ;;  %vm19323_vm9 = vmmov %vm19300_vm0 }
0x267f   : > { %10315 = vadd.xlane.f32.xlu0 %v10314_v10  ;;  %10312 = vadd.xlane.f32.xlu1 %v10311_v37 }
0x2708   : > { %v10310_v47 = vpop.xlane.xlu0 %10309  ;;  %v10307_v18 = vpop.xlane.xlu1 %10306 }
0x2709   : > { %v10318_v33 = vadd.f32 1e-08, %v10310_v47  ;;  %v10317_v24 = vadd.f32 1e-08, %v10307_v18 }
0x270b   : > { %14344 = vrsqrt.f32 %v10318_v33 }
0x270c   : > { %14346 = vrsqrt.f32 %v10317_v24  ;;  %v10316_v27 = vpop.xlane.xlu0 %10315  ;;  %v10313_v8 = vpop.xlane.xlu1 %10312 }
0x270d   : > { %v10320_v6 = vadd.f32 1e-08, %v10316_v27  ;;  %v10319_v43 = vadd.f32 1e-08, %v10313_v8 }
0x270f   : > { %14348 = vrsqrt.f32 %v10320_v6 }
0x2710   : > { %14350 = vrsqrt.f32 %v10319_v43 }
0x2715   : > { %v14345_v52 = vpop.eup %14344 }
0x2716   : > { %v14347_v25 = vpop.eup %14346  ;;  %v10326_v53 = vmul.f32 %v14345_v52, %v10298_v11 }
0x2717   : > { %v10325_v39 = vmul.f32 %v14347_v25, %v10297_v54 }
0x2719   : > { %v14349_v59 = vpop.eup %14348  ;;  %v12969_v60 = vpack.c.bf16 %v10326_v53, %v10325_v39 }
0x271a   : > { %v14351_v46 = vpop.eup %14350  ;;  %v10328_v38 = vmul.f32 %v14349_v59, %v10300_v62 }
0x271b   : > { %12971 = vmatprep.subr.msk.bf16.mxu0 %vm14645_vm3, %v12969_v60  ;;  %v10327_v1 = vmul.f32 %v14351_v46, %v10299_v7 }
0x271c   : > { %12974 = vmatpush3.bf16.xpose.msk.msra.mxu0 %vm14645_vm3, %v12969_v60 }
0x271d   : > { %v12975_v34 = vpack.c.bf16 %v10328_v38, %v10327_v1 }
0x271f   : > { %12977 = vmatprep.subr.msk.bf16.mxu0 %vm14645_vm3, %v12975_v34 }
0x2724   : > { %12980 = vmatpush3.bf16.xpose.msk.msra.mxu0 %vm14645_vm3, %v12975_v34  ;;  %vm19313_vm3 = vmmov %vm19300_vm0 }
0x272b   : > { %12582 = vmatmul.mubr.msk.f32.vlgmr.msra.gmra.mrb[192].mxu0 %vm19305_vm15, %v10203_v48 }
0x272c   : > { %12584 = vmatprep.mubr.msk.f32.mxu0 %vm19306_vm11, %v10204_v19 }
0x272f   : > { %12585 = vmatmul.mubr.msk.f32.gmra.mrb[194].mxu0 %vm19309_vm6, %v10205_v23 }
0x2730   : > { %12587 = vmatprep.mubr.msk.f32.mxu0 %vm19310_vm13, %v10206_v58 }
0x2733   : > { %12588 = vmatmul.mubr.msk.f32.gmra.mrb[196].mxu0 %vm19313_vm3, %v10207_v57 }
0x2734   : > { %12590 = vmatprep.mubr.msk.f32.mxu0 %vm19314_vm10, %v10208_v42 }
0x2737   : > { %12591 = vmatmul.mubr.msk.f32.gmra.mrb[198].mxu0 %vm19316_vm5, %v10209_v50 }
0x27fe   : > { %v12583_v56 = vpop.f32.mrb[192].mxu0 }
0x27ff   : > { %10471 = vst.msk [vmem:[%s404_s25 + $0x8] sm:$0xff] %vm19317_vm12, %v12583_v56  ;;  %v10431_v5 = vpop.f32.mrb[193].mxu0 }
0x2800   : > { %10470 = vst.msk [vmem:[%s404_s25] sm:$0xff] %vm19318_vm4, %v10431_v5 }
0x2802   : > { %v12586_v44 = vpop.f32.mrb[194].mxu0 }
0x2803   : > { %10473 = vst.msk [vmem:[%s404_s25 + $0x18] sm:$0xff] %vm19319_vm8, %v12586_v44  ;;  %v10441_v15 = vpop.f32.mrb[195].mxu0 }
0x2804   : > { %10472 = vst.msk [vmem:[%s404_s25 + $0x10] sm:$0xff] %vm19320_vm7, %v10441_v15 }
0x2806   : > { %v12589_v13 = vpop.f32.mrb[196].mxu0 }
0x2807   : > { %10475 = vst.msk [vmem:[%s404_s25 + $0x28] sm:$0xff] %vm19321_vm1, %v12589_v13  ;;  %v10451_v3 = vpop.f32.mrb[197].mxu0 }
0x2808   : > { %10474 = vst.msk [vmem:[%s404_s25 + $0x20] sm:$0xff] %vm19322_vm2, %v10451_v3 }
0x280a   : > { %v12592_v45 = vpop.f32.mrb[198].mxu0 }
0x280b   : > { %10477 = vst.msk [vmem:[%s404_s25 + $0x38] sm:$0xff] %vm19323_vm9, %v12592_v45  ;;  %v10461_v14 = vpop.f32.mrb[199].mxu0 }
0x280c   : > { %10476 = vst.msk [vmem:[%s404_s25 + $0x30] sm:$0xff] %vm19300_vm0, %v10461_v14 }
0x280d   : > { %14369 = shalt.err (!%p14366_p3)
}
0x280e   : > { %s14370_s22 = scalar_lea.hbm %s18840_s16, 1024  ;;  %s14374_s1 = scalar_lea.hbm %s18898_s10, 2048 }
0x280f   : > { %p14371_p4 = scmp.ne.s32.totalorder %s18840_s16, %s14370_s22  ;;  %p14375_p9 = scmp.lt.u32.totalorder %s18840_s16, %s18898_s10 }
0x2810   : > { %p14376_p10 = scmp.lt.u32.totalorder %s14374_s1, %s14370_s22  ;;  %p14378_p12 = scmp.lt.u32.totalorder %s14370_s22, %s18840_s16 }
0x2811   : > { %p14372_p7 = pnand %p14371_p4, %p14555_p5 }
0x2812   : > { %p14377_p11 = por %p14376_p10, %p14375_p9 }
0x2813   : > { %p14373_p8 = pneg %p14372_p7 }
0x2814   : > { %p14379_p13 = por %p14378_p12, %p14377_p11 }
0x2816   : > { %p14380_p0 = pnand %p14379_p13, %p14373_p8 }
0x2818   : > { %14383 = shalt.err (!%p14380_p0)
}
0x2819   : > { %s14456_s12 = smov 128  }
0x281a   : > { %12981 = dma.vmem_to_hbm [thread:$0]  (%p14555_p5), %s18842_s30, 1024, %s18840_s16, %s18846_s21, %s14456_s12, %s14456_s12, %s19228_s13  }
0x281b PF: > { %p12987_p1 = scmp.ge.s32.totalorder %s14418_s20, 2  ;;  %s10515_s14 = sand.u32 1, %s14406_s17  }
0x281c   : > { %s10516_s15 = scalar_lea.sflag [#allocation3], %s10515_s14 }
0x281d   : > { %p12984_p2 = pnand %p12987_p1, %p14559_p6 }
0x281f   : > { %14401 = dma.done.wait (!%p12984_p2), %s10516_s15, 1024  }
0x2820   : > { %14403 = vsyncadd (!%p12984_p2), %s10516_s15, 4294966272  ;;  %p22_p3 = scmp.ge.s32.totalorder %s14542_s23, 4   ;;  %s19324_s17 = smov %s14410_s18 }
0x2821   : > { %s19325_s18 = smov %s14414_s19  ;;  %s19326_s19 = smov %s14553_s26 }
0x2822   : > { %s19327_s20 = smov %s14542_s23  ;;  %24 = sbr.rel (!%p22_p3) target bundleno = 7 (0x7), region = 115 }
0x2829   :  { %10529 = vsyncpa [#allocation3], 1 }
0x282a   :  { %10531 = vsyncpa [#allocation3 + $0x1], 1 }

</bundles_post_ra>
